<compile_context>
chip_gen: v7x
topology: tpu7x:2x2x1
jax: 0.10.0
libtpu: 0.0.40
codegen_flags: <defaults>
</compile_context>

<pallas_src>
import functools
import math

import jax
import jax.numpy as jnp
from jax.experimental import pallas as pl
from jax.experimental.pallas import tpu as pltpu


def _round_up(x, m):
    return ((x + m - 1) // m) * m


def _sigmoid_via_tanh(x):
    # sigmoid(x) == 0.5 * tanh(0.5 * x) + 0.5 : single EUP push per gate; the
    # mul/add fixups ride in otherwise-idle VPU slots.
    return 0.5 * jnp.tanh(0.5 * x) + 0.5


def _encoder_kernel(*refs, n_layers, seq_len, batch, hidden_p, chunk_t,
                    n_seq, mm_dtype, unroll_big):
    """Fused LSTM stack.

    refs layout:
      inputs : x2d, w_ih0, w_hh0, b0, [w_slab_hbm if n_layers > 1]
      outputs: hidden, cell                       (n_layers, batch, Hp)
      scratch: gx ping-pong, n_seq inter-layer sequence buffers,
               [weight double-buffer + weight DMA sem if n_layers > 1]
    """
    stream = n_layers > 1
    idx = 0
    x_ref = refs[idx]; idx += 1
    wih0_ref, whh0_ref, b0_ref = refs[idx], refs[idx + 1], refs[idx + 2]
    idx += 3
    wslab_ref = None
    if stream:
        wslab_ref = refs[idx]; idx += 1
    hidden_ref, cell_ref = refs[idx], refs[idx + 1]; idx += 2
    gx_buf = refs[idx]; idx += 1
    seq_bufs = [refs[idx + i] for i in range(n_seq)]; idx += n_seq
    wbuf = wsem = None
    if stream:
        wbuf, wsem = refs[idx], refs[idx + 1]; idx += 2

    Hp = hidden_p
    n_chunks = -(-seq_len // chunk_t)

    def mxu(a, b):
        return jnp.dot(a.astype(mm_dtype), b.astype(mm_dtype),
                       preferred_element_type=jnp.float32)

    for layer in range(n_layers):
        # ------------------------- weight staging ---------------------------
        if layer == 0:
            def load_wih(): return wih0_ref[...]
            def load_whh(): return whh0_ref[...]
            def load_b():   return b0_ref[...]
        else:
            slot_w = (layer - 1) % 2
            # Wait for this layer's weights (prefetch was issued while the
            # previous layer was computing).
            pltpu.make_async_copy(wslab_ref.at[layer - 1], wbuf.at[slot_w],
                                  wsem.at[slot_w]).wait()
            wslot = wbuf.at[slot_w]

            def load_wih(wslot=wslot): return wslot[0:Hp, :]
            def load_whh(wslot=wslot): return wslot[Hp:2 * Hp, :]
            def load_b(wslot=wslot):   return wslot[2 * Hp:2 * Hp + 1, :]

        # Prefetch the NEXT layer's weights into the other slot; the DMA is
        # hidden behind this layer's projection + serial recurrence.
        if stream and layer + 1 < n_layers:
            nslot_w = layer % 2
            pltpu.make_async_copy(wslab_ref.at[layer], wbuf.at[nslot_w],
                                  wsem.at[nslot_w]).start()

        layer_in_ref = x_ref if layer == 0 else seq_bufs[(layer - 1) % n_seq]
        out_seq = seq_bufs[layer % n_seq] if layer < n_layers - 1 else None

        # --------- time-chunked, hoisted input projection (MXU) -------------
        # TODO(synk): for layer 0 with tiny d_input a VPU broadcast-FMA would
        #             avoid an almost-empty systolic-array pass.
        def project(c, slot, layer_in_ref=layer_in_ref,
                    load_wih=load_wih, load_b=load_b):
            row0 = c * chunk_t * batch                      # static
            clen = min(chunk_t, seq_len - c * chunk_t)      # static
            rows = clen * batch
            gx_slot = gx_buf.at[slot]
            gx_slot[pl.ds(0, rows), :] = (
                mxu(layer_in_ref[pl.ds(row0, rows), :], load_wih())
                + load_b().astype(jnp.float32))

        project(0, 0)

        h_c = (jnp.zeros((batch, Hp), jnp.float32),
               jnp.zeros((batch, Hp), jnp.float32))

        for c in range(n_chunks):
            slot = c % 2
            if c + 1 < n_chunks:
                # Issue next chunk's projection before this chunk's serial
                # recurrence (ping-pong gx buffer: slot 1-slot is free).
                project(c + 1, 1 - slot)

            clen = min(chunk_t, seq_len - c * chunk_t)
            chunk_row0 = c * chunk_t * batch
            gx_view = gx_buf.at[slot]

            # -------------- serial recurrence over this chunk ---------------
            def step(t, carry, gx_view=gx_view, chunk_row0=chunk_row0,
                     out_seq=out_seq, load_whh=load_whh):
                h_prev, c_prev = carry
                off = pl.multiple_of(t * batch, 8)          # sublane-aligned
                g = gx_view[pl.ds(off, batch), :] + mxu(h_prev, load_whh())
                i_g = _sigmoid_via_tanh(g[:, 0 * Hp:1 * Hp])
                f_g = _sigmoid_via_tanh(g[:, 1 * Hp:2 * Hp])
                c_bar = jnp.tanh(g[:, 2 * Hp:3 * Hp])
                o_g = _sigmoid_via_tanh(g[:, 3 * Hp:4 * Hp])
                c_new = f_g * c_prev + i_g * c_bar
                h_new = o_g * jnp.tanh(c_new)
                if out_seq is not None:
                    row = pl.multiple_of(chunk_row0 + off, 8)
                    out_seq[pl.ds(row, batch), :] = h_new.astype(out_seq.dtype)
                return h_new, c_new

            unroll = clen if clen <= 16 else unroll_big
            h_c = jax.lax.fori_loop(0, clen, step, h_c, unroll=unroll)

        # Final states written once per layer (what the module returns).
        hidden_ref[layer] = h_c[0]
        cell_ref[layer] = h_c[1]


# --------------------------------------------------------------------------
# Host-side parameter prep / wrapper
# --------------------------------------------------------------------------
def init_encoder_params(key, d_input, d_model, n_layers):
    """Deterministic init matching PyTorch nn.LSTM shapes (weights pre-transposed:
    W_ih (d_in, 4H), W_hh (H, 4H), combined bias (1, 4H); gate order i|f|g|o)."""
    params = []
    bound = 1.0 / math.sqrt(d_model)
    for layer in range(n_layers):
        d_in = d_input if layer == 0 else d_model
        key, k1, k2, k3, k4 = jax.random.split(key, 5)
        w_ih = jax.random.uniform(k1, (d_in, 4 * d_model), jnp.float32, -bound, bound)
        w_hh = jax.random.uniform(k2, (d_model, 4 * d_model), jnp.float32, -bound, bound)
        b_ih = jax.random.uniform(k3, (4 * d_model,), jnp.float32, -bound, bound)
        b_hh = jax.random.uniform(k4, (4 * d_model,), jnp.float32, -bound, bound)
        params.append((w_ih, w_hh, (b_ih + b_hh).reshape(1, 4 * d_model)))
    return params


def _pad_gate_cols(w, h, hp):
    """Pad each of the 4 gate column-slabs from width h to hp with zeros."""
    if h == hp:
        return w
    lead = w.shape[:-1]
    w4 = w.reshape(lead + (4, h))
    w4 = jnp.pad(w4, [(0, 0)] * len(lead) + [(0, 0), (0, hp - h)])
    return w4.reshape(lead + (4 * hp,))


def _pad_rows(w, rp):
    r = w.shape[0]
    return w if r == rp else jnp.pad(w, ((0, rp - r), (0, 0)))


def encoder_forward(params, x, *, compute_dtype=jnp.float32, time_chunk=64):
    """x: (B, T, d_input) batch_first. Returns (hidden, cell): (n_layers, B, d_model).

    compute_dtype=jnp.bfloat16 is recommended on v6e/v7x (bf16 weights/seq/MXU,
    f32 accumulation and f32 gate math); default f32 matches PyTorch numerics
    and is required for v5e's VPU/EUP."""
    n_layers = len(params)
    H = params[0][1].shape[0]
    B, T, d_in = x.shape

    Hp = _round_up(max(H, 1), 128)        # lane-dense gate slabs & outputs
    b_pad = _round_up(max(B, 1), 8)       # sublane-aligned per-step rows
    d_in_p = _round_up(max(d_in, 1), 8)
    # Keep each gx slot under ~8 MiB regardless of B/H.
    chunk_cap = max(1, (8 << 20) // (b_pad * 4 * Hp * 4))
    chunk_t = max(1, min(T, time_chunk, chunk_cap))

    # ---- activations: (B,T,D) -> time-major rows (T*b_pad, d_in_p) ----------
    x_tbd = jnp.transpose(x, (1, 0, 2)).astype(jnp.float32)
    x_tbd = jnp.pad(x_tbd, ((0, 0), (0, b_pad - B), (0, d_in_p - d_in)))
    x2d = x_tbd.reshape(T * b_pad, d_in_p).astype(compute_dtype)

    # ---- weights: per-gate pad H->Hp, row-pad contraction dims ---------------
    padded = []
    for layer, (w_ih, w_hh, b) in enumerate(params):
        rows_ih = d_in_p if layer == 0 else Hp
        w_ih_p = _pad_rows(_pad_gate_cols(w_ih.astype(jnp.float32), H, Hp), rows_ih)
        w_hh_p = _pad_rows(_pad_gate_cols(w_hh.astype(jnp.float32), H, Hp), Hp)
        b_p = _pad_gate_cols(b.astype(jnp.float32), H, Hp)
        padded.append((w_ih_p.astype(compute_dtype),
                       w_hh_p.astype(compute_dtype),
                       b_p.astype(compute_dtype)))

    wih0, whh0, b0 = padded[0]
    stream = n_layers > 1

    inputs = [x2d, wih0, whh0, b0]
    in_specs = [pl.BlockSpec(memory_space=pltpu.MemorySpace.VMEM)] * 4
    if stream:
        # One HBM slab per streamed layer: [W_ih (Hp) ; W_hh (Hp) ; bias (8 rows)]
        slabs = []
        for (w_ih_p, w_hh_p, b_p) in padded[1:]:
            b_rows = jnp.pad(b_p, ((0, 7), (0, 0)))
            slabs.append(jnp.concatenate([w_ih_p, w_hh_p, b_rows], axis=0))
        wslab = jnp.stack(slabs, axis=0)               # (L-1, 2Hp+8, 4Hp)
        inputs.append(wslab)
        in_specs.append(pl.BlockSpec(memory_space=pl.ANY))

    n_seq = min(n_layers - 1, 2)
    itemsize = jnp.dtype(compute_dtype).itemsize

    scratch_shapes = [pltpu.VMEM((2, chunk_t * b_pad, 4 * Hp), jnp.float32)]
    scratch_shapes += [pltpu.VMEM((T * b_pad, Hp), compute_dtype)
                       for _ in range(n_seq)]
    if stream:
        scratch_shapes += [pltpu.VMEM((2, 2 * Hp + 8, 4 * Hp), compute_dtype),
                           pltpu.SemaphoreType.DMA((2,))]

    # ---- right-size the VMEM limit from the actual footprint -----------------
    vmem_bytes = (
        x2d.size * itemsize
        + (wih0.size + whh0.size + b0.size) * itemsize
        + 2 * n_layers * b_pad * Hp * 4                         # hidden/cell out
        + 2 * chunk_t * b_pad * 4 * Hp * 4                      # gx ping-pong
        + n_seq * T * b_pad * Hp * itemsize                     # inter-layer seq
        + (2 * (2 * Hp + 8) * 4 * Hp * itemsize if stream else 0))
    vmem_limit = int(min(max(int(vmem_bytes * 1.3) + (2 << 20), 32 << 20),
                         100 << 20))

    unroll_big = 2 if Hp >= 512 else (4 if Hp >= 256 else 8)

    kernel = functools.partial(
        _encoder_kernel, n_layers=n_layers, seq_len=T, batch=b_pad,
        hidden_p=Hp, chunk_t=chunk_t, n_seq=n_seq,
        mm_dtype=compute_dtype, unroll_big=unroll_big)

    hidden, cell = pl.pallas_call(
        kernel,
        out_shape=(jax.ShapeDtypeStruct((n_layers, b_pad, Hp), jnp.float32),
                   jax.ShapeDtypeStruct((n_layers, b_pad, Hp), jnp.float32)),
        in_specs=in_specs,
        out_specs=(pl.BlockSpec(memory_space=pltpu.MemorySpace.VMEM),
                   pl.BlockSpec(memory_space=pltpu.MemorySpace.VMEM)),
        scratch_shapes=scratch_shapes,
        compiler_params=pltpu.CompilerParams(vmem_limit_bytes=vmem_limit),
    )(*inputs)

    return hidden[:, :B, :H], cell[:, :B, :H]


# --------------------------------------------------------------------------
# Pure-JAX reference (inference-mode nn.LSTM, batch_first)
# --------------------------------------------------------------------------
def encoder_reference(params, x):
    B, T, _ = x.shape
    layer_in = x.astype(jnp.float32)
    hs, cs = [], []
    for (w_ih, w_hh, b) in params:
        H = w_hh.shape[0]
        h = jnp.zeros((B, H), jnp.float32)
        c = jnp.zeros((B, H), jnp.float32)
        outs = []
        for t in range(T):
            g = layer_in[:, t, :] @ w_ih + h @ w_hh + b
            i = jax.nn.sigmoid(g[:, 0 * H:1 * H])
            f = jax.nn.sigmoid(g[:, 1 * H:2 * H])
            gg = jnp.tanh(g[:, 2 * H:3 * H])
            o = jax.nn.sigmoid(g[:, 3 * H:4 * H])
            c = f * c + i * gg
            h = o * jnp.tanh(c)
            outs.append(h)
        layer_in = jnp.stack(outs, axis=1)
        hs.append(h)
        cs.append(c)
    return jnp.stack(hs, 0), jnp.stack(cs, 0)


if __name__ == "__main__":
    B, T = 2, 8
    d_input, d_model, n_layers = 4, 32, 3

    key = jax.random.PRNGKey(0)
    k_param, k_x = jax.random.split(key)
    params = init_encoder_params(k_param, d_input, d_model, n_layers)
    x = jax.random.normal(k_x, (B, T, d_input), dtype=jnp.float32)

    hidden, cell = encoder_forward(params, x)
    jax.block_until_ready((hidden, cell))

    assert hidden.shape == (n_layers, B, d_model)
    assert cell.shape == (n_layers, B, d_model)

    h_ref, c_ref = encoder_reference(params, x)
    err_h = float(jnp.max(jnp.abs(hidden - h_ref)))
    err_c = float(jnp.max(jnp.abs(cell - c_ref)))
    assert err_h < 1e-3 and err_c < 1e-3, (err_h, err_c)

    print("KERNEL_OK")
</pallas_src>

<mosaic_0001>
module attributes {stable_mosaic.version = 11 : i64} {
  func.func @_encoder_kernel(%arg0: memref<64x8xf32, #tpu.memory_space<vmem>>, %arg1: memref<8x512xf32, #tpu.memory_space<vmem>>, %arg2: memref<128x512xf32, #tpu.memory_space<vmem>>, %arg3: memref<1x512xf32, #tpu.memory_space<vmem>>, %arg4: memref<2x264x512xf32, #tpu.memory_space<any>>, %arg5: memref<3x8x128xf32, #tpu.memory_space<vmem>>, %arg6: memref<3x8x128xf32, #tpu.memory_space<vmem>>, %arg7: memref<2x64x512xf32, #tpu.memory_space<vmem>>, %arg8: memref<64x128xf32, #tpu.memory_space<vmem>>, %arg9: memref<64x128xf32, #tpu.memory_space<vmem>>, %arg10: memref<2x264x512xf32, #tpu.memory_space<vmem>>, %arg11: memref<2x!tpu.dma_semaphore, #tpu.memory_space<semaphore_mem>>) attributes {dimension_semantics = [], scalar_prefetch = 0 : i64, scratch_operands = 5 : i64, tpu.core_type = #tpu.core_type<tc>} {
    %c0_i32 = arith.constant 0 : i32
    %c0_i32_0 = arith.constant 0 : i32
    %c0_i32_1 = arith.constant 0 : i32
    %c0_i32_2 = arith.constant 0 : i32
    %c0_i32_3 = arith.constant 0 : i32
    %0 = tpu.memref_slice %arg4[%c0_i32, %c0_i32_2, %c0_i32_3] : memref<2x264x512xf32, #tpu.memory_space<any>> -> memref<1x264x512xf32, #tpu.memory_space<any>>
    %1 = tpu.memref_squeeze %0 : memref<1x264x512xf32, #tpu.memory_space<any>> -> memref<264x512xf32, #tpu.memory_space<any>>
    %c0_i32_4 = arith.constant 0 : i32
    %c0_i32_5 = arith.constant 0 : i32
    %2 = tpu.memref_slice %arg10[%c0_i32_0, %c0_i32_4, %c0_i32_5] : memref<2x264x512xf32, #tpu.memory_space<vmem>> -> memref<1x264x512xf32, #tpu.memory_space<vmem>>
    %3 = tpu.memref_squeeze %2 : memref<1x264x512xf32, #tpu.memory_space<vmem>> -> memref<264x512xf32, #tpu.memory_space<vmem>>
    %4 = tpu.memref_slice %arg11[%c0_i32_1] : memref<2x!tpu.dma_semaphore, #tpu.memory_space<semaphore_mem>> -> memref<1x!tpu.dma_semaphore, #tpu.memory_space<semaphore_mem>>
    %5 = tpu.memref_squeeze %4 : memref<1x!tpu.dma_semaphore, #tpu.memory_space<semaphore_mem>> -> memref<!tpu.dma_semaphore, #tpu.memory_space<semaphore_mem>>
    tpu.enqueue_dma source(%1 : memref<264x512xf32, #tpu.memory_space<any>>) target(%3 : memref<264x512xf32, #tpu.memory_space<vmem>>) target_semaphore(%5 : memref<!tpu.dma_semaphore, #tpu.memory_space<semaphore_mem>>)
    %c0 = arith.constant 0 : index
    %c0_6 = arith.constant 0 : index
    %6 = vector.load %arg0[%c0, %c0_6] : memref<64x8xf32, #tpu.memory_space<vmem>>, vector<64x8xf32>
    %c0_7 = arith.constant 0 : index
    %c0_8 = arith.constant 0 : index
    %7 = vector.load %arg1[%c0_7, %c0_8] : memref<8x512xf32, #tpu.memory_space<vmem>>, vector<8x512xf32>
    %cst = arith.constant dense<0.000000e+00> : vector<64x512xf32>
    %8 = tpu.matmul %6, %7, %cst {dimension_numbers = #tpu.dot_dimension_numbers<[1], [0], [0], [1], [0, 0, 1, 1], [], []>} : vector<64x8xf32>, vector<8x512xf32>, vector<64x512xf32> -> vector<64x512xf32>
    %c0_9 = arith.constant 0 : index
    %c0_10 = arith.constant 0 : index
    %9 = vector.load %arg3[%c0_9, %c0_10] : memref<1x512xf32, #tpu.memory_space<vmem>>, vector<1x512xf32>
    %10 = vector.broadcast %9 : vector<1x512xf32> to vector<64x512xf32>
    %11 = arith.addf %8, %10 : vector<64x512xf32>
    %c0_i32_11 = arith.constant 0 : i32
    %c0_i32_12 = arith.constant 0 : i32
    %c0_i32_13 = arith.constant 0 : i32
    %12 = tpu.memref_slice %arg7[%c0_i32_11, %c0_i32_12, %c0_i32_13] : memref<2x64x512xf32, #tpu.memory_space<vmem>> -> memref<1x64x512xf32, #tpu.memory_space<vmem>>
    %13 = tpu.memref_squeeze %12 : memref<1x64x512xf32, #tpu.memory_space<vmem>> -> memref<64x512xf32, #tpu.memory_space<vmem>>
    %c0_14 = arith.constant 0 : index
    %c0_15 = arith.constant 0 : index
    %14 = vector.load %13[%c0_14, %c0_15] : memref<64x512xf32, #tpu.memory_space<vmem>>, vector<64x512xf32>
    tpu.vector_store %13[%c0_14, %c0_15], %11 {strides = array<i32>} : memref<64x512xf32, #tpu.memory_space<vmem>>, vector<64x512xf32>,
    %cst_16 = arith.constant 0.000000e+00 : f32
    %15 = vector.broadcast %cst_16 : f32 to vector<8x128xf32>
    %cst_17 = arith.constant 0.000000e+00 : f32
    %16 = vector.broadcast %cst_17 : f32 to vector<8x128xf32>
    %c0_i32_18 = arith.constant 0 : i32
    %c0_i32_19 = arith.constant 0 : i32
    %c8_i32 = arith.constant 8 : i32
    %17 = arith.muli %c0_i32_19, %c8_i32 : i32
    %18 = tpu.assume_multiple %17, 8 : i32
    %c0_i32_20 = arith.constant 0 : i32
    %c0_i32_21 = arith.constant 0 : i32
    %19 = tpu.memref_slice %arg7[%c0_i32_18, %c0_i32_20, %c0_i32_21] : memref<2x64x512xf32, #tpu.memory_space<vmem>> -> memref<1x64x512xf32, #tpu.memory_space<vmem>>
    %20 = tpu.memref_squeeze %19 : memref<1x64x512xf32, #tpu.memory_space<vmem>> -> memref<64x512xf32, #tpu.memory_space<vmem>>
    %21 = arith.index_cast %18 : i32 to index
    %c0_22 = arith.constant 0 : index
    %22 = vector.load %20[%21, %c0_22] : memref<64x512xf32, #tpu.memory_space<vmem>>, vector<8x512xf32>
    %c0_23 = arith.constant 0 : index
    %c0_24 = arith.constant 0 : index
    %23 = vector.load %arg2[%c0_23, %c0_24] : memref<128x512xf32, #tpu.memory_space<vmem>>, vector<128x512xf32>
    %cst_25 = arith.constant dense<0.000000e+00> : vector<8x512xf32>
    %24 = tpu.matmul %15, %23, %cst_25 {dimension_numbers = #tpu.dot_dimension_numbers<[1], [0], [0], [1], [0, 0, 1, 1], [], []>} : vector<8x128xf32>, vector<128x512xf32>, vector<8x512xf32> -> vector<8x512xf32>
    %25 = arith.addf %22, %24 : vector<8x512xf32>
    %26 = vector.extract_strided_slice %25 {offsets = [0, 0], sizes = [8, 128], strides = [1, 1]} : vector<8x512xf32> to vector<8x128xf32>
    %cst_26 = arith.constant 5.000000e-01 : f32
    %27 = vector.broadcast %cst_26 : f32 to vector<8x128xf32>
    %28 = arith.mulf %27, %26 : vector<8x128xf32>
    %29 = math.tanh %28 : vector<8x128xf32>
    %cst_27 = arith.constant 5.000000e-01 : f32
    %30 = vector.broadcast %cst_27 : f32 to vector<8x128xf32>
    %31 = arith.mulf %30, %29 : vector<8x128xf32>
    %cst_28 = arith.constant 5.000000e-01 : f32
    %32 = vector.broadcast %cst_28 : f32 to vector<8x128xf32>
    %33 = arith.addf %31, %32 : vector<8x128xf32>
    %34 = vector.extract_strided_slice %25 {offsets = [0, 128], sizes = [8, 128], strides = [1, 1]} : vector<8x512xf32> to vector<8x128xf32>
    %cst_29 = arith.constant 5.000000e-01 : f32
    %35 = vector.broadcast %cst_29 : f32 to vector<8x128xf32>
    %36 = arith.mulf %35, %34 : vector<8x128xf32>
    %37 = math.tanh %36 : vector<8x128xf32>
    %cst_30 = arith.constant 5.000000e-01 : f32
    %38 = vector.broadcast %cst_30 : f32 to vector<8x128xf32>
    %39 = arith.mulf %38, %37 : vector<8x128xf32>
    %cst_31 = arith.constant 5.000000e-01 : f32
    %40 = vector.broadcast %cst_31 : f32 to vector<8x128xf32>
    %41 = arith.addf %39, %40 : vector<8x128xf32>
    %42 = vector.extract_strided_slice %25 {offsets = [0, 256], sizes = [8, 128], strides = [1, 1]} : vector<8x512xf32> to vector<8x128xf32>
    %43 = math.tanh %42 : vector<8x128xf32>
    %44 = vector.extract_strided_slice %25 {offsets = [0, 384], sizes = [8, 128], strides = [1, 1]} : vector<8x512xf32> to vector<8x128xf32>
    %cst_32 = arith.constant 5.000000e-01 : f32
    %45 = vector.broadcast %cst_32 : f32 to vector<8x128xf32>
    %46 = arith.mulf %45, %44 : vector<8x128xf32>
    %47 = math.tanh %46 : vector<8x128xf32>
    %cst_33 = arith.constant 5.000000e-01 : f32
    %48 = vector.broadcast %cst_33 : f32 to vector<8x128xf32>
    %49 = arith.mulf %48, %47 : vector<8x128xf32>
    %cst_34 = arith.constant 5.000000e-01 : f32
    %50 = vector.broadcast %cst_34 : f32 to vector<8x128xf32>
    %51 = arith.addf %49, %50 : vector<8x128xf32>
    %52 = arith.mulf %41, %16 : vector<8x128xf32>
    %53 = arith.mulf %33, %43 : vector<8x128xf32>
    %54 = arith.addf %52, %53 : vector<8x128xf32>
    %55 = math.tanh %54 : vector<8x128xf32>
    %56 = arith.mulf %51, %55 : vector<8x128xf32>
    %c0_i32_35 = arith.constant 0 : i32
    %57 = arith.addi %c0_i32_35, %18 : i32
    %58 = tpu.assume_multiple %57, 8 : i32
    %59 = arith.index_cast %58 : i32 to index
    %c0_36 = arith.constant 0 : index
    %60 = vector.load %arg8[%59, %c0_36] : memref<64x128xf32, #tpu.memory_space<vmem>>, vector<8x128xf32>
    tpu.vector_store %arg8[%59, %c0_36], %56 {strides = array<i32>} : memref<64x128xf32, #tpu.memory_space<vmem>>, vector<8x128xf32>,
    %c1_i32 = arith.constant 1 : i32
    %c8_i32_37 = arith.constant 8 : i32
    %61 = arith.muli %c1_i32, %c8_i32_37 : i32
    %62 = tpu.assume_multiple %61, 8 : i32
    %c0_i32_38 = arith.constant 0 : i32
    %c0_i32_39 = arith.constant 0 : i32
    %63 = tpu.memref_slice %arg7[%c0_i32_18, %c0_i32_38, %c0_i32_39] : memref<2x64x512xf32, #tpu.memory_space<vmem>> -> memref<1x64x512xf32, #tpu.memory_space<vmem>>
    %64 = tpu.memref_squeeze %63 : memref<1x64x512xf32, #tpu.memory_space<vmem>> -> memref<64x512xf32, #tpu.memory_space<vmem>>
    %65 = arith.index_cast %62 : i32 to index
    %c0_40 = arith.constant 0 : index
    %66 = vector.load %64[%65, %c0_40] : memref<64x512xf32, #tpu.memory_space<vmem>>, vector<8x512xf32>
    %c0_41 = arith.constant 0 : index
    %c0_42 = arith.constant 0 : index
    %67 = vector.load %arg2[%c0_41, %c0_42] : memref<128x512xf32, #tpu.memory_space<vmem>>, vector<128x512xf32>
    %cst_43 = arith.constant dense<0.000000e+00> : vector<8x512xf32>
    %68 = tpu.matmul %56, %67, %cst_43 {dimension_numbers = #tpu.dot_dimension_numbers<[1], [0], [0], [1], [0, 0, 1, 1], [], []>} : vector<8x128xf32>, vector<128x512xf32>, vector<8x512xf32> -> vector<8x512xf32>
    %69 = arith.addf %66, %68 : vector<8x512xf32>
    %70 = vector.extract_strided_slice %69 {offsets = [0, 0], sizes = [8, 128], strides = [1, 1]} : vector<8x512xf32> to vector<8x128xf32>
    %cst_44 = arith.constant 5.000000e-01 : f32
    %71 = vector.broadcast %cst_44 : f32 to vector<8x128xf32>
    %72 = arith.mulf %71, %70 : vector<8x128xf32>
    %73 = math.tanh %72 : vector<8x128xf32>
    %cst_45 = arith.constant 5.000000e-01 : f32
    %74 = vector.broadcast %cst_45 : f32 to vector<8x128xf32>
    %75 = arith.mulf %74, %73 : vector<8x128xf32>
    %cst_46 = arith.constant 5.000000e-01 : f32
    %76 = vector.broadcast %cst_46 : f32 to vector<8x128xf32>
    %77 = arith.addf %75, %76 : vector<8x128xf32>
    %78 = vector.extract_strided_slice %69 {offsets = [0, 128], sizes = [8, 128], strides = [1, 1]} : vector<8x512xf32> to vector<8x128xf32>
    %cst_47 = arith.constant 5.000000e-01 : f32
    %79 = vector.broadcast %cst_47 : f32 to vector<8x128xf32>
    %80 = arith.mulf %79, %78 : vector<8x128xf32>
    %81 = math.tanh %80 : vector<8x128xf32>
    %cst_48 = arith.constant 5.000000e-01 : f32
    %82 = vector.broadcast %cst_48 : f32 to vector<8x128xf32>
    %83 = arith.mulf %82, %81 : vector<8x128xf32>
    %cst_49 = arith.constant 5.000000e-01 : f32
    %84 = vector.broadcast %cst_49 : f32 to vector<8x128xf32>
    %85 = arith.addf %83, %84 : vector<8x128xf32>
    %86 = vector.extract_strided_slice %69 {offsets = [0, 256], sizes = [8, 128], strides = [1, 1]} : vector<8x512xf32> to vector<8x128xf32>
    %87 = math.tanh %86 : vector<8x128xf32>
    %88 = vector.extract_strided_slice %69 {offsets = [0, 384], sizes = [8, 128], strides = [1, 1]} : vector<8x512xf32> to vector<8x128xf32>
    %cst_50 = arith.constant 5.000000e-01 : f32
    %89 = vector.broadcast %cst_50 : f32 to vector<8x128xf32>
    %90 = arith.mulf %89, %88 : vector<8x128xf32>
    %91 = math.tanh %90 : vector<8x128xf32>
    %cst_51 = arith.constant 5.000000e-01 : f32
    %92 = vector.broadcast %cst_51 : f32 to vector<8x128xf32>
    %93 = arith.mulf %92, %91 : vector<8x128xf32>
    %cst_52 = arith.constant 5.000000e-01 : f32
    %94 = vector.broadcast %cst_52 : f32 to vector<8x128xf32>
    %95 = arith.addf %93, %94 : vector<8x128xf32>
    %96 = arith.mulf %85, %54 : vector<8x128xf32>
    %97 = arith.mulf %77, %87 : vector<8x128xf32>
    %98 = arith.addf %96, %97 : vector<8x128xf32>
    %99 = math.tanh %98 : vector<8x128xf32>
    %100 = arith.mulf %95, %99 : vector<8x128xf32>
    %c0_i32_53 = arith.constant 0 : i32
    %101 = arith.addi %c0_i32_53, %62 : i32
    %102 = tpu.assume_multiple %101, 8 : i32
    %103 = arith.index_cast %102 : i32 to index
    %c0_54 = arith.constant 0 : index
    %104 = vector.load %arg8[%103, %c0_54] : memref<64x128xf32, #tpu.memory_space<vmem>>, vector<8x128xf32>
    tpu.vector_store %arg8[%103, %c0_54], %100 {strides = array<i32>} : memref<64x128xf32, #tpu.memory_space<vmem>>, vector<8x128xf32>,
    %c2_i32 = arith.constant 2 : i32
    %c8_i32_55 = arith.constant 8 : i32
    %105 = arith.muli %c2_i32, %c8_i32_55 : i32
    %106 = tpu.assume_multiple %105, 8 : i32
    %c0_i32_56 = arith.constant 0 : i32
    %c0_i32_57 = arith.constant 0 : i32
    %107 = tpu.memref_slice %arg7[%c0_i32_18, %c0_i32_56, %c0_i32_57] : memref<2x64x512xf32, #tpu.memory_space<vmem>> -> memref<1x64x512xf32, #tpu.memory_space<vmem>>
    %108 = tpu.memref_squeeze %107 : memref<1x64x512xf32, #tpu.memory_space<vmem>> -> memref<64x512xf32, #tpu.memory_space<vmem>>
    %109 = arith.index_cast %106 : i32 to index
    %c0_58 = arith.constant 0 : index
    %110 = vector.load %108[%109, %c0_58] : memref<64x512xf32, #tpu.memory_space<vmem>>, vector<8x512xf32>
    %c0_59 = arith.constant 0 : index
    %c0_60 = arith.constant 0 : index
    %111 = vector.load %arg2[%c0_59, %c0_60] : memref<128x512xf32, #tpu.memory_space<vmem>>, vector<128x512xf32>
    %cst_61 = arith.constant dense<0.000000e+00> : vector<8x512xf32>
    %112 = tpu.matmul %100, %111, %cst_61 {dimension_numbers = #tpu.dot_dimension_numbers<[1], [0], [0], [1], [0, 0, 1, 1], [], []>} : vector<8x128xf32>, vector<128x512xf32>, vector<8x512xf32> -> vector<8x512xf32>
    %113 = arith.addf %110, %112 : vector<8x512xf32>
    %114 = vector.extract_strided_slice %113 {offsets = [0, 0], sizes = [8, 128], strides = [1, 1]} : vector<8x512xf32> to vector<8x128xf32>
    %cst_62 = arith.constant 5.000000e-01 : f32
    %115 = vector.broadcast %cst_62 : f32 to vector<8x128xf32>
    %116 = arith.mulf %115, %114 : vector<8x128xf32>
    %117 = math.tanh %116 : vector<8x128xf32>
    %cst_63 = arith.constant 5.000000e-01 : f32
    %118 = vector.broadcast %cst_63 : f32 to vector<8x128xf32>
    %119 = arith.mulf %118, %117 : vector<8x128xf32>
    %cst_64 = arith.constant 5.000000e-01 : f32
    %120 = vector.broadcast %cst_64 : f32 to vector<8x128xf32>
    %121 = arith.addf %119, %120 : vector<8x128xf32>
    %122 = vector.extract_strided_slice %113 {offsets = [0, 128], sizes = [8, 128], strides = [1, 1]} : vector<8x512xf32> to vector<8x128xf32>
    %cst_65 = arith.constant 5.000000e-01 : f32
    %123 = vector.broadcast %cst_65 : f32 to vector<8x128xf32>
    %124 = arith.mulf %123, %122 : vector<8x128xf32>
    %125 = math.tanh %124 : vector<8x128xf32>
    %cst_66 = arith.constant 5.000000e-01 : f32
    %126 = vector.broadcast %cst_66 : f32 to vector<8x128xf32>
    %127 = arith.mulf %126, %125 : vector<8x128xf32>
    %cst_67 = arith.constant 5.000000e-01 : f32
    %128 = vector.broadcast %cst_67 : f32 to vector<8x128xf32>
    %129 = arith.addf %127, %128 : vector<8x128xf32>
    %130 = vector.extract_strided_slice %113 {offsets = [0, 256], sizes = [8, 128], strides = [1, 1]} : vector<8x512xf32> to vector<8x128xf32>
    %131 = math.tanh %130 : vector<8x128xf32>
    %132 = vector.extract_strided_slice %113 {offsets = [0, 384], sizes = [8, 128], strides = [1, 1]} : vector<8x512xf32> to vector<8x128xf32>
    %cst_68 = arith.constant 5.000000e-01 : f32
    %133 = vector.broadcast %cst_68 : f32 to vector<8x128xf32>
    %134 = arith.mulf %133, %132 : vector<8x128xf32>
    %135 = math.tanh %134 : vector<8x128xf32>
    %cst_69 = arith.constant 5.000000e-01 : f32
    %136 = vector.broadcast %cst_69 : f32 to vector<8x128xf32>
    %137 = arith.mulf %136, %135 : vector<8x128xf32>
    %cst_70 = arith.constant 5.000000e-01 : f32
    %138 = vector.broadcast %cst_70 : f32 to vector<8x128xf32>
    %139 = arith.addf %137, %138 : vector<8x128xf32>
    %140 = arith.mulf %129, %98 : vector<8x128xf32>
    %141 = arith.mulf %121, %131 : vector<8x128xf32>
    %142 = arith.addf %140, %141 : vector<8x128xf32>
    %143 = math.tanh %142 : vector<8x128xf32>
    %144 = arith.mulf %139, %143 : vector<8x128xf32>
    %c0_i32_71 = arith.constant 0 : i32
    %145 = arith.addi %c0_i32_71, %106 : i32
    %146 = tpu.assume_multiple %145, 8 : i32
    %147 = arith.index_cast %146 : i32 to index
    %c0_72 = arith.constant 0 : index
    %148 = vector.load %arg8[%147, %c0_72] : memref<64x128xf32, #tpu.memory_space<vmem>>, vector<8x128xf32>
    tpu.vector_store %arg8[%147, %c0_72], %144 {strides = array<i32>} : memref<64x128xf32, #tpu.memory_space<vmem>>, vector<8x128xf32>,
    %c3_i32 = arith.constant 3 : i32
    %c8_i32_73 = arith.constant 8 : i32
    %149 = arith.muli %c3_i32, %c8_i32_73 : i32
    %150 = tpu.assume_multiple %149, 8 : i32
    %c0_i32_74 = arith.constant 0 : i32
    %c0_i32_75 = arith.constant 0 : i32
    %151 = tpu.memref_slice %arg7[%c0_i32_18, %c0_i32_74, %c0_i32_75] : memref<2x64x512xf32, #tpu.memory_space<vmem>> -> memref<1x64x512xf32, #tpu.memory_space<vmem>>
    %152 = tpu.memref_squeeze %151 : memref<1x64x512xf32, #tpu.memory_space<vmem>> -> memref<64x512xf32, #tpu.memory_space<vmem>>
    %153 = arith.index_cast %150 : i32 to index
    %c0_76 = arith.constant 0 : index
    %154 = vector.load %152[%153, %c0_76] : memref<64x512xf32, #tpu.memory_space<vmem>>, vector<8x512xf32>
    %c0_77 = arith.constant 0 : index
    %c0_78 = arith.constant 0 : index
    %155 = vector.load %arg2[%c0_77, %c0_78] : memref<128x512xf32, #tpu.memory_space<vmem>>, vector<128x512xf32>
    %cst_79 = arith.constant dense<0.000000e+00> : vector<8x512xf32>
    %156 = tpu.matmul %144, %155, %cst_79 {dimension_numbers = #tpu.dot_dimension_numbers<[1], [0], [0], [1], [0, 0, 1, 1], [], []>} : vector<8x128xf32>, vector<128x512xf32>, vector<8x512xf32> -> vector<8x512xf32>
    %157 = arith.addf %154, %156 : vector<8x512xf32>
    %158 = vector.extract_strided_slice %157 {offsets = [0, 0], sizes = [8, 128], strides = [1, 1]} : vector<8x512xf32> to vector<8x128xf32>
    %cst_80 = arith.constant 5.000000e-01 : f32
    %159 = vector.broadcast %cst_80 : f32 to vector<8x128xf32>
    %160 = arith.mulf %159, %158 : vector<8x128xf32>
    %161 = math.tanh %160 : vector<8x128xf32>
    %cst_81 = arith.constant 5.000000e-01 : f32
    %162 = vector.broadcast %cst_81 : f32 to vector<8x128xf32>
    %163 = arith.mulf %162, %161 : vector<8x128xf32>
    %cst_82 = arith.constant 5.000000e-01 : f32
    %164 = vector.broadcast %cst_82 : f32 to vector<8x128xf32>
    %165 = arith.addf %163, %164 : vector<8x128xf32>
    %166 = vector.extract_strided_slice %157 {offsets = [0, 128], sizes = [8, 128], strides = [1, 1]} : vector<8x512xf32> to vector<8x128xf32>
    %cst_83 = arith.constant 5.000000e-01 : f32
    %167 = vector.broadcast %cst_83 : f32 to vector<8x128xf32>
    %168 = arith.mulf %167, %166 : vector<8x128xf32>
    %169 = math.tanh %168 : vector<8x128xf32>
    %cst_84 = arith.constant 5.000000e-01 : f32
    %170 = vector.broadcast %cst_84 : f32 to vector<8x128xf32>
    %171 = arith.mulf %170, %169 : vector<8x128xf32>
    %cst_85 = arith.constant 5.000000e-01 : f32
    %172 = vector.broadcast %cst_85 : f32 to vector<8x128xf32>
    %173 = arith.addf %171, %172 : vector<8x128xf32>
    %174 = vector.extract_strided_slice %157 {offsets = [0, 256], sizes = [8, 128], strides = [1, 1]} : vector<8x512xf32> to vector<8x128xf32>
    %175 = math.tanh %174 : vector<8x128xf32>
    %176 = vector.extract_strided_slice %157 {offsets = [0, 384], sizes = [8, 128], strides = [1, 1]} : vector<8x512xf32> to vector<8x128xf32>
    %cst_86 = arith.constant 5.000000e-01 : f32
    %177 = vector.broadcast %cst_86 : f32 to vector<8x128xf32>
    %178 = arith.mulf %177, %176 : vector<8x128xf32>
    %179 = math.tanh %178 : vector<8x128xf32>
    %cst_87 = arith.constant 5.000000e-01 : f32
    %180 = vector.broadcast %cst_87 : f32 to vector<8x128xf32>
    %181 = arith.mulf %180, %179 : vector<8x128xf32>
    %cst_88 = arith.constant 5.000000e-01 : f32
    %182 = vector.broadcast %cst_88 : f32 to vector<8x128xf32>
    %183 = arith.addf %181, %182 : vector<8x128xf32>
    %184 = arith.mulf %173, %142 : vector<8x128xf32>
    %185 = arith.mulf %165, %175 : vector<8x128xf32>
    %186 = arith.addf %184, %185 : vector<8x128xf32>
    %187 = math.tanh %186 : vector<8x128xf32>
    %188 = arith.mulf %183, %187 : vector<8x128xf32>
    %c0_i32_89 = arith.constant 0 : i32
    %189 = arith.addi %c0_i32_89, %150 : i32
    %190 = tpu.assume_multiple %189, 8 : i32
    %191 = arith.index_cast %190 : i32 to index
    %c0_90 = arith.constant 0 : index
    %192 = vector.load %arg8[%191, %c0_90] : memref<64x128xf32, #tpu.memory_space<vmem>>, vector<8x128xf32>
    tpu.vector_store %arg8[%191, %c0_90], %188 {strides = array<i32>} : memref<64x128xf32, #tpu.memory_space<vmem>>, vector<8x128xf32>,
    %c4_i32 = arith.constant 4 : i32
    %c8_i32_91 = arith.constant 8 : i32
    %193 = arith.muli %c4_i32, %c8_i32_91 : i32
    %194 = tpu.assume_multiple %193, 8 : i32
    %c0_i32_92 = arith.constant 0 : i32
    %c0_i32_93 = arith.constant 0 : i32
    %195 = tpu.memref_slice %arg7[%c0_i32_18, %c0_i32_92, %c0_i32_93] : memref<2x64x512xf32, #tpu.memory_space<vmem>> -> memref<1x64x512xf32, #tpu.memory_space<vmem>>
    %196 = tpu.memref_squeeze %195 : memref<1x64x512xf32, #tpu.memory_space<vmem>> -> memref<64x512xf32, #tpu.memory_space<vmem>>
    %197 = arith.index_cast %194 : i32 to index
    %c0_94 = arith.constant 0 : index
    %198 = vector.load %196[%197, %c0_94] : memref<64x512xf32, #tpu.memory_space<vmem>>, vector<8x512xf32>
    %c0_95 = arith.constant 0 : index
    %c0_96 = arith.constant 0 : index
    %199 = vector.load %arg2[%c0_95, %c0_96] : memref<128x512xf32, #tpu.memory_space<vmem>>, vector<128x512xf32>
    %cst_97 = arith.constant dense<0.000000e+00> : vector<8x512xf32>
    %200 = tpu.matmul %188, %199, %cst_97 {dimension_numbers = #tpu.dot_dimension_numbers<[1], [0], [0], [1], [0, 0, 1, 1], [], []>} : vector<8x128xf32>, vector<128x512xf32>, vector<8x512xf32> -> vector<8x512xf32>
    %201 = arith.addf %198, %200 : vector<8x512xf32>
    %202 = vector.extract_strided_slice %201 {offsets = [0, 0], sizes = [8, 128], strides = [1, 1]} : vector<8x512xf32> to vector<8x128xf32>
    %cst_98 = arith.constant 5.000000e-01 : f32
    %203 = vector.broadcast %cst_98 : f32 to vector<8x128xf32>
    %204 = arith.mulf %203, %202 : vector<8x128xf32>
    %205 = math.tanh %204 : vector<8x128xf32>
    %cst_99 = arith.constant 5.000000e-01 : f32
    %206 = vector.broadcast %cst_99 : f32 to vector<8x128xf32>
    %207 = arith.mulf %206, %205 : vector<8x128xf32>
    %cst_100 = arith.constant 5.000000e-01 : f32
    %208 = vector.broadcast %cst_100 : f32 to vector<8x128xf32>
    %209 = arith.addf %207, %208 : vector<8x128xf32>
    %210 = vector.extract_strided_slice %201 {offsets = [0, 128], sizes = [8, 128], strides = [1, 1]} : vector<8x512xf32> to vector<8x128xf32>
    %cst_101 = arith.constant 5.000000e-01 : f32
    %211 = vector.broadcast %cst_101 : f32 to vector<8x128xf32>
    %212 = arith.mulf %211, %210 : vector<8x128xf32>
    %213 = math.tanh %212 : vector<8x128xf32>
    %cst_102 = arith.constant 5.000000e-01 : f32
    %214 = vector.broadcast %cst_102 : f32 to vector<8x128xf32>
    %215 = arith.mulf %214, %213 : vector<8x128xf32>
    %cst_103 = arith.constant 5.000000e-01 : f32
    %216 = vector.broadcast %cst_103 : f32 to vector<8x128xf32>
    %217 = arith.addf %215, %216 : vector<8x128xf32>
    %218 = vector.extract_strided_slice %201 {offsets = [0, 256], sizes = [8, 128], strides = [1, 1]} : vector<8x512xf32> to vector<8x128xf32>
    %219 = math.tanh %218 : vector<8x128xf32>
    %220 = vector.extract_strided_slice %201 {offsets = [0, 384], sizes = [8, 128], strides = [1, 1]} : vector<8x512xf32> to vector<8x128xf32>
    %cst_104 = arith.constant 5.000000e-01 : f32
    %221 = vector.broadcast %cst_104 : f32 to vector<8x128xf32>
    %222 = arith.mulf %221, %220 : vector<8x128xf32>
    %223 = math.tanh %222 : vector<8x128xf32>
    %cst_105 = arith.constant 5.000000e-01 : f32
    %224 = vector.broadcast %cst_105 : f32 to vector<8x128xf32>
    %225 = arith.mulf %224, %223 : vector<8x128xf32>
    %cst_106 = arith.constant 5.000000e-01 : f32
    %226 = vector.broadcast %cst_106 : f32 to vector<8x128xf32>
    %227 = arith.addf %225, %226 : vector<8x128xf32>
    %228 = arith.mulf %217, %186 : vector<8x128xf32>
    %229 = arith.mulf %209, %219 : vector<8x128xf32>
    %230 = arith.addf %228, %229 : vector<8x128xf32>
    %231 = math.tanh %230 : vector<8x128xf32>
    %232 = arith.mulf %227, %231 : vector<8x128xf32>
    %c0_i32_107 = arith.constant 0 : i32
    %233 = arith.addi %c0_i32_107, %194 : i32
    %234 = tpu.assume_multiple %233, 8 : i32
    %235 = arith.index_cast %234 : i32 to index
    %c0_108 = arith.constant 0 : index
    %236 = vector.load %arg8[%235, %c0_108] : memref<64x128xf32, #tpu.memory_space<vmem>>, vector<8x128xf32>
    tpu.vector_store %arg8[%235, %c0_108], %232 {strides = array<i32>} : memref<64x128xf32, #tpu.memory_space<vmem>>, vector<8x128xf32>,
    %c5_i32 = arith.constant 5 : i32
    %c8_i32_109 = arith.constant 8 : i32
    %237 = arith.muli %c5_i32, %c8_i32_109 : i32
    %238 = tpu.assume_multiple %237, 8 : i32
    %c0_i32_110 = arith.constant 0 : i32
    %c0_i32_111 = arith.constant 0 : i32
    %239 = tpu.memref_slice %arg7[%c0_i32_18, %c0_i32_110, %c0_i32_111] : memref<2x64x512xf32, #tpu.memory_space<vmem>> -> memref<1x64x512xf32, #tpu.memory_space<vmem>>
    %240 = tpu.memref_squeeze %239 : memref<1x64x512xf32, #tpu.memory_space<vmem>> -> memref<64x512xf32, #tpu.memory_space<vmem>>
    %241 = arith.index_cast %238 : i32 to index
    %c0_112 = arith.constant 0 : index
    %242 = vector.load %240[%241, %c0_112] : memref<64x512xf32, #tpu.memory_space<vmem>>, vector<8x512xf32>
    %c0_113 = arith.constant 0 : index
    %c0_114 = arith.constant 0 : index
    %243 = vector.load %arg2[%c0_113, %c0_114] : memref<128x512xf32, #tpu.memory_space<vmem>>, vector<128x512xf32>
    %cst_115 = arith.constant dense<0.000000e+00> : vector<8x512xf32>
    %244 = tpu.matmul %232, %243, %cst_115 {dimension_numbers = #tpu.dot_dimension_numbers<[1], [0], [0], [1], [0, 0, 1, 1], [], []>} : vector<8x128xf32>, vector<128x512xf32>, vector<8x512xf32> -> vector<8x512xf32>
    %245 = arith.addf %242, %244 : vector<8x512xf32>
    %246 = vector.extract_strided_slice %245 {offsets = [0, 0], sizes = [8, 128], strides = [1, 1]} : vector<8x512xf32> to vector<8x128xf32>
    %cst_116 = arith.constant 5.000000e-01 : f32
    %247 = vector.broadcast %cst_116 : f32 to vector<8x128xf32>
    %248 = arith.mulf %247, %246 : vector<8x128xf32>
    %249 = math.tanh %248 : vector<8x128xf32>
    %cst_117 = arith.constant 5.000000e-01 : f32
    %250 = vector.broadcast %cst_117 : f32 to vector<8x128xf32>
    %251 = arith.mulf %250, %249 : vector<8x128xf32>
    %cst_118 = arith.constant 5.000000e-01 : f32
    %252 = vector.broadcast %cst_118 : f32 to vector<8x128xf32>
    %253 = arith.addf %251, %252 : vector<8x128xf32>
    %254 = vector.extract_strided_slice %245 {offsets = [0, 128], sizes = [8, 128], strides = [1, 1]} : vector<8x512xf32> to vector<8x128xf32>
    %cst_119 = arith.constant 5.000000e-01 : f32
    %255 = vector.broadcast %cst_119 : f32 to vector<8x128xf32>
    %256 = arith.mulf %255, %254 : vector<8x128xf32>
    %257 = math.tanh %256 : vector<8x128xf32>
    %cst_120 = arith.constant 5.000000e-01 : f32
    %258 = vector.broadcast %cst_120 : f32 to vector<8x128xf32>
    %259 = arith.mulf %258, %257 : vector<8x128xf32>
    %cst_121 = arith.constant 5.000000e-01 : f32
    %260 = vector.broadcast %cst_121 : f32 to vector<8x128xf32>
    %261 = arith.addf %259, %260 : vector<8x128xf32>
    %262 = vector.extract_strided_slice %245 {offsets = [0, 256], sizes = [8, 128], strides = [1, 1]} : vector<8x512xf32> to vector<8x128xf32>
    %263 = math.tanh %262 : vector<8x128xf32>
    %264 = vector.extract_strided_slice %245 {offsets = [0, 384], sizes = [8, 128], strides = [1, 1]} : vector<8x512xf32> to vector<8x128xf32>
    %cst_122 = arith.constant 5.000000e-01 : f32
    %265 = vector.broadcast %cst_122 : f32 to vector<8x128xf32>
    %266 = arith.mulf %265, %264 : vector<8x128xf32>
    %267 = math.tanh %266 : vector<8x128xf32>
    %cst_123 = arith.constant 5.000000e-01 : f32
    %268 = vector.broadcast %cst_123 : f32 to vector<8x128xf32>
    %269 = arith.mulf %268, %267 : vector<8x128xf32>
    %cst_124 = arith.constant 5.000000e-01 : f32
    %270 = vector.broadcast %cst_124 : f32 to vector<8x128xf32>
    %271 = arith.addf %269, %270 : vector<8x128xf32>
    %272 = arith.mulf %261, %230 : vector<8x128xf32>
    %273 = arith.mulf %253, %263 : vector<8x128xf32>
    %274 = arith.addf %272, %273 : vector<8x128xf32>
    %275 = math.tanh %274 : vector<8x128xf32>
    %276 = arith.mulf %271, %275 : vector<8x128xf32>
    %c0_i32_125 = arith.constant 0 : i32
    %277 = arith.addi %c0_i32_125, %238 : i32
    %278 = tpu.assume_multiple %277, 8 : i32
    %279 = arith.index_cast %278 : i32 to index
    %c0_126 = arith.constant 0 : index
    %280 = vector.load %arg8[%279, %c0_126] : memref<64x128xf32, #tpu.memory_space<vmem>>, vector<8x128xf32>
    tpu.vector_store %arg8[%279, %c0_126], %276 {strides = array<i32>} : memref<64x128xf32, #tpu.memory_space<vmem>>, vector<8x128xf32>,
    %c6_i32 = arith.constant 6 : i32
    %c8_i32_127 = arith.constant 8 : i32
    %281 = arith.muli %c6_i32, %c8_i32_127 : i32
    %282 = tpu.assume_multiple %281, 8 : i32
    %c0_i32_128 = arith.constant 0 : i32
    %c0_i32_129 = arith.constant 0 : i32
    %283 = tpu.memref_slice %arg7[%c0_i32_18, %c0_i32_128, %c0_i32_129] : memref<2x64x512xf32, #tpu.memory_space<vmem>> -> memref<1x64x512xf32, #tpu.memory_space<vmem>>
    %284 = tpu.memref_squeeze %283 : memref<1x64x512xf32, #tpu.memory_space<vmem>> -> memref<64x512xf32, #tpu.memory_space<vmem>>
    %285 = arith.index_cast %282 : i32 to index
    %c0_130 = arith.constant 0 : index
    %286 = vector.load %284[%285, %c0_130] : memref<64x512xf32, #tpu.memory_space<vmem>>, vector<8x512xf32>
    %c0_131 = arith.constant 0 : index
    %c0_132 = arith.constant 0 : index
    %287 = vector.load %arg2[%c0_131, %c0_132] : memref<128x512xf32, #tpu.memory_space<vmem>>, vector<128x512xf32>
    %cst_133 = arith.constant dense<0.000000e+00> : vector<8x512xf32>
    %288 = tpu.matmul %276, %287, %cst_133 {dimension_numbers = #tpu.dot_dimension_numbers<[1], [0], [0], [1], [0, 0, 1, 1], [], []>} : vector<8x128xf32>, vector<128x512xf32>, vector<8x512xf32> -> vector<8x512xf32>
    %289 = arith.addf %286, %288 : vector<8x512xf32>
    %290 = vector.extract_strided_slice %289 {offsets = [0, 0], sizes = [8, 128], strides = [1, 1]} : vector<8x512xf32> to vector<8x128xf32>
    %cst_134 = arith.constant 5.000000e-01 : f32
    %291 = vector.broadcast %cst_134 : f32 to vector<8x128xf32>
    %292 = arith.mulf %291, %290 : vector<8x128xf32>
    %293 = math.tanh %292 : vector<8x128xf32>
    %cst_135 = arith.constant 5.000000e-01 : f32
    %294 = vector.broadcast %cst_135 : f32 to vector<8x128xf32>
    %295 = arith.mulf %294, %293 : vector<8x128xf32>
    %cst_136 = arith.constant 5.000000e-01 : f32
    %296 = vector.broadcast %cst_136 : f32 to vector<8x128xf32>
    %297 = arith.addf %295, %296 : vector<8x128xf32>
    %298 = vector.extract_strided_slice %289 {offsets = [0, 128], sizes = [8, 128], strides = [1, 1]} : vector<8x512xf32> to vector<8x128xf32>
    %cst_137 = arith.constant 5.000000e-01 : f32
    %299 = vector.broadcast %cst_137 : f32 to vector<8x128xf32>
    %300 = arith.mulf %299, %298 : vector<8x128xf32>
    %301 = math.tanh %300 : vector<8x128xf32>
    %cst_138 = arith.constant 5.000000e-01 : f32
    %302 = vector.broadcast %cst_138 : f32 to vector<8x128xf32>
    %303 = arith.mulf %302, %301 : vector<8x128xf32>
    %cst_139 = arith.constant 5.000000e-01 : f32
    %304 = vector.broadcast %cst_139 : f32 to vector<8x128xf32>
    %305 = arith.addf %303, %304 : vector<8x128xf32>
    %306 = vector.extract_strided_slice %289 {offsets = [0, 256], sizes = [8, 128], strides = [1, 1]} : vector<8x512xf32> to vector<8x128xf32>
    %307 = math.tanh %306 : vector<8x128xf32>
    %308 = vector.extract_strided_slice %289 {offsets = [0, 384], sizes = [8, 128], strides = [1, 1]} : vector<8x512xf32> to vector<8x128xf32>
    %cst_140 = arith.constant 5.000000e-01 : f32
    %309 = vector.broadcast %cst_140 : f32 to vector<8x128xf32>
    %310 = arith.mulf %309, %308 : vector<8x128xf32>
    %311 = math.tanh %310 : vector<8x128xf32>
    %cst_141 = arith.constant 5.000000e-01 : f32
    %312 = vector.broadcast %cst_141 : f32 to vector<8x128xf32>
    %313 = arith.mulf %312, %311 : vector<8x128xf32>
    %cst_142 = arith.constant 5.000000e-01 : f32
    %314 = vector.broadcast %cst_142 : f32 to vector<8x128xf32>
    %315 = arith.addf %313, %314 : vector<8x128xf32>
    %316 = arith.mulf %305, %274 : vector<8x128xf32>
    %317 = arith.mulf %297, %307 : vector<8x128xf32>
    %318 = arith.addf %316, %317 : vector<8x128xf32>
    %319 = math.tanh %318 : vector<8x128xf32>
    %320 = arith.mulf %315, %319 : vector<8x128xf32>
    %c0_i32_143 = arith.constant 0 : i32
    %321 = arith.addi %c0_i32_143, %282 : i32
    %322 = tpu.assume_multiple %321, 8 : i32
    %323 = arith.index_cast %322 : i32 to index
    %c0_144 = arith.constant 0 : index
    %324 = vector.load %arg8[%323, %c0_144] : memref<64x128xf32, #tpu.memory_space<vmem>>, vector<8x128xf32>
    tpu.vector_store %arg8[%323, %c0_144], %320 {strides = array<i32>} : memref<64x128xf32, #tpu.memory_space<vmem>>, vector<8x128xf32>,
    %c7_i32 = arith.constant 7 : i32
    %c8_i32_145 = arith.constant 8 : i32
    %325 = arith.muli %c7_i32, %c8_i32_145 : i32
    %326 = tpu.assume_multiple %325, 8 : i32
    %c0_i32_146 = arith.constant 0 : i32
    %c0_i32_147 = arith.constant 0 : i32
    %327 = tpu.memref_slice %arg7[%c0_i32_18, %c0_i32_146, %c0_i32_147] : memref<2x64x512xf32, #tpu.memory_space<vmem>> -> memref<1x64x512xf32, #tpu.memory_space<vmem>>
    %328 = tpu.memref_squeeze %327 : memref<1x64x512xf32, #tpu.memory_space<vmem>> -> memref<64x512xf32, #tpu.memory_space<vmem>>
    %329 = arith.index_cast %326 : i32 to index
    %c0_148 = arith.constant 0 : index
    %330 = vector.load %328[%329, %c0_148] : memref<64x512xf32, #tpu.memory_space<vmem>>, vector<8x512xf32>
    %c0_149 = arith.constant 0 : index
    %c0_150 = arith.constant 0 : index
    %331 = vector.load %arg2[%c0_149, %c0_150] : memref<128x512xf32, #tpu.memory_space<vmem>>, vector<128x512xf32>
    %cst_151 = arith.constant dense<0.000000e+00> : vector<8x512xf32>
    %332 = tpu.matmul %320, %331, %cst_151 {dimension_numbers = #tpu.dot_dimension_numbers<[1], [0], [0], [1], [0, 0, 1, 1], [], []>} : vector<8x128xf32>, vector<128x512xf32>, vector<8x512xf32> -> vector<8x512xf32>
    %333 = arith.addf %330, %332 : vector<8x512xf32>
    %334 = vector.extract_strided_slice %333 {offsets = [0, 0], sizes = [8, 128], strides = [1, 1]} : vector<8x512xf32> to vector<8x128xf32>
    %cst_152 = arith.constant 5.000000e-01 : f32
    %335 = vector.broadcast %cst_152 : f32 to vector<8x128xf32>
    %336 = arith.mulf %335, %334 : vector<8x128xf32>
    %337 = math.tanh %336 : vector<8x128xf32>
    %cst_153 = arith.constant 5.000000e-01 : f32
    %338 = vector.broadcast %cst_153 : f32 to vector<8x128xf32>
    %339 = arith.mulf %338, %337 : vector<8x128xf32>
    %cst_154 = arith.constant 5.000000e-01 : f32
    %340 = vector.broadcast %cst_154 : f32 to vector<8x128xf32>
    %341 = arith.addf %339, %340 : vector<8x128xf32>
    %342 = vector.extract_strided_slice %333 {offsets = [0, 128], sizes = [8, 128], strides = [1, 1]} : vector<8x512xf32> to vector<8x128xf32>
    %cst_155 = arith.constant 5.000000e-01 : f32
    %343 = vector.broadcast %cst_155 : f32 to vector<8x128xf32>
    %344 = arith.mulf %343, %342 : vector<8x128xf32>
    %345 = math.tanh %344 : vector<8x128xf32>
    %cst_156 = arith.constant 5.000000e-01 : f32
    %346 = vector.broadcast %cst_156 : f32 to vector<8x128xf32>
    %347 = arith.mulf %346, %345 : vector<8x128xf32>
    %cst_157 = arith.constant 5.000000e-01 : f32
    %348 = vector.broadcast %cst_157 : f32 to vector<8x128xf32>
    %349 = arith.addf %347, %348 : vector<8x128xf32>
    %350 = vector.extract_strided_slice %333 {offsets = [0, 256], sizes = [8, 128], strides = [1, 1]} : vector<8x512xf32> to vector<8x128xf32>
    %351 = math.tanh %350 : vector<8x128xf32>
    %352 = vector.extract_strided_slice %333 {offsets = [0, 384], sizes = [8, 128], strides = [1, 1]} : vector<8x512xf32> to vector<8x128xf32>
    %cst_158 = arith.constant 5.000000e-01 : f32
    %353 = vector.broadcast %cst_158 : f32 to vector<8x128xf32>
    %354 = arith.mulf %353, %352 : vector<8x128xf32>
    %355 = math.tanh %354 : vector<8x128xf32>
    %cst_159 = arith.constant 5.000000e-01 : f32
    %356 = vector.broadcast %cst_159 : f32 to vector<8x128xf32>
    %357 = arith.mulf %356, %355 : vector<8x128xf32>
    %cst_160 = arith.constant 5.000000e-01 : f32
    %358 = vector.broadcast %cst_160 : f32 to vector<8x128xf32>
    %359 = arith.addf %357, %358 : vector<8x128xf32>
    %360 = arith.mulf %349, %318 : vector<8x128xf32>
    %361 = arith.mulf %341, %351 : vector<8x128xf32>
    %362 = arith.addf %360, %361 : vector<8x128xf32>
    %363 = math.tanh %362 : vector<8x128xf32>
    %364 = arith.mulf %359, %363 : vector<8x128xf32>
    %c0_i32_161 = arith.constant 0 : i32
    %365 = arith.addi %c0_i32_161, %326 : i32
    %366 = tpu.assume_multiple %365, 8 : i32
    %367 = arith.index_cast %366 : i32 to index
    %c0_162 = arith.constant 0 : index
    %368 = vector.load %arg8[%367, %c0_162] : memref<64x128xf32, #tpu.memory_space<vmem>>, vector<8x128xf32>
    tpu.vector_store %arg8[%367, %c0_162], %364 {strides = array<i32>} : memref<64x128xf32, #tpu.memory_space<vmem>>, vector<8x128xf32>,
    %c8_i32_163 = arith.constant 8 : i32
    %c0_164 = arith.constant 0 : index
    %c0_165 = arith.constant 0 : index
    %c0_166 = arith.constant 0 : index
    %369 = vector.load %arg5[%c0_164, %c0_165, %c0_166] : memref<3x8x128xf32, #tpu.memory_space<vmem>>, vector<1x8x128xf32>
    %370 = vector.shape_cast %369 : vector<1x8x128xf32> to vector<8x128xf32>
    %371 = vector.shape_cast %364 : vector<8x128xf32> to vector<1x8x128xf32>
    tpu.vector_store %arg5[%c0_164, %c0_165, %c0_166], %371 {strides = array<i32>} : memref<3x8x128xf32, #tpu.memory_space<vmem>>, vector<1x8x128xf32>,
    %c0_167 = arith.constant 0 : index
    %c0_168 = arith.constant 0 : index
    %c0_169 = arith.constant 0 : index
    %372 = vector.load %arg6[%c0_167, %c0_168, %c0_169] : memref<3x8x128xf32, #tpu.memory_space<vmem>>, vector<1x8x128xf32>
    %373 = vector.shape_cast %372 : vector<1x8x128xf32> to vector<8x128xf32>
    %374 = vector.shape_cast %362 : vector<8x128xf32> to vector<1x8x128xf32>
    tpu.vector_store %arg6[%c0_167, %c0_168, %c0_169], %374 {strides = array<i32>} : memref<3x8x128xf32, #tpu.memory_space<vmem>>, vector<1x8x128xf32>,
    %c0_i32_170 = arith.constant 0 : i32
    %c0_i32_171 = arith.constant 0 : i32
    %c0_i32_172 = arith.constant 0 : i32
    %c0_i32_173 = arith.constant 0 : i32
    %c0_i32_174 = arith.constant 0 : i32
    %375 = tpu.memref_slice %arg4[%c0_i32_170, %c0_i32_173, %c0_i32_174] : memref<2x264x512xf32, #tpu.memory_space<any>> -> memref<1x264x512xf32, #tpu.memory_space<any>>
    %376 = tpu.memref_squeeze %375 : memref<1x264x512xf32, #tpu.memory_space<any>> -> memref<264x512xf32, #tpu.memory_space<any>>
    %c0_i32_175 = arith.constant 0 : i32
    %c0_i32_176 = arith.constant 0 : i32
    %377 = tpu.memref_slice %arg10[%c0_i32_171, %c0_i32_175, %c0_i32_176] : memref<2x264x512xf32, #tpu.memory_space<vmem>> -> memref<1x264x512xf32, #tpu.memory_space<vmem>>
    %378 = tpu.memref_squeeze %377 : memref<1x264x512xf32, #tpu.memory_space<vmem>> -> memref<264x512xf32, #tpu.memory_space<vmem>>
    %379 = tpu.memref_slice %arg11[%c0_i32_172] : memref<2x!tpu.dma_semaphore, #tpu.memory_space<semaphore_mem>> -> memref<1x!tpu.dma_semaphore, #tpu.memory_space<semaphore_mem>>
    %380 = tpu.memref_squeeze %379 : memref<1x!tpu.dma_semaphore, #tpu.memory_space<semaphore_mem>> -> memref<!tpu.dma_semaphore, #tpu.memory_space<semaphore_mem>>
    tpu.wait_dma2 semaphore(%380 : memref<!tpu.dma_semaphore, #tpu.memory_space<semaphore_mem>>) src(%376 : memref<264x512xf32, #tpu.memory_space<any>>) dst(%378 : memref<264x512xf32, #tpu.memory_space<vmem>>)
    %c1_i32_177 = arith.constant 1 : i32
    %c1_i32_178 = arith.constant 1 : i32
    %c1_i32_179 = arith.constant 1 : i32
    %c0_i32_180 = arith.constant 0 : i32
    %c0_i32_181 = arith.constant 0 : i32
    %381 = tpu.memref_slice %arg4[%c1_i32_177, %c0_i32_180, %c0_i32_181] : memref<2x264x512xf32, #tpu.memory_space<any>> -> memref<1x264x512xf32, #tpu.memory_space<any>>
    %382 = tpu.memref_squeeze %381 : memref<1x264x512xf32, #tpu.memory_space<any>> -> memref<264x512xf32, #tpu.memory_space<any>>
    %c0_i32_182 = arith.constant 0 : i32
    %c0_i32_183 = arith.constant 0 : i32
    %383 = tpu.memref_slice %arg10[%c1_i32_178, %c0_i32_182, %c0_i32_183] : memref<2x264x512xf32, #tpu.memory_space<vmem>> -> memref<1x264x512xf32, #tpu.memory_space<vmem>>
    %384 = tpu.memref_squeeze %383 : memref<1x264x512xf32, #tpu.memory_space<vmem>> -> memref<264x512xf32, #tpu.memory_space<vmem>>
    %385 = tpu.memref_slice %arg11[%c1_i32_179] : memref<2x!tpu.dma_semaphore, #tpu.memory_space<semaphore_mem>> -> memref<1x!tpu.dma_semaphore, #tpu.memory_space<semaphore_mem>>
    %386 = tpu.memref_squeeze %385 : memref<1x!tpu.dma_semaphore, #tpu.memory_space<semaphore_mem>> -> memref<!tpu.dma_semaphore, #tpu.memory_space<semaphore_mem>>
    tpu.enqueue_dma source(%382 : memref<264x512xf32, #tpu.memory_space<any>>) target(%384 : memref<264x512xf32, #tpu.memory_space<vmem>>) target_semaphore(%386 : memref<!tpu.dma_semaphore, #tpu.memory_space<semaphore_mem>>)
    %c0_184 = arith.constant 0 : index
    %c0_185 = arith.constant 0 : index
    %387 = vector.load %arg8[%c0_184, %c0_185] : memref<64x128xf32, #tpu.memory_space<vmem>>, vector<64x128xf32>
    %c0_i32_186 = arith.constant 0 : i32
    %c0_i32_187 = arith.constant 0 : i32
    %c0_i32_188 = arith.constant 0 : i32
    %388 = tpu.memref_slice %arg10[%c0_i32_186, %c0_i32_187, %c0_i32_188] : memref<2x264x512xf32, #tpu.memory_space<vmem>> -> memref<1x264x512xf32, #tpu.memory_space<vmem>>
    %389 = tpu.memref_squeeze %388 : memref<1x264x512xf32, #tpu.memory_space<vmem>> -> memref<264x512xf32, #tpu.memory_space<vmem>>
    %c0_189 = arith.constant 0 : index
    %c0_190 = arith.constant 0 : index
    %390 = vector.load %389[%c0_189, %c0_190] : memref<264x512xf32, #tpu.memory_space<vmem>>, vector<128x512xf32>
    %cst_191 = arith.constant dense<0.000000e+00> : vector<64x512xf32>
    %391 = tpu.matmul %387, %390, %cst_191 {dimension_numbers = #tpu.dot_dimension_numbers<[1], [0], [0], [1], [0, 0, 1, 1], [], []>} : vector<64x128xf32>, vector<128x512xf32>, vector<64x512xf32> -> vector<64x512xf32>
    %c0_i32_192 = arith.constant 0 : i32
    %c0_i32_193 = arith.constant 0 : i32
    %c0_i32_194 = arith.constant 0 : i32
    %392 = tpu.memref_slice %arg10[%c0_i32_192, %c0_i32_193, %c0_i32_194] : memref<2x264x512xf32, #tpu.memory_space<vmem>> -> memref<1x264x512xf32, #tpu.memory_space<vmem>>
    %393 = tpu.memref_squeeze %392 : memref<1x264x512xf32, #tpu.memory_space<vmem>> -> memref<264x512xf32, #tpu.memory_space<vmem>>
    %c256 = arith.constant 256 : index
    %c0_195 = arith.constant 0 : index
    %394 = vector.load %393[%c256, %c0_195] : memref<264x512xf32, #tpu.memory_space<vmem>>, vector<1x512xf32>
    %395 = vector.broadcast %394 : vector<1x512xf32> to vector<64x512xf32>
    %396 = arith.addf %391, %395 : vector<64x512xf32>
    %c0_i32_196 = arith.constant 0 : i32
    %c0_i32_197 = arith.constant 0 : i32
    %c0_i32_198 = arith.constant 0 : i32
    %397 = tpu.memref_slice %arg7[%c0_i32_196, %c0_i32_197, %c0_i32_198] : memref<2x64x512xf32, #tpu.memory_space<vmem>> -> memref<1x64x512xf32, #tpu.memory_space<vmem>>
    %398 = tpu.memref_squeeze %397 : memref<1x64x512xf32, #tpu.memory_space<vmem>> -> memref<64x512xf32, #tpu.memory_space<vmem>>
    %c0_199 = arith.constant 0 : index
    %c0_200 = arith.constant 0 : index
    %399 = vector.load %398[%c0_199, %c0_200] : memref<64x512xf32, #tpu.memory_space<vmem>>, vector<64x512xf32>
    tpu.vector_store %398[%c0_199, %c0_200], %396 {strides = array<i32>} : memref<64x512xf32, #tpu.memory_space<vmem>>, vector<64x512xf32>,
    %cst_201 = arith.constant 0.000000e+00 : f32
    %400 = vector.broadcast %cst_201 : f32 to vector<8x128xf32>
    %cst_202 = arith.constant 0.000000e+00 : f32
    %401 = vector.broadcast %cst_202 : f32 to vector<8x128xf32>
    %c0_i32_203 = arith.constant 0 : i32
    %c0_i32_204 = arith.constant 0 : i32
    %c0_i32_205 = arith.constant 0 : i32
    %c8_i32_206 = arith.constant 8 : i32
    %402 = arith.muli %c0_i32_205, %c8_i32_206 : i32
    %403 = tpu.assume_multiple %402, 8 : i32
    %c0_i32_207 = arith.constant 0 : i32
    %c0_i32_208 = arith.constant 0 : i32
    %404 = tpu.memref_slice %arg7[%c0_i32_203, %c0_i32_207, %c0_i32_208] : memref<2x64x512xf32, #tpu.memory_space<vmem>> -> memref<1x64x512xf32, #tpu.memory_space<vmem>>
    %405 = tpu.memref_squeeze %404 : memref<1x64x512xf32, #tpu.memory_space<vmem>> -> memref<64x512xf32, #tpu.memory_space<vmem>>
    %406 = arith.index_cast %403 : i32 to index
    %c0_209 = arith.constant 0 : index
    %407 = vector.load %405[%406, %c0_209] : memref<64x512xf32, #tpu.memory_space<vmem>>, vector<8x512xf32>
    %c0_i32_210 = arith.constant 0 : i32
    %c0_i32_211 = arith.constant 0 : i32
    %408 = tpu.memref_slice %arg10[%c0_i32_204, %c0_i32_210, %c0_i32_211] : memref<2x264x512xf32, #tpu.memory_space<vmem>> -> memref<1x264x512xf32, #tpu.memory_space<vmem>>
    %409 = tpu.memref_squeeze %408 : memref<1x264x512xf32, #tpu.memory_space<vmem>> -> memref<264x512xf32, #tpu.memory_space<vmem>>
    %c128 = arith.constant 128 : index
    %c0_212 = arith.constant 0 : index
    %410 = vector.load %409[%c128, %c0_212] : memref<264x512xf32, #tpu.memory_space<vmem>>, vector<128x512xf32>
    %cst_213 = arith.constant dense<0.000000e+00> : vector<8x512xf32>
    %411 = tpu.matmul %400, %410, %cst_213 {dimension_numbers = #tpu.dot_dimension_numbers<[1], [0], [0], [1], [0, 0, 1, 1], [], []>} : vector<8x128xf32>, vector<128x512xf32>, vector<8x512xf32> -> vector<8x512xf32>
    %412 = arith.addf %407, %411 : vector<8x512xf32>
    %413 = vector.extract_strided_slice %412 {offsets = [0, 0], sizes = [8, 128], strides = [1, 1]} : vector<8x512xf32> to vector<8x128xf32>
    %cst_214 = arith.constant 5.000000e-01 : f32
    %414 = vector.broadcast %cst_214 : f32 to vector<8x128xf32>
    %415 = arith.mulf %414, %413 : vector<8x128xf32>
    %416 = math.tanh %415 : vector<8x128xf32>
    %cst_215 = arith.constant 5.000000e-01 : f32
    %417 = vector.broadcast %cst_215 : f32 to vector<8x128xf32>
    %418 = arith.mulf %417, %416 : vector<8x128xf32>
    %cst_216 = arith.constant 5.000000e-01 : f32
    %419 = vector.broadcast %cst_216 : f32 to vector<8x128xf32>
    %420 = arith.addf %418, %419 : vector<8x128xf32>
    %421 = vector.extract_strided_slice %412 {offsets = [0, 128], sizes = [8, 128], strides = [1, 1]} : vector<8x512xf32> to vector<8x128xf32>
    %cst_217 = arith.constant 5.000000e-01 : f32
    %422 = vector.broadcast %cst_217 : f32 to vector<8x128xf32>
    %423 = arith.mulf %422, %421 : vector<8x128xf32>
    %424 = math.tanh %423 : vector<8x128xf32>
    %cst_218 = arith.constant 5.000000e-01 : f32
    %425 = vector.broadcast %cst_218 : f32 to vector<8x128xf32>
    %426 = arith.mulf %425, %424 : vector<8x128xf32>
    %cst_219 = arith.constant 5.000000e-01 : f32
    %427 = vector.broadcast %cst_219 : f32 to vector<8x128xf32>
    %428 = arith.addf %426, %427 : vector<8x128xf32>
    %429 = vector.extract_strided_slice %412 {offsets = [0, 256], sizes = [8, 128], strides = [1, 1]} : vector<8x512xf32> to vector<8x128xf32>
    %430 = math.tanh %429 : vector<8x128xf32>
    %431 = vector.extract_strided_slice %412 {offsets = [0, 384], sizes = [8, 128], strides = [1, 1]} : vector<8x512xf32> to vector<8x128xf32>
    %cst_220 = arith.constant 5.000000e-01 : f32
    %432 = vector.broadcast %cst_220 : f32 to vector<8x128xf32>
    %433 = arith.mulf %432, %431 : vector<8x128xf32>
    %434 = math.tanh %433 : vector<8x128xf32>
    %cst_221 = arith.constant 5.000000e-01 : f32
    %435 = vector.broadcast %cst_221 : f32 to vector<8x128xf32>
    %436 = arith.mulf %435, %434 : vector<8x128xf32>
    %cst_222 = arith.constant 5.000000e-01 : f32
    %437 = vector.broadcast %cst_222 : f32 to vector<8x128xf32>
    %438 = arith.addf %436, %437 : vector<8x128xf32>
    %439 = arith.mulf %428, %401 : vector<8x128xf32>
    %440 = arith.mulf %420, %430 : vector<8x128xf32>
    %441 = arith.addf %439, %440 : vector<8x128xf32>
    %442 = math.tanh %441 : vector<8x128xf32>
    %443 = arith.mulf %438, %442 : vector<8x128xf32>
    %c0_i32_223 = arith.constant 0 : i32
    %444 = arith.addi %c0_i32_223, %403 : i32
    %445 = tpu.assume_multiple %444, 8 : i32
    %446 = arith.index_cast %445 : i32 to index
    %c0_224 = arith.constant 0 : index
    %447 = vector.load %arg9[%446, %c0_224] : memref<64x128xf32, #tpu.memory_space<vmem>>, vector<8x128xf32>
    tpu.vector_store %arg9[%446, %c0_224], %443 {strides = array<i32>} : memref<64x128xf32, #tpu.memory_space<vmem>>, vector<8x128xf32>,
    %c1_i32_225 = arith.constant 1 : i32
    %c8_i32_226 = arith.constant 8 : i32
    %448 = arith.muli %c1_i32_225, %c8_i32_226 : i32
    %449 = tpu.assume_multiple %448, 8 : i32
    %c0_i32_227 = arith.constant 0 : i32
    %c0_i32_228 = arith.constant 0 : i32
    %450 = tpu.memref_slice %arg7[%c0_i32_203, %c0_i32_227, %c0_i32_228] : memref<2x64x512xf32, #tpu.memory_space<vmem>> -> memref<1x64x512xf32, #tpu.memory_space<vmem>>
    %451 = tpu.memref_squeeze %450 : memref<1x64x512xf32, #tpu.memory_space<vmem>> -> memref<64x512xf32, #tpu.memory_space<vmem>>
    %452 = arith.index_cast %449 : i32 to index
    %c0_229 = arith.constant 0 : index
    %453 = vector.load %451[%452, %c0_229] : memref<64x512xf32, #tpu.memory_space<vmem>>, vector<8x512xf32>
    %c0_i32_230 = arith.constant 0 : i32
    %c0_i32_231 = arith.constant 0 : i32
    %454 = tpu.memref_slice %arg10[%c0_i32_204, %c0_i32_230, %c0_i32_231] : memref<2x264x512xf32, #tpu.memory_space<vmem>> -> memref<1x264x512xf32, #tpu.memory_space<vmem>>
    %455 = tpu.memref_squeeze %454 : memref<1x264x512xf32, #tpu.memory_space<vmem>> -> memref<264x512xf32, #tpu.memory_space<vmem>>
    %c128_232 = arith.constant 128 : index
    %c0_233 = arith.constant 0 : index
    %456 = vector.load %455[%c128_232, %c0_233] : memref<264x512xf32, #tpu.memory_space<vmem>>, vector<128x512xf32>
    %cst_234 = arith.constant dense<0.000000e+00> : vector<8x512xf32>
    %457 = tpu.matmul %443, %456, %cst_234 {dimension_numbers = #tpu.dot_dimension_numbers<[1], [0], [0], [1], [0, 0, 1, 1], [], []>} : vector<8x128xf32>, vector<128x512xf32>, vector<8x512xf32> -> vector<8x512xf32>
    %458 = arith.addf %453, %457 : vector<8x512xf32>
    %459 = vector.extract_strided_slice %458 {offsets = [0, 0], sizes = [8, 128], strides = [1, 1]} : vector<8x512xf32> to vector<8x128xf32>
    %cst_235 = arith.constant 5.000000e-01 : f32
    %460 = vector.broadcast %cst_235 : f32 to vector<8x128xf32>
    %461 = arith.mulf %460, %459 : vector<8x128xf32>
    %462 = math.tanh %461 : vector<8x128xf32>
    %cst_236 = arith.constant 5.000000e-01 : f32
    %463 = vector.broadcast %cst_236 : f32 to vector<8x128xf32>
    %464 = arith.mulf %463, %462 : vector<8x128xf32>
    %cst_237 = arith.constant 5.000000e-01 : f32
    %465 = vector.broadcast %cst_237 : f32 to vector<8x128xf32>
    %466 = arith.addf %464, %465 : vector<8x128xf32>
    %467 = vector.extract_strided_slice %458 {offsets = [0, 128], sizes = [8, 128], strides = [1, 1]} : vector<8x512xf32> to vector<8x128xf32>
    %cst_238 = arith.constant 5.000000e-01 : f32
    %468 = vector.broadcast %cst_238 : f32 to vector<8x128xf32>
    %469 = arith.mulf %468, %467 : vector<8x128xf32>
    %470 = math.tanh %469 : vector<8x128xf32>
    %cst_239 = arith.constant 5.000000e-01 : f32
    %471 = vector.broadcast %cst_239 : f32 to vector<8x128xf32>
    %472 = arith.mulf %471, %470 : vector<8x128xf32>
    %cst_240 = arith.constant 5.000000e-01 : f32
    %473 = vector.broadcast %cst_240 : f32 to vector<8x128xf32>
    %474 = arith.addf %472, %473 : vector<8x128xf32>
    %475 = vector.extract_strided_slice %458 {offsets = [0, 256], sizes = [8, 128], strides = [1, 1]} : vector<8x512xf32> to vector<8x128xf32>
    %476 = math.tanh %475 : vector<8x128xf32>
    %477 = vector.extract_strided_slice %458 {offsets = [0, 384], sizes = [8, 128], strides = [1, 1]} : vector<8x512xf32> to vector<8x128xf32>
    %cst_241 = arith.constant 5.000000e-01 : f32
    %478 = vector.broadcast %cst_241 : f32 to vector<8x128xf32>
    %479 = arith.mulf %478, %477 : vector<8x128xf32>
    %480 = math.tanh %479 : vector<8x128xf32>
    %cst_242 = arith.constant 5.000000e-01 : f32
    %481 = vector.broadcast %cst_242 : f32 to vector<8x128xf32>
    %482 = arith.mulf %481, %480 : vector<8x128xf32>
    %cst_243 = arith.constant 5.000000e-01 : f32
    %483 = vector.broadcast %cst_243 : f32 to vector<8x128xf32>
    %484 = arith.addf %482, %483 : vector<8x128xf32>
    %485 = arith.mulf %474, %441 : vector<8x128xf32>
    %486 = arith.mulf %466, %476 : vector<8x128xf32>
    %487 = arith.addf %485, %486 : vector<8x128xf32>
    %488 = math.tanh %487 : vector<8x128xf32>
    %489 = arith.mulf %484, %488 : vector<8x128xf32>
    %c0_i32_244 = arith.constant 0 : i32
    %490 = arith.addi %c0_i32_244, %449 : i32
    %491 = tpu.assume_multiple %490, 8 : i32
    %492 = arith.index_cast %491 : i32 to index
    %c0_245 = arith.constant 0 : index
    %493 = vector.load %arg9[%492, %c0_245] : memref<64x128xf32, #tpu.memory_space<vmem>>, vector<8x128xf32>
    tpu.vector_store %arg9[%492, %c0_245], %489 {strides = array<i32>} : memref<64x128xf32, #tpu.memory_space<vmem>>, vector<8x128xf32>,
    %c2_i32_246 = arith.constant 2 : i32
    %c8_i32_247 = arith.constant 8 : i32
    %494 = arith.muli %c2_i32_246, %c8_i32_247 : i32
    %495 = tpu.assume_multiple %494, 8 : i32
    %c0_i32_248 = arith.constant 0 : i32
    %c0_i32_249 = arith.constant 0 : i32
    %496 = tpu.memref_slice %arg7[%c0_i32_203, %c0_i32_248, %c0_i32_249] : memref<2x64x512xf32, #tpu.memory_space<vmem>> -> memref<1x64x512xf32, #tpu.memory_space<vmem>>
    %497 = tpu.memref_squeeze %496 : memref<1x64x512xf32, #tpu.memory_space<vmem>> -> memref<64x512xf32, #tpu.memory_space<vmem>>
    %498 = arith.index_cast %495 : i32 to index
    %c0_250 = arith.constant 0 : index
    %499 = vector.load %497[%498, %c0_250] : memref<64x512xf32, #tpu.memory_space<vmem>>, vector<8x512xf32>
    %c0_i32_251 = arith.constant 0 : i32
    %c0_i32_252 = arith.constant 0 : i32
    %500 = tpu.memref_slice %arg10[%c0_i32_204, %c0_i32_251, %c0_i32_252] : memref<2x264x512xf32, #tpu.memory_space<vmem>> -> memref<1x264x512xf32, #tpu.memory_space<vmem>>
    %501 = tpu.memref_squeeze %500 : memref<1x264x512xf32, #tpu.memory_space<vmem>> -> memref<264x512xf32, #tpu.memory_space<vmem>>
    %c128_253 = arith.constant 128 : index
    %c0_254 = arith.constant 0 : index
    %502 = vector.load %501[%c128_253, %c0_254] : memref<264x512xf32, #tpu.memory_space<vmem>>, vector<128x512xf32>
    %cst_255 = arith.constant dense<0.000000e+00> : vector<8x512xf32>
    %503 = tpu.matmul %489, %502, %cst_255 {dimension_numbers = #tpu.dot_dimension_numbers<[1], [0], [0], [1], [0, 0, 1, 1], [], []>} : vector<8x128xf32>, vector<128x512xf32>, vector<8x512xf32> -> vector<8x512xf32>
    %504 = arith.addf %499, %503 : vector<8x512xf32>
    %505 = vector.extract_strided_slice %504 {offsets = [0, 0], sizes = [8, 128], strides = [1, 1]} : vector<8x512xf32> to vector<8x128xf32>
    %cst_256 = arith.constant 5.000000e-01 : f32
    %506 = vector.broadcast %cst_256 : f32 to vector<8x128xf32>
    %507 = arith.mulf %506, %505 : vector<8x128xf32>
    %508 = math.tanh %507 : vector<8x128xf32>
    %cst_257 = arith.constant 5.000000e-01 : f32
    %509 = vector.broadcast %cst_257 : f32 to vector<8x128xf32>
    %510 = arith.mulf %509, %508 : vector<8x128xf32>
    %cst_258 = arith.constant 5.000000e-01 : f32
    %511 = vector.broadcast %cst_258 : f32 to vector<8x128xf32>
    %512 = arith.addf %510, %511 : vector<8x128xf32>
    %513 = vector.extract_strided_slice %504 {offsets = [0, 128], sizes = [8, 128], strides = [1, 1]} : vector<8x512xf32> to vector<8x128xf32>
    %cst_259 = arith.constant 5.000000e-01 : f32
    %514 = vector.broadcast %cst_259 : f32 to vector<8x128xf32>
    %515 = arith.mulf %514, %513 : vector<8x128xf32>
    %516 = math.tanh %515 : vector<8x128xf32>
    %cst_260 = arith.constant 5.000000e-01 : f32
    %517 = vector.broadcast %cst_260 : f32 to vector<8x128xf32>
    %518 = arith.mulf %517, %516 : vector<8x128xf32>
    %cst_261 = arith.constant 5.000000e-01 : f32
    %519 = vector.broadcast %cst_261 : f32 to vector<8x128xf32>
    %520 = arith.addf %518, %519 : vector<8x128xf32>
    %521 = vector.extract_strided_slice %504 {offsets = [0, 256], sizes = [8, 128], strides = [1, 1]} : vector<8x512xf32> to vector<8x128xf32>
    %522 = math.tanh %521 : vector<8x128xf32>
    %523 = vector.extract_strided_slice %504 {offsets = [0, 384], sizes = [8, 128], strides = [1, 1]} : vector<8x512xf32> to vector<8x128xf32>
    %cst_262 = arith.constant 5.000000e-01 : f32
    %524 = vector.broadcast %cst_262 : f32 to vector<8x128xf32>
    %525 = arith.mulf %524, %523 : vector<8x128xf32>
    %526 = math.tanh %525 : vector<8x128xf32>
    %cst_263 = arith.constant 5.000000e-01 : f32
    %527 = vector.broadcast %cst_263 : f32 to vector<8x128xf32>
    %528 = arith.mulf %527, %526 : vector<8x128xf32>
    %cst_264 = arith.constant 5.000000e-01 : f32
    %529 = vector.broadcast %cst_264 : f32 to vector<8x128xf32>
    %530 = arith.addf %528, %529 : vector<8x128xf32>
    %531 = arith.mulf %520, %487 : vector<8x128xf32>
    %532 = arith.mulf %512, %522 : vector<8x128xf32>
    %533 = arith.addf %531, %532 : vector<8x128xf32>
    %534 = math.tanh %533 : vector<8x128xf32>
    %535 = arith.mulf %530, %534 : vector<8x128xf32>
    %c0_i32_265 = arith.constant 0 : i32
    %536 = arith.addi %c0_i32_265, %495 : i32
    %537 = tpu.assume_multiple %536, 8 : i32
    %538 = arith.index_cast %537 : i32 to index
    %c0_266 = arith.constant 0 : index
    %539 = vector.load %arg9[%538, %c0_266] : memref<64x128xf32, #tpu.memory_space<vmem>>, vector<8x128xf32>
    tpu.vector_store %arg9[%538, %c0_266], %535 {strides = array<i32>} : memref<64x128xf32, #tpu.memory_space<vmem>>, vector<8x128xf32>,
    %c3_i32_267 = arith.constant 3 : i32
    %c8_i32_268 = arith.constant 8 : i32
    %540 = arith.muli %c3_i32_267, %c8_i32_268 : i32
    %541 = tpu.assume_multiple %540, 8 : i32
    %c0_i32_269 = arith.constant 0 : i32
    %c0_i32_270 = arith.constant 0 : i32
    %542 = tpu.memref_slice %arg7[%c0_i32_203, %c0_i32_269, %c0_i32_270] : memref<2x64x512xf32, #tpu.memory_space<vmem>> -> memref<1x64x512xf32, #tpu.memory_space<vmem>>
    %543 = tpu.memref_squeeze %542 : memref<1x64x512xf32, #tpu.memory_space<vmem>> -> memref<64x512xf32, #tpu.memory_space<vmem>>
    %544 = arith.index_cast %541 : i32 to index
    %c0_271 = arith.constant 0 : index
    %545 = vector.load %543[%544, %c0_271] : memref<64x512xf32, #tpu.memory_space<vmem>>, vector<8x512xf32>
    %c0_i32_272 = arith.constant 0 : i32
    %c0_i32_273 = arith.constant 0 : i32
    %546 = tpu.memref_slice %arg10[%c0_i32_204, %c0_i32_272, %c0_i32_273] : memref<2x264x512xf32, #tpu.memory_space<vmem>> -> memref<1x264x512xf32, #tpu.memory_space<vmem>>
    %547 = tpu.memref_squeeze %546 : memref<1x264x512xf32, #tpu.memory_space<vmem>> -> memref<264x512xf32, #tpu.memory_space<vmem>>
    %c128_274 = arith.constant 128 : index
    %c0_275 = arith.constant 0 : index
    %548 = vector.load %547[%c128_274, %c0_275] : memref<264x512xf32, #tpu.memory_space<vmem>>, vector<128x512xf32>
    %cst_276 = arith.constant dense<0.000000e+00> : vector<8x512xf32>
    %549 = tpu.matmul %535, %548, %cst_276 {dimension_numbers = #tpu.dot_dimension_numbers<[1], [0], [0], [1], [0, 0, 1, 1], [], []>} : vector<8x128xf32>, vector<128x512xf32>, vector<8x512xf32> -> vector<8x512xf32>
    %550 = arith.addf %545, %549 : vector<8x512xf32>
    %551 = vector.extract_strided_slice %550 {offsets = [0, 0], sizes = [8, 128], strides = [1, 1]} : vector<8x512xf32> to vector<8x128xf32>
    %cst_277 = arith.constant 5.000000e-01 : f32
    %552 = vector.broadcast %cst_277 : f32 to vector<8x128xf32>
    %553 = arith.mulf %552, %551 : vector<8x128xf32>
    %554 = math.tanh %553 : vector<8x128xf32>
    %cst_278 = arith.constant 5.000000e-01 : f32
    %555 = vector.broadcast %cst_278 : f32 to vector<8x128xf32>
    %556 = arith.mulf %555, %554 : vector<8x128xf32>
    %cst_279 = arith.constant 5.000000e-01 : f32
    %557 = vector.broadcast %cst_279 : f32 to vector<8x128xf32>
    %558 = arith.addf %556, %557 : vector<8x128xf32>
    %559 = vector.extract_strided_slice %550 {offsets = [0, 128], sizes = [8, 128], strides = [1, 1]} : vector<8x512xf32> to vector<8x128xf32>
    %cst_280 = arith.constant 5.000000e-01 : f32
    %560 = vector.broadcast %cst_280 : f32 to vector<8x128xf32>
    %561 = arith.mulf %560, %559 : vector<8x128xf32>
    %562 = math.tanh %561 : vector<8x128xf32>
    %cst_281 = arith.constant 5.000000e-01 : f32
    %563 = vector.broadcast %cst_281 : f32 to vector<8x128xf32>
    %564 = arith.mulf %563, %562 : vector<8x128xf32>
    %cst_282 = arith.constant 5.000000e-01 : f32
    %565 = vector.broadcast %cst_282 : f32 to vector<8x128xf32>
    %566 = arith.addf %564, %565 : vector<8x128xf32>
    %567 = vector.extract_strided_slice %550 {offsets = [0, 256], sizes = [8, 128], strides = [1, 1]} : vector<8x512xf32> to vector<8x128xf32>
    %568 = math.tanh %567 : vector<8x128xf32>
    %569 = vector.extract_strided_slice %550 {offsets = [0, 384], sizes = [8, 128], strides = [1, 1]} : vector<8x512xf32> to vector<8x128xf32>
    %cst_283 = arith.constant 5.000000e-01 : f32
    %570 = vector.broadcast %cst_283 : f32 to vector<8x128xf32>
    %571 = arith.mulf %570, %569 : vector<8x128xf32>
    %572 = math.tanh %571 : vector<8x128xf32>
    %cst_284 = arith.constant 5.000000e-01 : f32
    %573 = vector.broadcast %cst_284 : f32 to vector<8x128xf32>
    %574 = arith.mulf %573, %572 : vector<8x128xf32>
    %cst_285 = arith.constant 5.000000e-01 : f32
    %575 = vector.broadcast %cst_285 : f32 to vector<8x128xf32>
    %576 = arith.addf %574, %575 : vector<8x128xf32>
    %577 = arith.mulf %566, %533 : vector<8x128xf32>
    %578 = arith.mulf %558, %568 : vector<8x128xf32>
    %579 = arith.addf %577, %578 : vector<8x128xf32>
    %580 = math.tanh %579 : vector<8x128xf32>
    %581 = arith.mulf %576, %580 : vector<8x128xf32>
    %c0_i32_286 = arith.constant 0 : i32
    %582 = arith.addi %c0_i32_286, %541 : i32
    %583 = tpu.assume_multiple %582, 8 : i32
    %584 = arith.index_cast %583 : i32 to index
    %c0_287 = arith.constant 0 : index
    %585 = vector.load %arg9[%584, %c0_287] : memref<64x128xf32, #tpu.memory_space<vmem>>, vector<8x128xf32>
    tpu.vector_store %arg9[%584, %c0_287], %581 {strides = array<i32>} : memref<64x128xf32, #tpu.memory_space<vmem>>, vector<8x128xf32>,
    %c4_i32_288 = arith.constant 4 : i32
    %c8_i32_289 = arith.constant 8 : i32
    %586 = arith.muli %c4_i32_288, %c8_i32_289 : i32
    %587 = tpu.assume_multiple %586, 8 : i32
    %c0_i32_290 = arith.constant 0 : i32
    %c0_i32_291 = arith.constant 0 : i32
    %588 = tpu.memref_slice %arg7[%c0_i32_203, %c0_i32_290, %c0_i32_291] : memref<2x64x512xf32, #tpu.memory_space<vmem>> -> memref<1x64x512xf32, #tpu.memory_space<vmem>>
    %589 = tpu.memref_squeeze %588 : memref<1x64x512xf32, #tpu.memory_space<vmem>> -> memref<64x512xf32, #tpu.memory_space<vmem>>
    %590 = arith.index_cast %587 : i32 to index
    %c0_292 = arith.constant 0 : index
    %591 = vector.load %589[%590, %c0_292] : memref<64x512xf32, #tpu.memory_space<vmem>>, vector<8x512xf32>
    %c0_i32_293 = arith.constant 0 : i32
    %c0_i32_294 = arith.constant 0 : i32
    %592 = tpu.memref_slice %arg10[%c0_i32_204, %c0_i32_293, %c0_i32_294] : memref<2x264x512xf32, #tpu.memory_space<vmem>> -> memref<1x264x512xf32, #tpu.memory_space<vmem>>
    %593 = tpu.memref_squeeze %592 : memref<1x264x512xf32, #tpu.memory_space<vmem>> -> memref<264x512xf32, #tpu.memory_space<vmem>>
    %c128_295 = arith.constant 128 : index
    %c0_296 = arith.constant 0 : index
    %594 = vector.load %593[%c128_295, %c0_296] : memref<264x512xf32, #tpu.memory_space<vmem>>, vector<128x512xf32>
    %cst_297 = arith.constant dense<0.000000e+00> : vector<8x512xf32>
    %595 = tpu.matmul %581, %594, %cst_297 {dimension_numbers = #tpu.dot_dimension_numbers<[1], [0], [0], [1], [0, 0, 1, 1], [], []>} : vector<8x128xf32>, vector<128x512xf32>, vector<8x512xf32> -> vector<8x512xf32>
    %596 = arith.addf %591, %595 : vector<8x512xf32>
    %597 = vector.extract_strided_slice %596 {offsets = [0, 0], sizes = [8, 128], strides = [1, 1]} : vector<8x512xf32> to vector<8x128xf32>
    %cst_298 = arith.constant 5.000000e-01 : f32
    %598 = vector.broadcast %cst_298 : f32 to vector<8x128xf32>
    %599 = arith.mulf %598, %597 : vector<8x128xf32>
    %600 = math.tanh %599 : vector<8x128xf32>
    %cst_299 = arith.constant 5.000000e-01 : f32
    %601 = vector.broadcast %cst_299 : f32 to vector<8x128xf32>
    %602 = arith.mulf %601, %600 : vector<8x128xf32>
    %cst_300 = arith.constant 5.000000e-01 : f32
    %603 = vector.broadcast %cst_300 : f32 to vector<8x128xf32>
    %604 = arith.addf %602, %603 : vector<8x128xf32>
    %605 = vector.extract_strided_slice %596 {offsets = [0, 128], sizes = [8, 128], strides = [1, 1]} : vector<8x512xf32> to vector<8x128xf32>
    %cst_301 = arith.constant 5.000000e-01 : f32
    %606 = vector.broadcast %cst_301 : f32 to vector<8x128xf32>
    %607 = arith.mulf %606, %605 : vector<8x128xf32>
    %608 = math.tanh %607 : vector<8x128xf32>
    %cst_302 = arith.constant 5.000000e-01 : f32
    %609 = vector.broadcast %cst_302 : f32 to vector<8x128xf32>
    %610 = arith.mulf %609, %608 : vector<8x128xf32>
    %cst_303 = arith.constant 5.000000e-01 : f32
    %611 = vector.broadcast %cst_303 : f32 to vector<8x128xf32>
    %612 = arith.addf %610, %611 : vector<8x128xf32>
    %613 = vector.extract_strided_slice %596 {offsets = [0, 256], sizes = [8, 128], strides = [1, 1]} : vector<8x512xf32> to vector<8x128xf32>
    %614 = math.tanh %613 : vector<8x128xf32>
    %615 = vector.extract_strided_slice %596 {offsets = [0, 384], sizes = [8, 128], strides = [1, 1]} : vector<8x512xf32> to vector<8x128xf32>
    %cst_304 = arith.constant 5.000000e-01 : f32
    %616 = vector.broadcast %cst_304 : f32 to vector<8x128xf32>
    %617 = arith.mulf %616, %615 : vector<8x128xf32>
    %618 = math.tanh %617 : vector<8x128xf32>
    %cst_305 = arith.constant 5.000000e-01 : f32
    %619 = vector.broadcast %cst_305 : f32 to vector<8x128xf32>
    %620 = arith.mulf %619, %618 : vector<8x128xf32>
    %cst_306 = arith.constant 5.000000e-01 : f32
    %621 = vector.broadcast %cst_306 : f32 to vector<8x128xf32>
    %622 = arith.addf %620, %621 : vector<8x128xf32>
    %623 = arith.mulf %612, %579 : vector<8x128xf32>
    %624 = arith.mulf %604, %614 : vector<8x128xf32>
    %625 = arith.addf %623, %624 : vector<8x128xf32>
    %626 = math.tanh %625 : vector<8x128xf32>
    %627 = arith.mulf %622, %626 : vector<8x128xf32>
    %c0_i32_307 = arith.constant 0 : i32
    %628 = arith.addi %c0_i32_307, %587 : i32
    %629 = tpu.assume_multiple %628, 8 : i32
    %630 = arith.index_cast %629 : i32 to index
    %c0_308 = arith.constant 0 : index
    %631 = vector.load %arg9[%630, %c0_308] : memref<64x128xf32, #tpu.memory_space<vmem>>, vector<8x128xf32>
    tpu.vector_store %arg9[%630, %c0_308], %627 {strides = array<i32>} : memref<64x128xf32, #tpu.memory_space<vmem>>, vector<8x128xf32>,
    %c5_i32_309 = arith.constant 5 : i32
    %c8_i32_310 = arith.constant 8 : i32
    %632 = arith.muli %c5_i32_309, %c8_i32_310 : i32
    %633 = tpu.assume_multiple %632, 8 : i32
    %c0_i32_311 = arith.constant 0 : i32
    %c0_i32_312 = arith.constant 0 : i32
    %634 = tpu.memref_slice %arg7[%c0_i32_203, %c0_i32_311, %c0_i32_312] : memref<2x64x512xf32, #tpu.memory_space<vmem>> -> memref<1x64x512xf32, #tpu.memory_space<vmem>>
    %635 = tpu.memref_squeeze %634 : memref<1x64x512xf32, #tpu.memory_space<vmem>> -> memref<64x512xf32, #tpu.memory_space<vmem>>
    %636 = arith.index_cast %633 : i32 to index
    %c0_313 = arith.constant 0 : index
    %637 = vector.load %635[%636, %c0_313] : memref<64x512xf32, #tpu.memory_space<vmem>>, vector<8x512xf32>
    %c0_i32_314 = arith.constant 0 : i32
    %c0_i32_315 = arith.constant 0 : i32
    %638 = tpu.memref_slice %arg10[%c0_i32_204, %c0_i32_314, %c0_i32_315] : memref<2x264x512xf32, #tpu.memory_space<vmem>> -> memref<1x264x512xf32, #tpu.memory_space<vmem>>
    %639 = tpu.memref_squeeze %638 : memref<1x264x512xf32, #tpu.memory_space<vmem>> -> memref<264x512xf32, #tpu.memory_space<vmem>>
    %c128_316 = arith.constant 128 : index
    %c0_317 = arith.constant 0 : index
    %640 = vector.load %639[%c128_316, %c0_317] : memref<264x512xf32, #tpu.memory_space<vmem>>, vector<128x512xf32>
    %cst_318 = arith.constant dense<0.000000e+00> : vector<8x512xf32>
    %641 = tpu.matmul %627, %640, %cst_318 {dimension_numbers = #tpu.dot_dimension_numbers<[1], [0], [0], [1], [0, 0, 1, 1], [], []>} : vector<8x128xf32>, vector<128x512xf32>, vector<8x512xf32> -> vector<8x512xf32>
    %642 = arith.addf %637, %641 : vector<8x512xf32>
    %643 = vector.extract_strided_slice %642 {offsets = [0, 0], sizes = [8, 128], strides = [1, 1]} : vector<8x512xf32> to vector<8x128xf32>
    %cst_319 = arith.constant 5.000000e-01 : f32
    %644 = vector.broadcast %cst_319 : f32 to vector<8x128xf32>
    %645 = arith.mulf %644, %643 : vector<8x128xf32>
    %646 = math.tanh %645 : vector<8x128xf32>
    %cst_320 = arith.constant 5.000000e-01 : f32
    %647 = vector.broadcast %cst_320 : f32 to vector<8x128xf32>
    %648 = arith.mulf %647, %646 : vector<8x128xf32>
    %cst_321 = arith.constant 5.000000e-01 : f32
    %649 = vector.broadcast %cst_321 : f32 to vector<8x128xf32>
    %650 = arith.addf %648, %649 : vector<8x128xf32>
    %651 = vector.extract_strided_slice %642 {offsets = [0, 128], sizes = [8, 128], strides = [1, 1]} : vector<8x512xf32> to vector<8x128xf32>
    %cst_322 = arith.constant 5.000000e-01 : f32
    %652 = vector.broadcast %cst_322 : f32 to vector<8x128xf32>
    %653 = arith.mulf %652, %651 : vector<8x128xf32>
    %654 = math.tanh %653 : vector<8x128xf32>
    %cst_323 = arith.constant 5.000000e-01 : f32
    %655 = vector.broadcast %cst_323 : f32 to vector<8x128xf32>
    %656 = arith.mulf %655, %654 : vector<8x128xf32>
    %cst_324 = arith.constant 5.000000e-01 : f32
    %657 = vector.broadcast %cst_324 : f32 to vector<8x128xf32>
    %658 = arith.addf %656, %657 : vector<8x128xf32>
    %659 = vector.extract_strided_slice %642 {offsets = [0, 256], sizes = [8, 128], strides = [1, 1]} : vector<8x512xf32> to vector<8x128xf32>
    %660 = math.tanh %659 : vector<8x128xf32>
    %661 = vector.extract_strided_slice %642 {offsets = [0, 384], sizes = [8, 128], strides = [1, 1]} : vector<8x512xf32> to vector<8x128xf32>
    %cst_325 = arith.constant 5.000000e-01 : f32
    %662 = vector.broadcast %cst_325 : f32 to vector<8x128xf32>
    %663 = arith.mulf %662, %661 : vector<8x128xf32>
    %664 = math.tanh %663 : vector<8x128xf32>
    %cst_326 = arith.constant 5.000000e-01 : f32
    %665 = vector.broadcast %cst_326 : f32 to vector<8x128xf32>
    %666 = arith.mulf %665, %664 : vector<8x128xf32>
    %cst_327 = arith.constant 5.000000e-01 : f32
    %667 = vector.broadcast %cst_327 : f32 to vector<8x128xf32>
    %668 = arith.addf %666, %667 : vector<8x128xf32>
    %669 = arith.mulf %658, %625 : vector<8x128xf32>
    %670 = arith.mulf %650, %660 : vector<8x128xf32>
    %671 = arith.addf %669, %670 : vector<8x128xf32>
    %672 = math.tanh %671 : vector<8x128xf32>
    %673 = arith.mulf %668, %672 : vector<8x128xf32>
    %c0_i32_328 = arith.constant 0 : i32
    %674 = arith.addi %c0_i32_328, %633 : i32
    %675 = tpu.assume_multiple %674, 8 : i32
    %676 = arith.index_cast %675 : i32 to index
    %c0_329 = arith.constant 0 : index
    %677 = vector.load %arg9[%676, %c0_329] : memref<64x128xf32, #tpu.memory_space<vmem>>, vector<8x128xf32>
    tpu.vector_store %arg9[%676, %c0_329], %673 {strides = array<i32>} : memref<64x128xf32, #tpu.memory_space<vmem>>, vector<8x128xf32>,
    %c6_i32_330 = arith.constant 6 : i32
    %c8_i32_331 = arith.constant 8 : i32
    %678 = arith.muli %c6_i32_330, %c8_i32_331 : i32
    %679 = tpu.assume_multiple %678, 8 : i32
    %c0_i32_332 = arith.constant 0 : i32
    %c0_i32_333 = arith.constant 0 : i32
    %680 = tpu.memref_slice %arg7[%c0_i32_203, %c0_i32_332, %c0_i32_333] : memref<2x64x512xf32, #tpu.memory_space<vmem>> -> memref<1x64x512xf32, #tpu.memory_space<vmem>>
    %681 = tpu.memref_squeeze %680 : memref<1x64x512xf32, #tpu.memory_space<vmem>> -> memref<64x512xf32, #tpu.memory_space<vmem>>
    %682 = arith.index_cast %679 : i32 to index
    %c0_334 = arith.constant 0 : index
    %683 = vector.load %681[%682, %c0_334] : memref<64x512xf32, #tpu.memory_space<vmem>>, vector<8x512xf32>
    %c0_i32_335 = arith.constant 0 : i32
    %c0_i32_336 = arith.constant 0 : i32
    %684 = tpu.memref_slice %arg10[%c0_i32_204, %c0_i32_335, %c0_i32_336] : memref<2x264x512xf32, #tpu.memory_space<vmem>> -> memref<1x264x512xf32, #tpu.memory_space<vmem>>
    %685 = tpu.memref_squeeze %684 : memref<1x264x512xf32, #tpu.memory_space<vmem>> -> memref<264x512xf32, #tpu.memory_space<vmem>>
    %c128_337 = arith.constant 128 : index
    %c0_338 = arith.constant 0 : index
    %686 = vector.load %685[%c128_337, %c0_338] : memref<264x512xf32, #tpu.memory_space<vmem>>, vector<128x512xf32>
    %cst_339 = arith.constant dense<0.000000e+00> : vector<8x512xf32>
    %687 = tpu.matmul %673, %686, %cst_339 {dimension_numbers = #tpu.dot_dimension_numbers<[1], [0], [0], [1], [0, 0, 1, 1], [], []>} : vector<8x128xf32>, vector<128x512xf32>, vector<8x512xf32> -> vector<8x512xf32>
    %688 = arith.addf %683, %687 : vector<8x512xf32>
    %689 = vector.extract_strided_slice %688 {offsets = [0, 0], sizes = [8, 128], strides = [1, 1]} : vector<8x512xf32> to vector<8x128xf32>
    %cst_340 = arith.constant 5.000000e-01 : f32
    %690 = vector.broadcast %cst_340 : f32 to vector<8x128xf32>
    %691 = arith.mulf %690, %689 : vector<8x128xf32>
    %692 = math.tanh %691 : vector<8x128xf32>
    %cst_341 = arith.constant 5.000000e-01 : f32
    %693 = vector.broadcast %cst_341 : f32 to vector<8x128xf32>
    %694 = arith.mulf %693, %692 : vector<8x128xf32>
    %cst_342 = arith.constant 5.000000e-01 : f32
    %695 = vector.broadcast %cst_342 : f32 to vector<8x128xf32>
    %696 = arith.addf %694, %695 : vector<8x128xf32>
    %697 = vector.extract_strided_slice %688 {offsets = [0, 128], sizes = [8, 128], strides = [1, 1]} : vector<8x512xf32> to vector<8x128xf32>
    %cst_343 = arith.constant 5.000000e-01 : f32
    %698 = vector.broadcast %cst_343 : f32 to vector<8x128xf32>
    %699 = arith.mulf %698, %697 : vector<8x128xf32>
    %700 = math.tanh %699 : vector<8x128xf32>
    %cst_344 = arith.constant 5.000000e-01 : f32
    %701 = vector.broadcast %cst_344 : f32 to vector<8x128xf32>
    %702 = arith.mulf %701, %700 : vector<8x128xf32>
    %cst_345 = arith.constant 5.000000e-01 : f32
    %703 = vector.broadcast %cst_345 : f32 to vector<8x128xf32>
    %704 = arith.addf %702, %703 : vector<8x128xf32>
    %705 = vector.extract_strided_slice %688 {offsets = [0, 256], sizes = [8, 128], strides = [1, 1]} : vector<8x512xf32> to vector<8x128xf32>
    %706 = math.tanh %705 : vector<8x128xf32>
    %707 = vector.extract_strided_slice %688 {offsets = [0, 384], sizes = [8, 128], strides = [1, 1]} : vector<8x512xf32> to vector<8x128xf32>
    %cst_346 = arith.constant 5.000000e-01 : f32
    %708 = vector.broadcast %cst_346 : f32 to vector<8x128xf32>
    %709 = arith.mulf %708, %707 : vector<8x128xf32>
    %710 = math.tanh %709 : vector<8x128xf32>
    %cst_347 = arith.constant 5.000000e-01 : f32
    %711 = vector.broadcast %cst_347 : f32 to vector<8x128xf32>
    %712 = arith.mulf %711, %710 : vector<8x128xf32>
    %cst_348 = arith.constant 5.000000e-01 : f32
    %713 = vector.broadcast %cst_348 : f32 to vector<8x128xf32>
    %714 = arith.addf %712, %713 : vector<8x128xf32>
    %715 = arith.mulf %704, %671 : vector<8x128xf32>
    %716 = arith.mulf %696, %706 : vector<8x128xf32>
    %717 = arith.addf %715, %716 : vector<8x128xf32>
    %718 = math.tanh %717 : vector<8x128xf32>
    %719 = arith.mulf %714, %718 : vector<8x128xf32>
    %c0_i32_349 = arith.constant 0 : i32
    %720 = arith.addi %c0_i32_349, %679 : i32
    %721 = tpu.assume_multiple %720, 8 : i32
    %722 = arith.index_cast %721 : i32 to index
    %c0_350 = arith.constant 0 : index
    %723 = vector.load %arg9[%722, %c0_350] : memref<64x128xf32, #tpu.memory_space<vmem>>, vector<8x128xf32>
    tpu.vector_store %arg9[%722, %c0_350], %719 {strides = array<i32>} : memref<64x128xf32, #tpu.memory_space<vmem>>, vector<8x128xf32>,
    %c7_i32_351 = arith.constant 7 : i32
    %c8_i32_352 = arith.constant 8 : i32
    %724 = arith.muli %c7_i32_351, %c8_i32_352 : i32
    %725 = tpu.assume_multiple %724, 8 : i32
    %c0_i32_353 = arith.constant 0 : i32
    %c0_i32_354 = arith.constant 0 : i32
    %726 = tpu.memref_slice %arg7[%c0_i32_203, %c0_i32_353, %c0_i32_354] : memref<2x64x512xf32, #tpu.memory_space<vmem>> -> memref<1x64x512xf32, #tpu.memory_space<vmem>>
    %727 = tpu.memref_squeeze %726 : memref<1x64x512xf32, #tpu.memory_space<vmem>> -> memref<64x512xf32, #tpu.memory_space<vmem>>
    %728 = arith.index_cast %725 : i32 to index
    %c0_355 = arith.constant 0 : index
    %729 = vector.load %727[%728, %c0_355] : memref<64x512xf32, #tpu.memory_space<vmem>>, vector<8x512xf32>
    %c0_i32_356 = arith.constant 0 : i32
    %c0_i32_357 = arith.constant 0 : i32
    %730 = tpu.memref_slice %arg10[%c0_i32_204, %c0_i32_356, %c0_i32_357] : memref<2x264x512xf32, #tpu.memory_space<vmem>> -> memref<1x264x512xf32, #tpu.memory_space<vmem>>
    %731 = tpu.memref_squeeze %730 : memref<1x264x512xf32, #tpu.memory_space<vmem>> -> memref<264x512xf32, #tpu.memory_space<vmem>>
    %c128_358 = arith.constant 128 : index
    %c0_359 = arith.constant 0 : index
    %732 = vector.load %731[%c128_358, %c0_359] : memref<264x512xf32, #tpu.memory_space<vmem>>, vector<128x512xf32>
    %cst_360 = arith.constant dense<0.000000e+00> : vector<8x512xf32>
    %733 = tpu.matmul %719, %732, %cst_360 {dimension_numbers = #tpu.dot_dimension_numbers<[1], [0], [0], [1], [0, 0, 1, 1], [], []>} : vector<8x128xf32>, vector<128x512xf32>, vector<8x512xf32> -> vector<8x512xf32>
    %734 = arith.addf %729, %733 : vector<8x512xf32>
    %735 = vector.extract_strided_slice %734 {offsets = [0, 0], sizes = [8, 128], strides = [1, 1]} : vector<8x512xf32> to vector<8x128xf32>
    %cst_361 = arith.constant 5.000000e-01 : f32
    %736 = vector.broadcast %cst_361 : f32 to vector<8x128xf32>
    %737 = arith.mulf %736, %735 : vector<8x128xf32>
    %738 = math.tanh %737 : vector<8x128xf32>
    %cst_362 = arith.constant 5.000000e-01 : f32
    %739 = vector.broadcast %cst_362 : f32 to vector<8x128xf32>
    %740 = arith.mulf %739, %738 : vector<8x128xf32>
    %cst_363 = arith.constant 5.000000e-01 : f32
    %741 = vector.broadcast %cst_363 : f32 to vector<8x128xf32>
    %742 = arith.addf %740, %741 : vector<8x128xf32>
    %743 = vector.extract_strided_slice %734 {offsets = [0, 128], sizes = [8, 128], strides = [1, 1]} : vector<8x512xf32> to vector<8x128xf32>
    %cst_364 = arith.constant 5.000000e-01 : f32
    %744 = vector.broadcast %cst_364 : f32 to vector<8x128xf32>
    %745 = arith.mulf %744, %743 : vector<8x128xf32>
    %746 = math.tanh %745 : vector<8x128xf32>
    %cst_365 = arith.constant 5.000000e-01 : f32
    %747 = vector.broadcast %cst_365 : f32 to vector<8x128xf32>
    %748 = arith.mulf %747, %746 : vector<8x128xf32>
    %cst_366 = arith.constant 5.000000e-01 : f32
    %749 = vector.broadcast %cst_366 : f32 to vector<8x128xf32>
    %750 = arith.addf %748, %749 : vector<8x128xf32>
    %751 = vector.extract_strided_slice %734 {offsets = [0, 256], sizes = [8, 128], strides = [1, 1]} : vector<8x512xf32> to vector<8x128xf32>
    %752 = math.tanh %751 : vector<8x128xf32>
    %753 = vector.extract_strided_slice %734 {offsets = [0, 384], sizes = [8, 128], strides = [1, 1]} : vector<8x512xf32> to vector<8x128xf32>
    %cst_367 = arith.constant 5.000000e-01 : f32
    %754 = vector.broadcast %cst_367 : f32 to vector<8x128xf32>
    %755 = arith.mulf %754, %753 : vector<8x128xf32>
    %756 = math.tanh %755 : vector<8x128xf32>
    %cst_368 = arith.constant 5.000000e-01 : f32
    %757 = vector.broadcast %cst_368 : f32 to vector<8x128xf32>
    %758 = arith.mulf %757, %756 : vector<8x128xf32>
    %cst_369 = arith.constant 5.000000e-01 : f32
    %759 = vector.broadcast %cst_369 : f32 to vector<8x128xf32>
    %760 = arith.addf %758, %759 : vector<8x128xf32>
    %761 = arith.mulf %750, %717 : vector<8x128xf32>
    %762 = arith.mulf %742, %752 : vector<8x128xf32>
    %763 = arith.addf %761, %762 : vector<8x128xf32>
    %764 = math.tanh %763 : vector<8x128xf32>
    %765 = arith.mulf %760, %764 : vector<8x128xf32>
    %c0_i32_370 = arith.constant 0 : i32
    %766 = arith.addi %c0_i32_370, %725 : i32
    %767 = tpu.assume_multiple %766, 8 : i32
    %768 = arith.index_cast %767 : i32 to index
    %c0_371 = arith.constant 0 : index
    %769 = vector.load %arg9[%768, %c0_371] : memref<64x128xf32, #tpu.memory_space<vmem>>, vector<8x128xf32>
    tpu.vector_store %arg9[%768, %c0_371], %765 {strides = array<i32>} : memref<64x128xf32, #tpu.memory_space<vmem>>, vector<8x128xf32>,
    %c8_i32_372 = arith.constant 8 : i32
    %c1 = arith.constant 1 : index
    %c0_373 = arith.constant 0 : index
    %c0_374 = arith.constant 0 : index
    %770 = vector.load %arg5[%c1, %c0_373, %c0_374] : memref<3x8x128xf32, #tpu.memory_space<vmem>>, vector<1x8x128xf32>
    %771 = vector.shape_cast %770 : vector<1x8x128xf32> to vector<8x128xf32>
    %772 = vector.shape_cast %765 : vector<8x128xf32> to vector<1x8x128xf32>
    tpu.vector_store %arg5[%c1, %c0_373, %c0_374], %772 {strides = array<i32>} : memref<3x8x128xf32, #tpu.memory_space<vmem>>, vector<1x8x128xf32>,
    %c1_375 = arith.constant 1 : index
    %c0_376 = arith.constant 0 : index
    %c0_377 = arith.constant 0 : index
    %773 = vector.load %arg6[%c1_375, %c0_376, %c0_377] : memref<3x8x128xf32, #tpu.memory_space<vmem>>, vector<1x8x128xf32>
    %774 = vector.shape_cast %773 : vector<1x8x128xf32> to vector<8x128xf32>
    %775 = vector.shape_cast %763 : vector<8x128xf32> to vector<1x8x128xf32>
    tpu.vector_store %arg6[%c1_375, %c0_376, %c0_377], %775 {strides = array<i32>} : memref<3x8x128xf32, #tpu.memory_space<vmem>>, vector<1x8x128xf32>,
    %c1_i32_378 = arith.constant 1 : i32
    %c1_i32_379 = arith.constant 1 : i32
    %c1_i32_380 = arith.constant 1 : i32
    %c0_i32_381 = arith.constant 0 : i32
    %c0_i32_382 = arith.constant 0 : i32
    %776 = tpu.memref_slice %arg4[%c1_i32_378, %c0_i32_381, %c0_i32_382] : memref<2x264x512xf32, #tpu.memory_space<any>> -> memref<1x264x512xf32, #tpu.memory_space<any>>
    %777 = tpu.memref_squeeze %776 : memref<1x264x512xf32, #tpu.memory_space<any>> -> memref<264x512xf32, #tpu.memory_space<any>>
    %c0_i32_383 = arith.constant 0 : i32
    %c0_i32_384 = arith.constant 0 : i32
    %778 = tpu.memref_slice %arg10[%c1_i32_379, %c0_i32_383, %c0_i32_384] : memref<2x264x512xf32, #tpu.memory_space<vmem>> -> memref<1x264x512xf32, #tpu.memory_space<vmem>>
    %779 = tpu.memref_squeeze %778 : memref<1x264x512xf32, #tpu.memory_space<vmem>> -> memref<264x512xf32, #tpu.memory_space<vmem>>
    %780 = tpu.memref_slice %arg11[%c1_i32_380] : memref<2x!tpu.dma_semaphore, #tpu.memory_space<semaphore_mem>> -> memref<1x!tpu.dma_semaphore, #tpu.memory_space<semaphore_mem>>
    %781 = tpu.memref_squeeze %780 : memref<1x!tpu.dma_semaphore, #tpu.memory_space<semaphore_mem>> -> memref<!tpu.dma_semaphore, #tpu.memory_space<semaphore_mem>>
    tpu.wait_dma2 semaphore(%781 : memref<!tpu.dma_semaphore, #tpu.memory_space<semaphore_mem>>) src(%777 : memref<264x512xf32, #tpu.memory_space<any>>) dst(%779 : memref<264x512xf32, #tpu.memory_space<vmem>>)
    %c0_385 = arith.constant 0 : index
    %c0_386 = arith.constant 0 : index
    %782 = vector.load %arg9[%c0_385, %c0_386] : memref<64x128xf32, #tpu.memory_space<vmem>>, vector<64x128xf32>
    %c1_i32_387 = arith.constant 1 : i32
    %c0_i32_388 = arith.constant 0 : i32
    %c0_i32_389 = arith.constant 0 : i32
    %783 = tpu.memref_slice %arg10[%c1_i32_387, %c0_i32_388, %c0_i32_389] : memref<2x264x512xf32, #tpu.memory_space<vmem>> -> memref<1x264x512xf32, #tpu.memory_space<vmem>>
    %784 = tpu.memref_squeeze %783 : memref<1x264x512xf32, #tpu.memory_space<vmem>> -> memref<264x512xf32, #tpu.memory_space<vmem>>
    %c0_390 = arith.constant 0 : index
    %c0_391 = arith.constant 0 : index
    %785 = vector.load %784[%c0_390, %c0_391] : memref<264x512xf32, #tpu.memory_space<vmem>>, vector<128x512xf32>
    %cst_392 = arith.constant dense<0.000000e+00> : vector<64x512xf32>
    %786 = tpu.matmul %782, %785, %cst_392 {dimension_numbers = #tpu.dot_dimension_numbers<[1], [0], [0], [1], [0, 0, 1, 1], [], []>} : vector<64x128xf32>, vector<128x512xf32>, vector<64x512xf32> -> vector<64x512xf32>
    %c1_i32_393 = arith.constant 1 : i32
    %c0_i32_394 = arith.constant 0 : i32
    %c0_i32_395 = arith.constant 0 : i32
    %787 = tpu.memref_slice %arg10[%c1_i32_393, %c0_i32_394, %c0_i32_395] : memref<2x264x512xf32, #tpu.memory_space<vmem>> -> memref<1x264x512xf32, #tpu.memory_space<vmem>>
    %788 = tpu.memref_squeeze %787 : memref<1x264x512xf32, #tpu.memory_space<vmem>> -> memref<264x512xf32, #tpu.memory_space<vmem>>
    %c256_396 = arith.constant 256 : index
    %c0_397 = arith.constant 0 : index
    %789 = vector.load %788[%c256_396, %c0_397] : memref<264x512xf32, #tpu.memory_space<vmem>>, vector<1x512xf32>
    %790 = vector.broadcast %789 : vector<1x512xf32> to vector<64x512xf32>
    %791 = arith.addf %786, %790 : vector<64x512xf32>
    %c0_i32_398 = arith.constant 0 : i32
    %c0_i32_399 = arith.constant 0 : i32
    %c0_i32_400 = arith.constant 0 : i32
    %792 = tpu.memref_slice %arg7[%c0_i32_398, %c0_i32_399, %c0_i32_400] : memref<2x64x512xf32, #tpu.memory_space<vmem>> -> memref<1x64x512xf32, #tpu.memory_space<vmem>>
    %793 = tpu.memref_squeeze %792 : memref<1x64x512xf32, #tpu.memory_space<vmem>> -> memref<64x512xf32, #tpu.memory_space<vmem>>
    %c0_401 = arith.constant 0 : index
    %c0_402 = arith.constant 0 : index
    %794 = vector.load %793[%c0_401, %c0_402] : memref<64x512xf32, #tpu.memory_space<vmem>>, vector<64x512xf32>
    tpu.vector_store %793[%c0_401, %c0_402], %791 {strides = array<i32>} : memref<64x512xf32, #tpu.memory_space<vmem>>, vector<64x512xf32>,
    %cst_403 = arith.constant 0.000000e+00 : f32
    %795 = vector.broadcast %cst_403 : f32 to vector<8x128xf32>
    %cst_404 = arith.constant 0.000000e+00 : f32
    %796 = vector.broadcast %cst_404 : f32 to vector<8x128xf32>
    %c0_i32_405 = arith.constant 0 : i32
    %c1_i32_406 = arith.constant 1 : i32
    %c0_i32_407 = arith.constant 0 : i32
    %c8_i32_408 = arith.constant 8 : i32
    %797 = arith.muli %c0_i32_407, %c8_i32_408 : i32
    %798 = tpu.assume_multiple %797, 8 : i32
    %c0_i32_409 = arith.constant 0 : i32
    %c0_i32_410 = arith.constant 0 : i32
    %799 = tpu.memref_slice %arg7[%c0_i32_405, %c0_i32_409, %c0_i32_410] : memref<2x64x512xf32, #tpu.memory_space<vmem>> -> memref<1x64x512xf32, #tpu.memory_space<vmem>>
    %800 = tpu.memref_squeeze %799 : memref<1x64x512xf32, #tpu.memory_space<vmem>> -> memref<64x512xf32, #tpu.memory_space<vmem>>
    %801 = arith.index_cast %798 : i32 to index
    %c0_411 = arith.constant 0 : index
    %802 = vector.load %800[%801, %c0_411] : memref<64x512xf32, #tpu.memory_space<vmem>>, vector<8x512xf32>
    %c0_i32_412 = arith.constant 0 : i32
    %c0_i32_413 = arith.constant 0 : i32
    %803 = tpu.memref_slice %arg10[%c1_i32_406, %c0_i32_412, %c0_i32_413] : memref<2x264x512xf32, #tpu.memory_space<vmem>> -> memref<1x264x512xf32, #tpu.memory_space<vmem>>
    %804 = tpu.memref_squeeze %803 : memref<1x264x512xf32, #tpu.memory_space<vmem>> -> memref<264x512xf32, #tpu.memory_space<vmem>>
    %c128_414 = arith.constant 128 : index
    %c0_415 = arith.constant 0 : index
    %805 = vector.load %804[%c128_414, %c0_415] : memref<264x512xf32, #tpu.memory_space<vmem>>, vector<128x512xf32>
    %cst_416 = arith.constant dense<0.000000e+00> : vector<8x512xf32>
    %806 = tpu.matmul %795, %805, %cst_416 {dimension_numbers = #tpu.dot_dimension_numbers<[1], [0], [0], [1], [0, 0, 1, 1], [], []>} : vector<8x128xf32>, vector<128x512xf32>, vector<8x512xf32> -> vector<8x512xf32>
    %807 = arith.addf %802, %806 : vector<8x512xf32>
    %808 = vector.extract_strided_slice %807 {offsets = [0, 0], sizes = [8, 128], strides = [1, 1]} : vector<8x512xf32> to vector<8x128xf32>
    %cst_417 = arith.constant 5.000000e-01 : f32
    %809 = vector.broadcast %cst_417 : f32 to vector<8x128xf32>
    %810 = arith.mulf %809, %808 : vector<8x128xf32>
    %811 = math.tanh %810 : vector<8x128xf32>
    %cst_418 = arith.constant 5.000000e-01 : f32
    %812 = vector.broadcast %cst_418 : f32 to vector<8x128xf32>
    %813 = arith.mulf %812, %811 : vector<8x128xf32>
    %cst_419 = arith.constant 5.000000e-01 : f32
    %814 = vector.broadcast %cst_419 : f32 to vector<8x128xf32>
    %815 = arith.addf %813, %814 : vector<8x128xf32>
    %816 = vector.extract_strided_slice %807 {offsets = [0, 128], sizes = [8, 128], strides = [1, 1]} : vector<8x512xf32> to vector<8x128xf32>
    %cst_420 = arith.constant 5.000000e-01 : f32
    %817 = vector.broadcast %cst_420 : f32 to vector<8x128xf32>
    %818 = arith.mulf %817, %816 : vector<8x128xf32>
    %819 = math.tanh %818 : vector<8x128xf32>
    %cst_421 = arith.constant 5.000000e-01 : f32
    %820 = vector.broadcast %cst_421 : f32 to vector<8x128xf32>
    %821 = arith.mulf %820, %819 : vector<8x128xf32>
    %cst_422 = arith.constant 5.000000e-01 : f32
    %822 = vector.broadcast %cst_422 : f32 to vector<8x128xf32>
    %823 = arith.addf %821, %822 : vector<8x128xf32>
    %824 = vector.extract_strided_slice %807 {offsets = [0, 256], sizes = [8, 128], strides = [1, 1]} : vector<8x512xf32> to vector<8x128xf32>
    %825 = math.tanh %824 : vector<8x128xf32>
    %826 = vector.extract_strided_slice %807 {offsets = [0, 384], sizes = [8, 128], strides = [1, 1]} : vector<8x512xf32> to vector<8x128xf32>
    %cst_423 = arith.constant 5.000000e-01 : f32
    %827 = vector.broadcast %cst_423 : f32 to vector<8x128xf32>
    %828 = arith.mulf %827, %826 : vector<8x128xf32>
    %829 = math.tanh %828 : vector<8x128xf32>
    %cst_424 = arith.constant 5.000000e-01 : f32
    %830 = vector.broadcast %cst_424 : f32 to vector<8x128xf32>
    %831 = arith.mulf %830, %829 : vector<8x128xf32>
    %cst_425 = arith.constant 5.000000e-01 : f32
    %832 = vector.broadcast %cst_425 : f32 to vector<8x128xf32>
    %833 = arith.addf %831, %832 : vector<8x128xf32>
    %834 = arith.mulf %823, %796 : vector<8x128xf32>
    %835 = arith.mulf %815, %825 : vector<8x128xf32>
    %836 = arith.addf %834, %835 : vector<8x128xf32>
    %837 = math.tanh %836 : vector<8x128xf32>
    %838 = arith.mulf %833, %837 : vector<8x128xf32>
    %c1_i32_426 = arith.constant 1 : i32
    %c8_i32_427 = arith.constant 8 : i32
    %839 = arith.muli %c1_i32_426, %c8_i32_427 : i32
    %840 = tpu.assume_multiple %839, 8 : i32
    %c0_i32_428 = arith.constant 0 : i32
    %c0_i32_429 = arith.constant 0 : i32
    %841 = tpu.memref_slice %arg7[%c0_i32_405, %c0_i32_428, %c0_i32_429] : memref<2x64x512xf32, #tpu.memory_space<vmem>> -> memref<1x64x512xf32, #tpu.memory_space<vmem>>
    %842 = tpu.memref_squeeze %841 : memref<1x64x512xf32, #tpu.memory_space<vmem>> -> memref<64x512xf32, #tpu.memory_space<vmem>>
    %843 = arith.index_cast %840 : i32 to index
    %c0_430 = arith.constant 0 : index
    %844 = vector.load %842[%843, %c0_430] : memref<64x512xf32, #tpu.memory_space<vmem>>, vector<8x512xf32>
    %c0_i32_431 = arith.constant 0 : i32
    %c0_i32_432 = arith.constant 0 : i32
    %845 = tpu.memref_slice %arg10[%c1_i32_406, %c0_i32_431, %c0_i32_432] : memref<2x264x512xf32, #tpu.memory_space<vmem>> -> memref<1x264x512xf32, #tpu.memory_space<vmem>>
    %846 = tpu.memref_squeeze %845 : memref<1x264x512xf32, #tpu.memory_space<vmem>> -> memref<264x512xf32, #tpu.memory_space<vmem>>
    %c128_433 = arith.constant 128 : index
    %c0_434 = arith.constant 0 : index
    %847 = vector.load %846[%c128_433, %c0_434] : memref<264x512xf32, #tpu.memory_space<vmem>>, vector<128x512xf32>
    %cst_435 = arith.constant dense<0.000000e+00> : vector<8x512xf32>
    %848 = tpu.matmul %838, %847, %cst_435 {dimension_numbers = #tpu.dot_dimension_numbers<[1], [0], [0], [1], [0, 0, 1, 1], [], []>} : vector<8x128xf32>, vector<128x512xf32>, vector<8x512xf32> -> vector<8x512xf32>
    %849 = arith.addf %844, %848 : vector<8x512xf32>
    %850 = vector.extract_strided_slice %849 {offsets = [0, 0], sizes = [8, 128], strides = [1, 1]} : vector<8x512xf32> to vector<8x128xf32>
    %cst_436 = arith.constant 5.000000e-01 : f32
    %851 = vector.broadcast %cst_436 : f32 to vector<8x128xf32>
    %852 = arith.mulf %851, %850 : vector<8x128xf32>
    %853 = math.tanh %852 : vector<8x128xf32>
    %cst_437 = arith.constant 5.000000e-01 : f32
    %854 = vector.broadcast %cst_437 : f32 to vector<8x128xf32>
    %855 = arith.mulf %854, %853 : vector<8x128xf32>
    %cst_438 = arith.constant 5.000000e-01 : f32
    %856 = vector.broadcast %cst_438 : f32 to vector<8x128xf32>
    %857 = arith.addf %855, %856 : vector<8x128xf32>
    %858 = vector.extract_strided_slice %849 {offsets = [0, 128], sizes = [8, 128], strides = [1, 1]} : vector<8x512xf32> to vector<8x128xf32>
    %cst_439 = arith.constant 5.000000e-01 : f32
    %859 = vector.broadcast %cst_439 : f32 to vector<8x128xf32>
    %860 = arith.mulf %859, %858 : vector<8x128xf32>
    %861 = math.tanh %860 : vector<8x128xf32>
    %cst_440 = arith.constant 5.000000e-01 : f32
    %862 = vector.broadcast %cst_440 : f32 to vector<8x128xf32>
    %863 = arith.mulf %862, %861 : vector<8x128xf32>
    %cst_441 = arith.constant 5.000000e-01 : f32
    %864 = vector.broadcast %cst_441 : f32 to vector<8x128xf32>
    %865 = arith.addf %863, %864 : vector<8x128xf32>
    %866 = vector.extract_strided_slice %849 {offsets = [0, 256], sizes = [8, 128], strides = [1, 1]} : vector<8x512xf32> to vector<8x128xf32>
    %867 = math.tanh %866 : vector<8x128xf32>
    %868 = vector.extract_strided_slice %849 {offsets = [0, 384], sizes = [8, 128], strides = [1, 1]} : vector<8x512xf32> to vector<8x128xf32>
    %cst_442 = arith.constant 5.000000e-01 : f32
    %869 = vector.broadcast %cst_442 : f32 to vector<8x128xf32>
    %870 = arith.mulf %869, %868 : vector<8x128xf32>
    %871 = math.tanh %870 : vector<8x128xf32>
    %cst_443 = arith.constant 5.000000e-01 : f32
    %872 = vector.broadcast %cst_443 : f32 to vector<8x128xf32>
    %873 = arith.mulf %872, %871 : vector<8x128xf32>
    %cst_444 = arith.constant 5.000000e-01 : f32
    %874 = vector.broadcast %cst_444 : f32 to vector<8x128xf32>
    %875 = arith.addf %873, %874 : vector<8x128xf32>
    %876 = arith.mulf %865, %836 : vector<8x128xf32>
    %877 = arith.mulf %857, %867 : vector<8x128xf32>
    %878 = arith.addf %876, %877 : vector<8x128xf32>
    %879 = math.tanh %878 : vector<8x128xf32>
    %880 = arith.mulf %875, %879 : vector<8x128xf32>
    %c2_i32_445 = arith.constant 2 : i32
    %c8_i32_446 = arith.constant 8 : i32
    %881 = arith.muli %c2_i32_445, %c8_i32_446 : i32
    %882 = tpu.assume_multiple %881, 8 : i32
    %c0_i32_447 = arith.constant 0 : i32
    %c0_i32_448 = arith.constant 0 : i32
    %883 = tpu.memref_slice %arg7[%c0_i32_405, %c0_i32_447, %c0_i32_448] : memref<2x64x512xf32, #tpu.memory_space<vmem>> -> memref<1x64x512xf32, #tpu.memory_space<vmem>>
    %884 = tpu.memref_squeeze %883 : memref<1x64x512xf32, #tpu.memory_space<vmem>> -> memref<64x512xf32, #tpu.memory_space<vmem>>
    %885 = arith.index_cast %882 : i32 to index
    %c0_449 = arith.constant 0 : index
    %886 = vector.load %884[%885, %c0_449] : memref<64x512xf32, #tpu.memory_space<vmem>>, vector<8x512xf32>
    %c0_i32_450 = arith.constant 0 : i32
    %c0_i32_451 = arith.constant 0 : i32
    %887 = tpu.memref_slice %arg10[%c1_i32_406, %c0_i32_450, %c0_i32_451] : memref<2x264x512xf32, #tpu.memory_space<vmem>> -> memref<1x264x512xf32, #tpu.memory_space<vmem>>
    %888 = tpu.memref_squeeze %887 : memref<1x264x512xf32, #tpu.memory_space<vmem>> -> memref<264x512xf32, #tpu.memory_space<vmem>>
    %c128_452 = arith.constant 128 : index
    %c0_453 = arith.constant 0 : index
    %889 = vector.load %888[%c128_452, %c0_453] : memref<264x512xf32, #tpu.memory_space<vmem>>, vector<128x512xf32>
    %cst_454 = arith.constant dense<0.000000e+00> : vector<8x512xf32>
    %890 = tpu.matmul %880, %889, %cst_454 {dimension_numbers = #tpu.dot_dimension_numbers<[1], [0], [0], [1], [0, 0, 1, 1], [], []>} : vector<8x128xf32>, vector<128x512xf32>, vector<8x512xf32> -> vector<8x512xf32>
    %891 = arith.addf %886, %890 : vector<8x512xf32>
    %892 = vector.extract_strided_slice %891 {offsets = [0, 0], sizes = [8, 128], strides = [1, 1]} : vector<8x512xf32> to vector<8x128xf32>
    %cst_455 = arith.constant 5.000000e-01 : f32
    %893 = vector.broadcast %cst_455 : f32 to vector<8x128xf32>
    %894 = arith.mulf %893, %892 : vector<8x128xf32>
    %895 = math.tanh %894 : vector<8x128xf32>
    %cst_456 = arith.constant 5.000000e-01 : f32
    %896 = vector.broadcast %cst_456 : f32 to vector<8x128xf32>
    %897 = arith.mulf %896, %895 : vector<8x128xf32>
    %cst_457 = arith.constant 5.000000e-01 : f32
    %898 = vector.broadcast %cst_457 : f32 to vector<8x128xf32>
    %899 = arith.addf %897, %898 : vector<8x128xf32>
    %900 = vector.extract_strided_slice %891 {offsets = [0, 128], sizes = [8, 128], strides = [1, 1]} : vector<8x512xf32> to vector<8x128xf32>
    %cst_458 = arith.constant 5.000000e-01 : f32
    %901 = vector.broadcast %cst_458 : f32 to vector<8x128xf32>
    %902 = arith.mulf %901, %900 : vector<8x128xf32>
    %903 = math.tanh %902 : vector<8x128xf32>
    %cst_459 = arith.constant 5.000000e-01 : f32
    %904 = vector.broadcast %cst_459 : f32 to vector<8x128xf32>
    %905 = arith.mulf %904, %903 : vector<8x128xf32>
    %cst_460 = arith.constant 5.000000e-01 : f32
    %906 = vector.broadcast %cst_460 : f32 to vector<8x128xf32>
    %907 = arith.addf %905, %906 : vector<8x128xf32>
    %908 = vector.extract_strided_slice %891 {offsets = [0, 256], sizes = [8, 128], strides = [1, 1]} : vector<8x512xf32> to vector<8x128xf32>
    %909 = math.tanh %908 : vector<8x128xf32>
    %910 = vector.extract_strided_slice %891 {offsets = [0, 384], sizes = [8, 128], strides = [1, 1]} : vector<8x512xf32> to vector<8x128xf32>
    %cst_461 = arith.constant 5.000000e-01 : f32
    %911 = vector.broadcast %cst_461 : f32 to vector<8x128xf32>
    %912 = arith.mulf %911, %910 : vector<8x128xf32>
    %913 = math.tanh %912 : vector<8x128xf32>
    %cst_462 = arith.constant 5.000000e-01 : f32
    %914 = vector.broadcast %cst_462 : f32 to vector<8x128xf32>
    %915 = arith.mulf %914, %913 : vector<8x128xf32>
    %cst_463 = arith.constant 5.000000e-01 : f32
    %916 = vector.broadcast %cst_463 : f32 to vector<8x128xf32>
    %917 = arith.addf %915, %916 : vector<8x128xf32>
    %918 = arith.mulf %907, %878 : vector<8x128xf32>
    %919 = arith.mulf %899, %909 : vector<8x128xf32>
    %920 = arith.addf %918, %919 : vector<8x128xf32>
    %921 = math.tanh %920 : vector<8x128xf32>
    %922 = arith.mulf %917, %921 : vector<8x128xf32>
    %c3_i32_464 = arith.constant 3 : i32
    %c8_i32_465 = arith.constant 8 : i32
    %923 = arith.muli %c3_i32_464, %c8_i32_465 : i32
    %924 = tpu.assume_multiple %923, 8 : i32
    %c0_i32_466 = arith.constant 0 : i32
    %c0_i32_467 = arith.constant 0 : i32
    %925 = tpu.memref_slice %arg7[%c0_i32_405, %c0_i32_466, %c0_i32_467] : memref<2x64x512xf32, #tpu.memory_space<vmem>> -> memref<1x64x512xf32, #tpu.memory_space<vmem>>
    %926 = tpu.memref_squeeze %925 : memref<1x64x512xf32, #tpu.memory_space<vmem>> -> memref<64x512xf32, #tpu.memory_space<vmem>>
    %927 = arith.index_cast %924 : i32 to index
    %c0_468 = arith.constant 0 : index
    %928 = vector.load %926[%927, %c0_468] : memref<64x512xf32, #tpu.memory_space<vmem>>, vector<8x512xf32>
    %c0_i32_469 = arith.constant 0 : i32
    %c0_i32_470 = arith.constant 0 : i32
    %929 = tpu.memref_slice %arg10[%c1_i32_406, %c0_i32_469, %c0_i32_470] : memref<2x264x512xf32, #tpu.memory_space<vmem>> -> memref<1x264x512xf32, #tpu.memory_space<vmem>>
    %930 = tpu.memref_squeeze %929 : memref<1x264x512xf32, #tpu.memory_space<vmem>> -> memref<264x512xf32, #tpu.memory_space<vmem>>
    %c128_471 = arith.constant 128 : index
    %c0_472 = arith.constant 0 : index
    %931 = vector.load %930[%c128_471, %c0_472] : memref<264x512xf32, #tpu.memory_space<vmem>>, vector<128x512xf32>
    %cst_473 = arith.constant dense<0.000000e+00> : vector<8x512xf32>
    %932 = tpu.matmul %922, %931, %cst_473 {dimension_numbers = #tpu.dot_dimension_numbers<[1], [0], [0], [1], [0, 0, 1, 1], [], []>} : vector<8x128xf32>, vector<128x512xf32>, vector<8x512xf32> -> vector<8x512xf32>
    %933 = arith.addf %928, %932 : vector<8x512xf32>
    %934 = vector.extract_strided_slice %933 {offsets = [0, 0], sizes = [8, 128], strides = [1, 1]} : vector<8x512xf32> to vector<8x128xf32>
    %cst_474 = arith.constant 5.000000e-01 : f32
    %935 = vector.broadcast %cst_474 : f32 to vector<8x128xf32>
    %936 = arith.mulf %935, %934 : vector<8x128xf32>
    %937 = math.tanh %936 : vector<8x128xf32>
    %cst_475 = arith.constant 5.000000e-01 : f32
    %938 = vector.broadcast %cst_475 : f32 to vector<8x128xf32>
    %939 = arith.mulf %938, %937 : vector<8x128xf32>
    %cst_476 = arith.constant 5.000000e-01 : f32
    %940 = vector.broadcast %cst_476 : f32 to vector<8x128xf32>
    %941 = arith.addf %939, %940 : vector<8x128xf32>
    %942 = vector.extract_strided_slice %933 {offsets = [0, 128], sizes = [8, 128], strides = [1, 1]} : vector<8x512xf32> to vector<8x128xf32>
    %cst_477 = arith.constant 5.000000e-01 : f32
    %943 = vector.broadcast %cst_477 : f32 to vector<8x128xf32>
    %944 = arith.mulf %943, %942 : vector<8x128xf32>
    %945 = math.tanh %944 : vector<8x128xf32>
    %cst_478 = arith.constant 5.000000e-01 : f32
    %946 = vector.broadcast %cst_478 : f32 to vector<8x128xf32>
    %947 = arith.mulf %946, %945 : vector<8x128xf32>
    %cst_479 = arith.constant 5.000000e-01 : f32
    %948 = vector.broadcast %cst_479 : f32 to vector<8x128xf32>
    %949 = arith.addf %947, %948 : vector<8x128xf32>
    %950 = vector.extract_strided_slice %933 {offsets = [0, 256], sizes = [8, 128], strides = [1, 1]} : vector<8x512xf32> to vector<8x128xf32>
    %951 = math.tanh %950 : vector<8x128xf32>
    %952 = vector.extract_strided_slice %933 {offsets = [0, 384], sizes = [8, 128], strides = [1, 1]} : vector<8x512xf32> to vector<8x128xf32>
    %cst_480 = arith.constant 5.000000e-01 : f32
    %953 = vector.broadcast %cst_480 : f32 to vector<8x128xf32>
    %954 = arith.mulf %953, %952 : vector<8x128xf32>
    %955 = math.tanh %954 : vector<8x128xf32>
    %cst_481 = arith.constant 5.000000e-01 : f32
    %956 = vector.broadcast %cst_481 : f32 to vector<8x128xf32>
    %957 = arith.mulf %956, %955 : vector<8x128xf32>
    %cst_482 = arith.constant 5.000000e-01 : f32
    %958 = vector.broadcast %cst_482 : f32 to vector<8x128xf32>
    %959 = arith.addf %957, %958 : vector<8x128xf32>
    %960 = arith.mulf %949, %920 : vector<8x128xf32>
    %961 = arith.mulf %941, %951 : vector<8x128xf32>
    %962 = arith.addf %960, %961 : vector<8x128xf32>
    %963 = math.tanh %962 : vector<8x128xf32>
    %964 = arith.mulf %959, %963 : vector<8x128xf32>
    %c4_i32_483 = arith.constant 4 : i32
    %c8_i32_484 = arith.constant 8 : i32
    %965 = arith.muli %c4_i32_483, %c8_i32_484 : i32
    %966 = tpu.assume_multiple %965, 8 : i32
    %c0_i32_485 = arith.constant 0 : i32
    %c0_i32_486 = arith.constant 0 : i32
    %967 = tpu.memref_slice %arg7[%c0_i32_405, %c0_i32_485, %c0_i32_486] : memref<2x64x512xf32, #tpu.memory_space<vmem>> -> memref<1x64x512xf32, #tpu.memory_space<vmem>>
    %968 = tpu.memref_squeeze %967 : memref<1x64x512xf32, #tpu.memory_space<vmem>> -> memref<64x512xf32, #tpu.memory_space<vmem>>
    %969 = arith.index_cast %966 : i32 to index
    %c0_487 = arith.constant 0 : index
    %970 = vector.load %968[%969, %c0_487] : memref<64x512xf32, #tpu.memory_space<vmem>>, vector<8x512xf32>
    %c0_i32_488 = arith.constant 0 : i32
    %c0_i32_489 = arith.constant 0 : i32
    %971 = tpu.memref_slice %arg10[%c1_i32_406, %c0_i32_488, %c0_i32_489] : memref<2x264x512xf32, #tpu.memory_space<vmem>> -> memref<1x264x512xf32, #tpu.memory_space<vmem>>
    %972 = tpu.memref_squeeze %971 : memref<1x264x512xf32, #tpu.memory_space<vmem>> -> memref<264x512xf32, #tpu.memory_space<vmem>>
    %c128_490 = arith.constant 128 : index
    %c0_491 = arith.constant 0 : index
    %973 = vector.load %972[%c128_490, %c0_491] : memref<264x512xf32, #tpu.memory_space<vmem>>, vector<128x512xf32>
    %cst_492 = arith.constant dense<0.000000e+00> : vector<8x512xf32>
    %974 = tpu.matmul %964, %973, %cst_492 {dimension_numbers = #tpu.dot_dimension_numbers<[1], [0], [0], [1], [0, 0, 1, 1], [], []>} : vector<8x128xf32>, vector<128x512xf32>, vector<8x512xf32> -> vector<8x512xf32>
    %975 = arith.addf %970, %974 : vector<8x512xf32>
    %976 = vector.extract_strided_slice %975 {offsets = [0, 0], sizes = [8, 128], strides = [1, 1]} : vector<8x512xf32> to vector<8x128xf32>
    %cst_493 = arith.constant 5.000000e-01 : f32
    %977 = vector.broadcast %cst_493 : f32 to vector<8x128xf32>
    %978 = arith.mulf %977, %976 : vector<8x128xf32>
    %979 = math.tanh %978 : vector<8x128xf32>
    %cst_494 = arith.constant 5.000000e-01 : f32
    %980 = vector.broadcast %cst_494 : f32 to vector<8x128xf32>
    %981 = arith.mulf %980, %979 : vector<8x128xf32>
    %cst_495 = arith.constant 5.000000e-01 : f32
    %982 = vector.broadcast %cst_495 : f32 to vector<8x128xf32>
    %983 = arith.addf %981, %982 : vector<8x128xf32>
    %984 = vector.extract_strided_slice %975 {offsets = [0, 128], sizes = [8, 128], strides = [1, 1]} : vector<8x512xf32> to vector<8x128xf32>
    %cst_496 = arith.constant 5.000000e-01 : f32
    %985 = vector.broadcast %cst_496 : f32 to vector<8x128xf32>
    %986 = arith.mulf %985, %984 : vector<8x128xf32>
    %987 = math.tanh %986 : vector<8x128xf32>
    %cst_497 = arith.constant 5.000000e-01 : f32
    %988 = vector.broadcast %cst_497 : f32 to vector<8x128xf32>
    %989 = arith.mulf %988, %987 : vector<8x128xf32>
    %cst_498 = arith.constant 5.000000e-01 : f32
    %990 = vector.broadcast %cst_498 : f32 to vector<8x128xf32>
    %991 = arith.addf %989, %990 : vector<8x128xf32>
    %992 = vector.extract_strided_slice %975 {offsets = [0, 256], sizes = [8, 128], strides = [1, 1]} : vector<8x512xf32> to vector<8x128xf32>
    %993 = math.tanh %992 : vector<8x128xf32>
    %994 = vector.extract_strided_slice %975 {offsets = [0, 384], sizes = [8, 128], strides = [1, 1]} : vector<8x512xf32> to vector<8x128xf32>
    %cst_499 = arith.constant 5.000000e-01 : f32
    %995 = vector.broadcast %cst_499 : f32 to vector<8x128xf32>
    %996 = arith.mulf %995, %994 : vector<8x128xf32>
    %997 = math.tanh %996 : vector<8x128xf32>
    %cst_500 = arith.constant 5.000000e-01 : f32
    %998 = vector.broadcast %cst_500 : f32 to vector<8x128xf32>
    %999 = arith.mulf %998, %997 : vector<8x128xf32>
    %cst_501 = arith.constant 5.000000e-01 : f32
    %1000 = vector.broadcast %cst_501 : f32 to vector<8x128xf32>
    %1001 = arith.addf %999, %1000 : vector<8x128xf32>
    %1002 = arith.mulf %991, %962 : vector<8x128xf32>
    %1003 = arith.mulf %983, %993 : vector<8x128xf32>
    %1004 = arith.addf %1002, %1003 : vector<8x128xf32>
    %1005 = math.tanh %1004 : vector<8x128xf32>
    %1006 = arith.mulf %1001, %1005 : vector<8x128xf32>
    %c5_i32_502 = arith.constant 5 : i32
    %c8_i32_503 = arith.constant 8 : i32
    %1007 = arith.muli %c5_i32_502, %c8_i32_503 : i32
    %1008 = tpu.assume_multiple %1007, 8 : i32
    %c0_i32_504 = arith.constant 0 : i32
    %c0_i32_505 = arith.constant 0 : i32
    %1009 = tpu.memref_slice %arg7[%c0_i32_405, %c0_i32_504, %c0_i32_505] : memref<2x64x512xf32, #tpu.memory_space<vmem>> -> memref<1x64x512xf32, #tpu.memory_space<vmem>>
    %1010 = tpu.memref_squeeze %1009 : memref<1x64x512xf32, #tpu.memory_space<vmem>> -> memref<64x512xf32, #tpu.memory_space<vmem>>
    %1011 = arith.index_cast %1008 : i32 to index
    %c0_506 = arith.constant 0 : index
    %1012 = vector.load %1010[%1011, %c0_506] : memref<64x512xf32, #tpu.memory_space<vmem>>, vector<8x512xf32>
    %c0_i32_507 = arith.constant 0 : i32
    %c0_i32_508 = arith.constant 0 : i32
    %1013 = tpu.memref_slice %arg10[%c1_i32_406, %c0_i32_507, %c0_i32_508] : memref<2x264x512xf32, #tpu.memory_space<vmem>> -> memref<1x264x512xf32, #tpu.memory_space<vmem>>
    %1014 = tpu.memref_squeeze %1013 : memref<1x264x512xf32, #tpu.memory_space<vmem>> -> memref<264x512xf32, #tpu.memory_space<vmem>>
    %c128_509 = arith.constant 128 : index
    %c0_510 = arith.constant 0 : index
    %1015 = vector.load %1014[%c128_509, %c0_510] : memref<264x512xf32, #tpu.memory_space<vmem>>, vector<128x512xf32>
    %cst_511 = arith.constant dense<0.000000e+00> : vector<8x512xf32>
    %1016 = tpu.matmul %1006, %1015, %cst_511 {dimension_numbers = #tpu.dot_dimension_numbers<[1], [0], [0], [1], [0, 0, 1, 1], [], []>} : vector<8x128xf32>, vector<128x512xf32>, vector<8x512xf32> -> vector<8x512xf32>
    %1017 = arith.addf %1012, %1016 : vector<8x512xf32>
    %1018 = vector.extract_strided_slice %1017 {offsets = [0, 0], sizes = [8, 128], strides = [1, 1]} : vector<8x512xf32> to vector<8x128xf32>
    %cst_512 = arith.constant 5.000000e-01 : f32
    %1019 = vector.broadcast %cst_512 : f32 to vector<8x128xf32>
    %1020 = arith.mulf %1019, %1018 : vector<8x128xf32>
    %1021 = math.tanh %1020 : vector<8x128xf32>
    %cst_513 = arith.constant 5.000000e-01 : f32
    %1022 = vector.broadcast %cst_513 : f32 to vector<8x128xf32>
    %1023 = arith.mulf %1022, %1021 : vector<8x128xf32>
    %cst_514 = arith.constant 5.000000e-01 : f32
    %1024 = vector.broadcast %cst_514 : f32 to vector<8x128xf32>
    %1025 = arith.addf %1023, %1024 : vector<8x128xf32>
    %1026 = vector.extract_strided_slice %1017 {offsets = [0, 128], sizes = [8, 128], strides = [1, 1]} : vector<8x512xf32> to vector<8x128xf32>
    %cst_515 = arith.constant 5.000000e-01 : f32
    %1027 = vector.broadcast %cst_515 : f32 to vector<8x128xf32>
    %1028 = arith.mulf %1027, %1026 : vector<8x128xf32>
    %1029 = math.tanh %1028 : vector<8x128xf32>
    %cst_516 = arith.constant 5.000000e-01 : f32
    %1030 = vector.broadcast %cst_516 : f32 to vector<8x128xf32>
    %1031 = arith.mulf %1030, %1029 : vector<8x128xf32>
    %cst_517 = arith.constant 5.000000e-01 : f32
    %1032 = vector.broadcast %cst_517 : f32 to vector<8x128xf32>
    %1033 = arith.addf %1031, %1032 : vector<8x128xf32>
    %1034 = vector.extract_strided_slice %1017 {offsets = [0, 256], sizes = [8, 128], strides = [1, 1]} : vector<8x512xf32> to vector<8x128xf32>
    %1035 = math.tanh %1034 : vector<8x128xf32>
    %1036 = vector.extract_strided_slice %1017 {offsets = [0, 384], sizes = [8, 128], strides = [1, 1]} : vector<8x512xf32> to vector<8x128xf32>
    %cst_518 = arith.constant 5.000000e-01 : f32
    %1037 = vector.broadcast %cst_518 : f32 to vector<8x128xf32>
    %1038 = arith.mulf %1037, %1036 : vector<8x128xf32>
    %1039 = math.tanh %1038 : vector<8x128xf32>
    %cst_519 = arith.constant 5.000000e-01 : f32
    %1040 = vector.broadcast %cst_519 : f32 to vector<8x128xf32>
    %1041 = arith.mulf %1040, %1039 : vector<8x128xf32>
    %cst_520 = arith.constant 5.000000e-01 : f32
    %1042 = vector.broadcast %cst_520 : f32 to vector<8x128xf32>
    %1043 = arith.addf %1041, %1042 : vector<8x128xf32>
    %1044 = arith.mulf %1033, %1004 : vector<8x128xf32>
    %1045 = arith.mulf %1025, %1035 : vector<8x128xf32>
    %1046 = arith.addf %1044, %1045 : vector<8x128xf32>
    %1047 = math.tanh %1046 : vector<8x128xf32>
    %1048 = arith.mulf %1043, %1047 : vector<8x128xf32>
    %c6_i32_521 = arith.constant 6 : i32
    %c8_i32_522 = arith.constant 8 : i32
    %1049 = arith.muli %c6_i32_521, %c8_i32_522 : i32
    %1050 = tpu.assume_multiple %1049, 8 : i32
    %c0_i32_523 = arith.constant 0 : i32
    %c0_i32_524 = arith.constant 0 : i32
    %1051 = tpu.memref_slice %arg7[%c0_i32_405, %c0_i32_523, %c0_i32_524] : memref<2x64x512xf32, #tpu.memory_space<vmem>> -> memref<1x64x512xf32, #tpu.memory_space<vmem>>
    %1052 = tpu.memref_squeeze %1051 : memref<1x64x512xf32, #tpu.memory_space<vmem>> -> memref<64x512xf32, #tpu.memory_space<vmem>>
    %1053 = arith.index_cast %1050 : i32 to index
    %c0_525 = arith.constant 0 : index
    %1054 = vector.load %1052[%1053, %c0_525] : memref<64x512xf32, #tpu.memory_space<vmem>>, vector<8x512xf32>
    %c0_i32_526 = arith.constant 0 : i32
    %c0_i32_527 = arith.constant 0 : i32
    %1055 = tpu.memref_slice %arg10[%c1_i32_406, %c0_i32_526, %c0_i32_527] : memref<2x264x512xf32, #tpu.memory_space<vmem>> -> memref<1x264x512xf32, #tpu.memory_space<vmem>>
    %1056 = tpu.memref_squeeze %1055 : memref<1x264x512xf32, #tpu.memory_space<vmem>> -> memref<264x512xf32, #tpu.memory_space<vmem>>
    %c128_528 = arith.constant 128 : index
    %c0_529 = arith.constant 0 : index
    %1057 = vector.load %1056[%c128_528, %c0_529] : memref<264x512xf32, #tpu.memory_space<vmem>>, vector<128x512xf32>
    %cst_530 = arith.constant dense<0.000000e+00> : vector<8x512xf32>
    %1058 = tpu.matmul %1048, %1057, %cst_530 {dimension_numbers = #tpu.dot_dimension_numbers<[1], [0], [0], [1], [0, 0, 1, 1], [], []>} : vector<8x128xf32>, vector<128x512xf32>, vector<8x512xf32> -> vector<8x512xf32>
    %1059 = arith.addf %1054, %1058 : vector<8x512xf32>
    %1060 = vector.extract_strided_slice %1059 {offsets = [0, 0], sizes = [8, 128], strides = [1, 1]} : vector<8x512xf32> to vector<8x128xf32>
    %cst_531 = arith.constant 5.000000e-01 : f32
    %1061 = vector.broadcast %cst_531 : f32 to vector<8x128xf32>
    %1062 = arith.mulf %1061, %1060 : vector<8x128xf32>
    %1063 = math.tanh %1062 : vector<8x128xf32>
    %cst_532 = arith.constant 5.000000e-01 : f32
    %1064 = vector.broadcast %cst_532 : f32 to vector<8x128xf32>
    %1065 = arith.mulf %1064, %1063 : vector<8x128xf32>
    %cst_533 = arith.constant 5.000000e-01 : f32
    %1066 = vector.broadcast %cst_533 : f32 to vector<8x128xf32>
    %1067 = arith.addf %1065, %1066 : vector<8x128xf32>
    %1068 = vector.extract_strided_slice %1059 {offsets = [0, 128], sizes = [8, 128], strides = [1, 1]} : vector<8x512xf32> to vector<8x128xf32>
    %cst_534 = arith.constant 5.000000e-01 : f32
    %1069 = vector.broadcast %cst_534 : f32 to vector<8x128xf32>
    %1070 = arith.mulf %1069, %1068 : vector<8x128xf32>
    %1071 = math.tanh %1070 : vector<8x128xf32>
    %cst_535 = arith.constant 5.000000e-01 : f32
    %1072 = vector.broadcast %cst_535 : f32 to vector<8x128xf32>
    %1073 = arith.mulf %1072, %1071 : vector<8x128xf32>
    %cst_536 = arith.constant 5.000000e-01 : f32
    %1074 = vector.broadcast %cst_536 : f32 to vector<8x128xf32>
    %1075 = arith.addf %1073, %1074 : vector<8x128xf32>
    %1076 = vector.extract_strided_slice %1059 {offsets = [0, 256], sizes = [8, 128], strides = [1, 1]} : vector<8x512xf32> to vector<8x128xf32>
    %1077 = math.tanh %1076 : vector<8x128xf32>
    %1078 = vector.extract_strided_slice %1059 {offsets = [0, 384], sizes = [8, 128], strides = [1, 1]} : vector<8x512xf32> to vector<8x128xf32>
    %cst_537 = arith.constant 5.000000e-01 : f32
    %1079 = vector.broadcast %cst_537 : f32 to vector<8x128xf32>
    %1080 = arith.mulf %1079, %1078 : vector<8x128xf32>
    %1081 = math.tanh %1080 : vector<8x128xf32>
    %cst_538 = arith.constant 5.000000e-01 : f32
    %1082 = vector.broadcast %cst_538 : f32 to vector<8x128xf32>
    %1083 = arith.mulf %1082, %1081 : vector<8x128xf32>
    %cst_539 = arith.constant 5.000000e-01 : f32
    %1084 = vector.broadcast %cst_539 : f32 to vector<8x128xf32>
    %1085 = arith.addf %1083, %1084 : vector<8x128xf32>
    %1086 = arith.mulf %1075, %1046 : vector<8x128xf32>
    %1087 = arith.mulf %1067, %1077 : vector<8x128xf32>
    %1088 = arith.addf %1086, %1087 : vector<8x128xf32>
    %1089 = math.tanh %1088 : vector<8x128xf32>
    %1090 = arith.mulf %1085, %1089 : vector<8x128xf32>
    %c7_i32_540 = arith.constant 7 : i32
    %c8_i32_541 = arith.constant 8 : i32
    %1091 = arith.muli %c7_i32_540, %c8_i32_541 : i32
    %1092 = tpu.assume_multiple %1091, 8 : i32
    %c0_i32_542 = arith.constant 0 : i32
    %c0_i32_543 = arith.constant 0 : i32
    %1093 = tpu.memref_slice %arg7[%c0_i32_405, %c0_i32_542, %c0_i32_543] : memref<2x64x512xf32, #tpu.memory_space<vmem>> -> memref<1x64x512xf32, #tpu.memory_space<vmem>>
    %1094 = tpu.memref_squeeze %1093 : memref<1x64x512xf32, #tpu.memory_space<vmem>> -> memref<64x512xf32, #tpu.memory_space<vmem>>
    %1095 = arith.index_cast %1092 : i32 to index
    %c0_544 = arith.constant 0 : index
    %1096 = vector.load %1094[%1095, %c0_544] : memref<64x512xf32, #tpu.memory_space<vmem>>, vector<8x512xf32>
    %c0_i32_545 = arith.constant 0 : i32
    %c0_i32_546 = arith.constant 0 : i32
    %1097 = tpu.memref_slice %arg10[%c1_i32_406, %c0_i32_545, %c0_i32_546] : memref<2x264x512xf32, #tpu.memory_space<vmem>> -> memref<1x264x512xf32, #tpu.memory_space<vmem>>
    %1098 = tpu.memref_squeeze %1097 : memref<1x264x512xf32, #tpu.memory_space<vmem>> -> memref<264x512xf32, #tpu.memory_space<vmem>>
    %c128_547 = arith.constant 128 : index
    %c0_548 = arith.constant 0 : index
    %1099 = vector.load %1098[%c128_547, %c0_548] : memref<264x512xf32, #tpu.memory_space<vmem>>, vector<128x512xf32>
    %cst_549 = arith.constant dense<0.000000e+00> : vector<8x512xf32>
    %1100 = tpu.matmul %1090, %1099, %cst_549 {dimension_numbers = #tpu.dot_dimension_numbers<[1], [0], [0], [1], [0, 0, 1, 1], [], []>} : vector<8x128xf32>, vector<128x512xf32>, vector<8x512xf32> -> vector<8x512xf32>
    %1101 = arith.addf %1096, %1100 : vector<8x512xf32>
    %1102 = vector.extract_strided_slice %1101 {offsets = [0, 0], sizes = [8, 128], strides = [1, 1]} : vector<8x512xf32> to vector<8x128xf32>
    %cst_550 = arith.constant 5.000000e-01 : f32
    %1103 = vector.broadcast %cst_550 : f32 to vector<8x128xf32>
    %1104 = arith.mulf %1103, %1102 : vector<8x128xf32>
    %1105 = math.tanh %1104 : vector<8x128xf32>
    %cst_551 = arith.constant 5.000000e-01 : f32
    %1106 = vector.broadcast %cst_551 : f32 to vector<8x128xf32>
    %1107 = arith.mulf %1106, %1105 : vector<8x128xf32>
    %cst_552 = arith.constant 5.000000e-01 : f32
    %1108 = vector.broadcast %cst_552 : f32 to vector<8x128xf32>
    %1109 = arith.addf %1107, %1108 : vector<8x128xf32>
    %1110 = vector.extract_strided_slice %1101 {offsets = [0, 128], sizes = [8, 128], strides = [1, 1]} : vector<8x512xf32> to vector<8x128xf32>
    %cst_553 = arith.constant 5.000000e-01 : f32
    %1111 = vector.broadcast %cst_553 : f32 to vector<8x128xf32>
    %1112 = arith.mulf %1111, %1110 : vector<8x128xf32>
    %1113 = math.tanh %1112 : vector<8x128xf32>
    %cst_554 = arith.constant 5.000000e-01 : f32
    %1114 = vector.broadcast %cst_554 : f32 to vector<8x128xf32>
    %1115 = arith.mulf %1114, %1113 : vector<8x128xf32>
    %cst_555 = arith.constant 5.000000e-01 : f32
    %1116 = vector.broadcast %cst_555 : f32 to vector<8x128xf32>
    %1117 = arith.addf %1115, %1116 : vector<8x128xf32>
    %1118 = vector.extract_strided_slice %1101 {offsets = [0, 256], sizes = [8, 128], strides = [1, 1]} : vector<8x512xf32> to vector<8x128xf32>
    %1119 = math.tanh %1118 : vector<8x128xf32>
    %1120 = vector.extract_strided_slice %1101 {offsets = [0, 384], sizes = [8, 128], strides = [1, 1]} : vector<8x512xf32> to vector<8x128xf32>
    %cst_556 = arith.constant 5.000000e-01 : f32
    %1121 = vector.broadcast %cst_556 : f32 to vector<8x128xf32>
    %1122 = arith.mulf %1121, %1120 : vector<8x128xf32>
    %1123 = math.tanh %1122 : vector<8x128xf32>
    %cst_557 = arith.constant 5.000000e-01 : f32
    %1124 = vector.broadcast %cst_557 : f32 to vector<8x128xf32>
    %1125 = arith.mulf %1124, %1123 : vector<8x128xf32>
    %cst_558 = arith.constant 5.000000e-01 : f32
    %1126 = vector.broadcast %cst_558 : f32 to vector<8x128xf32>
    %1127 = arith.addf %1125, %1126 : vector<8x128xf32>
    %1128 = arith.mulf %1117, %1088 : vector<8x128xf32>
    %1129 = arith.mulf %1109, %1119 : vector<8x128xf32>
    %1130 = arith.addf %1128, %1129 : vector<8x128xf32>
    %1131 = math.tanh %1130 : vector<8x128xf32>
    %1132 = arith.mulf %1127, %1131 : vector<8x128xf32>
    %c8_i32_559 = arith.constant 8 : i32
    %c2 = arith.constant 2 : index
    %c0_560 = arith.constant 0 : index
    %c0_561 = arith.constant 0 : index
    %1133 = vector.load %arg5[%c2, %c0_560, %c0_561] : memref<3x8x128xf32, #tpu.memory_space<vmem>>, vector<1x8x128xf32>
    %1134 = vector.shape_cast %1133 : vector<1x8x128xf32> to vector<8x128xf32>
    %1135 = vector.shape_cast %1132 : vector<8x128xf32> to vector<1x8x128xf32>
    tpu.vector_store %arg5[%c2, %c0_560, %c0_561], %1135 {strides = array<i32>} : memref<3x8x128xf32, #tpu.memory_space<vmem>>, vector<1x8x128xf32>,
    %c2_562 = arith.constant 2 : index
    %c0_563 = arith.constant 0 : index
    %c0_564 = arith.constant 0 : index
    %1136 = vector.load %arg6[%c2_562, %c0_563, %c0_564] : memref<3x8x128xf32, #tpu.memory_space<vmem>>, vector<1x8x128xf32>
    %1137 = vector.shape_cast %1136 : vector<1x8x128xf32> to vector<8x128xf32>
    %1138 = vector.shape_cast %1130 : vector<8x128xf32> to vector<1x8x128xf32>
    tpu.vector_store %arg6[%c2_562, %c0_563, %c0_564], %1138 {strides = array<i32>} : memref<3x8x128xf32, #tpu.memory_space<vmem>>, vector<1x8x128xf32>,
    return
  }
}

</mosaic_0001>

<bundles_post_ra>
// kernel: tpu_custom_call.1
= control target key start
LH: loop header
LB: loop body
LE: loop exit
PB: predicated region body
PF: predicated region fallthrough
CT: control target
= control target key end

     0   :  { %12 = vsyncpa [#allocation8], 0  ;;  %s10339_s0 = inlined_call_operand.vmem [shape: f32[64,8], index: 0, kind: input, shape index: {}]   ;;  %s10340_s1 = inlined_call_operand.hbm [shape: f32[8,512], index: 1, kind: input, shape index: {}]   ;;  %s10341_s2 = inlined_call_operand.hbm [shape: f32[128,512], index: 2, kind: input, shape index: {}]   ;;  %s10342_s3 = inlined_call_operand.hbm [shape: f32[1,512], index: 3, kind: input, shape index: {}]   ;;  %s10343_s4 = inlined_call_operand.hbm [shape: f32[2,264,512], index: 4, kind: input, shape index: {}]   ;;  %s10344_s5 = inlined_call_operand.hbm [shape: f32[3,8,128], index: 5, kind: output, shape index: {0}]   ;;  %s10345_s6 = inlined_call_operand.hbm [shape: f32[3,8,128], index: 6, kind: output, shape index: {1}]  }
   0x1   :  { %13 = vsyncpa [#allocation11], 0 }
   0x2   :  { %14 = vsyncpa [#allocation9], 0 }
   0x3   :  { %15 = vsyncpa [#allocation15], 0  ;;  %s8647_s21 = smov [#allocation10]   ;;  %s8478_s25 = scalar_lea.hbm %s10341_s2, 8192 }
   0x4   :  { %s33_s22 = sshll.u32 %s8647_s21, 4  ;;  %p8479_p0 = scmp.ne.s32.totalorder %s10341_s2, %s8478_s25  ;;  %s34_s22 = int_to_ptr.vmem [resolvable:$true] %s33_s22 }
   0x5   :  { %p8482_p1 = scmp.lt.u32.totalorder %s8478_s25, %s10341_s2 }
   0x7   :  { %p8484_p2 = pnand %p8482_p1, %p8479_p0 }
   0x9   :  { %8487 = shalt.err (!%p8484_p2)
}
   0xa   :  { %s8488_s30 = scalar_lea.vmem %s34_s22, 8192  ;;  %p8493_p4 = scmp.lt.s32.totalorder %s34_s22, %s34_s22 }
   0xb   :  { %p8489_p3 = scmp.ne.s32.totalorder %s34_s22, %s8488_s30  ;;  %p8494_p5 = scmp.lt.s32.totalorder %s8488_s30, %s8488_s30 }
   0xd   :  { %p8495_p6 = por %p8494_p5, %p8493_p4 }
   0xf   :  { %p8496_p7 = pnand %p8495_p6, %p8489_p3 }
  0x11   :  { %8499 = shalt.err (!%p8496_p7)
}
  0x12   :  { %s8648_s7 = smov 512   ;;  %s8649_s8 = smov 32  }
  0x13   :  { %39 = dma.hbm_to_vmem [thread:$0]  %s10341_s2, 8192, %s34_s22, [#allocation11], %s8648_s7, %s8648_s7, %s8649_s8  }
  0x14   :  { %s8650_s11 = smov [#allocation7]   ;;  %s8651_s13 = smov [#allocation12]  }
  0x15   :  { %s24_s12 = sshll.u32 %s8650_s11, 4  ;;  %s46_s14 = sshll.u32 %s8651_s13, 4  ;;  %s25_s12 = int_to_ptr.vmem [resolvable:$true] %s24_s12  ;;  %s47_s14 = int_to_ptr.vmem [resolvable:$true] %s46_s14 }
  0x16   :  { %s8500_s17 = scalar_lea.hbm %s10340_s1, 512 }
  0x17   :  { %p8501_p8 = scmp.ne.s32.totalorder %s10340_s1, %s8500_s17  ;;  %p8504_p9 = scmp.lt.u32.totalorder %s8500_s17, %s10340_s1 }
  0x19   :  { %p8506_p10 = pnand %p8504_p9, %p8501_p8 }
  0x1b   :  { %8509 = shalt.err (!%p8506_p10)
}
  0x1c   :  { %s8510_s2 = scalar_lea.vmem %s25_s12, 512  ;;  %p8515_p12 = scmp.lt.s32.totalorder %s25_s12, %s25_s12 }
  0x1d   :  { %p8511_p11 = scmp.ne.s32.totalorder %s25_s12, %s8510_s2  ;;  %p8516_p13 = scmp.lt.s32.totalorder %s8510_s2, %s8510_s2 }
  0x1f   :  { %p8517_p0 = por %p8516_p13, %p8515_p12 }
  0x21   :  { %p8518_p1 = pnand %p8517_p0, %p8511_p11 }
  0x23   :  { %8521 = shalt.err (!%p8518_p1)
}
  0x24   :  { %27 = dma.hbm_to_vmem [thread:$0]  %s10340_s1, 512, %s25_s12, [#allocation8]  }
  0x25   :  { %s8522_s26 = scalar_lea.hbm %s10342_s3, 64 }
  0x26   :  { %p8523_p2 = scmp.ne.s32.totalorder %s10342_s3, %s8522_s26  ;;  %p8526_p3 = scmp.lt.u32.totalorder %s8522_s26, %s10342_s3 }
  0x28   :  { %p8528_p4 = pnand %p8526_p3, %p8523_p2 }
  0x2a   :  { %8531 = shalt.err (!%p8528_p4)
}
  0x2b   :  { %s8532_s7 = scalar_lea.vmem %s47_s14, 64  ;;  %p8537_p6 = scmp.lt.s32.totalorder %s47_s14, %s47_s14 }
  0x2c   :  { %p8533_p5 = scmp.ne.s32.totalorder %s47_s14, %s8532_s7  ;;  %p8538_p7 = scmp.lt.s32.totalorder %s8532_s7, %s8532_s7 }
  0x2e   :  { %p8539_p8 = por %p8538_p7, %p8537_p6 }
  0x30   :  { %p8540_p9 = pnand %p8539_p8, %p8533_p5 }
  0x32   :  { %8543 = shalt.err (!%p8540_p9)
}
  0x33   :  { %49 = dma.hbm_to_vmem [thread:$0]  %s10342_s3, 64, %s47_s14, [#allocation11]  }
  0x34   :  { %8635 = dma.done.wait [#allocation8], 512  }
  0x35   :  { %8636 = vsyncadd [#allocation8], 4294966784 }
  0x36   :  { %8637 = dma.done.wait [#allocation11], 8256  }
  0x37   :  { %8638 = vsyncadd [#allocation11], 4294959040  ;;  %v8652_v0 = vmov 0.0   ;;  %v79_v1 = vld [vmem:[#allocation7 + $0x8] sm:$0xff]  ;;  %v81_v2 = vld [vmem:[#allocation7 + $0x18] sm:$0xff]  ;;  %vm104_vm0 = vcmask 64512  }
  0x38   :  { %193 = vmatprep.mubr.f32.mxu0 %v8652_v0  ;;  %306 = vmatprep.mubr.f32.mxu1 %v8652_v0  ;;  %v78_v3 = vld [vmem:[#allocation7] sm:$0xff]  ;;  %v80_v4 = vld [vmem:[#allocation7 + $0x10] sm:$0xff]  ;;  %v395_v6 = vld [vmem:[#allocation10 + $0x8] sm:$0xff]  ;;  %s9285_s26 = scalar_lea.hbm %s10343_s4, 16896  ;;  %s9294_s7 = scalar_lea.hbm %s10343_s4, 33792 }
  0x39   :  { %129 = vmatprep.subr.mxu0 %v79_v1  ;;  %242 = vmatprep.subr.mxu1 %v81_v2  ;;  %v70_v5 = vld [vmem:[%s10339_s0] sm:$0xff]  ;;  %v399_v7 = vld [vmem:[#allocation10 + $0x28] sm:$0xff]  ;;  %v397_v8 = vld [vmem:[#allocation10 + $0x18] sm:$0xff]  ;;  %p8545_p10 = scmp.ne.s32.totalorder %s10343_s4, %s9285_s26  ;;  %p8547_p11 = scmp.lt.u32.totalorder %s9294_s7, %s9285_s26 }
  0x3a   :  { %130 = vmatpush1.msra.mxu0 %v78_v3  ;;  %243 = vmatpush1.msra.mxu1 %v80_v4  ;;  %v401_v9 = vld [vmem:[#allocation10 + $0x38] sm:$0xff]  ;;  %v8737_v10 = vpack.c.bf16 %v399_v7, %v395_v6  ;;  %v394_v12 = vld [vmem:[#allocation10] sm:$0xff]  ;;  %v396_v14 = vld [vmem:[#allocation10 + $0x10] sm:$0xff]  ;;  %p8548_p12 = scmp.lt.u32.totalorder %s9285_s26, %s10343_s4 }
  0x3b   :  { %6352 = vmatmul.mubr.msk.f32.vlgmr.msra.gmra.mrb[0].mxu0 %vm104_vm0, %v70_v5  ;;  %6360 = vmatmul.mubr.msk.f32.vlgmr.msra.gmra.mrb[0].mxu1 %vm104_vm0, %v70_v5  ;;  %v8739_v11 = vpack.c.bf16 %v401_v9, %v397_v8  ;;  %v398_v13 = vld [vmem:[#allocation10 + $0x20] sm:$0xff]  ;;  %v400_v16 = vld [vmem:[#allocation10 + $0x30] sm:$0xff]  ;;  %v71_v17 = vld [vmem:[%s10339_s0 + $0x8] sm:$0xff] }
  0x3c   :  { %v8741_v15 = vpack.c.bf16 %v398_v13, %v394_v12  ;;  %199 = vmatprep.mubr.f32.mxu0 %v8652_v0  ;;  %312 = vmatprep.mubr.f32.mxu1 %v8652_v0  ;;  %v403_v18 = vld [vmem:[#allocation10 + $0x48] sm:$0xff]  ;;  %v8750_v19 = vpack.c.bf16 %v400_v16, %v396_v14  ;;  %v405_v21 = vld [vmem:[#allocation10 + $0x58] sm:$0xff]  ;;  %v402_v25 = vld [vmem:[#allocation10 + $0x40] sm:$0xff]  ;;  %p8549_p13 = por %p8548_p12, %p8547_p11 }
  0x3d   :  { %6371 = vmatprep.subr.bf16.mxu0 %v8737_v10  ;;  %6403 = vmatprep.subr.bf16.mxu1 %v8739_v11  ;;  %v407_v20 = vld [vmem:[#allocation10 + $0x68] sm:$0xff]  ;;  %v409_v22 = vld [vmem:[#allocation10 + $0x78] sm:$0xff]  ;;  %v406_v26 = vld [vmem:[#allocation10 + $0x60] sm:$0xff] }
  0x3e   :  { %6373 = vmatpush1.bf16.msra.mxu0 %v8741_v15  ;;  %v8753_v23 = vpack.c.bf16 %v407_v20, %v403_v18  ;;  %v8755_v24 = vpack.c.bf16 %v409_v22, %v405_v21  ;;  %v404_v27 = vld [vmem:[#allocation10 + $0x50] sm:$0xff]  ;;  %6405 = vmatpush1.bf16.msra.mxu1 %v8750_v19  ;;  %v8759_v28 = vpack.c.bf16 %v406_v26, %v402_v25  ;;  %v411_v31 = vld [vmem:[#allocation10 + $0x88] sm:$0xff]  ;;  %v413_v34 = vld [vmem:[#allocation10 + $0x98] sm:$0xff]  ;;  %p8550_p0 = pnand %p8549_p13, %p8545_p10 }
  0x3f   :  { %6353 = vmatmul.mubr.msk.f32.gmra.mrb[2].mxu0 %vm104_vm0, %v71_v17  ;;  %v408_v29 = vld [vmem:[#allocation10 + $0x70] sm:$0xff]  ;;  %6361 = vmatmul.mubr.msk.f32.gmra.mrb[2].mxu1 %vm104_vm0, %v71_v17  ;;  %v415_v33 = vld [vmem:[#allocation10 + $0xa8] sm:$0xff]  ;;  %v417_v35 = vld [vmem:[#allocation10 + $0xb8] sm:$0xff] }
  0x40   :  { %v72_v30 = vld [vmem:[%s10339_s0 + $0x10] sm:$0xff]  ;;  %6375 = vmatprep.subr.bf16.mxu0 %v8753_v23  ;;  %v8766_v32 = vpack.c.bf16 %v408_v29, %v404_v27  ;;  %6407 = vmatprep.subr.bf16.mxu1 %v8755_v24  ;;  %v8770_v36 = vpack.c.bf16 %v415_v33, %v411_v31  ;;  %v8772_v37 = vpack.c.bf16 %v417_v35, %v413_v34  ;;  %v410_v38 = vld [vmem:[#allocation10 + $0x80] sm:$0xff]  ;;  %v73_v43 = vld [vmem:[%s10339_s0 + $0x18] sm:$0xff] }
  0x41   :  { %205 = vmatprep.mubr.f32.mxu0 %v8652_v0  ;;  %v414_v39 = vld [vmem:[#allocation10 + $0xa0] sm:$0xff]  ;;  %v412_v40 = vld [vmem:[#allocation10 + $0x90] sm:$0xff]  ;;  %318 = vmatprep.mubr.f32.mxu1 %v8652_v0  ;;  %v419_v44 = vld [vmem:[#allocation10 + $0xc8] sm:$0xff] }
  0x42   :  { %6377 = vmatpush1.bf16.msra.mxu0 %v8759_v28  ;;  %v8776_v41 = vpack.c.bf16 %v414_v39, %v410_v38  ;;  %v416_v42 = vld [vmem:[#allocation10 + $0xb0] sm:$0xff]  ;;  %6409 = vmatpush1.bf16.msra.mxu1 %v8766_v32  ;;  %v423_v46 = vld [vmem:[#allocation10 + $0xe8] sm:$0xff]  ;;  %v421_v47 = vld [vmem:[#allocation10 + $0xd8] sm:$0xff] }
  0x43   :  { %6354 = vmatmul.mubr.msk.f32.gmra.mrb[4].mxu0 %vm104_vm0, %v72_v30  ;;  %v8783_v45 = vpack.c.bf16 %v416_v42, %v412_v40  ;;  %v425_v48 = vld [vmem:[#allocation10 + $0xf8] sm:$0xff]  ;;  %6362 = vmatmul.mubr.msk.f32.gmra.mrb[4].mxu1 %vm104_vm0, %v72_v30  ;;  %v8787_v49 = vpack.c.bf16 %v423_v46, %v419_v44  ;;  %v418_v50 = vld [vmem:[#allocation10 + $0xc0] sm:$0xff]  ;;  %v420_v52 = vld [vmem:[#allocation10 + $0xd0] sm:$0xff] }
  0x44   :  { %6379 = vmatprep.subr.bf16.mxu0 %v8770_v36  ;;  %v422_v51 = vld [vmem:[#allocation10 + $0xe0] sm:$0xff]  ;;  %6411 = vmatprep.subr.bf16.mxu1 %v8772_v37  ;;  %v8791_v53 = vpack.c.bf16 %v425_v48, %v421_v47  ;;  %v424_v54 = vld [vmem:[#allocation10 + $0xf0] sm:$0xff]  ;;  %v427_v55 = vld [vmem:[#allocation10 + $0x108] sm:$0xff] }
  0x45   :  { %211 = vmatprep.mubr.f32.mxu0 %v8652_v0  ;;  %324 = vmatprep.mubr.f32.mxu1 %v8652_v0  ;;  %v8795_v56 = vpack.c.bf16 %v422_v51, %v418_v50  ;;  %v431_v57 = vld [vmem:[#allocation10 + $0x128] sm:$0xff]  ;;  %v429_v58 = vld [vmem:[#allocation10 + $0x118] sm:$0xff]  ;;  %v8799_v60 = vpack.c.bf16 %v424_v54, %v420_v52  ;;  %v426_v61 = vld [vmem:[#allocation10 + $0x100] sm:$0xff] }
  0x46   :  { %6381 = vmatpush1.bf16.msra.mxu0 %v8776_v41  ;;  %v433_v59 = vld [vmem:[#allocation10 + $0x138] sm:$0xff]  ;;  %6413 = vmatpush1.bf16.msra.mxu1 %v8783_v45  ;;  %v430_v62 = vld [vmem:[#allocation10 + $0x120] sm:$0xff]  ;;  %v8806_v1 = vpack.c.bf16 %v431_v57, %v427_v55  ;;  %v428_v2 = vld [vmem:[#allocation10 + $0x110] sm:$0xff] }
  0x47   :  { %6355 = vmatmul.mubr.msk.f32.gmra.mrb[6].mxu0 %vm104_vm0, %v73_v43  ;;  %6363 = vmatmul.mubr.msk.f32.gmra.mrb[6].mxu1 %vm104_vm0, %v73_v43  ;;  %v74_v63 = vld [vmem:[%s10339_s0 + $0x20] sm:$0xff]  ;;  %v432_v3 = vld [vmem:[#allocation10 + $0x130] sm:$0xff]  ;;  %v8810_v4 = vpack.c.bf16 %v433_v59, %v429_v58  ;;  %v435_v5 = vld [vmem:[#allocation10 + $0x148] sm:$0xff]  ;;  %v8814_v7 = vpack.c.bf16 %v430_v62, %v426_v61  ;;  %v84_v62 = vlaneseq }
  0x48   :  { %6383 = vmatprep.subr.bf16.mxu0 %v8787_v49  ;;  %6415 = vmatprep.subr.bf16.mxu1 %v8791_v53  ;;  %v439_v6 = vld [vmem:[#allocation10 + $0x168] sm:$0xff]  ;;  %v437_v8 = vld [vmem:[#allocation10 + $0x158] sm:$0xff]  ;;  %v8818_v12 = vpack.c.bf16 %v432_v3, %v428_v2  ;;  %v434_v13 = vld [vmem:[#allocation10 + $0x140] sm:$0xff] }
  0x49   :  { %217 = vmatprep.mubr.f32.mxu0 %v8652_v0  ;;  %330 = vmatprep.mubr.f32.mxu1 %v8652_v0  ;;  %v441_v9 = vld [vmem:[#allocation10 + $0x178] sm:$0xff]  ;;  %v438_v14 = vld [vmem:[#allocation10 + $0x160] sm:$0xff]  ;;  %v75_v16 = vld [vmem:[%s10339_s0 + $0x28] sm:$0xff]  ;;  %v8825_v17 = vpack.c.bf16 %v439_v6, %v435_v5 }
  0x4a   :  { %6385 = vmatpush1.bf16.msra.mxu0 %v8795_v56  ;;  %6417 = vmatpush1.bf16.msra.mxu1 %v8799_v60  ;;  %v436_v18 = vld [vmem:[#allocation10 + $0x150] sm:$0xff]  ;;  %v8829_v21 = vpack.c.bf16 %v441_v9, %v437_v8  ;;  %v443_v22 = vld [vmem:[#allocation10 + $0x188] sm:$0xff]  ;;  %v8833_v26 = vpack.c.bf16 %v438_v14, %v434_v13  ;;  %v445_v27 = vld [vmem:[#allocation10 + $0x198] sm:$0xff] }
  0x4b   :  { %6356 = vmatmul.mubr.msk.f32.gmra.mrb[8].mxu0 %vm104_vm0, %v74_v63  ;;  %6364 = vmatmul.mubr.msk.f32.gmra.mrb[8].mxu1 %vm104_vm0, %v74_v63  ;;  %v440_v20 = vld [vmem:[#allocation10 + $0x170] sm:$0xff]  ;;  %v447_v25 = vld [vmem:[#allocation10 + $0x1a8] sm:$0xff]  ;;  %v449_v29 = vld [vmem:[#allocation10 + $0x1b8] sm:$0xff]  ;;  %v85_v63 = vshrl.u32 %v84_v62, 7 }
  0x4c   :  { %6387 = vmatprep.subr.bf16.mxu0 %v8806_v1  ;;  %6419 = vmatprep.subr.bf16.mxu1 %v8810_v4  ;;  %v8837_v30 = vpack.c.bf16 %v440_v20, %v436_v18  ;;  %v442_v31 = vld [vmem:[#allocation10 + $0x180] sm:$0xff]  ;;  %v76_v34 = vld [vmem:[%s10339_s0 + $0x30] sm:$0xff]  ;;  %v8844_v35 = vpack.c.bf16 %v447_v25, %v443_v22  ;;  %v8848_v40 = vpack.c.bf16 %v449_v29, %v445_v27  ;;  %v451_v42 = vld [vmem:[#allocation10 + $0x1c8] sm:$0xff] }
  0x4d   :  { %223 = vmatprep.mubr.f32.mxu0 %v8652_v0  ;;  %336 = vmatprep.mubr.f32.mxu1 %v8652_v0  ;;  %v446_v33 = vld [vmem:[#allocation10 + $0x1a0] sm:$0xff]  ;;  %v444_v38 = vld [vmem:[#allocation10 + $0x190] sm:$0xff]  ;;  %v455_v43 = vld [vmem:[#allocation10 + $0x1e8] sm:$0xff]  ;;  %v8922_v2 = vsub.s32 0, %v85_v63  ;;  %v8924_v5 = vsub.s32 1, %v85_v63  ;;  %v8929_v8 = vsub.s32 2, %v85_v63 }
  0x4e   :  { %6389 = vmatpush1.bf16.msra.mxu0 %v8814_v7  ;;  %6421 = vmatpush1.bf16.msra.mxu1 %v8818_v12  ;;  %v448_v39 = vld [vmem:[#allocation10 + $0x1b0] sm:$0xff]  ;;  %v8852_v44 = vpack.c.bf16 %v446_v33, %v442_v31  ;;  %v453_v46 = vld [vmem:[#allocation10 + $0x1d8] sm:$0xff]  ;;  %v450_v50 = vld [vmem:[#allocation10 + $0x1c0] sm:$0xff]  ;;  %v8863_v54 = vpack.c.bf16 %v455_v43, %v451_v42  ;;  %v8938_v18 = vsub.s32 3, %v85_v63 }
  0x4f   :  { %6357 = vmatmul.mubr.msk.f32.gmra.mrb[10].mxu0 %vm104_vm0, %v75_v16  ;;  %6365 = vmatmul.mubr.msk.f32.gmra.mrb[10].mxu1 %vm104_vm0, %v75_v16  ;;  %v457_v47 = vld [vmem:[#allocation10 + $0x1f8] sm:$0xff]  ;;  %v8856_v48 = vpack.c.bf16 %v448_v39, %v444_v38  ;;  %v454_v51 = vld [vmem:[#allocation10 + $0x1e0] sm:$0xff]  ;;  %v452_v55 = vld [vmem:[#allocation10 + $0x1d0] sm:$0xff] }
  0x50   :  { %6391 = vmatprep.subr.bf16.mxu0 %v8825_v17  ;;  %6423 = vmatprep.subr.bf16.mxu1 %v8829_v21  ;;  %v77_v52 = vld [vmem:[%s10339_s0 + $0x38] sm:$0xff]  ;;  %v456_v57 = vld [vmem:[#allocation10 + $0x1f0] sm:$0xff]  ;;  %v8867_v58 = vpack.c.bf16 %v457_v47, %v453_v46  ;;  %v8871_v59 = vpack.c.bf16 %v454_v51, %v450_v50  ;;  %v82_v3 = vld [vmem:[#allocation12] sm:$0xf]  ;;  %s8653_s0 = smov [#allocation5]  }
  0x51   :  { %229 = vmatprep.mubr.f32.mxu0 %v8652_v0  ;;  %342 = vmatprep.mubr.f32.mxu1 %v8652_v0  ;;  %v8875_v61 = vpack.c.bf16 %v456_v57, %v452_v55  ;;  %v8927_v6 = vrot.slane %v82_v3, %v8922_v2  ;;  %v8932_v9 = vrot.slane %v82_v3, %v8924_v5  ;;  %s66_s23 = sshll.u32 %s8653_s0, 4  ;;  %s9280_s23 = int_to_ptr.vmem [resolvable:$true] %s66_s23 }
  0x52   :  { %6393 = vmatpush1.bf16.msra.mxu0 %v8833_v26  ;;  %6425 = vmatpush1.bf16.msra.mxu1 %v8837_v30  ;;  %v8943_v31 = vrot.slane %v82_v3, %v8938_v18 }
  0x53   :  { %6358 = vmatmul.mubr.msk.f32.gmra.mrb[12].mxu0 %vm104_vm0, %v76_v34  ;;  %6366 = vmatmul.mubr.msk.f32.gmra.mrb[12].mxu1 %vm104_vm0, %v76_v34 }
  0x54   :  { %6395 = vmatprep.subr.bf16.mxu0 %v8844_v35  ;;  %6427 = vmatprep.subr.bf16.mxu1 %v8848_v40 }
  0x55   :  { %235 = vmatprep.mubr.f32.mxu0 %v8652_v0  ;;  %348 = vmatprep.mubr.f32.mxu1 %v8652_v0 }
  0x56   :  { %6397 = vmatpush1.bf16.msra.mxu0 %v8852_v44  ;;  %6429 = vmatpush1.bf16.msra.mxu1 %v8856_v48 }
  0x57   :  { %6359 = vmatmul.mubr.msk.f32.gmra.mrb[14].mxu0 %vm104_vm0, %v77_v52  ;;  %6367 = vmatmul.mubr.msk.f32.gmra.mrb[14].mxu1 %vm104_vm0, %v77_v52 }
  0x58   :  { %6399 = vmatprep.subr.bf16.mxu0 %v8863_v54  ;;  %6431 = vmatprep.subr.bf16.mxu1 %v8867_v58 }
  0x59   :  { %522 = vmatprep.mubr.f32.mxu0 %v8652_v0  ;;  %593 = vmatprep.mubr.f32.mxu1 %v8652_v0 }
  0x5a   :  { %6401 = vmatpush1.bf16.msra.mxu0 %v8871_v59  ;;  %6433 = vmatpush1.bf16.msra.mxu1 %v8875_v61 }
  0x5b   :  { %6435 = vmatprep.subr.bf16.mxu0 %v8737_v10  ;;  %6467 = vmatprep.subr.bf16.mxu1 %v8739_v11 }
  0x5d   :  { %523 = vmatmul.mubr.f32.vlgmr.msra.gmra.mrb[0].mxu0 %v8652_v0  ;;  %594 = vmatmul.mubr.f32.vlgmr.msra.gmra.mrb[0].mxu1 %v8652_v0 }
  0x5e   :  { %6437 = vmatpush1.bf16.msra.mxu0 %v8741_v15  ;;  %6469 = vmatpush1.bf16.msra.mxu1 %v8750_v19 }
  0x5f   :  { %6439 = vmatprep.subr.bf16.mxu0 %v8753_v23  ;;  %6471 = vmatprep.subr.bf16.mxu1 %v8755_v24 }
  0x60   :  { %758 = vmatprep.mubr.f32.mxu0 %v8652_v0  ;;  %829 = vmatprep.mubr.f32.mxu1 %v8652_v0 }
  0x62   :  { %6441 = vmatpush1.bf16.msra.mxu0 %v8759_v28  ;;  %6473 = vmatpush1.bf16.msra.mxu1 %v8766_v32 }
  0x63   :  { %6443 = vmatprep.subr.bf16.mxu0 %v8770_v36  ;;  %6475 = vmatprep.subr.bf16.mxu1 %v8772_v37 }
  0x66   :  { %6445 = vmatpush1.bf16.msra.mxu0 %v8776_v41  ;;  %6477 = vmatpush1.bf16.msra.mxu1 %v8783_v45 }
  0x67   :  { %6447 = vmatprep.subr.bf16.mxu0 %v8787_v49  ;;  %6479 = vmatprep.subr.bf16.mxu1 %v8791_v53 }
  0x6a   :  { %6449 = vmatpush1.bf16.msra.mxu0 %v8795_v56  ;;  %6481 = vmatpush1.bf16.msra.mxu1 %v8799_v60 }
  0x6b   :  { %6451 = vmatprep.subr.bf16.mxu0 %v8806_v1  ;;  %6483 = vmatprep.subr.bf16.mxu1 %v8810_v4 }
  0x6e   :  { %6453 = vmatpush1.bf16.msra.mxu0 %v8814_v7  ;;  %6485 = vmatpush1.bf16.msra.mxu1 %v8818_v12 }
  0x6f   :  { %6455 = vmatprep.subr.bf16.mxu0 %v8825_v17  ;;  %6487 = vmatprep.subr.bf16.mxu1 %v8829_v21 }
  0x72   :  { %6457 = vmatpush1.bf16.msra.mxu0 %v8833_v26  ;;  %6489 = vmatpush1.bf16.msra.mxu1 %v8837_v30 }
  0x73   :  { %6459 = vmatprep.subr.bf16.mxu0 %v8844_v35  ;;  %6491 = vmatprep.subr.bf16.mxu1 %v8848_v40 }
  0x76   :  { %6461 = vmatpush1.bf16.msra.mxu0 %v8852_v44  ;;  %6493 = vmatpush1.bf16.msra.mxu1 %v8856_v48 }
  0x77   :  { %6463 = vmatprep.subr.bf16.mxu0 %v8863_v54  ;;  %6495 = vmatprep.subr.bf16.mxu1 %v8867_v58 }
  0x7a   :  { %6465 = vmatpush1.bf16.msra.mxu0 %v8871_v59  ;;  %6497 = vmatpush1.bf16.msra.mxu1 %v8875_v61 }
  0x7b   :  { %6499 = vmatprep.subr.bf16.mxu0 %v8737_v10  ;;  %6531 = vmatprep.subr.bf16.mxu1 %v8739_v11  ;;  %v8936_v11 = vrot.slane %v82_v3, %v8929_v8 }
 0x130   :  { %v524_v13 = vpop.f32.mrb[0].mxu0  ;;  %v595_v14 = vpop.f32.mrb[0].mxu1 }
 0x131   :  { %v8034_v10 = vadd.f32 %v524_v13, %v8927_v6  ;;  %v526_v16 = vpop.f32.mrb[1].mxu0  ;;  %v597_v22 = vpop.f32.mrb[1].mxu1  ;;  %v8050_v29 = vadd.f32 %v595_v14, %v8936_v11 }
 0x132   :  { %v8035_v20 = vadd.f32 %v526_v16, %v8932_v9  ;;  %v8051_v33 = vadd.f32 %v597_v22, %v8943_v31 }
 0x133   :  { %v604_v25 = vmul.f32 0.5, %v8034_v10 }
 0x134   :  { %v608_v27 = vmul.f32 0.5, %v8035_v20  ;;  %v613_v34 = vmul.f32 0.5, %v8051_v33 }
 0x135   :  { %8238 = vtanh.f32 %v604_v25 }
 0x136   :  { %8240 = vtanh.f32 %v608_v27 }
 0x137   :  { %8242 = vtanh.f32 %v8050_v29 }
 0x138   :  { %8244 = vtanh.f32 %v613_v34 }
 0x13f   :  { %v8239_v38 = vpop.eup %8238 }
 0x140   :  { %v8241_v39 = vpop.eup %8240  ;;  %v606_v42 = vmul.f32 0.5, %v8239_v38 }
 0x141   :  { %v610_v43 = vmul.f32 0.5, %v8241_v39  ;;  %v8243_v47 = vpop.eup %8242 }
 0x142   :  { %v607_v46 = vadd.f32 0.5, %v606_v42  ;;  %v8245_v57 = vpop.eup %8244 }
 0x143   :  { %v611_v50 = vadd.f32 0.5, %v610_v43  ;;  %v615_v62 = vmul.f32 0.5, %v8245_v57 }
 0x144   :  { %v618_v51 = vmul.f32 %v8243_v47, %v607_v46 }
 0x145   :  { %v617_v52 = vmul.f32 0.0, %v611_v50  ;;  %v616_v63 = vadd.f32 0.5, %v615_v62  ;;  %v1105_v62 = vld [vmem:[#allocation10 + $0x8] sm:$0xff] }
 0x147   :  { %v8946_v55 = vadd.f32 %v618_v51, %v617_v52 }
 0x149   :  { %8246 = vtanh.f32 %v8946_v55 }
 0x153   :  { %v8247_v3 = vpop.eup %8246 }
 0x154   :  { %v8949_v13 = vmul.f32 %v8247_v3, %v616_v63  ;;  %v1107_v63 = vld [vmem:[#allocation10 + $0x18] sm:$0xff] }
 0x156   :  { %759 = vmatmul.mubr.f32.vlgmr.msra.gmra.mrb[2].mxu0 %v8949_v13  ;;  %830 = vmatmul.mubr.f32.vlgmr.msra.gmra.mrb[2].mxu1 %v8949_v13 }
 0x157   :  { %6501 = vmatpush1.bf16.msra.mxu0 %v8741_v15  ;;  %6533 = vmatpush1.bf16.msra.mxu1 %v8750_v19 }
 0x158   :  { %6503 = vmatprep.subr.bf16.mxu0 %v8753_v23  ;;  %6535 = vmatprep.subr.bf16.mxu1 %v8755_v24 }
 0x159   :  { %995 = vmatprep.mubr.f32.mxu0 %v8652_v0  ;;  %1066 = vmatprep.mubr.f32.mxu1 %v8652_v0 }
 0x15b   :  { %6505 = vmatpush1.bf16.msra.mxu0 %v8759_v28  ;;  %6537 = vmatpush1.bf16.msra.mxu1 %v8766_v32 }
 0x15c   :  { %6507 = vmatprep.subr.bf16.mxu0 %v8770_v36  ;;  %6539 = vmatprep.subr.bf16.mxu1 %v8772_v37 }
 0x15f   :  { %6509 = vmatpush1.bf16.msra.mxu0 %v8776_v41  ;;  %6541 = vmatpush1.bf16.msra.mxu1 %v8783_v45 }
 0x160   :  { %6511 = vmatprep.subr.bf16.mxu0 %v8787_v49  ;;  %6543 = vmatprep.subr.bf16.mxu1 %v8791_v53 }
 0x163   :  { %6513 = vmatpush1.bf16.msra.mxu0 %v8795_v56  ;;  %6545 = vmatpush1.bf16.msra.mxu1 %v8799_v60 }
 0x164   :  { %6515 = vmatprep.subr.bf16.mxu0 %v8806_v1  ;;  %6547 = vmatprep.subr.bf16.mxu1 %v8810_v4 }
 0x167   :  { %6517 = vmatpush1.bf16.msra.mxu0 %v8814_v7  ;;  %6549 = vmatpush1.bf16.msra.mxu1 %v8818_v12 }
 0x168   :  { %6519 = vmatprep.subr.bf16.mxu0 %v8825_v17  ;;  %6551 = vmatprep.subr.bf16.mxu1 %v8829_v21 }
 0x16b   :  { %6521 = vmatpush1.bf16.msra.mxu0 %v8833_v26  ;;  %6553 = vmatpush1.bf16.msra.mxu1 %v8837_v30 }
 0x16c   :  { %6523 = vmatprep.subr.bf16.mxu0 %v8844_v35  ;;  %6555 = vmatprep.subr.bf16.mxu1 %v8848_v40 }
 0x16f   :  { %6525 = vmatpush1.bf16.msra.mxu0 %v8852_v44  ;;  %6557 = vmatpush1.bf16.msra.mxu1 %v8856_v48 }
 0x170   :  { %6527 = vmatprep.subr.bf16.mxu0 %v8863_v54  ;;  %6559 = vmatprep.subr.bf16.mxu1 %v8867_v58 }
 0x173   :  { %6529 = vmatpush1.bf16.msra.mxu0 %v8871_v59  ;;  %6561 = vmatpush1.bf16.msra.mxu1 %v8875_v61 }
 0x229   :  { %v760_v15 = vpop.f32.mrb[2].mxu0  ;;  %v831_v19 = vpop.f32.mrb[2].mxu1 }
 0x22a   :  { %v8036_v23 = vadd.f32 %v760_v15, %v8927_v6  ;;  %v762_v24 = vpop.f32.mrb[3].mxu0  ;;  %v833_v28 = vpop.f32.mrb[3].mxu1  ;;  %v8052_v16 = vadd.f32 %v831_v19, %v8936_v11  ;;  %v1111_v15 = vld [vmem:[#allocation10 + $0x38] sm:$0xff]  ;;  %v1104_v19 = vld [vmem:[#allocation10] sm:$0xff] }
 0x22b   :  { %v8037_v32 = vadd.f32 %v762_v24, %v8932_v9  ;;  %v8053_v20 = vadd.f32 %v833_v28, %v8943_v31  ;;  %v9001_v24 = vpack.c.bf16 %v1111_v15, %v1107_v63  ;;  %v1357_v63 = vld [vmem:[#allocation10 + $0x80] sm:$0xff] }
 0x22c   :  { %v840_v10 = vmul.f32 0.5, %v8036_v23  ;;  %v1108_v23 = vld [vmem:[#allocation10 + $0x20] sm:$0xff] }
 0x22d   :  { %v844_v14 = vmul.f32 0.5, %v8037_v32  ;;  %v849_v22 = vmul.f32 0.5, %v8053_v20  ;;  %v9003_v28 = vpack.c.bf16 %v1108_v23, %v1104_v19  ;;  %v1106_v32 = vld [vmem:[#allocation10 + $0x10] sm:$0xff]  ;;  %6595 = vmatprep.subr.bf16.mxu1 %v9001_v24  ;;  %v1117_v20 = vld [vmem:[#allocation10 + $0x68] sm:$0xff]  ;;  %v1361_v15 = vld [vmem:[#allocation10 + $0xa0] sm:$0xff] }
 0x22e   :  { %8248 = vtanh.f32 %v840_v10  ;;  %v1110_v10 = vld [vmem:[#allocation10 + $0x30] sm:$0xff]  ;;  %v9073_v23 = vpack.c.bf16 %v1361_v15, %v1357_v63  ;;  %v1390_v15 = vld [vmem:[#allocation10 + $0x188] sm:$0xff] }
 0x22f   :  { %8250 = vtanh.f32 %v844_v14  ;;  %v9006_v14 = vpack.c.bf16 %v1110_v10, %v1106_v32  ;;  %v1359_v32 = vld [vmem:[#allocation10 + $0x90] sm:$0xff] }
 0x230   :  { %8252 = vtanh.f32 %v8052_v16  ;;  %v1113_v16 = vld [vmem:[#allocation10 + $0x48] sm:$0xff]  ;;  %v1363_v10 = vld [vmem:[#allocation10 + $0xb0] sm:$0xff] }
 0x231   :  { %8254 = vtanh.f32 %v849_v22  ;;  %v1115_v22 = vld [vmem:[#allocation10 + $0x58] sm:$0xff] }
 0x238   :  { %v8249_v25 = vpop.eup %8248 }
 0x239   :  { %v8251_v27 = vpop.eup %8250  ;;  %v842_v29 = vmul.f32 0.5, %v8249_v25  ;;  %v9011_v25 = vpack.c.bf16 %v1117_v20, %v1113_v16  ;;  %v9076_v16 = vpack.c.bf16 %v1363_v10, %v1359_v32  ;;  %v1366_v20 = vld [vmem:[#allocation10 + $0xc8] sm:$0xff]  ;;  %v1392_v10 = vld [vmem:[#allocation10 + $0x198] sm:$0xff] }
 0x23a   :  { %v846_v33 = vmul.f32 0.5, %v8251_v27  ;;  %v8253_v38 = vpop.eup %8252  ;;  %v1119_v27 = vld [vmem:[#allocation10 + $0x78] sm:$0xff]  ;;  %v1394_v32 = vld [vmem:[#allocation10 + $0x1a8] sm:$0xff] }
 0x23b   :  { %v843_v34 = vadd.f32 0.5, %v842_v29  ;;  %v8255_v47 = vpop.eup %8254  ;;  %v1112_v29 = vld [vmem:[#allocation10 + $0x40] sm:$0xff] }
 0x23c   :  { %v847_v39 = vadd.f32 0.5, %v846_v33  ;;  %v851_v50 = vmul.f32 0.5, %v8255_v47  ;;  %v1116_v33 = vld [vmem:[#allocation10 + $0x60] sm:$0xff] }
 0x23d   :  { %v854_v42 = vmul.f32 %v8253_v38, %v843_v34  ;;  %v9013_v34 = vpack.c.bf16 %v1119_v27, %v1115_v22  ;;  %v9015_v38 = vpack.c.bf16 %v1116_v33, %v1112_v29  ;;  %v1370_v22 = vld [vmem:[#allocation10 + $0xe8] sm:$0xff]  ;;  %v1368_v27 = vld [vmem:[#allocation10 + $0xd8] sm:$0xff] }
 0x23e   :  { %v853_v43 = vmul.f32 %v847_v39, %v8946_v55  ;;  %v852_v51 = vadd.f32 0.5, %v851_v50  ;;  %v1109_v55 = vld [vmem:[#allocation10 + $0x28] sm:$0xff]  ;;  %v1114_v39 = vld [vmem:[#allocation10 + $0x50] sm:$0xff]  ;;  %v9081_v29 = vpack.c.bf16 %v1370_v22, %v1366_v20  ;;  %v1372_v33 = vld [vmem:[#allocation10 + $0xf8] sm:$0xff]  ;;  %v9117_v20 = vpack.c.bf16 %v1394_v32, %v1390_v15 }
 0x23f   :  { %v8999_v3 = vpack.c.bf16 %v1109_v55, %v1105_v62  ;;  %v1364_v55 = vld [vmem:[#allocation10 + $0xb8] sm:$0xff] }
 0x240   :  { %v8990_v46 = vadd.f32 %v854_v42, %v853_v43  ;;  %v1118_v42 = vld [vmem:[#allocation10 + $0x70] sm:$0xff]  ;;  %v1396_v22 = vld [vmem:[#allocation10 + $0x1b8] sm:$0xff] }
 0x241   :  { %6563 = vmatprep.subr.bf16.mxu0 %v8999_v3  ;;  %v9018_v43 = vpack.c.bf16 %v1118_v42, %v1114_v39  ;;  %v1365_v39 = vld [vmem:[#allocation10 + $0xc0] sm:$0xff] }
 0x242   :  { %8256 = vtanh.f32 %v8990_v46  ;;  %v1369_v42 = vld [vmem:[#allocation10 + $0xe0] sm:$0xff] }
 0x24c   :  { %v8257_v52 = vpop.eup %8256 }
 0x24d   :  { %v8993_v57 = vmul.f32 %v8257_v52, %v852_v51  ;;  %v1362_v51 = vld [vmem:[#allocation10 + $0xa8] sm:$0xff]  ;;  %v1360_v52 = vld [vmem:[#allocation10 + $0x98] sm:$0xff] }
 0x24e   :  { %v9071_v19 = vpack.c.bf16 %v1364_v55, %v1360_v52  ;;  %v1383_v52 = vld [vmem:[#allocation10 + $0x150] sm:$0xff] }
 0x24f   :  { %996 = vmatmul.mubr.f32.vlgmr.msra.gmra.mrb[4].mxu0 %v8993_v57  ;;  %1067 = vmatmul.mubr.f32.vlgmr.msra.gmra.mrb[4].mxu1 %v8993_v57  ;;  %v1387_v55 = vld [vmem:[#allocation10 + $0x170] sm:$0xff] }
 0x250   :  { %1232 = vmatprep.mubr.f32.mxu0 %v8652_v0  ;;  %1303 = vmatprep.mubr.f32.mxu1 %v8652_v0  ;;  %v9112_v63 = vpack.c.bf16 %v1387_v55, %v1383_v52 }
 0x251   :  { %6565 = vmatpush1.bf16.msra.mxu0 %v9003_v28  ;;  %6597 = vmatpush1.bf16.msra.mxu1 %v9006_v14 }
 0x252   :  { %6567 = vmatprep.subr.bf16.mxu0 %v9011_v25  ;;  %6599 = vmatprep.subr.bf16.mxu1 %v9013_v34 }
 0x255   :  { %6569 = vmatpush1.bf16.msra.mxu0 %v9015_v38  ;;  %6601 = vmatpush1.bf16.msra.mxu1 %v9018_v43 }
 0x256   :  { %6571 = vmatprep.subr.bf16.mxu0 %v8770_v36  ;;  %6603 = vmatprep.subr.bf16.mxu1 %v8772_v37 }
 0x259   :  { %6573 = vmatpush1.bf16.msra.mxu0 %v8776_v41  ;;  %6605 = vmatpush1.bf16.msra.mxu1 %v8783_v45 }
 0x25a   :  { %6575 = vmatprep.subr.bf16.mxu0 %v8787_v49  ;;  %6607 = vmatprep.subr.bf16.mxu1 %v8791_v53 }
 0x25d   :  { %6577 = vmatpush1.bf16.msra.mxu0 %v8795_v56  ;;  %6609 = vmatpush1.bf16.msra.mxu1 %v8799_v60 }
 0x25e   :  { %6579 = vmatprep.subr.bf16.mxu0 %v8806_v1  ;;  %6611 = vmatprep.subr.bf16.mxu1 %v8810_v4 }
 0x261   :  { %6581 = vmatpush1.bf16.msra.mxu0 %v8814_v7  ;;  %6613 = vmatpush1.bf16.msra.mxu1 %v8818_v12 }
 0x262   :  { %6583 = vmatprep.subr.bf16.mxu0 %v8825_v17  ;;  %6615 = vmatprep.subr.bf16.mxu1 %v8829_v21 }
 0x265   :  { %6585 = vmatpush1.bf16.msra.mxu0 %v8833_v26  ;;  %6617 = vmatpush1.bf16.msra.mxu1 %v8837_v30 }
 0x266   :  { %6587 = vmatprep.subr.bf16.mxu0 %v8844_v35  ;;  %6619 = vmatprep.subr.bf16.mxu1 %v8848_v40 }
 0x269   :  { %6589 = vmatpush1.bf16.msra.mxu0 %v8852_v44  ;;  %6621 = vmatpush1.bf16.msra.mxu1 %v8856_v48 }
 0x26a   :  { %6591 = vmatprep.subr.bf16.mxu0 %v8863_v54  ;;  %6623 = vmatprep.subr.bf16.mxu1 %v8867_v58 }
 0x26d   :  { %6593 = vmatpush1.bf16.msra.mxu0 %v8871_v59  ;;  %6625 = vmatpush1.bf16.msra.mxu1 %v8875_v61 }
 0x26e   :  { %6627 = vmatprep.subr.bf16.mxu0 %v8999_v3  ;;  %6659 = vmatprep.subr.bf16.mxu1 %v9001_v24 }
 0x322   :  { %v997_v36 = vpop.f32.mrb[4].mxu0  ;;  %v1068_v37 = vpop.f32.mrb[4].mxu1 }
 0x323   :  { %v8038_v41 = vadd.f32 %v997_v36, %v8927_v6  ;;  %v999_v45 = vpop.f32.mrb[5].mxu0  ;;  %v1070_v49 = vpop.f32.mrb[5].mxu1  ;;  %v8054_v1 = vadd.f32 %v1068_v37, %v8936_v11  ;;  %v9083_v36 = vpack.c.bf16 %v1372_v33, %v1368_v27  ;;  %v9085_v37 = vpack.c.bf16 %v1369_v42, %v1365_v39  ;;  %v1389_v27 = vld [vmem:[#allocation10 + $0x180] sm:$0xff] }
 0x324   :  { %v8039_v53 = vadd.f32 %v999_v45, %v8932_v9  ;;  %v8055_v4 = vadd.f32 %v1070_v49, %v8943_v31  ;;  %v1371_v45 = vld [vmem:[#allocation10 + $0xf0] sm:$0xff]  ;;  %v1393_v33 = vld [vmem:[#allocation10 + $0x1a0] sm:$0xff]  ;;  %v9119_v39 = vpack.c.bf16 %v1396_v22, %v1392_v10 }
 0x325   :  { %v1077_v56 = vmul.f32 0.5, %v8038_v41  ;;  %v1367_v41 = vld [vmem:[#allocation10 + $0xd0] sm:$0xff]  ;;  %v9121_v42 = vpack.c.bf16 %v1393_v33, %v1389_v27 }
 0x326   :  { %v1081_v60 = vmul.f32 0.5, %v8039_v53  ;;  %v1086_v7 = vmul.f32 0.5, %v8055_v4  ;;  %v9088_v49 = vpack.c.bf16 %v1371_v45, %v1367_v41  ;;  %v1374_v53 = vld [vmem:[#allocation10 + $0x108] sm:$0xff]  ;;  %v1380_v4 = vld [vmem:[#allocation10 + $0x138] sm:$0xff]  ;;  %v1391_v41 = vld [vmem:[#allocation10 + $0x190] sm:$0xff] }
 0x327   :  { %8258 = vtanh.f32 %v1077_v56  ;;  %v1378_v56 = vld [vmem:[#allocation10 + $0x128] sm:$0xff]  ;;  %v1395_v45 = vld [vmem:[#allocation10 + $0x1b0] sm:$0xff] }
 0x328   :  { %8260 = vtanh.f32 %v1081_v60  ;;  %v1376_v60 = vld [vmem:[#allocation10 + $0x118] sm:$0xff] }
 0x329   :  { %8262 = vtanh.f32 %v8054_v1  ;;  %v9093_v1 = vpack.c.bf16 %v1378_v56, %v1374_v53  ;;  %v9124_v53 = vpack.c.bf16 %v1395_v45, %v1391_v41  ;;  %v1398_v56 = vld [vmem:[#allocation10 + $0x1c8] sm:$0xff] }
 0x32a   :  { %8264 = vtanh.f32 %v1086_v7  ;;  %v1373_v7 = vld [vmem:[#allocation10 + $0x100] sm:$0xff] }
 0x331   :  { %v8259_v12 = vpop.eup %8258 }
 0x332   :  { %v8261_v17 = vpop.eup %8260  ;;  %v1079_v21 = vmul.f32 0.5, %v8259_v12  ;;  %v1377_v12 = vld [vmem:[#allocation10 + $0x120] sm:$0xff] }
 0x333   :  { %v1083_v26 = vmul.f32 0.5, %v8261_v17  ;;  %v8263_v35 = vpop.eup %8262  ;;  %v9095_v17 = vpack.c.bf16 %v1380_v4, %v1376_v60  ;;  %v1402_v60 = vld [vmem:[#allocation10 + $0x1e8] sm:$0xff]  ;;  %v1400_v4 = vld [vmem:[#allocation10 + $0x1d8] sm:$0xff] }
 0x334   :  { %v1080_v30 = vadd.f32 0.5, %v1079_v21  ;;  %v8265_v58 = vpop.eup %8264  ;;  %v9097_v21 = vpack.c.bf16 %v1377_v12, %v1373_v7  ;;  %v9129_v7 = vpack.c.bf16 %v1402_v60, %v1398_v56  ;;  %v1404_v12 = vld [vmem:[#allocation10 + $0x1f8] sm:$0xff] }
 0x335   :  { %v1084_v40 = vadd.f32 0.5, %v1083_v26  ;;  %v1088_v59 = vmul.f32 0.5, %v8265_v58  ;;  %v1375_v26 = vld [vmem:[#allocation10 + $0x110] sm:$0xff] }
 0x336   :  { %v1091_v44 = vmul.f32 %v8263_v35, %v1080_v30  ;;  %v1379_v30 = vld [vmem:[#allocation10 + $0x130] sm:$0xff] }
 0x337   :  { %v1090_v48 = vmul.f32 %v1084_v40, %v8990_v46  ;;  %v1089_v61 = vadd.f32 0.5, %v1088_v59  ;;  %v1358_v46 = vld [vmem:[#allocation10 + $0x88] sm:$0xff]  ;;  %v9100_v35 = vpack.c.bf16 %v1379_v30, %v1375_v26  ;;  %v1388_v59 = vld [vmem:[#allocation10 + $0x178] sm:$0xff]  ;;  %v1397_v26 = vld [vmem:[#allocation10 + $0x1c0] sm:$0xff] }
 0x338   :  { %v9069_v62 = vpack.c.bf16 %v1362_v51, %v1358_v46  ;;  %v1382_v40 = vld [vmem:[#allocation10 + $0x148] sm:$0xff]  ;;  %v1401_v30 = vld [vmem:[#allocation10 + $0x1e0] sm:$0xff] }
 0x339   :  { %v9054_v54 = vadd.f32 %v1091_v44, %v1090_v48  ;;  %v1386_v44 = vld [vmem:[#allocation10 + $0x168] sm:$0xff]  ;;  %v1384_v48 = vld [vmem:[#allocation10 + $0x158] sm:$0xff] }
 0x33a   :  { %v9105_v58 = vpack.c.bf16 %v1386_v44, %v1382_v40  ;;  %v9107_v46 = vpack.c.bf16 %v1388_v59, %v1384_v48  ;;  %v9131_v40 = vpack.c.bf16 %v1404_v12, %v1400_v4  ;;  %v9133_v44 = vpack.c.bf16 %v1401_v30, %v1397_v26  ;;  %v1399_v48 = vld [vmem:[#allocation10 + $0x1d0] sm:$0xff] }
 0x33b   :  { %8266 = vtanh.f32 %v9054_v54  ;;  %v1403_v59 = vld [vmem:[#allocation10 + $0x1f0] sm:$0xff] }
 0x345   :  { %v8267_v47 = vpop.eup %8266 }
 0x346   :  { %v9057_v50 = vmul.f32 %v8267_v47, %v1089_v61  ;;  %v1381_v61 = vld [vmem:[#allocation10 + $0x140] sm:$0xff] }
 0x347   :  { %v1385_v47 = vld [vmem:[#allocation10 + $0x160] sm:$0xff] }
 0x348   :  { %1233 = vmatmul.mubr.f32.vlgmr.msra.gmra.mrb[6].mxu0 %v9057_v50  ;;  %1304 = vmatmul.mubr.f32.vlgmr.msra.gmra.mrb[6].mxu1 %v9057_v50  ;;  %v9109_v51 = vpack.c.bf16 %v1385_v47, %v1381_v61  ;;  %v9136_v61 = vpack.c.bf16 %v1403_v59, %v1399_v48 }
 0x349   :  { %6629 = vmatpush1.bf16.msra.mxu0 %v9003_v28  ;;  %6661 = vmatpush1.bf16.msra.mxu1 %v9006_v14 }
 0x34a   :  { %6631 = vmatprep.subr.bf16.mxu0 %v9011_v25  ;;  %6663 = vmatprep.subr.bf16.mxu1 %v9013_v34 }
 0x34b   :  { %1469 = vmatprep.mubr.f32.mxu0 %v8652_v0  ;;  %1540 = vmatprep.mubr.f32.mxu1 %v8652_v0 }
 0x34d   :  { %6633 = vmatpush1.bf16.msra.mxu0 %v9015_v38  ;;  %6665 = vmatpush1.bf16.msra.mxu1 %v9018_v43 }
 0x34e   :  { %6635 = vmatprep.subr.bf16.mxu0 %v9069_v62  ;;  %6667 = vmatprep.subr.bf16.mxu1 %v9071_v19 }
 0x351   :  { %6637 = vmatpush1.bf16.msra.mxu0 %v9073_v23  ;;  %6669 = vmatpush1.bf16.msra.mxu1 %v9076_v16 }
 0x352   :  { %6639 = vmatprep.subr.bf16.mxu0 %v9081_v29  ;;  %6671 = vmatprep.subr.bf16.mxu1 %v9083_v36 }
 0x355   :  { %6641 = vmatpush1.bf16.msra.mxu0 %v9085_v37  ;;  %6673 = vmatpush1.bf16.msra.mxu1 %v9088_v49 }
 0x356   :  { %6643 = vmatprep.subr.bf16.mxu0 %v9093_v1  ;;  %6675 = vmatprep.subr.bf16.mxu1 %v9095_v17 }
 0x359   :  { %6645 = vmatpush1.bf16.msra.mxu0 %v9097_v21  ;;  %6677 = vmatpush1.bf16.msra.mxu1 %v9100_v35 }
 0x35a   :  { %6647 = vmatprep.subr.bf16.mxu0 %v9105_v58  ;;  %6679 = vmatprep.subr.bf16.mxu1 %v9107_v46 }
 0x35d   :  { %6649 = vmatpush1.bf16.msra.mxu0 %v9109_v51  ;;  %6681 = vmatpush1.bf16.msra.mxu1 %v9112_v63 }
 0x35e   :  { %6651 = vmatprep.subr.bf16.mxu0 %v9117_v20  ;;  %6683 = vmatprep.subr.bf16.mxu1 %v9119_v39 }
 0x361   :  { %6653 = vmatpush1.bf16.msra.mxu0 %v9121_v42  ;;  %6685 = vmatpush1.bf16.msra.mxu1 %v9124_v53 }
 0x362   :  { %6655 = vmatprep.subr.bf16.mxu0 %v9129_v7  ;;  %6687 = vmatprep.subr.bf16.mxu1 %v9131_v40 }
 0x365   :  { %6657 = vmatpush1.bf16.msra.mxu0 %v9133_v44  ;;  %6689 = vmatpush1.bf16.msra.mxu1 %v9136_v61 }
 0x366   :  { %6691 = vmatprep.subr.bf16.mxu0 %v8999_v3  ;;  %6723 = vmatprep.subr.bf16.mxu1 %v9001_v24 }
 0x41b   :  { %v1234_v47 = vpop.f32.mrb[6].mxu0  ;;  %v1305_v52 = vpop.f32.mrb[6].mxu1 }
 0x41c   :  { %v8040_v55 = vadd.f32 %v1234_v47, %v8927_v6  ;;  %v1236_v15 = vpop.f32.mrb[7].mxu0  ;;  %v1307_v32 = vpop.f32.mrb[7].mxu1  ;;  %v8056_v33 = vadd.f32 %v1305_v52, %v8936_v11 }
 0x41d   :  { %v8041_v10 = vadd.f32 %v1236_v15, %v8932_v9  ;;  %v8057_v41 = vadd.f32 %v1307_v32, %v8943_v31 }
 0x41e   :  { %v1314_v22 = vmul.f32 0.5, %v8040_v55 }
 0x41f   :  { %v1318_v27 = vmul.f32 0.5, %v8041_v10  ;;  %v1323_v45 = vmul.f32 0.5, %v8057_v41 }
 0x420   :  { %8268 = vtanh.f32 %v1314_v22 }
 0x421   :  { %8270 = vtanh.f32 %v1318_v27 }
 0x422   :  { %8272 = vtanh.f32 %v8056_v33 }
 0x423   :  { %8274 = vtanh.f32 %v1323_v45 }
 0x42a   :  { %v8269_v56 = vpop.eup %8268 }
 0x42b   :  { %v8271_v60 = vpop.eup %8270  ;;  %v1316_v4 = vmul.f32 0.5, %v8269_v56 }
 0x42c   :  { %v1320_v12 = vmul.f32 0.5, %v8271_v60  ;;  %v8273_v30 = vpop.eup %8272 }
 0x42d   :  { %v1317_v26 = vadd.f32 0.5, %v1316_v4  ;;  %v8275_v52 = vpop.eup %8274 }
 0x42e   :  { %v1321_v48 = vadd.f32 0.5, %v1320_v12  ;;  %v1325_v15 = vmul.f32 0.5, %v8275_v52 }
 0x42f   :  { %v1328_v59 = vmul.f32 %v8273_v30, %v1317_v26 }
 0x430   :  { %v1327_v47 = vmul.f32 %v1321_v48, %v9054_v54  ;;  %v1326_v10 = vadd.f32 0.5, %v1325_v15 }
 0x432   :  { %v9148_v55 = vadd.f32 %v1328_v59, %v1327_v47 }
 0x434   :  { %8276 = vtanh.f32 %v9148_v55 }
 0x43e   :  { %v8277_v32 = vpop.eup %8276 }
 0x43f   :  { %v9151_v22 = vmul.f32 %v8277_v32, %v1326_v10 }
 0x441   :  { %1470 = vmatmul.mubr.f32.vlgmr.msra.gmra.mrb[8].mxu0 %v9151_v22  ;;  %1541 = vmatmul.mubr.f32.vlgmr.msra.gmra.mrb[8].mxu1 %v9151_v22 }
 0x442   :  { %6693 = vmatpush1.bf16.msra.mxu0 %v9003_v28  ;;  %6725 = vmatpush1.bf16.msra.mxu1 %v9006_v14 }
 0x443   :  { %6695 = vmatprep.subr.bf16.mxu0 %v9011_v25  ;;  %6727 = vmatprep.subr.bf16.mxu1 %v9013_v34 }
 0x444   :  { %1706 = vmatprep.mubr.f32.mxu0 %v8652_v0  ;;  %1777 = vmatprep.mubr.f32.mxu1 %v8652_v0 }
 0x446   :  { %6697 = vmatpush1.bf16.msra.mxu0 %v9015_v38  ;;  %6729 = vmatpush1.bf16.msra.mxu1 %v9018_v43 }
 0x447   :  { %6699 = vmatprep.subr.bf16.mxu0 %v9069_v62  ;;  %6731 = vmatprep.subr.bf16.mxu1 %v9071_v19 }
 0x44a   :  { %6701 = vmatpush1.bf16.msra.mxu0 %v9073_v23  ;;  %6733 = vmatpush1.bf16.msra.mxu1 %v9076_v16 }
 0x44b   :  { %6703 = vmatprep.subr.bf16.mxu0 %v9081_v29  ;;  %6735 = vmatprep.subr.bf16.mxu1 %v9083_v36 }
 0x44e   :  { %6705 = vmatpush1.bf16.msra.mxu0 %v9085_v37  ;;  %6737 = vmatpush1.bf16.msra.mxu1 %v9088_v49 }
 0x44f   :  { %6707 = vmatprep.subr.bf16.mxu0 %v9093_v1  ;;  %6739 = vmatprep.subr.bf16.mxu1 %v9095_v17 }
 0x452   :  { %6709 = vmatpush1.bf16.msra.mxu0 %v9097_v21  ;;  %6741 = vmatpush1.bf16.msra.mxu1 %v9100_v35 }
 0x453   :  { %6711 = vmatprep.subr.bf16.mxu0 %v9105_v58  ;;  %6743 = vmatprep.subr.bf16.mxu1 %v9107_v46 }
 0x456   :  { %6713 = vmatpush1.bf16.msra.mxu0 %v9109_v51  ;;  %6745 = vmatpush1.bf16.msra.mxu1 %v9112_v63 }
 0x457   :  { %6715 = vmatprep.subr.bf16.mxu0 %v9117_v20  ;;  %6747 = vmatprep.subr.bf16.mxu1 %v9119_v39 }
 0x45a   :  { %6717 = vmatpush1.bf16.msra.mxu0 %v9121_v42  ;;  %6749 = vmatpush1.bf16.msra.mxu1 %v9124_v53 }
 0x45b   :  { %6719 = vmatprep.subr.bf16.mxu0 %v9129_v7  ;;  %6751 = vmatprep.subr.bf16.mxu1 %v9131_v40 }
 0x45e   :  { %6721 = vmatpush1.bf16.msra.mxu0 %v9133_v44  ;;  %6753 = vmatpush1.bf16.msra.mxu1 %v9136_v61 }
 0x45f   :  { %6755 = vmatprep.subr.bf16.mxu0 %v8999_v3  ;;  %6787 = vmatprep.subr.bf16.mxu1 %v9001_v24 }
 0x514   :  { %v1471_v54 = vpop.f32.mrb[8].mxu0  ;;  %v1542_v27 = vpop.f32.mrb[8].mxu1 }
 0x515   :  { %v8042_v33 = vadd.f32 %v1471_v54, %v8927_v6  ;;  %v1473_v41 = vpop.f32.mrb[9].mxu0  ;;  %v1544_v45 = vpop.f32.mrb[9].mxu1  ;;  %v8058_v12 = vadd.f32 %v1542_v27, %v8936_v11 }
 0x516   :  { %v8043_v56 = vadd.f32 %v1473_v41, %v8932_v9  ;;  %v8059_v26 = vadd.f32 %v1544_v45, %v8943_v31 }
 0x517   :  { %v1551_v60 = vmul.f32 0.5, %v8042_v33 }
 0x518   :  { %v1555_v4 = vmul.f32 0.5, %v8043_v56  ;;  %v1560_v3 = vmul.f32 0.5, %v8059_v26 }
 0x519   :  { %8278 = vtanh.f32 %v1551_v60 }
 0x51a   :  { %8280 = vtanh.f32 %v1555_v4 }
 0x51b   :  { %8282 = vtanh.f32 %v8058_v12 }
 0x51c   :  { %8284 = vtanh.f32 %v1560_v3 }
 0x523   :  { %v8279_v30 = vpop.eup %8278 }
 0x524   :  { %v8281_v24 = vpop.eup %8280  ;;  %v1553_v48 = vmul.f32 0.5, %v8279_v30 }
 0x525   :  { %v1557_v59 = vmul.f32 0.5, %v8281_v24  ;;  %v8283_v52 = vpop.eup %8282 }
 0x526   :  { %v1554_v47 = vadd.f32 0.5, %v1553_v48  ;;  %v8285_v27 = vpop.eup %8284 }
 0x527   :  { %v1558_v15 = vadd.f32 0.5, %v1557_v59  ;;  %v1562_v33 = vmul.f32 0.5, %v8285_v27 }
 0x528   :  { %v1565_v10 = vmul.f32 %v8283_v52, %v1554_v47 }
 0x529   :  { %v1564_v32 = vmul.f32 %v1558_v15, %v9148_v55  ;;  %v1563_v41 = vadd.f32 0.5, %v1562_v33 }
 0x52b   :  { %v9194_v54 = vadd.f32 %v1565_v10, %v1564_v32 }
 0x52d   :  { %8286 = vtanh.f32 %v9194_v54 }
 0x537   :  { %v8287_v45 = vpop.eup %8286 }
 0x538   :  { %v9197_v56 = vmul.f32 %v8287_v45, %v1563_v41 }
 0x53a   :  { %1707 = vmatmul.mubr.f32.vlgmr.msra.gmra.mrb[10].mxu0 %v9197_v56  ;;  %1778 = vmatmul.mubr.f32.vlgmr.msra.gmra.mrb[10].mxu1 %v9197_v56 }
 0x53b   :  { %6757 = vmatpush1.bf16.msra.mxu0 %v9003_v28  ;;  %6789 = vmatpush1.bf16.msra.mxu1 %v9006_v14 }
 0x53c   :  { %6759 = vmatprep.subr.bf16.mxu0 %v9011_v25  ;;  %6791 = vmatprep.subr.bf16.mxu1 %v9013_v34 }
 0x53d   :  { %1943 = vmatprep.mubr.f32.mxu0 %v8652_v0  ;;  %2014 = vmatprep.mubr.f32.mxu1 %v8652_v0 }
 0x53f   :  { %6761 = vmatpush1.bf16.msra.mxu0 %v9015_v38  ;;  %6793 = vmatpush1.bf16.msra.mxu1 %v9018_v43 }
 0x540   :  { %6763 = vmatprep.subr.bf16.mxu0 %v9069_v62  ;;  %6795 = vmatprep.subr.bf16.mxu1 %v9071_v19 }
 0x543   :  { %6765 = vmatpush1.bf16.msra.mxu0 %v9073_v23  ;;  %6797 = vmatpush1.bf16.msra.mxu1 %v9076_v16 }
 0x544   :  { %6767 = vmatprep.subr.bf16.mxu0 %v9081_v29  ;;  %6799 = vmatprep.subr.bf16.mxu1 %v9083_v36 }
 0x547   :  { %6769 = vmatpush1.bf16.msra.mxu0 %v9085_v37  ;;  %6801 = vmatpush1.bf16.msra.mxu1 %v9088_v49 }
 0x548   :  { %6771 = vmatprep.subr.bf16.mxu0 %v9093_v1  ;;  %6803 = vmatprep.subr.bf16.mxu1 %v9095_v17 }
 0x54b   :  { %6773 = vmatpush1.bf16.msra.mxu0 %v9097_v21  ;;  %6805 = vmatpush1.bf16.msra.mxu1 %v9100_v35 }
 0x54c   :  { %6775 = vmatprep.subr.bf16.mxu0 %v9105_v58  ;;  %6807 = vmatprep.subr.bf16.mxu1 %v9107_v46 }
 0x54f   :  { %6777 = vmatpush1.bf16.msra.mxu0 %v9109_v51  ;;  %6809 = vmatpush1.bf16.msra.mxu1 %v9112_v63 }
 0x550   :  { %6779 = vmatprep.subr.bf16.mxu0 %v9117_v20  ;;  %6811 = vmatprep.subr.bf16.mxu1 %v9119_v39 }
 0x553   :  { %6781 = vmatpush1.bf16.msra.mxu0 %v9121_v42  ;;  %6813 = vmatpush1.bf16.msra.mxu1 %v9124_v53 }
 0x554   :  { %6783 = vmatprep.subr.bf16.mxu0 %v9129_v7  ;;  %6815 = vmatprep.subr.bf16.mxu1 %v9131_v40 }
 0x557   :  { %6785 = vmatpush1.bf16.msra.mxu0 %v9133_v44  ;;  %6817 = vmatpush1.bf16.msra.mxu1 %v9136_v61 }
 0x60d   :  { %v1708_v28 = vpop.f32.mrb[10].mxu0  ;;  %v1779_v14 = vpop.f32.mrb[10].mxu1 }
 0x60e   :  { %v8044_v25 = vadd.f32 %v1708_v28, %v8927_v6  ;;  %v1710_v34 = vpop.f32.mrb[11].mxu0  ;;  %v1781_v38 = vpop.f32.mrb[11].mxu1  ;;  %v8060_v4 = vadd.f32 %v1779_v14, %v8936_v11  ;;  %v2053_v14 = vld [vmem:[#allocation10 + $0x8] sm:$0xff] }
 0x60f   :  { %v8045_v43 = vadd.f32 %v1710_v34, %v8932_v9  ;;  %v8061_v12 = vadd.f32 %v1781_v38, %v8943_v31  ;;  %v2059_v38 = vld [vmem:[#allocation10 + $0x38] sm:$0xff] }
 0x610   :  { %v1788_v55 = vmul.f32 0.5, %v8044_v25  ;;  %v2055_v25 = vld [vmem:[#allocation10 + $0x18] sm:$0xff] }
 0x611   :  { %v1792_v60 = vmul.f32 0.5, %v8045_v43  ;;  %v1797_v26 = vmul.f32 0.5, %v8061_v12  ;;  %v2052_v43 = vld [vmem:[#allocation10] sm:$0xff]  ;;  %v2054_v12 = vld [vmem:[#allocation10 + $0x10] sm:$0xff] }
 0x612   :  { %8288 = vtanh.f32 %v1788_v55  ;;  %v2056_v55 = vld [vmem:[#allocation10 + $0x20] sm:$0xff] }
 0x613   :  { %8290 = vtanh.f32 %v1792_v60  ;;  %v6850_v60 = vpack.c.bf16 %v2059_v38, %v2055_v25 }
 0x614   :  { %8292 = vtanh.f32 %v8060_v4  ;;  %v6820_v4 = vpack.c.bf16 %v2056_v55, %v2052_v43 }
 0x615   :  { %8294 = vtanh.f32 %v1797_v26  ;;  %v2058_v26 = vld [vmem:[#allocation10 + $0x30] sm:$0xff]  ;;  %6851 = vmatprep.subr.bf16.mxu1 %v6850_v60 }
 0x61c   :  { %v8289_v3 = vpop.eup %8288 }
 0x61d   :  { %v8291_v30 = vpop.eup %8290  ;;  %v1790_v24 = vmul.f32 0.5, %v8289_v3  ;;  %v6852_v3 = vpack.c.bf16 %v2058_v26, %v2054_v12 }
 0x61e   :  { %v1794_v48 = vmul.f32 0.5, %v8291_v30  ;;  %v8293_v47 = vpop.eup %8292  ;;  %v2061_v30 = vld [vmem:[#allocation10 + $0x48] sm:$0xff] }
 0x61f   :  { %v1791_v59 = vadd.f32 0.5, %v1790_v24  ;;  %v8295_v27 = vpop.eup %8294  ;;  %v2065_v24 = vld [vmem:[#allocation10 + $0x68] sm:$0xff] }
 0x620   :  { %v1795_v52 = vadd.f32 0.5, %v1794_v48  ;;  %v1799_v33 = vmul.f32 0.5, %v8295_v27  ;;  %v2063_v48 = vld [vmem:[#allocation10 + $0x58] sm:$0xff] }
 0x621   :  { %v1802_v15 = vmul.f32 %v8293_v47, %v1791_v59  ;;  %v6822_v59 = vpack.c.bf16 %v2065_v24, %v2061_v30  ;;  %v2067_v47 = vld [vmem:[#allocation10 + $0x78] sm:$0xff] }
 0x622   :  { %v1801_v10 = vmul.f32 %v1795_v52, %v9194_v54  ;;  %v1800_v41 = vadd.f32 0.5, %v1799_v33  ;;  %v2057_v54 = vld [vmem:[#allocation10 + $0x28] sm:$0xff]  ;;  %v2060_v52 = vld [vmem:[#allocation10 + $0x40] sm:$0xff]  ;;  %v2062_v33 = vld [vmem:[#allocation10 + $0x50] sm:$0xff] }
 0x623   :  { %v6818_v34 = vpack.c.bf16 %v2057_v54, %v2053_v14 }
 0x624   :  { %v9238_v32 = vadd.f32 %v1802_v15, %v1801_v10  ;;  %v2064_v15 = vld [vmem:[#allocation10 + $0x60] sm:$0xff]  ;;  %v6854_v10 = vpack.c.bf16 %v2067_v47, %v2063_v48 }
 0x625   :  { %6819 = vmatprep.subr.bf16.mxu0 %v6818_v34  ;;  %v6824_v27 = vpack.c.bf16 %v2064_v15, %v2060_v52 }
 0x626   :  { %8296 = vtanh.f32 %v9238_v32 }
 0x630   :  { %v8297_v45 = vpop.eup %8296 }
 0x631   :  { %v9241_v28 = vmul.f32 %v8297_v45, %v1800_v41  ;;  %v2066_v41 = vld [vmem:[#allocation10 + $0x70] sm:$0xff] }
 0x632   :  { %v6856_v45 = vpack.c.bf16 %v2066_v41, %v2062_v33 }
 0x633   :  { %1944 = vmatmul.mubr.f32.vlgmr.msra.gmra.mrb[12].mxu0 %v9241_v28  ;;  %2015 = vmatmul.mubr.f32.vlgmr.msra.gmra.mrb[12].mxu1 %v9241_v28 }
 0x634   :  { %2180 = vmatprep.mubr.f32.mxu0 %v8652_v0  ;;  %2251 = vmatprep.mubr.f32.mxu1 %v8652_v0 }
 0x635   :  { %6821 = vmatpush1.bf16.msra.mxu0 %v6820_v4  ;;  %6853 = vmatpush1.bf16.msra.mxu1 %v6852_v3 }
 0x636   :  { %6823 = vmatprep.subr.bf16.mxu0 %v6822_v59  ;;  %6855 = vmatprep.subr.bf16.mxu1 %v6854_v10 }
 0x639   :  { %6825 = vmatpush1.bf16.msra.mxu0 %v6824_v27  ;;  %6857 = vmatpush1.bf16.msra.mxu1 %v6856_v45 }
 0x63a   :  { %6827 = vmatprep.subr.bf16.mxu0 %v9069_v62  ;;  %6859 = vmatprep.subr.bf16.mxu1 %v9071_v19 }
 0x63d   :  { %6829 = vmatpush1.bf16.msra.mxu0 %v9073_v23  ;;  %6861 = vmatpush1.bf16.msra.mxu1 %v9076_v16 }
 0x63e   :  { %6831 = vmatprep.subr.bf16.mxu0 %v9081_v29  ;;  %6863 = vmatprep.subr.bf16.mxu1 %v9083_v36 }
 0x641   :  { %6833 = vmatpush1.bf16.msra.mxu0 %v9085_v37  ;;  %6865 = vmatpush1.bf16.msra.mxu1 %v9088_v49 }
 0x642   :  { %6835 = vmatprep.subr.bf16.mxu0 %v9093_v1  ;;  %6867 = vmatprep.subr.bf16.mxu1 %v9095_v17 }
 0x645   :  { %6837 = vmatpush1.bf16.msra.mxu0 %v9097_v21  ;;  %6869 = vmatpush1.bf16.msra.mxu1 %v9100_v35 }
 0x646   :  { %6839 = vmatprep.subr.bf16.mxu0 %v9105_v58  ;;  %6871 = vmatprep.subr.bf16.mxu1 %v9107_v46 }
 0x649   :  { %6841 = vmatpush1.bf16.msra.mxu0 %v9109_v51  ;;  %6873 = vmatpush1.bf16.msra.mxu1 %v9112_v63 }
 0x64a   :  { %6843 = vmatprep.subr.bf16.mxu0 %v9117_v20  ;;  %6875 = vmatprep.subr.bf16.mxu1 %v9119_v39 }
 0x64d   :  { %6845 = vmatpush1.bf16.msra.mxu0 %v9121_v42  ;;  %6877 = vmatpush1.bf16.msra.mxu1 %v9124_v53 }
 0x64e   :  { %6847 = vmatprep.subr.bf16.mxu0 %v9129_v7  ;;  %6879 = vmatprep.subr.bf16.mxu1 %v9131_v40 }
 0x651   :  { %6849 = vmatpush1.bf16.msra.mxu0 %v9133_v44  ;;  %6881 = vmatpush1.bf16.msra.mxu1 %v9136_v61 }
 0x706   :  { %v1945_v62 = vpop.f32.mrb[12].mxu0  ;;  %v2016_v19 = vpop.f32.mrb[12].mxu1 }
 0x707   :  { %v8046_v23 = vadd.f32 %v1945_v62, %v8927_v6  ;;  %v1947_v16 = vpop.f32.mrb[13].mxu0  ;;  %v2018_v29 = vpop.f32.mrb[13].mxu1  ;;  %v8062_v1 = vadd.f32 %v2016_v19, %v8936_v11 }
 0x708   :  { %v8047_v36 = vadd.f32 %v1947_v16, %v8932_v9  ;;  %v8063_v17 = vadd.f32 %v2018_v29, %v8943_v31 }
 0x709   :  { %v2025_v37 = vmul.f32 0.5, %v8046_v23 }
 0x70a   :  { %v2029_v49 = vmul.f32 0.5, %v8047_v36  ;;  %v2034_v21 = vmul.f32 0.5, %v8063_v17 }
 0x70b   :  { %8298 = vtanh.f32 %v2025_v37 }
 0x70c   :  { %8300 = vtanh.f32 %v2029_v49 }
 0x70d   :  { %8302 = vtanh.f32 %v8062_v1 }
 0x70e   :  { %8304 = vtanh.f32 %v2034_v21 }
 0x715   :  { %v8299_v35 = vpop.eup %8298 }
 0x716   :  { %v8301_v58 = vpop.eup %8300  ;;  %v2027_v46 = vmul.f32 0.5, %v8299_v35 }
 0x717   :  { %v2031_v51 = vmul.f32 0.5, %v8301_v58  ;;  %v8303_v20 = vpop.eup %8302 }
 0x718   :  { %v2028_v63 = vadd.f32 0.5, %v2027_v46  ;;  %v8305_v40 = vpop.eup %8304 }
 0x719   :  { %v2032_v39 = vadd.f32 0.5, %v2031_v51  ;;  %v2036_v44 = vmul.f32 0.5, %v8305_v40 }
 0x71a   :  { %v2039_v42 = vmul.f32 %v8303_v20, %v2028_v63 }
 0x71b   :  { %v2038_v53 = vmul.f32 %v2032_v39, %v9238_v32  ;;  %v2037_v61 = vadd.f32 0.5, %v2036_v44 }
 0x71d   :  { %v2040_v7 = vadd.f32 %v2039_v42, %v2038_v53 }
 0x71f   :  { %8306 = vtanh.f32 %v2040_v7 }
 0x729   :  { %v8307_v14 = vpop.eup %8306 }
 0x72a   :  { %v9276_v54 = vmul.f32 %v8307_v14, %v2037_v61 }
 0x72c   :  { %2181 = vmatmul.mubr.f32.vlgmr.msra.gmra.mrb[14].mxu0 %v9276_v54  ;;  %2252 = vmatmul.mubr.f32.vlgmr.msra.gmra.mrb[14].mxu1 %v9276_v54 }
 0x72d   :  { %8553 = shalt.err (!%p8550_p0)  }
 0x72e   :  { %s8554_s3 = scalar_lea.vmem %s9280_s23, 16896  ;;  %s8558_s11 = scalar_lea.vmem %s9280_s23, 33792 }
 0x72f   :  { %p8555_p1 = scmp.ne.s32.totalorder %s9280_s23, %s8554_s3  ;;  %p8559_p2 = scmp.lt.s32.totalorder %s9280_s23, %s9280_s23 }
 0x730   :  { %p8560_p3 = scmp.lt.s32.totalorder %s8558_s11, %s8554_s3 }
 0x732   :  { %p8561_p4 = por %p8560_p3, %p8559_p2 }
 0x734   :  { %p8562_p5 = pnand %p8561_p4, %p8555_p1 }
 0x736   :  { %8565 = shalt.err (!%p8562_p5)  }
 0x737   :  { %69 = dma.hbm_to_vmem [thread:$0]  %s10343_s4, 16896, %s9280_s23, [#allocation6] }
 0x7ff   :  { %v2182_v32 = vpop.f32.mrb[14].mxu0  ;;  %v2253_v25 = vpop.f32.mrb[14].mxu1 }
 0x800   :  { %v8048_v34 = vadd.f32 %v2182_v32, %v8927_v6  ;;  %v2184_v38 = vpop.f32.mrb[15].mxu0  ;;  %v2255_v43 = vpop.f32.mrb[15].mxu1  ;;  %v8064_v12 = vadd.f32 %v2253_v25, %v8936_v11 }
 0x801   :  { %v8049_v55 = vadd.f32 %v2184_v38, %v8932_v9  ;;  %v8065_v26 = vadd.f32 %v2255_v43, %v8943_v31 }
 0x802   :  { %v2262_v60 = vmul.f32 0.5, %v8048_v34 }
 0x803   :  { %v2266_v4 = vmul.f32 0.5, %v8049_v55  ;;  %v2271_v3 = vmul.f32 0.5, %v8065_v26 }
 0x804   :  { %8308 = vtanh.f32 %v2262_v60 }
 0x805   :  { %8310 = vtanh.f32 %v2266_v4 }
 0x806   :  { %8312 = vtanh.f32 %v8064_v12 }
 0x807   :  { %8314 = vtanh.f32 %v2271_v3 }
 0x80e   :  { %v8309_v30 = vpop.eup %8308 }
 0x80f   :  { %v8311_v24 = vpop.eup %8310  ;;  %v2264_v48 = vmul.f32 0.5, %v8309_v30 }
 0x810   :  { %v2268_v59 = vmul.f32 0.5, %v8311_v24  ;;  %v8313_v47 = vpop.eup %8312 }
 0x811   :  { %v2265_v6 = vadd.f32 0.5, %v2264_v48  ;;  %v8315_v27 = vpop.eup %8314 }
 0x812   :  { %v2269_v52 = vadd.f32 0.5, %v2268_v59  ;;  %v2273_v11 = vmul.f32 0.5, %v8315_v27 }
 0x813   :  { %v2276_v15 = vmul.f32 %v8313_v47, %v2265_v6 }
 0x814   :  { %v2275_v9 = vmul.f32 %v2269_v52, %v2040_v7  ;;  %v2274_v33 = vadd.f32 0.5, %v2273_v11 }
 0x816   :  { %v2277_v10 = vadd.f32 %v2276_v15, %v2275_v9 }
 0x818   :  { %8316 = vtanh.f32 %v2277_v10  ;;  %2283 = vst [vmem:[#allocation14] sm:$0xff] %v2277_v10 }
 0x822   :  { %v8317_v41 = vpop.eup %8316 }
 0x823   :  { %v9325_v45 = vmul.f32 %v8317_v41, %v2274_v33 }
 0x825   :  { %2282 = vst [vmem:[#allocation13] sm:$0xff] %v9325_v45 }
 0x826   :  { %8639 = dma.done.wait [#allocation6], 16896 }
 0x827   :  { %8640 = vsyncadd [#allocation6], 4294950400  ;;  %2461 = vmatprep.mubr.f32.mxu0 %v8652_v0  ;;  %2574 = vmatprep.mubr.f32.mxu1 %v8652_v0  ;;  %s8654_s14 = smov [#allocation5 + $0x420]   ;;  %p8567_p6 = scmp.ne.s32.totalorder %s9285_s26, %s9294_s7 }
 0x828   :  { %s2298_s15 = sshll.u32 %s8654_s14, 4  ;;  %p8570_p7 = scmp.lt.u32.totalorder %s9294_s7, %s9294_s7  ;;  %s2299_s15 = int_to_ptr.vmem [resolvable:$true] %s2298_s15 }
 0x82a   :  { %p8571_p8 = por %p8570_p7, %p8548_p12 }
 0x82c   :  { %p8573_p9 = por %p8571_p8, %p8547_p11 }
 0x82e   :  { %p8574_p10 = pnand %p8573_p9, %p8567_p6 }
 0x830   :  { %8577 = shalt.err (!%p8574_p10)  }
 0x831   :  { %s8578_s18 = scalar_lea.vmem %s2299_s15, 16896  ;;  %p8583_p0 = scmp.lt.s32.totalorder %s2299_s15, %s9280_s23 }
 0x832   :  { %p8579_p13 = scmp.ne.s32.totalorder %s2299_s15, %s8578_s18  ;;  %p8584_p1 = scmp.lt.s32.totalorder %s8558_s11, %s8578_s18 }
 0x834   :  { %p8585_p2 = por %p8584_p1, %p8583_p0 }
 0x836   :  { %p8586_p3 = pnand %p8585_p2, %p8579_p13 }
 0x838   :  { %8589 = shalt.err (!%p8586_p3)  }
 0x839   :  { %2301 = dma.hbm_to_vmem [thread:$0]  %s9285_s26, 16896, %s2299_s15, [#allocation6 + $0x1] }
 0x83a   :  { %v2311_v31 = vld [vmem:[#allocation5 + $0x8] sm:$0xff]  ;;  %v2313_v19 = vld [vmem:[#allocation5 + $0x18] sm:$0xff]  ;;  %v2310_v29 = vld [vmem:[#allocation5] sm:$0xff] }
 0x83b   :  { %v2315_v62 = vld [vmem:[#allocation5 + $0x28] sm:$0xff]  ;;  %v2317_v16 = vld [vmem:[#allocation5 + $0x38] sm:$0xff]  ;;  %v2314_v36 = vld [vmem:[#allocation5 + $0x20] sm:$0xff] }
 0x83c   :  { %v6882_v23 = vpack.c.bf16 %v2315_v62, %v2311_v31  ;;  %v6914_v37 = vpack.c.bf16 %v2317_v16, %v2313_v19  ;;  %v6884_v49 = vpack.c.bf16 %v2314_v36, %v2310_v29  ;;  %v2312_v1 = vld [vmem:[#allocation5 + $0x10] sm:$0xff]  ;;  %v2319_v21 = vld [vmem:[#allocation5 + $0x48] sm:$0xff]  ;;  %v2321_v46 = vld [vmem:[#allocation5 + $0x58] sm:$0xff] }
 0x83d   :  { %v2316_v17 = vld [vmem:[#allocation5 + $0x30] sm:$0xff]  ;;  %v2323_v58 = vld [vmem:[#allocation5 + $0x68] sm:$0xff]  ;;  %v2325_v51 = vld [vmem:[#allocation5 + $0x78] sm:$0xff] }
 0x83e   :  { %6883 = vmatprep.subr.bf16.mxu0 %v6882_v23  ;;  %v6916_v35 = vpack.c.bf16 %v2316_v17, %v2312_v1  ;;  %6915 = vmatprep.subr.bf16.mxu1 %v6914_v37  ;;  %v6886_v63 = vpack.c.bf16 %v2323_v58, %v2319_v21  ;;  %v6918_v20 = vpack.c.bf16 %v2325_v51, %v2321_v46  ;;  %v2318_v39 = vld [vmem:[#allocation5 + $0x40] sm:$0xff]  ;;  %v2320_v53 = vld [vmem:[#allocation5 + $0x50] sm:$0xff]  ;;  %v2327_v44 = vld [vmem:[#allocation5 + $0x88] sm:$0xff] }
 0x83f   :  { %6885 = vmatpush1.bf16.msra.mxu0 %v6884_v49  ;;  %v2322_v42 = vld [vmem:[#allocation5 + $0x60] sm:$0xff]  ;;  %v2324_v40 = vld [vmem:[#allocation5 + $0x70] sm:$0xff]  ;;  %v2331_v61 = vld [vmem:[#allocation5 + $0xa8] sm:$0xff] }
 0x840   :  { %6917 = vmatpush1.bf16.msra.mxu1 %v6916_v35  ;;  %v6888_v7 = vpack.c.bf16 %v2322_v42, %v2318_v39  ;;  %6887 = vmatprep.subr.bf16.mxu0 %v6886_v63  ;;  %v6920_v14 = vpack.c.bf16 %v2324_v40, %v2320_v53  ;;  %v6890_v32 = vpack.c.bf16 %v2331_v61, %v2327_v44  ;;  %v2329_v25 = vld [vmem:[#allocation5 + $0x98] sm:$0xff]  ;;  %v2326_v38 = vld [vmem:[#allocation5 + $0x80] sm:$0xff]  ;;  %v2328_v60 = vld [vmem:[#allocation5 + $0x90] sm:$0xff] }
 0x841   :  { %6919 = vmatprep.subr.bf16.mxu1 %v6918_v20  ;;  %v2333_v34 = vld [vmem:[#allocation5 + $0xb8] sm:$0xff]  ;;  %v2330_v55 = vld [vmem:[#allocation5 + $0xa0] sm:$0xff]  ;;  %v2332_v4 = vld [vmem:[#allocation5 + $0xb0] sm:$0xff] }
 0x842   :  { %v6922_v43 = vpack.c.bf16 %v2333_v34, %v2329_v25  ;;  %v6892_v12 = vpack.c.bf16 %v2330_v55, %v2326_v38  ;;  %v2335_v26 = vld [vmem:[#allocation5 + $0xc8] sm:$0xff]  ;;  %v2337_v30 = vld [vmem:[#allocation5 + $0xd8] sm:$0xff]  ;;  %v6924_v24 = vpack.c.bf16 %v2332_v4, %v2328_v60  ;;  %v2334_v6 = vld [vmem:[#allocation5 + $0xc0] sm:$0xff] }
 0x843   :  { %6889 = vmatpush1.bf16.msra.mxu0 %v6888_v7  ;;  %v2339_v3 = vld [vmem:[#allocation5 + $0xe8] sm:$0xff]  ;;  %v2341_v59 = vld [vmem:[#allocation5 + $0xf8] sm:$0xff]  ;;  %v2338_v47 = vld [vmem:[#allocation5 + $0xe0] sm:$0xff] }
 0x844   :  { %6921 = vmatpush1.bf16.msra.mxu1 %v6920_v14  ;;  %6891 = vmatprep.subr.bf16.mxu0 %v6890_v32  ;;  %v6894_v48 = vpack.c.bf16 %v2339_v3, %v2335_v26  ;;  %v6926_v52 = vpack.c.bf16 %v2341_v59, %v2337_v30  ;;  %v2336_v15 = vld [vmem:[#allocation5 + $0xd0] sm:$0xff]  ;;  %v2343_v10 = vld [vmem:[#allocation5 + $0x108] sm:$0xff]  ;;  %v2345_v11 = vld [vmem:[#allocation5 + $0x118] sm:$0xff]  ;;  %v6896_v41 = vpack.c.bf16 %v2338_v47, %v2334_v6 }
 0x845   :  { %6923 = vmatprep.subr.bf16.mxu1 %v6922_v43  ;;  %v2340_v9 = vld [vmem:[#allocation5 + $0xf0] sm:$0xff]  ;;  %v2347_v27 = vld [vmem:[#allocation5 + $0x128] sm:$0xff]  ;;  %v2349_v33 = vld [vmem:[#allocation5 + $0x138] sm:$0xff] }
 0x846   :  { %v6928_v31 = vpack.c.bf16 %v2340_v9, %v2336_v15  ;;  %v6898_v62 = vpack.c.bf16 %v2347_v27, %v2343_v10  ;;  %v2342_v19 = vld [vmem:[#allocation5 + $0x100] sm:$0xff]  ;;  %v2344_v16 = vld [vmem:[#allocation5 + $0x110] sm:$0xff]  ;;  %v6930_v29 = vpack.c.bf16 %v2349_v33, %v2345_v11  ;;  %v2351_v37 = vld [vmem:[#allocation5 + $0x148] sm:$0xff] }
 0x847   :  { %6893 = vmatpush1.bf16.msra.mxu0 %v6892_v12  ;;  %v2346_v23 = vld [vmem:[#allocation5 + $0x120] sm:$0xff]  ;;  %v2348_v36 = vld [vmem:[#allocation5 + $0x130] sm:$0xff]  ;;  %v2355_v49 = vld [vmem:[#allocation5 + $0x168] sm:$0xff] }
 0x848   :  { %6925 = vmatpush1.bf16.msra.mxu1 %v6924_v24  ;;  %6895 = vmatprep.subr.bf16.mxu0 %v6894_v48  ;;  %v2353_v1 = vld [vmem:[#allocation5 + $0x158] sm:$0xff]  ;;  %v6900_v21 = vpack.c.bf16 %v2346_v23, %v2342_v19  ;;  %v6932_v35 = vpack.c.bf16 %v2348_v36, %v2344_v16  ;;  %v6902_v58 = vpack.c.bf16 %v2355_v49, %v2351_v37  ;;  %v2350_v46 = vld [vmem:[#allocation5 + $0x140] sm:$0xff]  ;;  %v2352_v63 = vld [vmem:[#allocation5 + $0x150] sm:$0xff] }
 0x849   :  { %6927 = vmatprep.subr.bf16.mxu1 %v6926_v52  ;;  %v2357_v17 = vld [vmem:[#allocation5 + $0x178] sm:$0xff]  ;;  %v2354_v51 = vld [vmem:[#allocation5 + $0x160] sm:$0xff]  ;;  %v2356_v39 = vld [vmem:[#allocation5 + $0x170] sm:$0xff] }
 0x84a   :  { %v6934_v20 = vpack.c.bf16 %v2357_v17, %v2353_v1  ;;  %v2359_v42 = vld [vmem:[#allocation5 + $0x188] sm:$0xff]  ;;  %v2361_v7 = vld [vmem:[#allocation5 + $0x198] sm:$0xff]  ;;  %v6904_v44 = vpack.c.bf16 %v2354_v51, %v2350_v46  ;;  %v6936_v61 = vpack.c.bf16 %v2356_v39, %v2352_v63  ;;  %v2358_v32 = vld [vmem:[#allocation5 + $0x180] sm:$0xff] }
 0x84b   :  { %6897 = vmatpush1.bf16.msra.mxu0 %v6896_v41  ;;  %v2363_v53 = vld [vmem:[#allocation5 + $0x1a8] sm:$0xff]  ;;  %v2365_v40 = vld [vmem:[#allocation5 + $0x1b8] sm:$0xff]  ;;  %v2362_v25 = vld [vmem:[#allocation5 + $0x1a0] sm:$0xff] }
 0x84c   :  { %6929 = vmatpush1.bf16.msra.mxu1 %v6928_v31  ;;  %6899 = vmatprep.subr.bf16.mxu0 %v6898_v62  ;;  %v6906_v14 = vpack.c.bf16 %v2363_v53, %v2359_v42  ;;  %v2360_v34 = vld [vmem:[#allocation5 + $0x190] sm:$0xff]  ;;  %v6938_v38 = vpack.c.bf16 %v2365_v40, %v2361_v7  ;;  %v2367_v55 = vld [vmem:[#allocation5 + $0x1c8] sm:$0xff]  ;;  %v2369_v4 = vld [vmem:[#allocation5 + $0x1d8] sm:$0xff]  ;;  %v6908_v26 = vpack.c.bf16 %v2362_v25, %v2358_v32 }
 0x84d   :  { %6931 = vmatprep.subr.bf16.mxu1 %v6930_v29  ;;  %v2364_v43 = vld [vmem:[#allocation5 + $0x1b0] sm:$0xff]  ;;  %v2371_v60 = vld [vmem:[#allocation5 + $0x1e8] sm:$0xff]  ;;  %v2373_v12 = vld [vmem:[#allocation5 + $0x1f8] sm:$0xff] }
 0x84e   :  { %v6940_v3 = vpack.c.bf16 %v2364_v43, %v2360_v34  ;;  %v6910_v30 = vpack.c.bf16 %v2371_v60, %v2367_v55  ;;  %v2366_v24 = vld [vmem:[#allocation5 + $0x1c0] sm:$0xff]  ;;  %v2368_v59 = vld [vmem:[#allocation5 + $0x1d0] sm:$0xff]  ;;  %v6942_v6 = vpack.c.bf16 %v2373_v12, %v2369_v4  ;;  %v2660_v52 = vld [vmem:[#allocation5 + $0x208] sm:$0xff] }
 0x84f   :  { %6901 = vmatpush1.bf16.msra.mxu0 %v6900_v21  ;;  %v2370_v48 = vld [vmem:[#allocation5 + $0x1e0] sm:$0xff]  ;;  %v2372_v47 = vld [vmem:[#allocation5 + $0x1f0] sm:$0xff]  ;;  %v2664_v15 = vld [vmem:[#allocation5 + $0x228] sm:$0xff] }
 0x850   :  { %6933 = vmatpush1.bf16.msra.mxu1 %v6932_v35  ;;  %6903 = vmatprep.subr.bf16.mxu0 %v6902_v58  ;;  %v2662_v9 = vld [vmem:[#allocation5 + $0x218] sm:$0xff]  ;;  %v6912_v27 = vpack.c.bf16 %v2370_v48, %v2366_v24  ;;  %v6944_v11 = vpack.c.bf16 %v2372_v47, %v2368_v59  ;;  %v9346_v33 = vpack.c.bf16 %v2664_v15, %v2660_v52  ;;  %v2659_v41 = vld [vmem:[#allocation5 + $0x200] sm:$0xff]  ;;  %v2661_v19 = vld [vmem:[#allocation5 + $0x210] sm:$0xff] }
 0x851   :  { %6935 = vmatprep.subr.bf16.mxu1 %v6934_v20  ;;  %v2666_v10 = vld [vmem:[#allocation5 + $0x238] sm:$0xff]  ;;  %v2663_v31 = vld [vmem:[#allocation5 + $0x220] sm:$0xff]  ;;  %v2665_v23 = vld [vmem:[#allocation5 + $0x230] sm:$0xff] }
 0x852   :  { %v9348_v62 = vpack.c.bf16 %v2666_v10, %v2662_v9  ;;  %v2668_v16 = vld [vmem:[#allocation5 + $0x248] sm:$0xff]  ;;  %v9350_v36 = vpack.c.bf16 %v2663_v31, %v2659_v41  ;;  %v2670_v37 = vld [vmem:[#allocation5 + $0x258] sm:$0xff]  ;;  %v9353_v1 = vpack.c.bf16 %v2665_v23, %v2661_v19  ;;  %v2667_v17 = vld [vmem:[#allocation5 + $0x240] sm:$0xff] }
 0x853   :  { %6905 = vmatpush1.bf16.msra.mxu0 %v6904_v44  ;;  %v2672_v29 = vld [vmem:[#allocation5 + $0x268] sm:$0xff]  ;;  %v2674_v49 = vld [vmem:[#allocation5 + $0x278] sm:$0xff]  ;;  %v2671_v21 = vld [vmem:[#allocation5 + $0x260] sm:$0xff] }
 0x854   :  { %6937 = vmatpush1.bf16.msra.mxu1 %v6936_v61  ;;  %6907 = vmatprep.subr.bf16.mxu0 %v6906_v14  ;;  %v9356_v35 = vpack.c.bf16 %v2672_v29, %v2668_v16  ;;  %v2669_v58 = vld [vmem:[#allocation5 + $0x250] sm:$0xff]  ;;  %v9359_v51 = vpack.c.bf16 %v2674_v49, %v2670_v37  ;;  %v2676_v63 = vld [vmem:[#allocation5 + $0x288] sm:$0xff]  ;;  %v9363_v39 = vpack.c.bf16 %v2671_v21, %v2667_v17  ;;  %v2678_v42 = vld [vmem:[#allocation5 + $0x298] sm:$0xff] }
 0x855   :  { %6939 = vmatprep.subr.bf16.mxu1 %v6938_v38  ;;  %v2673_v46 = vld [vmem:[#allocation5 + $0x270] sm:$0xff]  ;;  %v2680_v20 = vld [vmem:[#allocation5 + $0x2a8] sm:$0xff]  ;;  %v2682_v53 = vld [vmem:[#allocation5 + $0x2b8] sm:$0xff] }
 0x856   :  { %v9367_v7 = vpack.c.bf16 %v2673_v46, %v2669_v58  ;;  %v2675_v40 = vld [vmem:[#allocation5 + $0x280] sm:$0xff]  ;;  %v9371_v61 = vpack.c.bf16 %v2680_v20, %v2676_v63  ;;  %v2681_v14 = vld [vmem:[#allocation5 + $0x2b0] sm:$0xff]  ;;  %v9375_v32 = vpack.c.bf16 %v2682_v53, %v2678_v42  ;;  %v2684_v25 = vld [vmem:[#allocation5 + $0x2c8] sm:$0xff] }
 0x857   :  { %6909 = vmatpush1.bf16.msra.mxu0 %v6908_v26  ;;  %v2679_v44 = vld [vmem:[#allocation5 + $0x2a0] sm:$0xff]  ;;  %v2688_v34 = vld [vmem:[#allocation5 + $0x2e8] sm:$0xff]  ;;  %v2686_v43 = vld [vmem:[#allocation5 + $0x2d8] sm:$0xff] }
 0x858   :  { %6941 = vmatpush1.bf16.msra.mxu1 %v6940_v3  ;;  %6911 = vmatprep.subr.bf16.mxu0 %v6910_v30  ;;  %v9379_v38 = vpack.c.bf16 %v2679_v44, %v2675_v40  ;;  %v2690_v55 = vld [vmem:[#allocation5 + $0x2f8] sm:$0xff]  ;;  %v2683_v4 = vld [vmem:[#allocation5 + $0x2c0] sm:$0xff]  ;;  %v9387_v26 = vpack.c.bf16 %v2688_v34, %v2684_v25  ;;  %v2689_v3 = vld [vmem:[#allocation5 + $0x2f0] sm:$0xff] }
 0x859   :  { %6943 = vmatprep.subr.bf16.mxu1 %v6942_v6  ;;  %v2687_v12 = vld [vmem:[#allocation5 + $0x2e0] sm:$0xff]  ;;  %v9391_v30 = vpack.c.bf16 %v2690_v55, %v2686_v43  ;;  %v2692_v24 = vld [vmem:[#allocation5 + $0x308] sm:$0xff]  ;;  %v2694_v6 = vld [vmem:[#allocation5 + $0x318] sm:$0xff] }
 0x85a   :  { %v2696_v48 = vld [vmem:[#allocation5 + $0x328] sm:$0xff]  ;;  %v9395_v59 = vpack.c.bf16 %v2687_v12, %v2683_v4  ;;  %v2698_v47 = vld [vmem:[#allocation5 + $0x338] sm:$0xff]  ;;  %v2691_v15 = vld [vmem:[#allocation5 + $0x300] sm:$0xff] }
 0x85b   :  { %6913 = vmatpush1.bf16.msra.mxu0 %v6912_v27  ;;  %v2695_v9 = vld [vmem:[#allocation5 + $0x320] sm:$0xff]  ;;  %v9403_v10 = vpack.c.bf16 %v2696_v48, %v2692_v24  ;;  %v2697_v27 = vld [vmem:[#allocation5 + $0x330] sm:$0xff]  ;;  %v2700_v41 = vld [vmem:[#allocation5 + $0x348] sm:$0xff] }
 0x85c   :  { %6945 = vmatpush1.bf16.msra.mxu1 %v6944_v11  ;;  %6947 = vmatprep.subr.bf16.mxu0 %v9346_v33  ;;  %v9407_v11 = vpack.c.bf16 %v2698_v47, %v2694_v6  ;;  %v2704_v31 = vld [vmem:[#allocation5 + $0x368] sm:$0xff]  ;;  %v9411_v19 = vpack.c.bf16 %v2695_v9, %v2691_v15  ;;  %v2702_v23 = vld [vmem:[#allocation5 + $0x358] sm:$0xff]  ;;  %v2699_v37 = vld [vmem:[#allocation5 + $0x340] sm:$0xff] }
 0x85d   :  { %6979 = vmatprep.subr.bf16.mxu1 %v9348_v62  ;;  %v2706_v16 = vld [vmem:[#allocation5 + $0x378] sm:$0xff]  ;;  %v2703_v49 = vld [vmem:[#allocation5 + $0x360] sm:$0xff]  ;;  %v9419_v17 = vpack.c.bf16 %v2704_v31, %v2700_v41  ;;  %v2705_v21 = vld [vmem:[#allocation5 + $0x370] sm:$0xff] }
 0x85e   :  { %2462 = vmatmul.mubr.f32.vlgmr.msra.gmra.mrb[16].mxu0 %v8949_v13  ;;  %v9423_v58 = vpack.c.bf16 %v2706_v16, %v2702_v23  ;;  %v2708_v46 = vld [vmem:[#allocation5 + $0x388] sm:$0xff]  ;;  %v9427_v20 = vpack.c.bf16 %v2703_v49, %v2699_v37  ;;  %v2710_v42 = vld [vmem:[#allocation5 + $0x398] sm:$0xff]  ;;  %v2707_v44 = vld [vmem:[#allocation5 + $0x380] sm:$0xff] }
 0x85f   :  { %2575 = vmatmul.mubr.f32.vlgmr.msra.gmra.mrb[16].mxu1 %v8949_v13  ;;  %6949 = vmatpush1.bf16.msra.mxu0 %v9350_v36  ;;  %v2677_v13 = vld [vmem:[#allocation5 + $0x290] sm:$0xff]  ;;  %v2712_v63 = vld [vmem:[#allocation5 + $0x3a8] sm:$0xff]  ;;  %v2714_v53 = vld [vmem:[#allocation5 + $0x3b8] sm:$0xff] }
 0x860   :  { %6981 = vmatpush1.bf16.msra.mxu1 %v9353_v1  ;;  %2467 = vmatprep.mubr.f32.mxu0 %v8652_v0  ;;  %v9383_v60 = vpack.c.bf16 %v2681_v14, %v2677_v13  ;;  %v2711_v13 = vld [vmem:[#allocation5 + $0x3a0] sm:$0xff]  ;;  %v9435_v14 = vpack.c.bf16 %v2712_v63, %v2708_v46  ;;  %v2713_v25 = vld [vmem:[#allocation5 + $0x3b0] sm:$0xff]  ;;  %v9439_v34 = vpack.c.bf16 %v2714_v53, %v2710_v42  ;;  %v2716_v43 = vld [vmem:[#allocation5 + $0x3c8] sm:$0xff] }
 0x861   :  { %2580 = vmatprep.mubr.f32.mxu1 %v8652_v0  ;;  %6951 = vmatprep.subr.bf16.mxu0 %v9356_v35  ;;  %v2720_v55 = vld [vmem:[#allocation5 + $0x3e8] sm:$0xff]  ;;  %v9443_v4 = vpack.c.bf16 %v2711_v13, %v2707_v44  ;;  %v2718_v12 = vld [vmem:[#allocation5 + $0x3d8] sm:$0xff]  ;;  %v2715_v24 = vld [vmem:[#allocation5 + $0x3c0] sm:$0xff] }
 0x862   :  { %2468 = vmatmul.mubr.f32.gmra.mrb[18].mxu0 %v8993_v57  ;;  %6983 = vmatprep.subr.bf16.mxu1 %v9359_v51  ;;  %v2719_v48 = vld [vmem:[#allocation5 + $0x3e0] sm:$0xff]  ;;  %v9451_v6 = vpack.c.bf16 %v2720_v55, %v2716_v43  ;;  %v2721_v47 = vld [vmem:[#allocation5 + $0x3f0] sm:$0xff] }
 0x863   :  { %2581 = vmatmul.mubr.f32.gmra.mrb[18].mxu1 %v8993_v57  ;;  %6953 = vmatpush1.bf16.msra.mxu0 %v9363_v39  ;;  %v2685_v57 = vld [vmem:[#allocation5 + $0x2d0] sm:$0xff]  ;;  %v9459_v9 = vpack.c.bf16 %v2719_v48, %v2715_v24 }
 0x864   :  { %6985 = vmatpush1.bf16.msra.mxu1 %v9367_v7  ;;  %2473 = vmatprep.mubr.f32.mxu0 %v8652_v0  ;;  %v9399_v52 = vpack.c.bf16 %v2689_v3, %v2685_v57  ;;  %v2722_v57 = vld [vmem:[#allocation5 + $0x3f8] sm:$0xff] }
 0x865   :  { %2586 = vmatprep.mubr.f32.mxu1 %v8652_v0  ;;  %6955 = vmatprep.subr.bf16.mxu0 %v9371_v61  ;;  %v9455_v15 = vpack.c.bf16 %v2722_v57, %v2718_v12 }
 0x866   :  { %2474 = vmatmul.mubr.f32.gmra.mrb[20].mxu0 %v9057_v50  ;;  %6987 = vmatprep.subr.bf16.mxu1 %v9375_v32 }
 0x867   :  { %2587 = vmatmul.mubr.f32.gmra.mrb[20].mxu1 %v9057_v50  ;;  %6957 = vmatpush1.bf16.msra.mxu0 %v9379_v38  ;;  %v2693_v50 = vld [vmem:[#allocation5 + $0x310] sm:$0xff] }
 0x868   :  { %6989 = vmatpush1.bf16.msra.mxu1 %v9383_v60  ;;  %2479 = vmatprep.mubr.f32.mxu0 %v8652_v0  ;;  %v9415_v29 = vpack.c.bf16 %v2697_v27, %v2693_v50 }
 0x869   :  { %2592 = vmatprep.mubr.f32.mxu1 %v8652_v0  ;;  %6959 = vmatprep.subr.bf16.mxu0 %v9387_v26 }
 0x86a   :  { %2480 = vmatmul.mubr.f32.gmra.mrb[22].mxu0 %v9151_v22  ;;  %6991 = vmatprep.subr.bf16.mxu1 %v9391_v30 }
 0x86b   :  { %2593 = vmatmul.mubr.f32.gmra.mrb[22].mxu1 %v9151_v22  ;;  %6961 = vmatpush1.bf16.msra.mxu0 %v9395_v59  ;;  %v2701_v22 = vld [vmem:[#allocation5 + $0x350] sm:$0xff] }
 0x86c   :  { %6993 = vmatpush1.bf16.msra.mxu1 %v9399_v52  ;;  %2485 = vmatprep.mubr.f32.mxu0 %v8652_v0  ;;  %v9431_v40 = vpack.c.bf16 %v2705_v21, %v2701_v22 }
 0x86d   :  { %2598 = vmatprep.mubr.f32.mxu1 %v8652_v0  ;;  %6963 = vmatprep.subr.bf16.mxu0 %v9403_v10 }
 0x86e   :  { %2486 = vmatmul.mubr.f32.gmra.mrb[24].mxu0 %v9197_v56  ;;  %6995 = vmatprep.subr.bf16.mxu1 %v9407_v11 }
 0x86f   :  { %2599 = vmatmul.mubr.f32.gmra.mrb[24].mxu1 %v9197_v56  ;;  %6965 = vmatpush1.bf16.msra.mxu0 %v9411_v19  ;;  %v2709_v56 = vld [vmem:[#allocation5 + $0x390] sm:$0xff] }
 0x870   :  { %6997 = vmatpush1.bf16.msra.mxu1 %v9415_v29  ;;  %2491 = vmatprep.mubr.f32.mxu0 %v8652_v0  ;;  %v9447_v3 = vpack.c.bf16 %v2713_v25, %v2709_v56 }
 0x871   :  { %2604 = vmatprep.mubr.f32.mxu1 %v8652_v0  ;;  %6967 = vmatprep.subr.bf16.mxu0 %v9419_v17 }
 0x872   :  { %2492 = vmatmul.mubr.f32.gmra.mrb[26].mxu0 %v9241_v28  ;;  %6999 = vmatprep.subr.bf16.mxu1 %v9423_v58 }
 0x873   :  { %2605 = vmatmul.mubr.f32.gmra.mrb[26].mxu1 %v9241_v28  ;;  %6969 = vmatpush1.bf16.msra.mxu0 %v9427_v20  ;;  %v2717_v28 = vld [vmem:[#allocation5 + $0x3d0] sm:$0xff] }
 0x874   :  { %7001 = vmatpush1.bf16.msra.mxu1 %v9431_v40  ;;  %2497 = vmatprep.mubr.f32.mxu0 %v8652_v0  ;;  %v9463_v50 = vpack.c.bf16 %v2721_v47, %v2717_v28 }
 0x875   :  { %2610 = vmatprep.mubr.f32.mxu1 %v8652_v0  ;;  %6971 = vmatprep.subr.bf16.mxu0 %v9435_v14 }
 0x876   :  { %2498 = vmatmul.mubr.f32.gmra.mrb[28].mxu0 %v9276_v54  ;;  %7003 = vmatprep.subr.bf16.mxu1 %v9439_v34 }
 0x877   :  { %2611 = vmatmul.mubr.f32.gmra.mrb[28].mxu1 %v9276_v54  ;;  %6973 = vmatpush1.bf16.msra.mxu0 %v9443_v4  ;;  %v2375_v54 = vld [vmem:[#allocation5 + $0x400] ss:$8 sm:$0xf] }
 0x878   :  { %7005 = vmatpush1.bf16.msra.mxu1 %v9447_v3  ;;  %2503 = vmatprep.mubr.f32.mxu0 %v8652_v0  ;;  %v9516_v27 = vrot.slane %v2375_v54, %v8924_v5  ;;  %v9520_v23 = vrot.slane %v2375_v54, %v8929_v8  ;;  %v9525_v42 = vrot.slane %v2375_v54, %v8938_v18 }
 0x879   :  { %2616 = vmatprep.mubr.f32.mxu1 %v8652_v0  ;;  %6975 = vmatprep.subr.bf16.mxu0 %v9451_v6 }
 0x87a   :  { %2504 = vmatmul.mubr.f32.gmra.mrb[30].mxu0 %v9325_v45  ;;  %7007 = vmatprep.subr.bf16.mxu1 %v9455_v15 }
 0x87b   :  { %2617 = vmatmul.mubr.f32.gmra.mrb[30].mxu1 %v9325_v45  ;;  %6977 = vmatpush1.bf16.msra.mxu0 %v9459_v9  ;;  %v9513_v45 = vrot.slane %v2375_v54, %v8922_v2 }
 0x87c   :  { %7009 = vmatpush1.bf16.msra.mxu1 %v9463_v50  ;;  %2787 = vmatprep.mubr.f32.mxu0 %v8652_v0 }
 0x87d   :  { %2858 = vmatprep.mubr.f32.mxu1 %v8652_v0  ;;  %7011 = vmatprep.subr.bf16.mxu0 %v9346_v33 }
 0x87e   :  { %2788 = vmatmul.mubr.f32.vlgmr.msra.gmra.mrb[16].mxu0 %v8652_v0  ;;  %7043 = vmatprep.subr.bf16.mxu1 %v9348_v62 }
 0x87f   :  { %2859 = vmatmul.mubr.f32.vlgmr.msra.gmra.mrb[16].mxu1 %v8652_v0  ;;  %7013 = vmatpush1.bf16.msra.mxu0 %v9350_v36 }
 0x880   :  { %7045 = vmatpush1.bf16.msra.mxu1 %v9353_v1  ;;  %7015 = vmatprep.subr.bf16.mxu0 %v9356_v35 }
 0x881   :  { %7047 = vmatprep.subr.bf16.mxu1 %v9359_v51  ;;  %3020 = vmatprep.mubr.f32.mxu0 %v8652_v0 }
 0x882   :  { %3091 = vmatprep.mubr.f32.mxu1 %v8652_v0 }
 0x883   :  { %7017 = vmatpush1.bf16.msra.mxu0 %v9363_v39 }
 0x884   :  { %7049 = vmatpush1.bf16.msra.mxu1 %v9367_v7  ;;  %7019 = vmatprep.subr.bf16.mxu0 %v9371_v61 }
 0x885   :  { %7051 = vmatprep.subr.bf16.mxu1 %v9375_v32 }
 0x887   :  { %7021 = vmatpush1.bf16.msra.mxu0 %v9379_v38 }
 0x888   :  { %7053 = vmatpush1.bf16.msra.mxu1 %v9383_v60  ;;  %7023 = vmatprep.subr.bf16.mxu0 %v9387_v26 }
 0x889   :  { %7055 = vmatprep.subr.bf16.mxu1 %v9391_v30 }
 0x88b   :  { %7025 = vmatpush1.bf16.msra.mxu0 %v9395_v59 }
 0x88c   :  { %7057 = vmatpush1.bf16.msra.mxu1 %v9399_v52  ;;  %7027 = vmatprep.subr.bf16.mxu0 %v9403_v10 }
 0x88d   :  { %7059 = vmatprep.subr.bf16.mxu1 %v9407_v11 }
 0x88f   :  { %7029 = vmatpush1.bf16.msra.mxu0 %v9411_v19 }
 0x890   :  { %7061 = vmatpush1.bf16.msra.mxu1 %v9415_v29  ;;  %7031 = vmatprep.subr.bf16.mxu0 %v9419_v17 }
 0x891   :  { %7063 = vmatprep.subr.bf16.mxu1 %v9423_v58 }
 0x893   :  { %7033 = vmatpush1.bf16.msra.mxu0 %v9427_v20 }
 0x894   :  { %7065 = vmatpush1.bf16.msra.mxu1 %v9431_v40  ;;  %7035 = vmatprep.subr.bf16.mxu0 %v9435_v14 }
 0x895   :  { %7067 = vmatprep.subr.bf16.mxu1 %v9439_v34 }
 0x897   :  { %7037 = vmatpush1.bf16.msra.mxu0 %v9443_v4 }
 0x898   :  { %7069 = vmatpush1.bf16.msra.mxu1 %v9447_v3  ;;  %7039 = vmatprep.subr.bf16.mxu0 %v9451_v6 }
 0x899   :  { %7071 = vmatprep.subr.bf16.mxu1 %v9455_v15 }
 0x89b   :  { %7041 = vmatpush1.bf16.msra.mxu0 %v9459_v9 }
 0x89c   :  { %7073 = vmatpush1.bf16.msra.mxu1 %v9463_v50  ;;  %7075 = vmatprep.subr.bf16.mxu0 %v9346_v33 }
 0x89d   :  { %7107 = vmatprep.subr.bf16.mxu1 %v9348_v62 }
 0x951   :  { %v2789_v41 = vpop.f32.mrb[16].mxu0 }
 0x952   :  { %v8066_v31 = vadd.f32 %v2789_v41, %v9513_v45  ;;  %v2860_v16 = vpop.f32.mrb[16].mxu1  ;;  %v2791_v37 = vpop.f32.mrb[17].mxu0 }
 0x953   :  { %v8067_v49 = vadd.f32 %v2791_v37, %v9516_v27  ;;  %v2862_v22 = vpop.f32.mrb[17].mxu1  ;;  %v8082_v63 = vadd.f32 %v2860_v16, %v9520_v23 }
 0x954   :  { %v2869_v21 = vmul.f32 0.5, %v8066_v31  ;;  %v8083_v53 = vadd.f32 %v2862_v22, %v9525_v42 }
 0x955   :  { %v2873_v46 = vmul.f32 0.5, %v8067_v49 }
 0x956   :  { %8318 = vtanh.f32 %v2869_v21  ;;  %v2878_v44 = vmul.f32 0.5, %v8083_v53 }
 0x957   :  { %8320 = vtanh.f32 %v2873_v46 }
 0x958   :  { %8322 = vtanh.f32 %v8082_v63 }
 0x959   :  { %8324 = vtanh.f32 %v2878_v44 }
 0x960   :  { %v8319_v13 = vpop.eup %8318 }
 0x961   :  { %v8321_v56 = vpop.eup %8320  ;;  %v2871_v25 = vmul.f32 0.5, %v8319_v13 }
 0x962   :  { %v2875_v43 = vmul.f32 0.5, %v8321_v56  ;;  %v8323_v12 = vpop.eup %8322 }
 0x963   :  { %v2872_v55 = vadd.f32 0.5, %v2871_v25  ;;  %v8325_v47 = vpop.eup %8324 }
 0x964   :  { %v2876_v57 = vadd.f32 0.5, %v2875_v43  ;;  %v2880_v54 = vmul.f32 0.5, %v8325_v47 }
 0x965   :  { %v2883_v24 = vmul.f32 %v8323_v12, %v2872_v55 }
 0x966   :  { %v2882_v48 = vmul.f32 0.0, %v2876_v57  ;;  %v2881_v41 = vadd.f32 0.5, %v2880_v54 }
 0x968   :  { %v9528_v28 = vadd.f32 %v2883_v24, %v2882_v48 }
 0x96a   :  { %8326 = vtanh.f32 %v9528_v28 }
 0x974   :  { %v8327_v31 = vpop.eup %8326 }
 0x975   :  { %v9531_v16 = vmul.f32 %v8327_v31, %v2881_v41 }
 0x977   :  { %3021 = vmatmul.mubr.f32.vlgmr.msra.gmra.mrb[18].mxu0 %v9531_v16  ;;  %3092 = vmatmul.mubr.f32.vlgmr.msra.gmra.mrb[18].mxu1 %v9531_v16 }
 0x978   :  { %7077 = vmatpush1.bf16.msra.mxu0 %v9350_v36  ;;  %7109 = vmatpush1.bf16.msra.mxu1 %v9353_v1 }
 0x979   :  { %7079 = vmatprep.subr.bf16.mxu0 %v9356_v35  ;;  %7111 = vmatprep.subr.bf16.mxu1 %v9359_v51 }
 0x97a   :  { %3254 = vmatprep.mubr.f32.mxu0 %v8652_v0  ;;  %3325 = vmatprep.mubr.f32.mxu1 %v8652_v0 }
 0x97c   :  { %7081 = vmatpush1.bf16.msra.mxu0 %v9363_v39  ;;  %7113 = vmatpush1.bf16.msra.mxu1 %v9367_v7 }
 0x97d   :  { %7083 = vmatprep.subr.bf16.mxu0 %v9371_v61  ;;  %7115 = vmatprep.subr.bf16.mxu1 %v9375_v32 }
 0x980   :  { %7085 = vmatpush1.bf16.msra.mxu0 %v9379_v38  ;;  %7117 = vmatpush1.bf16.msra.mxu1 %v9383_v60 }
 0x981   :  { %7087 = vmatprep.subr.bf16.mxu0 %v9387_v26  ;;  %7119 = vmatprep.subr.bf16.mxu1 %v9391_v30 }
 0x984   :  { %7089 = vmatpush1.bf16.msra.mxu0 %v9395_v59  ;;  %7121 = vmatpush1.bf16.msra.mxu1 %v9399_v52 }
 0x985   :  { %7091 = vmatprep.subr.bf16.mxu0 %v9403_v10  ;;  %7123 = vmatprep.subr.bf16.mxu1 %v9407_v11 }
 0x988   :  { %7093 = vmatpush1.bf16.msra.mxu0 %v9411_v19  ;;  %7125 = vmatpush1.bf16.msra.mxu1 %v9415_v29 }
 0x989   :  { %7095 = vmatprep.subr.bf16.mxu0 %v9419_v17  ;;  %7127 = vmatprep.subr.bf16.mxu1 %v9423_v58 }
 0x98c   :  { %7097 = vmatpush1.bf16.msra.mxu0 %v9427_v20  ;;  %7129 = vmatpush1.bf16.msra.mxu1 %v9431_v40 }
 0x98d   :  { %7099 = vmatprep.subr.bf16.mxu0 %v9435_v14  ;;  %7131 = vmatprep.subr.bf16.mxu1 %v9439_v34 }
 0x990   :  { %7101 = vmatpush1.bf16.msra.mxu0 %v9443_v4  ;;  %7133 = vmatpush1.bf16.msra.mxu1 %v9447_v3 }
 0x991   :  { %7103 = vmatprep.subr.bf16.mxu0 %v9451_v6  ;;  %7135 = vmatprep.subr.bf16.mxu1 %v9455_v15 }
 0x994   :  { %7105 = vmatpush1.bf16.msra.mxu0 %v9459_v9  ;;  %7137 = vmatpush1.bf16.msra.mxu1 %v9463_v50 }
 0x995   :  { %7139 = vmatprep.subr.bf16.mxu0 %v9346_v33  ;;  %7171 = vmatprep.subr.bf16.mxu1 %v9348_v62 }
 0xa4a   :  { %v3022_v37 = vpop.f32.mrb[18].mxu0  ;;  %v3093_v49 = vpop.f32.mrb[18].mxu1 }
 0xa4b   :  { %v8068_v22 = vadd.f32 %v3022_v37, %v9513_v45  ;;  %v3024_v21 = vpop.f32.mrb[19].mxu0  ;;  %v3095_v46 = vpop.f32.mrb[19].mxu1  ;;  %v8084_v13 = vadd.f32 %v3093_v49, %v9520_v23 }
 0xa4c   :  { %v8069_v63 = vadd.f32 %v3024_v21, %v9516_v27  ;;  %v8085_v56 = vadd.f32 %v3095_v46, %v9525_v42  ;;  %v3594_v21 = vld [vmem:[#allocation5 + $0x200] sm:$0xff] }
 0xa4d   :  { %v3102_v53 = vmul.f32 0.5, %v8068_v22  ;;  %v3598_v46 = vld [vmem:[#allocation5 + $0x220] sm:$0xff] }
 0xa4e   :  { %v3106_v44 = vmul.f32 0.5, %v8069_v63  ;;  %v3111_v33 = vmul.f32 0.5, %v8085_v56 }
 0xa4f   :  { %8328 = vtanh.f32 %v3102_v53  ;;  %v9631_v53 = vpack.c.bf16 %v3598_v46, %v3594_v21 }
 0xa50   :  { %8330 = vtanh.f32 %v3106_v44  ;;  %v3596_v44 = vld [vmem:[#allocation5 + $0x210] sm:$0xff] }
 0xa51   :  { %8332 = vtanh.f32 %v8084_v13  ;;  %v3600_v13 = vld [vmem:[#allocation5 + $0x230] sm:$0xff] }
 0xa52   :  { %8334 = vtanh.f32 %v3111_v33  ;;  %v9634_v56 = vpack.c.bf16 %v3600_v13, %v3596_v44  ;;  %v3603_v33 = vld [vmem:[#allocation5 + $0x248] sm:$0xff]  ;;  %v3628_v44 = vld [vmem:[#allocation5 + $0x310] sm:$0xff] }
 0xa53   :  { %v3632_v13 = vld [vmem:[#allocation5 + $0x330] sm:$0xff] }
 0xa59   :  { %v8329_v25 = vpop.eup %8328 }
 0xa5a   :  { %v8331_v62 = vpop.eup %8330  ;;  %v3104_v43 = vmul.f32 0.5, %v8329_v25  ;;  %v3607_v25 = vld [vmem:[#allocation5 + $0x268] sm:$0xff] }
 0xa5b   :  { %v3108_v55 = vmul.f32 0.5, %v8331_v62  ;;  %v8333_v57 = vpop.eup %8332  ;;  %v3605_v62 = vld [vmem:[#allocation5 + $0x258] sm:$0xff] }
 0xa5c   :  { %v3105_v12 = vadd.f32 0.5, %v3104_v43  ;;  %v8335_v41 = vpop.eup %8334  ;;  %v9639_v43 = vpack.c.bf16 %v3607_v25, %v3603_v33  ;;  %v9682_v33 = vpack.c.bf16 %v3632_v13, %v3628_v44  ;;  %v3635_v25 = vld [vmem:[#allocation5 + $0x348] sm:$0xff]  ;;  %v3650_v44 = vld [vmem:[#allocation5 + $0x3c0] sm:$0xff] }
 0xa5d   :  { %v3109_v24 = vadd.f32 0.5, %v3108_v55  ;;  %v3113_v31 = vmul.f32 0.5, %v8335_v41  ;;  %v3609_v55 = vld [vmem:[#allocation5 + $0x278] sm:$0xff]  ;;  %v3654_v13 = vld [vmem:[#allocation5 + $0x3e0] sm:$0xff] }
 0xa5e   :  { %v3116_v48 = vmul.f32 %v8333_v57, %v3105_v12  ;;  %v3602_v12 = vld [vmem:[#allocation5 + $0x240] sm:$0xff] }
 0xa5f   :  { %v3115_v47 = vmul.f32 %v3109_v24, %v9528_v28  ;;  %v3114_v37 = vadd.f32 0.5, %v3113_v31  ;;  %v3601_v28 = vld [vmem:[#allocation5 + $0x238] sm:$0xff]  ;;  %v3606_v57 = vld [vmem:[#allocation5 + $0x260] sm:$0xff]  ;;  %v9641_v24 = vpack.c.bf16 %v3609_v55, %v3605_v62  ;;  %v3611_v31 = vld [vmem:[#allocation5 + $0x288] sm:$0xff] }
 0xa60   :  { %v3639_v62 = vld [vmem:[#allocation5 + $0x368] sm:$0xff]  ;;  %v3637_v55 = vld [vmem:[#allocation5 + $0x358] sm:$0xff] }
 0xa61   :  { %v9574_v54 = vadd.f32 %v3116_v48, %v3115_v47  ;;  %v9643_v48 = vpack.c.bf16 %v3606_v57, %v3602_v12  ;;  %v3604_v47 = vld [vmem:[#allocation5 + $0x250] sm:$0xff]  ;;  %v9687_v12 = vpack.c.bf16 %v3639_v62, %v3635_v25  ;;  %v3641_v57 = vld [vmem:[#allocation5 + $0x378] sm:$0xff]  ;;  %v9715_v62 = vpack.c.bf16 %v3654_v13, %v3650_v44 }
 0xa63   :  { %8336 = vtanh.f32 %v9574_v54 }
 0xa6d   :  { %v8337_v49 = vpop.eup %8336 }
 0xa6e   :  { %v9577_v22 = vmul.f32 %v8337_v49, %v3114_v37  ;;  %v3615_v37 = vld [vmem:[#allocation5 + $0x2a8] sm:$0xff]  ;;  %v3613_v49 = vld [vmem:[#allocation5 + $0x298] sm:$0xff] }
 0xa70   :  { %3255 = vmatmul.mubr.f32.vlgmr.msra.gmra.mrb[20].mxu0 %v9577_v22  ;;  %3326 = vmatmul.mubr.f32.vlgmr.msra.gmra.mrb[20].mxu1 %v9577_v22 }
 0xa71   :  { %7141 = vmatpush1.bf16.msra.mxu0 %v9350_v36  ;;  %7173 = vmatpush1.bf16.msra.mxu1 %v9353_v1 }
 0xa72   :  { %7143 = vmatprep.subr.bf16.mxu0 %v9356_v35  ;;  %7175 = vmatprep.subr.bf16.mxu1 %v9359_v51 }
 0xa73   :  { %3488 = vmatprep.mubr.f32.mxu0 %v8652_v0  ;;  %3559 = vmatprep.mubr.f32.mxu1 %v8652_v0 }
 0xa75   :  { %7145 = vmatpush1.bf16.msra.mxu0 %v9363_v39  ;;  %7177 = vmatpush1.bf16.msra.mxu1 %v9367_v7 }
 0xa76   :  { %7147 = vmatprep.subr.bf16.mxu0 %v9371_v61  ;;  %7179 = vmatprep.subr.bf16.mxu1 %v9375_v32 }
 0xa79   :  { %7149 = vmatpush1.bf16.msra.mxu0 %v9379_v38  ;;  %7181 = vmatpush1.bf16.msra.mxu1 %v9383_v60 }
 0xa7a   :  { %7151 = vmatprep.subr.bf16.mxu0 %v9387_v26  ;;  %7183 = vmatprep.subr.bf16.mxu1 %v9391_v30 }
 0xa7d   :  { %7153 = vmatpush1.bf16.msra.mxu0 %v9395_v59  ;;  %7185 = vmatpush1.bf16.msra.mxu1 %v9399_v52 }
 0xa7e   :  { %7155 = vmatprep.subr.bf16.mxu0 %v9403_v10  ;;  %7187 = vmatprep.subr.bf16.mxu1 %v9407_v11 }
 0xa81   :  { %7157 = vmatpush1.bf16.msra.mxu0 %v9411_v19  ;;  %7189 = vmatpush1.bf16.msra.mxu1 %v9415_v29 }
 0xa82   :  { %7159 = vmatprep.subr.bf16.mxu0 %v9419_v17  ;;  %7191 = vmatprep.subr.bf16.mxu1 %v9423_v58 }
 0xa85   :  { %7161 = vmatpush1.bf16.msra.mxu0 %v9427_v20  ;;  %7193 = vmatpush1.bf16.msra.mxu1 %v9431_v40 }
 0xa86   :  { %7163 = vmatprep.subr.bf16.mxu0 %v9435_v14  ;;  %7195 = vmatprep.subr.bf16.mxu1 %v9439_v34 }
 0xa89   :  { %7165 = vmatpush1.bf16.msra.mxu0 %v9443_v4  ;;  %7197 = vmatpush1.bf16.msra.mxu1 %v9447_v3 }
 0xa8a   :  { %7167 = vmatprep.subr.bf16.mxu0 %v9451_v6  ;;  %7199 = vmatprep.subr.bf16.mxu1 %v9455_v15  ;;  %v3595_v6 = vld [vmem:[#allocation5 + $0x208] sm:$0xff] }
 0xa8b   :  { %v3599_v15 = vld [vmem:[#allocation5 + $0x228] sm:$0xff] }
 0xa8d   :  { %7169 = vmatpush1.bf16.msra.mxu0 %v9459_v9  ;;  %7201 = vmatpush1.bf16.msra.mxu1 %v9463_v50  ;;  %v3597_v9 = vld [vmem:[#allocation5 + $0x218] sm:$0xff]  ;;  %v9627_v50 = vpack.c.bf16 %v3599_v15, %v3595_v6 }
 0xa8e   :  { %v9629_v63 = vpack.c.bf16 %v3601_v28, %v3597_v9  ;;  %v3633_v15 = vld [vmem:[#allocation5 + $0x338] sm:$0xff]  ;;  %v3626_v9 = vld [vmem:[#allocation5 + $0x300] sm:$0xff] }
 0xa8f   :  { %7203 = vmatprep.subr.bf16.mxu0 %v9627_v50  ;;  %v3630_v28 = vld [vmem:[#allocation5 + $0x320] sm:$0xff] }
 0xa90   :  { %7235 = vmatprep.subr.bf16.mxu1 %v9629_v63  ;;  %v9679_v46 = vpack.c.bf16 %v3630_v28, %v3626_v9  ;;  %v3657_v28 = vld [vmem:[#allocation5 + $0x3f8] sm:$0xff] }
 0xb43   :  { %v3256_v36 = vpop.f32.mrb[20].mxu0  ;;  %v3327_v1 = vpop.f32.mrb[20].mxu1 }
 0xb44   :  { %v8070_v35 = vadd.f32 %v3256_v36, %v9513_v45  ;;  %v3258_v51 = vpop.f32.mrb[21].mxu0  ;;  %v3329_v39 = vpop.f32.mrb[21].mxu1  ;;  %v8086_v38 = vadd.f32 %v3327_v1, %v9520_v23  ;;  %v9651_v36 = vpack.c.bf16 %v3615_v37, %v3611_v31  ;;  %v3617_v1 = vld [vmem:[#allocation5 + $0x2b8] sm:$0xff]  ;;  %v9689_v31 = vpack.c.bf16 %v3641_v57, %v3637_v55  ;;  %v3652_v55 = vld [vmem:[#allocation5 + $0x3d0] sm:$0xff] }
 0xb45   :  { %v8071_v7 = vadd.f32 %v3258_v51, %v9516_v27  ;;  %v8087_v60 = vadd.f32 %v3329_v39, %v9525_v42  ;;  %v3614_v51 = vld [vmem:[#allocation5 + $0x2a0] sm:$0xff]  ;;  %v9653_v39 = vpack.c.bf16 %v3617_v1, %v3613_v49  ;;  %v3636_v49 = vld [vmem:[#allocation5 + $0x350] sm:$0xff] }
 0xb46   :  { %v3336_v61 = vmul.f32 0.5, %v8070_v35  ;;  %v3610_v35 = vld [vmem:[#allocation5 + $0x280] sm:$0xff]  ;;  %v3640_v1 = vld [vmem:[#allocation5 + $0x370] sm:$0xff] }
 0xb47   :  { %v3340_v32 = vmul.f32 0.5, %v8071_v7  ;;  %v3345_v26 = vmul.f32 0.5, %v8087_v60  ;;  %v9655_v7 = vpack.c.bf16 %v3614_v51, %v3610_v35  ;;  %v3619_v60 = vld [vmem:[#allocation5 + $0x2c8] sm:$0xff]  ;;  %v9694_v35 = vpack.c.bf16 %v3640_v1, %v3636_v49  ;;  %v3656_v57 = vld [vmem:[#allocation5 + $0x3f0] sm:$0xff] }
 0xb48   :  { %8338 = vtanh.f32 %v3336_v61  ;;  %v3612_v61 = vld [vmem:[#allocation5 + $0x290] sm:$0xff]  ;;  %v3643_v51 = vld [vmem:[#allocation5 + $0x388] sm:$0xff] }
 0xb49   :  { %8340 = vtanh.f32 %v3340_v32  ;;  %v3616_v32 = vld [vmem:[#allocation5 + $0x2b0] sm:$0xff] }
 0xb4a   :  { %8342 = vtanh.f32 %v8086_v38  ;;  %v9658_v38 = vpack.c.bf16 %v3616_v32, %v3612_v61  ;;  %v3647_v61 = vld [vmem:[#allocation5 + $0x3a8] sm:$0xff]  ;;  %v3645_v32 = vld [vmem:[#allocation5 + $0x398] sm:$0xff] }
 0xb4b   :  { %8344 = vtanh.f32 %v3345_v26  ;;  %v3623_v26 = vld [vmem:[#allocation5 + $0x2e8] sm:$0xff] }
 0xb52   :  { %v8339_v30 = vpop.eup %8338 }
 0xb53   :  { %v8341_v59 = vpop.eup %8340  ;;  %v3338_v52 = vmul.f32 0.5, %v8339_v30  ;;  %v3621_v30 = vld [vmem:[#allocation5 + $0x2d8] sm:$0xff] }
 0xb54   :  { %v3342_v10 = vmul.f32 0.5, %v8341_v59  ;;  %v8343_v19 = vpop.eup %8342  ;;  %v9663_v59 = vpack.c.bf16 %v3623_v26, %v3619_v60  ;;  %v9699_v60 = vpack.c.bf16 %v3647_v61, %v3643_v51  ;;  %v3649_v26 = vld [vmem:[#allocation5 + $0x3b8] sm:$0xff] }
 0xb55   :  { %v3339_v11 = vadd.f32 0.5, %v3338_v52  ;;  %v8345_v40 = vpop.eup %8344  ;;  %v3625_v52 = vld [vmem:[#allocation5 + $0x2f8] sm:$0xff] }
 0xb56   :  { %v3343_v29 = vadd.f32 0.5, %v3342_v10  ;;  %v3347_v14 = vmul.f32 0.5, %v8345_v40  ;;  %v3618_v10 = vld [vmem:[#allocation5 + $0x2c0] sm:$0xff] }
 0xb57   :  { %v3350_v17 = vmul.f32 %v8343_v19, %v3339_v11  ;;  %v3622_v11 = vld [vmem:[#allocation5 + $0x2e0] sm:$0xff]  ;;  %v9665_v19 = vpack.c.bf16 %v3625_v52, %v3621_v30 }
 0xb58   :  { %v3349_v58 = vmul.f32 %v3343_v29, %v9574_v54  ;;  %v3348_v34 = vadd.f32 0.5, %v3347_v14  ;;  %v3608_v54 = vld [vmem:[#allocation5 + $0x270] sm:$0xff]  ;;  %v9667_v29 = vpack.c.bf16 %v3622_v11, %v3618_v10  ;;  %v3627_v14 = vld [vmem:[#allocation5 + $0x308] sm:$0xff]  ;;  %v3642_v30 = vld [vmem:[#allocation5 + $0x380] sm:$0xff]  ;;  %v9701_v10 = vpack.c.bf16 %v3649_v26, %v3645_v32 }
 0xb59   :  { %v9646_v41 = vpack.c.bf16 %v3608_v54, %v3604_v47  ;;  %v3634_v47 = vld [vmem:[#allocation5 + $0x340] sm:$0xff] }
 0xb5a   :  { %v9618_v20 = vadd.f32 %v3350_v17, %v3349_v58  ;;  %v3620_v17 = vld [vmem:[#allocation5 + $0x2d0] sm:$0xff]  ;;  %v3638_v54 = vld [vmem:[#allocation5 + $0x360] sm:$0xff] }
 0xb5b   :  { %v3624_v58 = vld [vmem:[#allocation5 + $0x2f0] sm:$0xff]  ;;  %v9691_v37 = vpack.c.bf16 %v3638_v54, %v3634_v47  ;;  %v3646_v52 = vld [vmem:[#allocation5 + $0x3a0] sm:$0xff]  ;;  %v9718_v47 = vpack.c.bf16 %v3656_v57, %v3652_v55 }
 0xb5c   :  { %8346 = vtanh.f32 %v9618_v20  ;;  %v9670_v40 = vpack.c.bf16 %v3624_v58, %v3620_v17  ;;  %v9703_v11 = vpack.c.bf16 %v3646_v52, %v3642_v30  ;;  %v3644_v17 = vld [vmem:[#allocation5 + $0x390] sm:$0xff] }
 0xb5d   :  { %v3648_v58 = vld [vmem:[#allocation5 + $0x3b0] sm:$0xff] }
 0xb66   :  { %v8347_v4 = vpop.eup %8346 }
 0xb67   :  { %v9621_v3 = vmul.f32 %v8347_v4, %v3348_v34  ;;  %v3631_v34 = vld [vmem:[#allocation5 + $0x328] sm:$0xff]  ;;  %v3629_v4 = vld [vmem:[#allocation5 + $0x318] sm:$0xff] }
 0xb68   :  { %v9675_v6 = vpack.c.bf16 %v3631_v34, %v3627_v14  ;;  %v9677_v21 = vpack.c.bf16 %v3633_v15, %v3629_v4  ;;  %v9706_v14 = vpack.c.bf16 %v3648_v58, %v3644_v17  ;;  %v3651_v34 = vld [vmem:[#allocation5 + $0x3c8] sm:$0xff]  ;;  %v3653_v15 = vld [vmem:[#allocation5 + $0x3d8] sm:$0xff] }
 0xb69   :  { %3489 = vmatmul.mubr.f32.vlgmr.msra.gmra.mrb[22].mxu0 %v9621_v3  ;;  %3560 = vmatmul.mubr.f32.vlgmr.msra.gmra.mrb[22].mxu1 %v9621_v3  ;;  %v3655_v4 = vld [vmem:[#allocation5 + $0x3e8] sm:$0xff]  ;;  %v9713_v25 = vpack.c.bf16 %v3657_v28, %v3653_v15 }
 0xb6a   :  { %3722 = vmatprep.mubr.f32.mxu0 %v8652_v0  ;;  %3793 = vmatprep.mubr.f32.mxu1 %v8652_v0  ;;  %v9711_v9 = vpack.c.bf16 %v3655_v4, %v3651_v34 }
 0xb6b   :  { %7205 = vmatpush1.bf16.msra.mxu0 %v9631_v53  ;;  %7237 = vmatpush1.bf16.msra.mxu1 %v9634_v56 }
 0xb6c   :  { %7207 = vmatprep.subr.bf16.mxu0 %v9639_v43  ;;  %7239 = vmatprep.subr.bf16.mxu1 %v9641_v24 }
 0xb6f   :  { %7209 = vmatpush1.bf16.msra.mxu0 %v9643_v48  ;;  %7241 = vmatpush1.bf16.msra.mxu1 %v9646_v41 }
 0xb70   :  { %7211 = vmatprep.subr.bf16.mxu0 %v9651_v36  ;;  %7243 = vmatprep.subr.bf16.mxu1 %v9653_v39 }
 0xb73   :  { %7213 = vmatpush1.bf16.msra.mxu0 %v9655_v7  ;;  %7245 = vmatpush1.bf16.msra.mxu1 %v9658_v38 }
 0xb74   :  { %7215 = vmatprep.subr.bf16.mxu0 %v9663_v59  ;;  %7247 = vmatprep.subr.bf16.mxu1 %v9665_v19 }
 0xb77   :  { %7217 = vmatpush1.bf16.msra.mxu0 %v9667_v29  ;;  %7249 = vmatpush1.bf16.msra.mxu1 %v9670_v40 }
 0xb78   :  { %7219 = vmatprep.subr.bf16.mxu0 %v9675_v6  ;;  %7251 = vmatprep.subr.bf16.mxu1 %v9677_v21 }
 0xb7b   :  { %7221 = vmatpush1.bf16.msra.mxu0 %v9679_v46  ;;  %7253 = vmatpush1.bf16.msra.mxu1 %v9682_v33 }
 0xb7c   :  { %7223 = vmatprep.subr.bf16.mxu0 %v9687_v12  ;;  %7255 = vmatprep.subr.bf16.mxu1 %v9689_v31 }
 0xb7f   :  { %7225 = vmatpush1.bf16.msra.mxu0 %v9691_v37  ;;  %7257 = vmatpush1.bf16.msra.mxu1 %v9694_v35 }
 0xb80   :  { %7227 = vmatprep.subr.bf16.mxu0 %v9699_v60  ;;  %7259 = vmatprep.subr.bf16.mxu1 %v9701_v10 }
 0xb83   :  { %7229 = vmatpush1.bf16.msra.mxu0 %v9703_v11  ;;  %7261 = vmatpush1.bf16.msra.mxu1 %v9706_v14 }
 0xb84   :  { %7231 = vmatprep.subr.bf16.mxu0 %v9711_v9  ;;  %7263 = vmatprep.subr.bf16.mxu1 %v9713_v25 }
 0xb87   :  { %7233 = vmatpush1.bf16.msra.mxu0 %v9715_v62  ;;  %7265 = vmatpush1.bf16.msra.mxu1 %v9718_v47 }
 0xb88   :  { %7267 = vmatprep.subr.bf16.mxu0 %v9627_v50  ;;  %7299 = vmatprep.subr.bf16.mxu1 %v9629_v63 }
 0xc3c   :  { %v3490_v54 = vpop.f32.mrb[22].mxu0  ;;  %v3561_v49 = vpop.f32.mrb[22].mxu1 }
 0xc3d   :  { %v8072_v1 = vadd.f32 %v3490_v54, %v9513_v45  ;;  %v3492_v51 = vpop.f32.mrb[23].mxu0  ;;  %v3563_v61 = vpop.f32.mrb[23].mxu1  ;;  %v8088_v52 = vadd.f32 %v3561_v49, %v9520_v23 }
 0xc3e   :  { %v8073_v32 = vadd.f32 %v3492_v51, %v9516_v27  ;;  %v8089_v17 = vadd.f32 %v3563_v61, %v9525_v42 }
 0xc3f   :  { %v3570_v26 = vmul.f32 0.5, %v8072_v1 }
 0xc40   :  { %v3574_v30 = vmul.f32 0.5, %v8073_v32  ;;  %v3579_v58 = vmul.f32 0.5, %v8089_v17 }
 0xc41   :  { %8348 = vtanh.f32 %v3570_v26 }
 0xc42   :  { %8350 = vtanh.f32 %v3574_v30 }
 0xc43   :  { %8352 = vtanh.f32 %v8088_v52 }
 0xc44   :  { %8354 = vtanh.f32 %v3579_v58 }
 0xc4b   :  { %v8349_v34 = vpop.eup %8348 }
 0xc4c   :  { %v8351_v4 = vpop.eup %8350  ;;  %v3572_v15 = vmul.f32 0.5, %v8349_v34 }
 0xc4d   :  { %v3576_v28 = vmul.f32 0.5, %v8351_v4  ;;  %v8353_v13 = vpop.eup %8352 }
 0xc4e   :  { %v3573_v44 = vadd.f32 0.5, %v3572_v15  ;;  %v8355_v49 = vpop.eup %8354 }
 0xc4f   :  { %v3577_v55 = vadd.f32 0.5, %v3576_v28  ;;  %v3581_v51 = vmul.f32 0.5, %v8355_v49 }
 0xc50   :  { %v3584_v57 = vmul.f32 %v8353_v13, %v3573_v44 }
 0xc51   :  { %v3583_v54 = vmul.f32 %v3577_v55, %v9618_v20  ;;  %v3582_v32 = vadd.f32 0.5, %v3581_v51 }
 0xc53   :  { %v9730_v1 = vadd.f32 %v3584_v57, %v3583_v54 }
 0xc55   :  { %8356 = vtanh.f32 %v9730_v1 }
 0xc5f   :  { %v8357_v61 = vpop.eup %8356 }
 0xc60   :  { %v9733_v26 = vmul.f32 %v8357_v61, %v3582_v32 }
 0xc62   :  { %3723 = vmatmul.mubr.f32.vlgmr.msra.gmra.mrb[24].mxu0 %v9733_v26  ;;  %3794 = vmatmul.mubr.f32.vlgmr.msra.gmra.mrb[24].mxu1 %v9733_v26 }
 0xc63   :  { %7269 = vmatpush1.bf16.msra.mxu0 %v9631_v53  ;;  %7301 = vmatpush1.bf16.msra.mxu1 %v9634_v56 }
 0xc64   :  { %7271 = vmatprep.subr.bf16.mxu0 %v9639_v43  ;;  %7303 = vmatprep.subr.bf16.mxu1 %v9641_v24 }
 0xc65   :  { %3956 = vmatprep.mubr.f32.mxu0 %v8652_v0  ;;  %4027 = vmatprep.mubr.f32.mxu1 %v8652_v0 }
 0xc67   :  { %7273 = vmatpush1.bf16.msra.mxu0 %v9643_v48  ;;  %7305 = vmatpush1.bf16.msra.mxu1 %v9646_v41 }
 0xc68   :  { %7275 = vmatprep.subr.bf16.mxu0 %v9651_v36  ;;  %7307 = vmatprep.subr.bf16.mxu1 %v9653_v39 }
 0xc6b   :  { %7277 = vmatpush1.bf16.msra.mxu0 %v9655_v7  ;;  %7309 = vmatpush1.bf16.msra.mxu1 %v9658_v38 }
 0xc6c   :  { %7279 = vmatprep.subr.bf16.mxu0 %v9663_v59  ;;  %7311 = vmatprep.subr.bf16.mxu1 %v9665_v19 }
 0xc6f   :  { %7281 = vmatpush1.bf16.msra.mxu0 %v9667_v29  ;;  %7313 = vmatpush1.bf16.msra.mxu1 %v9670_v40 }
 0xc70   :  { %7283 = vmatprep.subr.bf16.mxu0 %v9675_v6  ;;  %7315 = vmatprep.subr.bf16.mxu1 %v9677_v21 }
 0xc73   :  { %7285 = vmatpush1.bf16.msra.mxu0 %v9679_v46  ;;  %7317 = vmatpush1.bf16.msra.mxu1 %v9682_v33 }
 0xc74   :  { %7287 = vmatprep.subr.bf16.mxu0 %v9687_v12  ;;  %7319 = vmatprep.subr.bf16.mxu1 %v9689_v31 }
 0xc77   :  { %7289 = vmatpush1.bf16.msra.mxu0 %v9691_v37  ;;  %7321 = vmatpush1.bf16.msra.mxu1 %v9694_v35 }
 0xc78   :  { %7291 = vmatprep.subr.bf16.mxu0 %v9699_v60  ;;  %7323 = vmatprep.subr.bf16.mxu1 %v9701_v10 }
 0xc7b   :  { %7293 = vmatpush1.bf16.msra.mxu0 %v9703_v11  ;;  %7325 = vmatpush1.bf16.msra.mxu1 %v9706_v14 }
 0xc7c   :  { %7295 = vmatprep.subr.bf16.mxu0 %v9711_v9  ;;  %7327 = vmatprep.subr.bf16.mxu1 %v9713_v25 }
 0xc7f   :  { %7297 = vmatpush1.bf16.msra.mxu0 %v9715_v62  ;;  %7329 = vmatpush1.bf16.msra.mxu1 %v9718_v47 }
 0xc80   :  { %7331 = vmatprep.subr.bf16.mxu0 %v9627_v50  ;;  %7363 = vmatprep.subr.bf16.mxu1 %v9629_v63 }
 0xd35   :  { %v3724_v20 = vpop.f32.mrb[24].mxu0  ;;  %v3795_v30 = vpop.f32.mrb[24].mxu1 }
 0xd36   :  { %v8074_v52 = vadd.f32 %v3724_v20, %v9513_v45  ;;  %v3726_v17 = vpop.f32.mrb[25].mxu0  ;;  %v3797_v58 = vpop.f32.mrb[25].mxu1  ;;  %v8090_v28 = vadd.f32 %v3795_v30, %v9520_v23 }
 0xd37   :  { %v8075_v34 = vadd.f32 %v3726_v17, %v9516_v27  ;;  %v8091_v44 = vadd.f32 %v3797_v58, %v9525_v42 }
 0xd38   :  { %v3804_v4 = vmul.f32 0.5, %v8074_v52 }
 0xd39   :  { %v3808_v15 = vmul.f32 0.5, %v8075_v34  ;;  %v3813_v13 = vmul.f32 0.5, %v8091_v44 }
 0xd3a   :  { %8358 = vtanh.f32 %v3804_v4 }
 0xd3b   :  { %8360 = vtanh.f32 %v3808_v15 }
 0xd3c   :  { %8362 = vtanh.f32 %v8090_v28 }
 0xd3d   :  { %8364 = vtanh.f32 %v3813_v13 }
 0xd44   :  { %v8359_v55 = vpop.eup %8358 }
 0xd45   :  { %v8361_v57 = vpop.eup %8360  ;;  %v3806_v54 = vmul.f32 0.5, %v8359_v55 }
 0xd46   :  { %v3810_v49 = vmul.f32 0.5, %v8361_v57  ;;  %v8363_v32 = vpop.eup %8362 }
 0xd47   :  { %v3807_v51 = vadd.f32 0.5, %v3806_v54  ;;  %v8365_v30 = vpop.eup %8364 }
 0xd48   :  { %v3811_v61 = vadd.f32 0.5, %v3810_v49  ;;  %v3815_v34 = vmul.f32 0.5, %v8365_v30 }
 0xd49   :  { %v3818_v20 = vmul.f32 %v8363_v32, %v3807_v51 }
 0xd4a   :  { %v3817_v52 = vmul.f32 %v3811_v61, %v9730_v1  ;;  %v3816_v4 = vadd.f32 0.5, %v3815_v34 }
 0xd4c   :  { %v9776_v17 = vadd.f32 %v3818_v20, %v3817_v52 }
 0xd4e   :  { %8366 = vtanh.f32 %v9776_v17 }
 0xd58   :  { %v8367_v58 = vpop.eup %8366 }
 0xd59   :  { %v9779_v15 = vmul.f32 %v8367_v58, %v3816_v4 }
 0xd5b   :  { %3957 = vmatmul.mubr.f32.vlgmr.msra.gmra.mrb[26].mxu0 %v9779_v15  ;;  %4028 = vmatmul.mubr.f32.vlgmr.msra.gmra.mrb[26].mxu1 %v9779_v15 }
 0xd5c   :  { %7333 = vmatpush1.bf16.msra.mxu0 %v9631_v53  ;;  %7365 = vmatpush1.bf16.msra.mxu1 %v9634_v56 }
 0xd5d   :  { %7335 = vmatprep.subr.bf16.mxu0 %v9639_v43  ;;  %7367 = vmatprep.subr.bf16.mxu1 %v9641_v24 }
 0xd5e   :  { %4190 = vmatprep.mubr.f32.mxu0 %v8652_v0  ;;  %4261 = vmatprep.mubr.f32.mxu1 %v8652_v0 }
 0xd60   :  { %7337 = vmatpush1.bf16.msra.mxu0 %v9643_v48  ;;  %7369 = vmatpush1.bf16.msra.mxu1 %v9646_v41 }
 0xd61   :  { %7339 = vmatprep.subr.bf16.mxu0 %v9651_v36  ;;  %7371 = vmatprep.subr.bf16.mxu1 %v9653_v39 }
 0xd64   :  { %7341 = vmatpush1.bf16.msra.mxu0 %v9655_v7  ;;  %7373 = vmatpush1.bf16.msra.mxu1 %v9658_v38 }
 0xd65   :  { %7343 = vmatprep.subr.bf16.mxu0 %v9663_v59  ;;  %7375 = vmatprep.subr.bf16.mxu1 %v9665_v19 }
 0xd68   :  { %7345 = vmatpush1.bf16.msra.mxu0 %v9667_v29  ;;  %7377 = vmatpush1.bf16.msra.mxu1 %v9670_v40 }
 0xd69   :  { %7347 = vmatprep.subr.bf16.mxu0 %v9675_v6  ;;  %7379 = vmatprep.subr.bf16.mxu1 %v9677_v21 }
 0xd6c   :  { %7349 = vmatpush1.bf16.msra.mxu0 %v9679_v46  ;;  %7381 = vmatpush1.bf16.msra.mxu1 %v9682_v33 }
 0xd6d   :  { %7351 = vmatprep.subr.bf16.mxu0 %v9687_v12  ;;  %7383 = vmatprep.subr.bf16.mxu1 %v9689_v31 }
 0xd70   :  { %7353 = vmatpush1.bf16.msra.mxu0 %v9691_v37  ;;  %7385 = vmatpush1.bf16.msra.mxu1 %v9694_v35 }
 0xd71   :  { %7355 = vmatprep.subr.bf16.mxu0 %v9699_v60  ;;  %7387 = vmatprep.subr.bf16.mxu1 %v9701_v10 }
 0xd74   :  { %7357 = vmatpush1.bf16.msra.mxu0 %v9703_v11  ;;  %7389 = vmatpush1.bf16.msra.mxu1 %v9706_v14 }
 0xd75   :  { %7359 = vmatprep.subr.bf16.mxu0 %v9711_v9  ;;  %7391 = vmatprep.subr.bf16.mxu1 %v9713_v25 }
 0xd78   :  { %7361 = vmatpush1.bf16.msra.mxu0 %v9715_v62  ;;  %7393 = vmatpush1.bf16.msra.mxu1 %v9718_v47 }
 0xd79   :  { %7395 = vmatprep.subr.bf16.mxu0 %v9627_v50  ;;  %7427 = vmatprep.subr.bf16.mxu1 %v9629_v63 }
 0xe2e   :  { %v3958_v1 = vpop.f32.mrb[26].mxu0  ;;  %v4029_v28 = vpop.f32.mrb[26].mxu1 }
 0xe2f   :  { %v8076_v44 = vadd.f32 %v3958_v1, %v9513_v45  ;;  %v3960_v13 = vpop.f32.mrb[27].mxu0  ;;  %v4031_v55 = vpop.f32.mrb[27].mxu1  ;;  %v8092_v51 = vadd.f32 %v4029_v28, %v9520_v23 }
 0xe30   :  { %v8077_v57 = vadd.f32 %v3960_v13, %v9516_v27  ;;  %v8093_v32 = vadd.f32 %v4031_v55, %v9525_v42 }
 0xe31   :  { %v4038_v54 = vmul.f32 0.5, %v8076_v44 }
 0xe32   :  { %v4042_v49 = vmul.f32 0.5, %v8077_v57  ;;  %v4047_v50 = vmul.f32 0.5, %v8093_v32 }
 0xe33   :  { %8368 = vtanh.f32 %v4038_v54 }
 0xe34   :  { %8370 = vtanh.f32 %v4042_v49 }
 0xe35   :  { %8372 = vtanh.f32 %v8092_v51 }
 0xe36   :  { %8374 = vtanh.f32 %v4047_v50 }
 0xe3d   :  { %v8369_v61 = vpop.eup %8368 }
 0xe3e   :  { %v8371_v63 = vpop.eup %8370  ;;  %v4040_v20 = vmul.f32 0.5, %v8369_v61 }
 0xe3f   :  { %v4044_v52 = vmul.f32 0.5, %v8371_v63  ;;  %v8373_v34 = vpop.eup %8372 }
 0xe40   :  { %v4041_v30 = vadd.f32 0.5, %v4040_v20  ;;  %v8375_v28 = vpop.eup %8374 }
 0xe41   :  { %v4045_v4 = vadd.f32 0.5, %v4044_v52  ;;  %v4049_v13 = vmul.f32 0.5, %v8375_v28 }
 0xe42   :  { %v4052_v58 = vmul.f32 %v8373_v34, %v4041_v30 }
 0xe43   :  { %v4051_v1 = vmul.f32 %v4045_v4, %v9776_v17  ;;  %v4050_v57 = vadd.f32 0.5, %v4049_v13 }
 0xe45   :  { %v9822_v44 = vadd.f32 %v4052_v58, %v4051_v1 }
 0xe47   :  { %8376 = vtanh.f32 %v9822_v44 }
 0xe51   :  { %v8377_v55 = vpop.eup %8376 }
 0xe52   :  { %v9825_v54 = vmul.f32 %v8377_v55, %v4050_v57 }
 0xe54   :  { %4191 = vmatmul.mubr.f32.vlgmr.msra.gmra.mrb[28].mxu0 %v9825_v54  ;;  %4262 = vmatmul.mubr.f32.vlgmr.msra.gmra.mrb[28].mxu1 %v9825_v54 }
 0xe55   :  { %7397 = vmatpush1.bf16.msra.mxu0 %v9631_v53  ;;  %7429 = vmatpush1.bf16.msra.mxu1 %v9634_v56 }
 0xe56   :  { %7399 = vmatprep.subr.bf16.mxu0 %v9639_v43  ;;  %7431 = vmatprep.subr.bf16.mxu1 %v9641_v24 }
 0xe57   :  { %4424 = vmatprep.mubr.f32.mxu0 %v8652_v0  ;;  %4495 = vmatprep.mubr.f32.mxu1 %v8652_v0 }
 0xe59   :  { %7401 = vmatpush1.bf16.msra.mxu0 %v9643_v48  ;;  %7433 = vmatpush1.bf16.msra.mxu1 %v9646_v41 }
 0xe5a   :  { %7403 = vmatprep.subr.bf16.mxu0 %v9651_v36  ;;  %7435 = vmatprep.subr.bf16.mxu1 %v9653_v39 }
 0xe5d   :  { %7405 = vmatpush1.bf16.msra.mxu0 %v9655_v7  ;;  %7437 = vmatpush1.bf16.msra.mxu1 %v9658_v38 }
 0xe5e   :  { %7407 = vmatprep.subr.bf16.mxu0 %v9663_v59  ;;  %7439 = vmatprep.subr.bf16.mxu1 %v9665_v19 }
 0xe61   :  { %7409 = vmatpush1.bf16.msra.mxu0 %v9667_v29  ;;  %7441 = vmatpush1.bf16.msra.mxu1 %v9670_v40 }
 0xe62   :  { %7411 = vmatprep.subr.bf16.mxu0 %v9675_v6  ;;  %7443 = vmatprep.subr.bf16.mxu1 %v9677_v21 }
 0xe65   :  { %7413 = vmatpush1.bf16.msra.mxu0 %v9679_v46  ;;  %7445 = vmatpush1.bf16.msra.mxu1 %v9682_v33 }
 0xe66   :  { %7415 = vmatprep.subr.bf16.mxu0 %v9687_v12  ;;  %7447 = vmatprep.subr.bf16.mxu1 %v9689_v31 }
 0xe69   :  { %7417 = vmatpush1.bf16.msra.mxu0 %v9691_v37  ;;  %7449 = vmatpush1.bf16.msra.mxu1 %v9694_v35 }
 0xe6a   :  { %7419 = vmatprep.subr.bf16.mxu0 %v9699_v60  ;;  %7451 = vmatprep.subr.bf16.mxu1 %v9701_v10 }
 0xe6d   :  { %7421 = vmatpush1.bf16.msra.mxu0 %v9703_v11  ;;  %7453 = vmatpush1.bf16.msra.mxu1 %v9706_v14 }
 0xe6e   :  { %7423 = vmatprep.subr.bf16.mxu0 %v9711_v9  ;;  %7455 = vmatprep.subr.bf16.mxu1 %v9713_v25 }
 0xe71   :  { %7425 = vmatpush1.bf16.msra.mxu0 %v9715_v62  ;;  %7457 = vmatpush1.bf16.msra.mxu1 %v9718_v47 }
 0xf27   :  { %v4192_v53 = vpop.f32.mrb[28].mxu0  ;;  %v4263_v56 = vpop.f32.mrb[28].mxu1 }
 0xf28   :  { %v8078_v43 = vadd.f32 %v4192_v53, %v9513_v45  ;;  %v4194_v24 = vpop.f32.mrb[29].mxu0  ;;  %v4265_v48 = vpop.f32.mrb[29].mxu1  ;;  %v8094_v7 = vadd.f32 %v4263_v56, %v9520_v23 }
 0xf29   :  { %v8079_v41 = vadd.f32 %v4194_v24, %v9516_v27  ;;  %v8095_v38 = vadd.f32 %v4265_v48, %v9525_v42 }
 0xf2a   :  { %v4272_v36 = vmul.f32 0.5, %v8078_v43 }
 0xf2b   :  { %v4276_v39 = vmul.f32 0.5, %v8079_v41  ;;  %v4281_v59 = vmul.f32 0.5, %v8095_v38 }
 0xf2c   :  { %8378 = vtanh.f32 %v4272_v36 }
 0xf2d   :  { %8380 = vtanh.f32 %v4276_v39 }
 0xf2e   :  { %8382 = vtanh.f32 %v8094_v7 }
 0xf2f   :  { %8384 = vtanh.f32 %v4281_v59 }
 0xf36   :  { %v8379_v19 = vpop.eup %8378 }
 0xf37   :  { %v8381_v29 = vpop.eup %8380  ;;  %v4274_v40 = vmul.f32 0.5, %v8379_v19 }
 0xf38   :  { %v4278_v6 = vmul.f32 0.5, %v8381_v29  ;;  %v8383_v46 = vpop.eup %8382 }
 0xf39   :  { %v4275_v21 = vadd.f32 0.5, %v4274_v40  ;;  %v8385_v35 = vpop.eup %8384 }
 0xf3a   :  { %v4279_v33 = vadd.f32 0.5, %v4278_v6  ;;  %v4283_v60 = vmul.f32 0.5, %v8385_v35 }
 0xf3b   :  { %v4286_v12 = vmul.f32 %v8383_v46, %v4275_v21 }
 0xf3c   :  { %v4285_v31 = vmul.f32 %v4279_v33, %v9822_v44  ;;  %v4284_v10 = vadd.f32 0.5, %v4283_v60 }
 0xf3e   :  { %v4287_v37 = vadd.f32 %v4286_v12, %v4285_v31 }
 0xf40   :  { %8386 = vtanh.f32 %v4287_v37 }
 0xf4a   :  { %v8387_v11 = vpop.eup %8386 }
 0xf4b   :  { %v9866_v14 = vmul.f32 %v8387_v11, %v4284_v10 }
 0xf4d   :  { %4425 = vmatmul.mubr.f32.vlgmr.msra.gmra.mrb[30].mxu0 %v9866_v14  ;;  %4496 = vmatmul.mubr.f32.vlgmr.msra.gmra.mrb[30].mxu1 %v9866_v14 }
0x1020   :  { %v4426_v9 = vpop.f32.mrb[30].mxu0  ;;  %v4497_v25 = vpop.f32.mrb[30].mxu1 }
0x1021   :  { %v8080_v62 = vadd.f32 %v4426_v9, %v9513_v45  ;;  %v4428_v47 = vpop.f32.mrb[31].mxu0  ;;  %v4499_v17 = vpop.f32.mrb[31].mxu1  ;;  %v8096_v50 = vadd.f32 %v4497_v25, %v9520_v23 }
0x1022   :  { %v8081_v49 = vadd.f32 %v4428_v47, %v9516_v27  ;;  %v8097_v61 = vadd.f32 %v4499_v17, %v9525_v42 }
0x1023   :  { %v4506_v51 = vmul.f32 0.5, %v8080_v62 }
0x1024   :  { %v4510_v32 = vmul.f32 0.5, %v8081_v49  ;;  %v4515_v63 = vmul.f32 0.5, %v8097_v61 }
0x1025   :  { %8388 = vtanh.f32 %v4506_v51 }
0x1026   :  { %8390 = vtanh.f32 %v4510_v32 }
0x1027   :  { %8392 = vtanh.f32 %v8096_v50 }
0x1028   :  { %8394 = vtanh.f32 %v4515_v63 }
0x102f   :  { %v8389_v20 = vpop.eup %8388 }
0x1030   :  { %v8391_v52 = vpop.eup %8390  ;;  %v4508_v30 = vmul.f32 0.5, %v8389_v20 }
0x1031   :  { %v4512_v34 = vmul.f32 0.5, %v8391_v52  ;;  %v8393_v4 = vpop.eup %8392 }
0x1032   :  { %v4509_v45 = vadd.f32 0.5, %v4508_v30  ;;  %v8395_v28 = vpop.eup %8394 }
0x1033   :  { %v4513_v58 = vadd.f32 0.5, %v4512_v34  ;;  %v4517_v23 = vmul.f32 0.5, %v8395_v28 }
0x1034   :  { %v4520_v1 = vmul.f32 %v8393_v4, %v4509_v45 }
0x1035   :  { %v4519_v27 = vmul.f32 %v4513_v58, %v4287_v37  ;;  %v4518_v13 = vadd.f32 0.5, %v4517_v23 }
0x1037   :  { %v4521_v44 = vadd.f32 %v4520_v1, %v4519_v27 }
0x1039   :  { %8396 = vtanh.f32 %v4521_v44  ;;  %4529 = vst [vmem:[#allocation14 + $0x8] sm:$0xff] %v4521_v44 }
0x1043   :  { %v8397_v57 = vpop.eup %8396 }
0x1044   :  { %v9874_v55 = vmul.f32 %v8397_v57, %v4518_v13 }
0x1046   :  { %4527 = vst [vmem:[#allocation13 + $0x8] sm:$0xff] %v9874_v55 }
0x1047   :  { %8641 = dma.done.wait [#allocation6 + $0x1], 16896 }
0x1048   :  { %8642 = vsyncadd [#allocation6 + $0x1], 4294950400  ;;  %4691 = vmatprep.mubr.f32.mxu0 %v8652_v0  ;;  %4804 = vmatprep.mubr.f32.mxu1 %v8652_v0  ;;  %v4541_v42 = vld [vmem:[#allocation5 + $0x428] sm:$0xff]  ;;  %v4543_v56 = vld [vmem:[#allocation5 + $0x438] sm:$0xff]  ;;  %s8655_s4 = smov [#allocation14]  }
0x1049   :  { %v4545_v53 = vld [vmem:[#allocation5 + $0x448] sm:$0xff]  ;;  %v4547_v24 = vld [vmem:[#allocation5 + $0x458] sm:$0xff]  ;;  %v4540_v48 = vld [vmem:[#allocation5 + $0x420] sm:$0xff]  ;;  %s6314_s19 = sshll.u32 %s8655_s4, 4  ;;  %s6315_s19 = int_to_ptr.vmem [resolvable:$true] %s6314_s19 }
0x104a   :  { %v7458_v43 = vpack.c.bf16 %v4545_v53, %v4541_v42  ;;  %v4544_v41 = vld [vmem:[#allocation5 + $0x440] sm:$0xff]  ;;  %v7490_v36 = vpack.c.bf16 %v4547_v24, %v4543_v56  ;;  %v4542_v7 = vld [vmem:[#allocation5 + $0x430] sm:$0xff]  ;;  %v4549_v59 = vld [vmem:[#allocation5 + $0x468] sm:$0xff]  ;;  %s8591_s20 = scalar_lea.vmem %s6315_s19, 384  ;;  %p8596_p12 = scmp.lt.s32.totalorder %s6315_s19, %s6315_s19 }
0x104b   :  { %v7460_v39 = vpack.c.bf16 %v4544_v41, %v4540_v48  ;;  %v4546_v38 = vld [vmem:[#allocation5 + $0x450] sm:$0xff]  ;;  %v4553_v29 = vld [vmem:[#allocation5 + $0x488] sm:$0xff]  ;;  %v4551_v40 = vld [vmem:[#allocation5 + $0x478] sm:$0xff]  ;;  %p8592_p11 = scmp.ne.s32.totalorder %s6315_s19, %s8591_s20  ;;  %p8597_p4 = scmp.lt.s32.totalorder %s8591_s20, %s8591_s20 }
0x104c   :  { %7459 = vmatprep.subr.bf16.mxu0 %v7458_v43  ;;  %v7492_v19 = vpack.c.bf16 %v4546_v38, %v4542_v7  ;;  %v4555_v6 = vld [vmem:[#allocation5 + $0x498] sm:$0xff]  ;;  %7491 = vmatprep.subr.bf16.mxu1 %v7490_v36  ;;  %v7462_v21 = vpack.c.bf16 %v4553_v29, %v4549_v59  ;;  %v4548_v33 = vld [vmem:[#allocation5 + $0x460] sm:$0xff]  ;;  %v4550_v31 = vld [vmem:[#allocation5 + $0x470] sm:$0xff] }
0x104d   :  { %7461 = vmatpush1.bf16.msra.mxu0 %v7460_v39  ;;  %v7494_v46 = vpack.c.bf16 %v4555_v6, %v4551_v40  ;;  %v4552_v12 = vld [vmem:[#allocation5 + $0x480] sm:$0xff]  ;;  %v4554_v35 = vld [vmem:[#allocation5 + $0x490] sm:$0xff]  ;;  %v4557_v60 = vld [vmem:[#allocation5 + $0x4a8] sm:$0xff]  ;;  %p8598_p5 = por %p8597_p4, %p8596_p12 }
0x104e   :  { %7493 = vmatpush1.bf16.msra.mxu1 %v7492_v19  ;;  %v7464_v37 = vpack.c.bf16 %v4552_v12, %v4548_v33  ;;  %v4561_v10 = vld [vmem:[#allocation5 + $0x4c8] sm:$0xff]  ;;  %7463 = vmatprep.subr.bf16.mxu0 %v7462_v21  ;;  %v7496_v11 = vpack.c.bf16 %v4554_v35, %v4550_v31  ;;  %v4559_v25 = vld [vmem:[#allocation5 + $0x4b8] sm:$0xff]  ;;  %v4556_v47 = vld [vmem:[#allocation5 + $0x4a0] sm:$0xff] }
0x104f   :  { %7495 = vmatprep.subr.bf16.mxu1 %v7494_v46  ;;  %v7466_v9 = vpack.c.bf16 %v4561_v10, %v4557_v60  ;;  %v4563_v62 = vld [vmem:[#allocation5 + $0x4d8] sm:$0xff]  ;;  %v4560_v49 = vld [vmem:[#allocation5 + $0x4c0] sm:$0xff]  ;;  %v4558_v51 = vld [vmem:[#allocation5 + $0x4b0] sm:$0xff]  ;;  %p8599_p6 = pnand %p8598_p5, %p8592_p11 }
0x1050   :  { %v7498_v17 = vpack.c.bf16 %v4563_v62, %v4559_v25  ;;  %v4562_v32 = vld [vmem:[#allocation5 + $0x4d0] sm:$0xff]  ;;  %v7468_v50 = vpack.c.bf16 %v4560_v49, %v4556_v47  ;;  %v4565_v61 = vld [vmem:[#allocation5 + $0x4e8] sm:$0xff]  ;;  %v4567_v20 = vld [vmem:[#allocation5 + $0x4f8] sm:$0xff] }
0x1051   :  { %7465 = vmatpush1.bf16.msra.mxu0 %v7464_v37  ;;  %v4569_v63 = vld [vmem:[#allocation5 + $0x508] sm:$0xff]  ;;  %v7500_v52 = vpack.c.bf16 %v4562_v32, %v4558_v51  ;;  %v4571_v34 = vld [vmem:[#allocation5 + $0x518] sm:$0xff]  ;;  %v4564_v45 = vld [vmem:[#allocation5 + $0x4e0] sm:$0xff] }
0x1052   :  { %7497 = vmatpush1.bf16.msra.mxu1 %v7496_v11  ;;  %7467 = vmatprep.subr.bf16.mxu0 %v7466_v9  ;;  %v7470_v30 = vpack.c.bf16 %v4569_v63, %v4565_v61  ;;  %v4568_v4 = vld [vmem:[#allocation5 + $0x500] sm:$0xff]  ;;  %v7502_v58 = vpack.c.bf16 %v4571_v34, %v4567_v20  ;;  %v4566_v1 = vld [vmem:[#allocation5 + $0x4f0] sm:$0xff]  ;;  %v4573_v44 = vld [vmem:[#allocation5 + $0x528] sm:$0xff] }
0x1053   :  { %7499 = vmatprep.subr.bf16.mxu1 %v7498_v17  ;;  %v4570_v27 = vld [vmem:[#allocation5 + $0x510] sm:$0xff]  ;;  %v4577_v28 = vld [vmem:[#allocation5 + $0x548] sm:$0xff]  ;;  %v4575_v23 = vld [vmem:[#allocation5 + $0x538] sm:$0xff]  ;;  %v7472_v57 = vpack.c.bf16 %v4568_v4, %v4564_v45 }
0x1054   :  { %v4579_v13 = vld [vmem:[#allocation5 + $0x558] sm:$0xff]  ;;  %v7504_v42 = vpack.c.bf16 %v4570_v27, %v4566_v1  ;;  %v7474_v53 = vpack.c.bf16 %v4577_v28, %v4573_v44  ;;  %v4572_v56 = vld [vmem:[#allocation5 + $0x520] sm:$0xff]  ;;  %v4574_v24 = vld [vmem:[#allocation5 + $0x530] sm:$0xff] }
0x1055   :  { %7469 = vmatpush1.bf16.msra.mxu0 %v7468_v50  ;;  %v4576_v43 = vld [vmem:[#allocation5 + $0x540] sm:$0xff]  ;;  %v7506_v48 = vpack.c.bf16 %v4579_v13, %v4575_v23  ;;  %v4578_v41 = vld [vmem:[#allocation5 + $0x550] sm:$0xff]  ;;  %v4581_v36 = vld [vmem:[#allocation5 + $0x568] sm:$0xff] }
0x1056   :  { %7501 = vmatpush1.bf16.msra.mxu1 %v7500_v52  ;;  %7471 = vmatprep.subr.bf16.mxu0 %v7470_v30  ;;  %v4585_v39 = vld [vmem:[#allocation5 + $0x588] sm:$0xff]  ;;  %v4583_v7 = vld [vmem:[#allocation5 + $0x578] sm:$0xff]  ;;  %v7476_v59 = vpack.c.bf16 %v4576_v43, %v4572_v56  ;;  %v7508_v19 = vpack.c.bf16 %v4578_v41, %v4574_v24  ;;  %v4580_v40 = vld [vmem:[#allocation5 + $0x560] sm:$0xff] }
0x1057   :  { %7503 = vmatprep.subr.bf16.mxu1 %v7502_v58  ;;  %v4587_v38 = vld [vmem:[#allocation5 + $0x598] sm:$0xff]  ;;  %v7478_v29 = vpack.c.bf16 %v4585_v39, %v4581_v36  ;;  %v4584_v6 = vld [vmem:[#allocation5 + $0x580] sm:$0xff]  ;;  %v4582_v21 = vld [vmem:[#allocation5 + $0x570] sm:$0xff] }
0x1058   :  { %v7510_v46 = vpack.c.bf16 %v4587_v38, %v4583_v7  ;;  %v4586_v33 = vld [vmem:[#allocation5 + $0x590] sm:$0xff]  ;;  %v4589_v12 = vld [vmem:[#allocation5 + $0x5a8] sm:$0xff]  ;;  %v4591_v37 = vld [vmem:[#allocation5 + $0x5b8] sm:$0xff]  ;;  %v7480_v60 = vpack.c.bf16 %v4584_v6, %v4580_v40 }
0x1059   :  { %7473 = vmatpush1.bf16.msra.mxu0 %v7472_v57  ;;  %v4593_v31 = vld [vmem:[#allocation5 + $0x5c8] sm:$0xff]  ;;  %v4595_v35 = vld [vmem:[#allocation5 + $0x5d8] sm:$0xff]  ;;  %v7512_v10 = vpack.c.bf16 %v4586_v33, %v4582_v21  ;;  %v4588_v9 = vld [vmem:[#allocation5 + $0x5a0] sm:$0xff] }
0x105a   :  { %7505 = vmatpush1.bf16.msra.mxu1 %v7504_v42  ;;  %7475 = vmatprep.subr.bf16.mxu0 %v7474_v53  ;;  %v7482_v11 = vpack.c.bf16 %v4593_v31, %v4589_v12  ;;  %v4592_v25 = vld [vmem:[#allocation5 + $0x5c0] sm:$0xff]  ;;  %v4590_v62 = vld [vmem:[#allocation5 + $0x5b0] sm:$0xff]  ;;  %v7514_v47 = vpack.c.bf16 %v4595_v35, %v4591_v37  ;;  %v4597_v49 = vld [vmem:[#allocation5 + $0x5e8] sm:$0xff] }
0x105b   :  { %7507 = vmatprep.subr.bf16.mxu1 %v7506_v48  ;;  %v4594_v17 = vld [vmem:[#allocation5 + $0x5d0] sm:$0xff]  ;;  %v4601_v51 = vld [vmem:[#allocation5 + $0x608] sm:$0xff]  ;;  %v4599_v32 = vld [vmem:[#allocation5 + $0x5f8] sm:$0xff]  ;;  %v7484_v61 = vpack.c.bf16 %v4592_v25, %v4588_v9 }
0x105c   :  { %v4603_v50 = vld [vmem:[#allocation5 + $0x618] sm:$0xff]  ;;  %v7516_v63 = vpack.c.bf16 %v4594_v17, %v4590_v62  ;;  %v7486_v20 = vpack.c.bf16 %v4601_v51, %v4597_v49  ;;  %v4596_v52 = vld [vmem:[#allocation5 + $0x5e0] sm:$0xff]  ;;  %v4598_v34 = vld [vmem:[#allocation5 + $0x5f0] sm:$0xff] }
0x105d   :  { %7477 = vmatpush1.bf16.msra.mxu0 %v7476_v59  ;;  %v4600_v30 = vld [vmem:[#allocation5 + $0x600] sm:$0xff]  ;;  %v7518_v45 = vpack.c.bf16 %v4603_v50, %v4599_v32  ;;  %v4602_v4 = vld [vmem:[#allocation5 + $0x610] sm:$0xff]  ;;  %v4890_v58 = vld [vmem:[#allocation5 + $0x628] sm:$0xff] }
0x105e   :  { %7509 = vmatpush1.bf16.msra.mxu1 %v7508_v19  ;;  %7479 = vmatprep.subr.bf16.mxu0 %v7478_v29  ;;  %v4894_v1 = vld [vmem:[#allocation5 + $0x648] sm:$0xff]  ;;  %v4892_v27 = vld [vmem:[#allocation5 + $0x638] sm:$0xff]  ;;  %v7488_v28 = vpack.c.bf16 %v4600_v30, %v4596_v52  ;;  %v7520_v23 = vpack.c.bf16 %v4602_v4, %v4598_v34  ;;  %v4889_v57 = vld [vmem:[#allocation5 + $0x620] sm:$0xff] }
0x105f   :  { %7511 = vmatprep.subr.bf16.mxu1 %v7510_v46  ;;  %v4896_v44 = vld [vmem:[#allocation5 + $0x658] sm:$0xff]  ;;  %v9879_v13 = vpack.c.bf16 %v4894_v1, %v4890_v58  ;;  %v4893_v42 = vld [vmem:[#allocation5 + $0x640] sm:$0xff]  ;;  %v4891_v56 = vld [vmem:[#allocation5 + $0x630] sm:$0xff] }
0x1060   :  { %v9881_v53 = vpack.c.bf16 %v4896_v44, %v4892_v27  ;;  %v4895_v43 = vld [vmem:[#allocation5 + $0x650] sm:$0xff]  ;;  %v4898_v24 = vld [vmem:[#allocation5 + $0x668] sm:$0xff]  ;;  %v9883_v41 = vpack.c.bf16 %v4893_v42, %v4889_v57  ;;  %v4900_v36 = vld [vmem:[#allocation5 + $0x678] sm:$0xff] }
0x1061   :  { %7481 = vmatpush1.bf16.msra.mxu0 %v7480_v60  ;;  %v4902_v48 = vld [vmem:[#allocation5 + $0x688] sm:$0xff]  ;;  %v4904_v39 = vld [vmem:[#allocation5 + $0x698] sm:$0xff]  ;;  %v9886_v7 = vpack.c.bf16 %v4895_v43, %v4891_v56  ;;  %v4897_v38 = vld [vmem:[#allocation5 + $0x660] sm:$0xff] }
0x1062   :  { %7513 = vmatpush1.bf16.msra.mxu1 %v7512_v10  ;;  %7483 = vmatprep.subr.bf16.mxu0 %v7482_v11  ;;  %v4901_v59 = vld [vmem:[#allocation5 + $0x680] sm:$0xff]  ;;  %v9889_v19 = vpack.c.bf16 %v4902_v48, %v4898_v24  ;;  %v4899_v29 = vld [vmem:[#allocation5 + $0x670] sm:$0xff]  ;;  %v9892_v6 = vpack.c.bf16 %v4904_v39, %v4900_v36  ;;  %v4906_v21 = vld [vmem:[#allocation5 + $0x6a8] sm:$0xff] }
0x1063   :  { %7515 = vmatprep.subr.bf16.mxu1 %v7514_v47  ;;  %v4903_v40 = vld [vmem:[#allocation5 + $0x690] sm:$0xff]  ;;  %v4910_v46 = vld [vmem:[#allocation5 + $0x6c8] sm:$0xff]  ;;  %v9896_v33 = vpack.c.bf16 %v4901_v59, %v4897_v38  ;;  %v4908_v12 = vld [vmem:[#allocation5 + $0x6b8] sm:$0xff] }
0x1064   :  { %v4912_v31 = vld [vmem:[#allocation5 + $0x6d8] sm:$0xff]  ;;  %v9900_v37 = vpack.c.bf16 %v4903_v40, %v4899_v29  ;;  %v4905_v35 = vld [vmem:[#allocation5 + $0x6a0] sm:$0xff]  ;;  %v9904_v10 = vpack.c.bf16 %v4910_v46, %v4906_v21  ;;  %v4911_v11 = vld [vmem:[#allocation5 + $0x6d0] sm:$0xff] }
0x1065   :  { %7485 = vmatpush1.bf16.msra.mxu0 %v7484_v61  ;;  %v4909_v60 = vld [vmem:[#allocation5 + $0x6c0] sm:$0xff]  ;;  %v9908_v9 = vpack.c.bf16 %v4912_v31, %v4908_v12  ;;  %v4914_v25 = vld [vmem:[#allocation5 + $0x6e8] sm:$0xff]  ;;  %v4916_v17 = vld [vmem:[#allocation5 + $0x6f8] sm:$0xff] }
0x1066   :  { %7517 = vmatpush1.bf16.msra.mxu1 %v7516_v63  ;;  %7487 = vmatprep.subr.bf16.mxu0 %v7486_v20  ;;  %v4918_v62 = vld [vmem:[#allocation5 + $0x708] sm:$0xff]  ;;  %v9912_v47 = vpack.c.bf16 %v4909_v60, %v4905_v35  ;;  %v4920_v49 = vld [vmem:[#allocation5 + $0x718] sm:$0xff]  ;;  %v4913_v32 = vld [vmem:[#allocation5 + $0x6e0] sm:$0xff] }
0x1067   :  { %7519 = vmatprep.subr.bf16.mxu1 %v7518_v45  ;;  %v4917_v50 = vld [vmem:[#allocation5 + $0x700] sm:$0xff]  ;;  %v9920_v61 = vpack.c.bf16 %v4918_v62, %v4914_v25  ;;  %v4919_v63 = vld [vmem:[#allocation5 + $0x710] sm:$0xff]  ;;  %v9924_v20 = vpack.c.bf16 %v4920_v49, %v4916_v17  ;;  %v4922_v52 = vld [vmem:[#allocation5 + $0x728] sm:$0xff] }
0x1068   :  { %v4926_v30 = vld [vmem:[#allocation5 + $0x748] sm:$0xff]  ;;  %v9928_v34 = vpack.c.bf16 %v4917_v50, %v4913_v32  ;;  %v4924_v45 = vld [vmem:[#allocation5 + $0x738] sm:$0xff]  ;;  %v4921_v1 = vld [vmem:[#allocation5 + $0x720] sm:$0xff] }
0x1069   :  { %7489 = vmatpush1.bf16.msra.mxu0 %v7488_v28  ;;  %v4928_v4 = vld [vmem:[#allocation5 + $0x758] sm:$0xff]  ;;  %v4925_v27 = vld [vmem:[#allocation5 + $0x740] sm:$0xff]  ;;  %v9936_v44 = vpack.c.bf16 %v4926_v30, %v4922_v52  ;;  %v4927_v28 = vld [vmem:[#allocation5 + $0x750] sm:$0xff] }
0x106a   :  { %7521 = vmatpush1.bf16.msra.mxu1 %v7520_v23  ;;  %7523 = vmatprep.subr.bf16.mxu0 %v9879_v13  ;;  %v9940_v23 = vpack.c.bf16 %v4928_v4, %v4924_v45  ;;  %v4930_v57 = vld [vmem:[#allocation5 + $0x768] sm:$0xff]  ;;  %v9944_v56 = vpack.c.bf16 %v4925_v27, %v4921_v1  ;;  %v4932_v43 = vld [vmem:[#allocation5 + $0x778] sm:$0xff]  ;;  %v4929_v36 = vld [vmem:[#allocation5 + $0x760] sm:$0xff] }
0x106b   :  { %7555 = vmatprep.subr.bf16.mxu1 %v9881_v53  ;;  %v4934_v42 = vld [vmem:[#allocation5 + $0x788] sm:$0xff]  ;;  %v4936_v24 = vld [vmem:[#allocation5 + $0x798] sm:$0xff]  ;;  %v4933_v39 = vld [vmem:[#allocation5 + $0x780] sm:$0xff] }
0x106c   :  { %4692 = vmatmul.mubr.f32.vlgmr.msra.gmra.mrb[32].mxu0 %v9531_v16  ;;  %v9952_v38 = vpack.c.bf16 %v4934_v42, %v4930_v57  ;;  %v4935_v59 = vld [vmem:[#allocation5 + $0x790] sm:$0xff]  ;;  %v9956_v29 = vpack.c.bf16 %v4936_v24, %v4932_v43  ;;  %v4938_v40 = vld [vmem:[#allocation5 + $0x7a8] sm:$0xff]  ;;  %v9960_v46 = vpack.c.bf16 %v4933_v39, %v4929_v36  ;;  %v4940_v12 = vld [vmem:[#allocation5 + $0x7b8] sm:$0xff] }
0x106d   :  { %4805 = vmatmul.mubr.f32.vlgmr.msra.gmra.mrb[32].mxu1 %v9531_v16  ;;  %7525 = vmatpush1.bf16.msra.mxu0 %v9883_v41  ;;  %v4907_v16 = vld [vmem:[#allocation5 + $0x6b0] sm:$0xff]  ;;  %v4942_v21 = vld [vmem:[#allocation5 + $0x7c8] sm:$0xff]  ;;  %v4944_v31 = vld [vmem:[#allocation5 + $0x7d8] sm:$0xff] }
0x106e   :  { %7557 = vmatpush1.bf16.msra.mxu1 %v9886_v7  ;;  %4697 = vmatprep.mubr.f32.mxu0 %v8652_v0  ;;  %v9916_v51 = vpack.c.bf16 %v4911_v11, %v4907_v16  ;;  %v4937_v60 = vld [vmem:[#allocation5 + $0x7a0] sm:$0xff]  ;;  %v9968_v11 = vpack.c.bf16 %v4942_v21, %v4938_v40  ;;  %v4943_v25 = vld [vmem:[#allocation5 + $0x7d0] sm:$0xff]  ;;  %v9972_v62 = vpack.c.bf16 %v4944_v31, %v4940_v12  ;;  %v4946_v17 = vld [vmem:[#allocation5 + $0x7e8] sm:$0xff] }
0x106f   :  { %4810 = vmatprep.mubr.f32.mxu1 %v8652_v0  ;;  %7527 = vmatprep.subr.bf16.mxu0 %v9889_v19  ;;  %v4941_v16 = vld [vmem:[#allocation5 + $0x7c0] sm:$0xff]  ;;  %v4950_v49 = vld [vmem:[#allocation5 + $0x808] sm:$0xff]  ;;  %v4948_v50 = vld [vmem:[#allocation5 + $0x7f8] sm:$0xff] }
0x1070   :  { %4698 = vmatmul.mubr.f32.gmra.mrb[34].mxu0 %v9577_v22  ;;  %7559 = vmatprep.subr.bf16.mxu1 %v9892_v6  ;;  %v9976_v32 = vpack.c.bf16 %v4941_v16, %v4937_v60  ;;  %v4945_v52 = vld [vmem:[#allocation5 + $0x7e0] sm:$0xff]  ;;  %v9984_v45 = vpack.c.bf16 %v4950_v49, %v4946_v17  ;;  %v4951_v4 = vld [vmem:[#allocation5 + $0x810] sm:$0xff] }
0x1071   :  { %4811 = vmatmul.mubr.f32.gmra.mrb[34].mxu1 %v9577_v22  ;;  %7529 = vmatpush1.bf16.msra.mxu0 %v9896_v33  ;;  %v4915_v22 = vld [vmem:[#allocation5 + $0x6f0] sm:$0xff]  ;;  %v4949_v30 = vld [vmem:[#allocation5 + $0x800] sm:$0xff] }
0x1072   :  { %7561 = vmatpush1.bf16.msra.mxu1 %v9900_v37  ;;  %4703 = vmatprep.mubr.f32.mxu0 %v8652_v0  ;;  %v9932_v58 = vpack.c.bf16 %v4919_v63, %v4915_v22  ;;  %v4952_v22 = vld [vmem:[#allocation5 + $0x818] sm:$0xff]  ;;  %v9992_v27 = vpack.c.bf16 %v4949_v30, %v4945_v52 }
0x1073   :  { %4816 = vmatprep.mubr.f32.mxu1 %v8652_v0  ;;  %7531 = vmatprep.subr.bf16.mxu0 %v9904_v10  ;;  %v9988_v1 = vpack.c.bf16 %v4952_v22, %v4948_v50 }
0x1074   :  { %4704 = vmatmul.mubr.f32.gmra.mrb[36].mxu0 %v9621_v3  ;;  %7563 = vmatprep.subr.bf16.mxu1 %v9908_v9 }
0x1075   :  { %4817 = vmatmul.mubr.f32.gmra.mrb[36].mxu1 %v9621_v3  ;;  %7533 = vmatpush1.bf16.msra.mxu0 %v9912_v47  ;;  %v4923_v3 = vld [vmem:[#allocation5 + $0x730] sm:$0xff] }
0x1076   :  { %7565 = vmatpush1.bf16.msra.mxu1 %v9916_v51  ;;  %4709 = vmatprep.mubr.f32.mxu0 %v8652_v0  ;;  %v9948_v48 = vpack.c.bf16 %v4927_v28, %v4923_v3 }
0x1077   :  { %4822 = vmatprep.mubr.f32.mxu1 %v8652_v0  ;;  %7535 = vmatprep.subr.bf16.mxu0 %v9920_v61 }
0x1078   :  { %4710 = vmatmul.mubr.f32.gmra.mrb[38].mxu0 %v9733_v26  ;;  %7567 = vmatprep.subr.bf16.mxu1 %v9924_v20 }
0x1079   :  { %4823 = vmatmul.mubr.f32.gmra.mrb[38].mxu1 %v9733_v26  ;;  %7537 = vmatpush1.bf16.msra.mxu0 %v9928_v34  ;;  %v4931_v26 = vld [vmem:[#allocation5 + $0x770] sm:$0xff] }
0x107a   :  { %7569 = vmatpush1.bf16.msra.mxu1 %v9932_v58  ;;  %4715 = vmatprep.mubr.f32.mxu0 %v8652_v0  ;;  %v9964_v35 = vpack.c.bf16 %v4935_v59, %v4931_v26 }
0x107b   :  { %4828 = vmatprep.mubr.f32.mxu1 %v8652_v0  ;;  %7539 = vmatprep.subr.bf16.mxu0 %v9936_v44 }
0x107c   :  { %4716 = vmatmul.mubr.f32.gmra.mrb[40].mxu0 %v9779_v15  ;;  %7571 = vmatprep.subr.bf16.mxu1 %v9940_v23 }
0x107d   :  { %4829 = vmatmul.mubr.f32.gmra.mrb[40].mxu1 %v9779_v15  ;;  %7541 = vmatpush1.bf16.msra.mxu0 %v9944_v56  ;;  %v4939_v15 = vld [vmem:[#allocation5 + $0x7b0] sm:$0xff] }
0x107e   :  { %7573 = vmatpush1.bf16.msra.mxu1 %v9948_v48  ;;  %4721 = vmatprep.mubr.f32.mxu0 %v8652_v0  ;;  %v9980_v63 = vpack.c.bf16 %v4943_v25, %v4939_v15 }
0x107f   :  { %4834 = vmatprep.mubr.f32.mxu1 %v8652_v0  ;;  %7543 = vmatprep.subr.bf16.mxu0 %v9952_v38 }
0x1080   :  { %4722 = vmatmul.mubr.f32.gmra.mrb[42].mxu0 %v9825_v54  ;;  %7575 = vmatprep.subr.bf16.mxu1 %v9956_v29 }
0x1081   :  { %4835 = vmatmul.mubr.f32.gmra.mrb[42].mxu1 %v9825_v54  ;;  %7545 = vmatpush1.bf16.msra.mxu0 %v9960_v46  ;;  %v4947_v54 = vld [vmem:[#allocation5 + $0x7f0] sm:$0xff] }
0x1082   :  { %7577 = vmatpush1.bf16.msra.mxu1 %v9964_v35  ;;  %4727 = vmatprep.mubr.f32.mxu0 %v8652_v0  ;;  %v9996_v3 = vpack.c.bf16 %v4951_v4, %v4947_v54 }
0x1083   :  { %4840 = vmatprep.mubr.f32.mxu1 %v8652_v0  ;;  %7547 = vmatprep.subr.bf16.mxu0 %v9968_v11 }
0x1084   :  { %4728 = vmatmul.mubr.f32.gmra.mrb[44].mxu0 %v9866_v14  ;;  %7579 = vmatprep.subr.bf16.mxu1 %v9972_v62 }
0x1085   :  { %4841 = vmatmul.mubr.f32.gmra.mrb[44].mxu1 %v9866_v14  ;;  %7549 = vmatpush1.bf16.msra.mxu0 %v9976_v32  ;;  %v4605_v14 = vld [vmem:[#allocation5 + $0x820] ss:$8 sm:$0xf] }
0x1086   :  { %7581 = vmatpush1.bf16.msra.mxu1 %v9980_v63  ;;  %4733 = vmatprep.mubr.f32.mxu0 %v8652_v0  ;;  %v10049_v28 = vrot.slane %v4605_v14, %v8924_v5  ;;  %v10053_v43 = vrot.slane %v4605_v14, %v8929_v8  ;;  %v10058_v21 = vrot.slane %v4605_v14, %v8938_v18 }
0x1087   :  { %4846 = vmatprep.mubr.f32.mxu1 %v8652_v0  ;;  %7551 = vmatprep.subr.bf16.mxu0 %v9984_v45 }
0x1088   :  { %4734 = vmatmul.mubr.f32.gmra.mrb[46].mxu0 %v9874_v55  ;;  %7583 = vmatprep.subr.bf16.mxu1 %v9988_v1 }
0x1089   :  { %4847 = vmatmul.mubr.f32.gmra.mrb[46].mxu1 %v9874_v55  ;;  %7553 = vmatpush1.bf16.msra.mxu0 %v9992_v27  ;;  %v10046_v55 = vrot.slane %v4605_v14, %v8922_v2 }
0x108a   :  { %7585 = vmatpush1.bf16.msra.mxu1 %v9996_v3  ;;  %5017 = vmatprep.mubr.f32.mxu0 %v8652_v0 }
0x108b   :  { %5088 = vmatprep.mubr.f32.mxu1 %v8652_v0  ;;  %7587 = vmatprep.subr.bf16.mxu0 %v9879_v13 }
0x108c   :  { %5018 = vmatmul.mubr.f32.vlgmr.msra.gmra.mrb[32].mxu0 %v8652_v0  ;;  %7619 = vmatprep.subr.bf16.mxu1 %v9881_v53 }
0x108d   :  { %5089 = vmatmul.mubr.f32.vlgmr.msra.gmra.mrb[32].mxu1 %v8652_v0  ;;  %7589 = vmatpush1.bf16.msra.mxu0 %v9883_v41 }
0x108e   :  { %7621 = vmatpush1.bf16.msra.mxu1 %v9886_v7  ;;  %7591 = vmatprep.subr.bf16.mxu0 %v9889_v19 }
0x108f   :  { %7623 = vmatprep.subr.bf16.mxu1 %v9892_v6  ;;  %5185 = vmatprep.mubr.f32.mxu0 %v8652_v0 }
0x1090   :  { %5256 = vmatprep.mubr.f32.mxu1 %v8652_v0 }
0x1091   :  { %7593 = vmatpush1.bf16.msra.mxu0 %v9896_v33 }
0x1092   :  { %7625 = vmatpush1.bf16.msra.mxu1 %v9900_v37  ;;  %7595 = vmatprep.subr.bf16.mxu0 %v9904_v10 }
0x1093   :  { %7627 = vmatprep.subr.bf16.mxu1 %v9908_v9 }
0x1095   :  { %7597 = vmatpush1.bf16.msra.mxu0 %v9912_v47 }
0x1096   :  { %7629 = vmatpush1.bf16.msra.mxu1 %v9916_v51  ;;  %7599 = vmatprep.subr.bf16.mxu0 %v9920_v61 }
0x1097   :  { %7631 = vmatprep.subr.bf16.mxu1 %v9924_v20 }
0x1099   :  { %7601 = vmatpush1.bf16.msra.mxu0 %v9928_v34 }
0x109a   :  { %7633 = vmatpush1.bf16.msra.mxu1 %v9932_v58  ;;  %7603 = vmatprep.subr.bf16.mxu0 %v9936_v44 }
0x109b   :  { %7635 = vmatprep.subr.bf16.mxu1 %v9940_v23 }
0x109d   :  { %7605 = vmatpush1.bf16.msra.mxu0 %v9944_v56 }
0x109e   :  { %7637 = vmatpush1.bf16.msra.mxu1 %v9948_v48  ;;  %7607 = vmatprep.subr.bf16.mxu0 %v9952_v38 }
0x109f   :  { %7639 = vmatprep.subr.bf16.mxu1 %v9956_v29 }
0x10a1   :  { %7609 = vmatpush1.bf16.msra.mxu0 %v9960_v46 }
0x10a2   :  { %7641 = vmatpush1.bf16.msra.mxu1 %v9964_v35  ;;  %7611 = vmatprep.subr.bf16.mxu0 %v9968_v11 }
0x10a3   :  { %7643 = vmatprep.subr.bf16.mxu1 %v9972_v62 }
0x10a5   :  { %7613 = vmatpush1.bf16.msra.mxu0 %v9976_v32 }
0x10a6   :  { %7645 = vmatpush1.bf16.msra.mxu1 %v9980_v63  ;;  %7615 = vmatprep.subr.bf16.mxu0 %v9984_v45 }
0x10a7   :  { %7647 = vmatprep.subr.bf16.mxu1 %v9988_v1 }
0x10a9   :  { %7617 = vmatpush1.bf16.msra.mxu0 %v9992_v27 }
0x10aa   :  { %7649 = vmatpush1.bf16.msra.mxu1 %v9996_v3  ;;  %7651 = vmatprep.subr.bf16.mxu0 %v9879_v13 }
0x10ab   :  { %7683 = vmatprep.subr.bf16.mxu1 %v9881_v53 }
0x115f   :  { %v5019_v57 = vpop.f32.mrb[32].mxu0 }
0x1160   :  { %v8098_v42 = vadd.f32 %v5019_v57, %v10046_v55  ;;  %v5090_v24 = vpop.f32.mrb[32].mxu1  ;;  %v5021_v36 = vpop.f32.mrb[33].mxu0 }
0x1161   :  { %v8099_v39 = vadd.f32 %v5021_v36, %v10049_v28  ;;  %v5092_v26 = vpop.f32.mrb[33].mxu1  ;;  %v8114_v2 = vadd.f32 %v5090_v24, %v10053_v43 }
0x1162   :  { %v5099_v59 = vmul.f32 0.5, %v8098_v42  ;;  %v8115_v5 = vadd.f32 %v5092_v26, %v10058_v21 }
0x1163   :  { %v5103_v40 = vmul.f32 0.5, %v8099_v39 }
0x1164   :  { %8398 = vtanh.f32 %v5099_v59  ;;  %v5108_v12 = vmul.f32 0.5, %v8115_v5 }
0x1165   :  { %8400 = vtanh.f32 %v5103_v40 }
0x1166   :  { %8402 = vtanh.f32 %v8114_v2 }
0x1167   :  { %8404 = vtanh.f32 %v5108_v12 }
0x116e   :  { %v8399_v8 = vpop.eup %8398 }
0x116f   :  { %v8401_v31 = vpop.eup %8400  ;;  %v5101_v60 = vmul.f32 0.5, %v8399_v8 }
0x1170   :  { %v5105_v16 = vmul.f32 0.5, %v8401_v31  ;;  %v8403_v25 = vpop.eup %8402 }
0x1171   :  { %v5102_v15 = vadd.f32 0.5, %v5101_v60  ;;  %v8405_v18 = vpop.eup %8404 }
0x1172   :  { %v5106_v17 = vadd.f32 0.5, %v5105_v16  ;;  %v5110_v52 = vmul.f32 0.5, %v8405_v18 }
0x1173   :  { %v5113_v49 = vmul.f32 %v8403_v25, %v5102_v15 }
0x1174   :  { %v5112_v50 = vmul.f32 0.0, %v5106_v17  ;;  %v5111_v30 = vadd.f32 0.5, %v5110_v52 }
0x1176   :  { %v10061_v22 = vadd.f32 %v5113_v49, %v5112_v50 }
0x1178   :  { %8406 = vtanh.f32 %v10061_v22 }
0x1182   :  { %v8407_v54 = vpop.eup %8406 }
0x1183   :  { %v5116_v4 = vmul.f32 %v8407_v54, %v5111_v30 }
0x1185   :  { %5186 = vmatmul.mubr.f32.vlgmr.msra.gmra.mrb[34].mxu0 %v5116_v4  ;;  %5257 = vmatmul.mubr.f32.vlgmr.msra.gmra.mrb[34].mxu1 %v5116_v4 }
0x1186   :  { %7653 = vmatpush1.bf16.msra.mxu0 %v9883_v41  ;;  %7685 = vmatpush1.bf16.msra.mxu1 %v9886_v7 }
0x1187   :  { %7655 = vmatprep.subr.bf16.mxu0 %v9889_v19  ;;  %7687 = vmatprep.subr.bf16.mxu1 %v9892_v6 }
0x1188   :  { %5353 = vmatprep.mubr.f32.mxu0 %v8652_v0  ;;  %5424 = vmatprep.mubr.f32.mxu1 %v8652_v0 }
0x118a   :  { %7657 = vmatpush1.bf16.msra.mxu0 %v9896_v33  ;;  %7689 = vmatpush1.bf16.msra.mxu1 %v9900_v37 }
0x118b   :  { %7659 = vmatprep.subr.bf16.mxu0 %v9904_v10  ;;  %7691 = vmatprep.subr.bf16.mxu1 %v9908_v9 }
0x118e   :  { %7661 = vmatpush1.bf16.msra.mxu0 %v9912_v47  ;;  %7693 = vmatpush1.bf16.msra.mxu1 %v9916_v51 }
0x118f   :  { %7663 = vmatprep.subr.bf16.mxu0 %v9920_v61  ;;  %7695 = vmatprep.subr.bf16.mxu1 %v9924_v20 }
0x1192   :  { %7665 = vmatpush1.bf16.msra.mxu0 %v9928_v34  ;;  %7697 = vmatpush1.bf16.msra.mxu1 %v9932_v58 }
0x1193   :  { %7667 = vmatprep.subr.bf16.mxu0 %v9936_v44  ;;  %7699 = vmatprep.subr.bf16.mxu1 %v9940_v23 }
0x1196   :  { %7669 = vmatpush1.bf16.msra.mxu0 %v9944_v56  ;;  %7701 = vmatpush1.bf16.msra.mxu1 %v9948_v48 }
0x1197   :  { %7671 = vmatprep.subr.bf16.mxu0 %v9952_v38  ;;  %7703 = vmatprep.subr.bf16.mxu1 %v9956_v29 }
0x119a   :  { %7673 = vmatpush1.bf16.msra.mxu0 %v9960_v46  ;;  %7705 = vmatpush1.bf16.msra.mxu1 %v9964_v35 }
0x119b   :  { %7675 = vmatprep.subr.bf16.mxu0 %v9968_v11  ;;  %7707 = vmatprep.subr.bf16.mxu1 %v9972_v62 }
0x119e   :  { %7677 = vmatpush1.bf16.msra.mxu0 %v9976_v32  ;;  %7709 = vmatpush1.bf16.msra.mxu1 %v9980_v63 }
0x119f   :  { %7679 = vmatprep.subr.bf16.mxu0 %v9984_v45  ;;  %7711 = vmatprep.subr.bf16.mxu1 %v9988_v1 }
0x11a2   :  { %7681 = vmatpush1.bf16.msra.mxu0 %v9992_v27  ;;  %7713 = vmatpush1.bf16.msra.mxu1 %v9996_v3 }
0x11a3   :  { %7715 = vmatprep.subr.bf16.mxu0 %v9879_v13  ;;  %7747 = vmatprep.subr.bf16.mxu1 %v9881_v53 }
0x1258   :  { %v5187_v14 = vpop.f32.mrb[34].mxu0  ;;  %v5258_v57 = vpop.f32.mrb[34].mxu1 }
0x1259   :  { %v8100_v42 = vadd.f32 %v5187_v14, %v10046_v55  ;;  %v5189_v24 = vpop.f32.mrb[35].mxu0  ;;  %v5260_v36 = vpop.f32.mrb[35].mxu1  ;;  %v8116_v40 = vadd.f32 %v5258_v57, %v10053_v43 }
0x125a   :  { %v8101_v39 = vadd.f32 %v5189_v24, %v10049_v28  ;;  %v8117_v2 = vadd.f32 %v5260_v36, %v10058_v21 }
0x125b   :  { %v5267_v26 = vmul.f32 0.5, %v8100_v42 }
0x125c   :  { %v5271_v59 = vmul.f32 0.5, %v8101_v39  ;;  %v5276_v5 = vmul.f32 0.5, %v8117_v2 }
0x125d   :  { %8408 = vtanh.f32 %v5267_v26 }
0x125e   :  { %8410 = vtanh.f32 %v5271_v59 }
0x125f   :  { %8412 = vtanh.f32 %v8116_v40 }
0x1260   :  { %8414 = vtanh.f32 %v5276_v5 }
0x1267   :  { %v8409_v12 = vpop.eup %8408 }
0x1268   :  { %v8411_v8 = vpop.eup %8410  ;;  %v5269_v31 = vmul.f32 0.5, %v8409_v12 }
0x1269   :  { %v5273_v60 = vmul.f32 0.5, %v8411_v8  ;;  %v8413_v15 = vpop.eup %8412 }
0x126a   :  { %v5270_v16 = vadd.f32 0.5, %v5269_v31  ;;  %v8415_v18 = vpop.eup %8414 }
0x126b   :  { %v5274_v25 = vadd.f32 0.5, %v5273_v60  ;;  %v5278_v52 = vmul.f32 0.5, %v8415_v18 }
0x126c   :  { %v5281_v17 = vmul.f32 %v8413_v15, %v5270_v16 }
0x126d   :  { %v5280_v49 = vmul.f32 %v5274_v25, %v10061_v22  ;;  %v5279_v30 = vadd.f32 0.5, %v5278_v52 }
0x126f   :  { %v10103_v50 = vadd.f32 %v5281_v17, %v5280_v49 }
0x1271   :  { %8416 = vtanh.f32 %v10103_v50 }
0x127b   :  { %v8417_v54 = vpop.eup %8416 }
0x127c   :  { %v5284_v4 = vmul.f32 %v8417_v54, %v5279_v30 }
0x127e   :  { %5354 = vmatmul.mubr.f32.vlgmr.msra.gmra.mrb[36].mxu0 %v5284_v4  ;;  %5425 = vmatmul.mubr.f32.vlgmr.msra.gmra.mrb[36].mxu1 %v5284_v4 }
0x127f   :  { %7717 = vmatpush1.bf16.msra.mxu0 %v9883_v41  ;;  %7749 = vmatpush1.bf16.msra.mxu1 %v9886_v7 }
0x1280   :  { %7719 = vmatprep.subr.bf16.mxu0 %v9889_v19  ;;  %7751 = vmatprep.subr.bf16.mxu1 %v9892_v6 }
0x1281   :  { %5521 = vmatprep.mubr.f32.mxu0 %v8652_v0  ;;  %5592 = vmatprep.mubr.f32.mxu1 %v8652_v0 }
0x1283   :  { %7721 = vmatpush1.bf16.msra.mxu0 %v9896_v33  ;;  %7753 = vmatpush1.bf16.msra.mxu1 %v9900_v37 }
0x1284   :  { %7723 = vmatprep.subr.bf16.mxu0 %v9904_v10  ;;  %7755 = vmatprep.subr.bf16.mxu1 %v9908_v9 }
0x1287   :  { %7725 = vmatpush1.bf16.msra.mxu0 %v9912_v47  ;;  %7757 = vmatpush1.bf16.msra.mxu1 %v9916_v51 }
0x1288   :  { %7727 = vmatprep.subr.bf16.mxu0 %v9920_v61  ;;  %7759 = vmatprep.subr.bf16.mxu1 %v9924_v20 }
0x128b   :  { %7729 = vmatpush1.bf16.msra.mxu0 %v9928_v34  ;;  %7761 = vmatpush1.bf16.msra.mxu1 %v9932_v58 }
0x128c   :  { %7731 = vmatprep.subr.bf16.mxu0 %v9936_v44  ;;  %7763 = vmatprep.subr.bf16.mxu1 %v9940_v23 }
0x128f   :  { %7733 = vmatpush1.bf16.msra.mxu0 %v9944_v56  ;;  %7765 = vmatpush1.bf16.msra.mxu1 %v9948_v48 }
0x1290   :  { %7735 = vmatprep.subr.bf16.mxu0 %v9952_v38  ;;  %7767 = vmatprep.subr.bf16.mxu1 %v9956_v29 }
0x1293   :  { %7737 = vmatpush1.bf16.msra.mxu0 %v9960_v46  ;;  %7769 = vmatpush1.bf16.msra.mxu1 %v9964_v35 }
0x1294   :  { %7739 = vmatprep.subr.bf16.mxu0 %v9968_v11  ;;  %7771 = vmatprep.subr.bf16.mxu1 %v9972_v62 }
0x1297   :  { %7741 = vmatpush1.bf16.msra.mxu0 %v9976_v32  ;;  %7773 = vmatpush1.bf16.msra.mxu1 %v9980_v63 }
0x1298   :  { %7743 = vmatprep.subr.bf16.mxu0 %v9984_v45  ;;  %7775 = vmatprep.subr.bf16.mxu1 %v9988_v1 }
0x129b   :  { %7745 = vmatpush1.bf16.msra.mxu0 %v9992_v27  ;;  %7777 = vmatpush1.bf16.msra.mxu1 %v9996_v3 }
0x129c   :  { %7779 = vmatprep.subr.bf16.mxu0 %v9879_v13  ;;  %7811 = vmatprep.subr.bf16.mxu1 %v9881_v53 }
0x1351   :  { %v5355_v22 = vpop.f32.mrb[36].mxu0  ;;  %v5426_v14 = vpop.f32.mrb[36].mxu1 }
0x1352   :  { %v8102_v57 = vadd.f32 %v5355_v22, %v10046_v55  ;;  %v5357_v42 = vpop.f32.mrb[37].mxu0  ;;  %v5428_v24 = vpop.f32.mrb[37].mxu1  ;;  %v8118_v59 = vadd.f32 %v5426_v14, %v10053_v43 }
0x1353   :  { %v8103_v36 = vadd.f32 %v5357_v42, %v10049_v28  ;;  %v8119_v40 = vadd.f32 %v5428_v24, %v10058_v21 }
0x1354   :  { %v5435_v39 = vmul.f32 0.5, %v8102_v57 }
0x1355   :  { %v5439_v26 = vmul.f32 0.5, %v8103_v36  ;;  %v5444_v2 = vmul.f32 0.5, %v8119_v40 }
0x1356   :  { %8418 = vtanh.f32 %v5435_v39 }
0x1357   :  { %8420 = vtanh.f32 %v5439_v26 }
0x1358   :  { %8422 = vtanh.f32 %v8118_v59 }
0x1359   :  { %8424 = vtanh.f32 %v5444_v2 }
0x1360   :  { %v8419_v5 = vpop.eup %8418 }
0x1361   :  { %v8421_v12 = vpop.eup %8420  ;;  %v5437_v8 = vmul.f32 0.5, %v8419_v5 }
0x1362   :  { %v5441_v31 = vmul.f32 0.5, %v8421_v12  ;;  %v8423_v16 = vpop.eup %8422 }
0x1363   :  { %v5438_v60 = vadd.f32 0.5, %v5437_v8  ;;  %v8425_v18 = vpop.eup %8424 }
0x1364   :  { %v5442_v15 = vadd.f32 0.5, %v5441_v31  ;;  %v5446_v52 = vmul.f32 0.5, %v8425_v18 }
0x1365   :  { %v5449_v25 = vmul.f32 %v8423_v16, %v5438_v60 }
0x1366   :  { %v5448_v17 = vmul.f32 %v5442_v15, %v10103_v50  ;;  %v5447_v30 = vadd.f32 0.5, %v5446_v52 }
0x1368   :  { %v10145_v49 = vadd.f32 %v5449_v25, %v5448_v17 }
0x136a   :  { %8426 = vtanh.f32 %v10145_v49 }
0x1374   :  { %v8427_v54 = vpop.eup %8426 }
0x1375   :  { %v5452_v4 = vmul.f32 %v8427_v54, %v5447_v30 }
0x1377   :  { %5522 = vmatmul.mubr.f32.vlgmr.msra.gmra.mrb[38].mxu0 %v5452_v4  ;;  %5593 = vmatmul.mubr.f32.vlgmr.msra.gmra.mrb[38].mxu1 %v5452_v4 }
0x1378   :  { %7781 = vmatpush1.bf16.msra.mxu0 %v9883_v41  ;;  %7813 = vmatpush1.bf16.msra.mxu1 %v9886_v7 }
0x1379   :  { %7783 = vmatprep.subr.bf16.mxu0 %v9889_v19  ;;  %7815 = vmatprep.subr.bf16.mxu1 %v9892_v6 }
0x137a   :  { %5689 = vmatprep.mubr.f32.mxu0 %v8652_v0  ;;  %5760 = vmatprep.mubr.f32.mxu1 %v8652_v0 }
0x137c   :  { %7785 = vmatpush1.bf16.msra.mxu0 %v9896_v33  ;;  %7817 = vmatpush1.bf16.msra.mxu1 %v9900_v37 }
0x137d   :  { %7787 = vmatprep.subr.bf16.mxu0 %v9904_v10  ;;  %7819 = vmatprep.subr.bf16.mxu1 %v9908_v9 }
0x1380   :  { %7789 = vmatpush1.bf16.msra.mxu0 %v9912_v47  ;;  %7821 = vmatpush1.bf16.msra.mxu1 %v9916_v51 }
0x1381   :  { %7791 = vmatprep.subr.bf16.mxu0 %v9920_v61  ;;  %7823 = vmatprep.subr.bf16.mxu1 %v9924_v20 }
0x1384   :  { %7793 = vmatpush1.bf16.msra.mxu0 %v9928_v34  ;;  %7825 = vmatpush1.bf16.msra.mxu1 %v9932_v58 }
0x1385   :  { %7795 = vmatprep.subr.bf16.mxu0 %v9936_v44  ;;  %7827 = vmatprep.subr.bf16.mxu1 %v9940_v23 }
0x1388   :  { %7797 = vmatpush1.bf16.msra.mxu0 %v9944_v56  ;;  %7829 = vmatpush1.bf16.msra.mxu1 %v9948_v48 }
0x1389   :  { %7799 = vmatprep.subr.bf16.mxu0 %v9952_v38  ;;  %7831 = vmatprep.subr.bf16.mxu1 %v9956_v29 }
0x138c   :  { %7801 = vmatpush1.bf16.msra.mxu0 %v9960_v46  ;;  %7833 = vmatpush1.bf16.msra.mxu1 %v9964_v35 }
0x138d   :  { %7803 = vmatprep.subr.bf16.mxu0 %v9968_v11  ;;  %7835 = vmatprep.subr.bf16.mxu1 %v9972_v62 }
0x1390   :  { %7805 = vmatpush1.bf16.msra.mxu0 %v9976_v32  ;;  %7837 = vmatpush1.bf16.msra.mxu1 %v9980_v63 }
0x1391   :  { %7807 = vmatprep.subr.bf16.mxu0 %v9984_v45  ;;  %7839 = vmatprep.subr.bf16.mxu1 %v9988_v1 }
0x1394   :  { %7809 = vmatpush1.bf16.msra.mxu0 %v9992_v27  ;;  %7841 = vmatpush1.bf16.msra.mxu1 %v9996_v3 }
0x1395   :  { %7843 = vmatprep.subr.bf16.mxu0 %v9879_v13  ;;  %7875 = vmatprep.subr.bf16.mxu1 %v9881_v53 }
0x144a   :  { %v5523_v50 = vpop.f32.mrb[38].mxu0  ;;  %v5594_v22 = vpop.f32.mrb[38].mxu1 }
0x144b   :  { %v8104_v14 = vadd.f32 %v5523_v50, %v10046_v55  ;;  %v5525_v57 = vpop.f32.mrb[39].mxu0  ;;  %v5596_v42 = vpop.f32.mrb[39].mxu1  ;;  %v8120_v26 = vadd.f32 %v5594_v22, %v10053_v43 }
0x144c   :  { %v8105_v24 = vadd.f32 %v5525_v57, %v10049_v28  ;;  %v8121_v59 = vadd.f32 %v5596_v42, %v10058_v21 }
0x144d   :  { %v5603_v36 = vmul.f32 0.5, %v8104_v14 }
0x144e   :  { %v5607_v39 = vmul.f32 0.5, %v8105_v24  ;;  %v5612_v40 = vmul.f32 0.5, %v8121_v59 }
0x144f   :  { %8428 = vtanh.f32 %v5603_v36 }
0x1450   :  { %8430 = vtanh.f32 %v5607_v39 }
0x1451   :  { %8432 = vtanh.f32 %v8120_v26 }
0x1452   :  { %8434 = vtanh.f32 %v5612_v40 }
0x1459   :  { %v8429_v2 = vpop.eup %8428 }
0x145a   :  { %v8431_v5 = vpop.eup %8430  ;;  %v5605_v12 = vmul.f32 0.5, %v8429_v2 }
0x145b   :  { %v5609_v8 = vmul.f32 0.5, %v8431_v5  ;;  %v8433_v60 = vpop.eup %8432 }
0x145c   :  { %v5606_v31 = vadd.f32 0.5, %v5605_v12  ;;  %v8435_v18 = vpop.eup %8434 }
0x145d   :  { %v5610_v16 = vadd.f32 0.5, %v5609_v8  ;;  %v5614_v52 = vmul.f32 0.5, %v8435_v18 }
0x145e   :  { %v5617_v15 = vmul.f32 %v8433_v60, %v5606_v31 }
0x145f   :  { %v5616_v25 = vmul.f32 %v5610_v16, %v10145_v49  ;;  %v5615_v30 = vadd.f32 0.5, %v5614_v52 }
0x1461   :  { %v10187_v17 = vadd.f32 %v5617_v15, %v5616_v25 }
0x1463   :  { %8436 = vtanh.f32 %v10187_v17 }
0x146d   :  { %v8437_v54 = vpop.eup %8436 }
0x146e   :  { %v5620_v4 = vmul.f32 %v8437_v54, %v5615_v30 }
0x1470   :  { %5690 = vmatmul.mubr.f32.vlgmr.msra.gmra.mrb[40].mxu0 %v5620_v4  ;;  %5761 = vmatmul.mubr.f32.vlgmr.msra.gmra.mrb[40].mxu1 %v5620_v4 }
0x1471   :  { %7845 = vmatpush1.bf16.msra.mxu0 %v9883_v41  ;;  %7877 = vmatpush1.bf16.msra.mxu1 %v9886_v7 }
0x1472   :  { %7847 = vmatprep.subr.bf16.mxu0 %v9889_v19  ;;  %7879 = vmatprep.subr.bf16.mxu1 %v9892_v6 }
0x1473   :  { %5857 = vmatprep.mubr.f32.mxu0 %v8652_v0  ;;  %5928 = vmatprep.mubr.f32.mxu1 %v8652_v0 }
0x1475   :  { %7849 = vmatpush1.bf16.msra.mxu0 %v9896_v33  ;;  %7881 = vmatpush1.bf16.msra.mxu1 %v9900_v37 }
0x1476   :  { %7851 = vmatprep.subr.bf16.mxu0 %v9904_v10  ;;  %7883 = vmatprep.subr.bf16.mxu1 %v9908_v9 }
0x1479   :  { %7853 = vmatpush1.bf16.msra.mxu0 %v9912_v47  ;;  %7885 = vmatpush1.bf16.msra.mxu1 %v9916_v51 }
0x147a   :  { %7855 = vmatprep.subr.bf16.mxu0 %v9920_v61  ;;  %7887 = vmatprep.subr.bf16.mxu1 %v9924_v20 }
0x147d   :  { %7857 = vmatpush1.bf16.msra.mxu0 %v9928_v34  ;;  %7889 = vmatpush1.bf16.msra.mxu1 %v9932_v58 }
0x147e   :  { %7859 = vmatprep.subr.bf16.mxu0 %v9936_v44  ;;  %7891 = vmatprep.subr.bf16.mxu1 %v9940_v23 }
0x1481   :  { %7861 = vmatpush1.bf16.msra.mxu0 %v9944_v56  ;;  %7893 = vmatpush1.bf16.msra.mxu1 %v9948_v48 }
0x1482   :  { %7863 = vmatprep.subr.bf16.mxu0 %v9952_v38  ;;  %7895 = vmatprep.subr.bf16.mxu1 %v9956_v29 }
0x1485   :  { %7865 = vmatpush1.bf16.msra.mxu0 %v9960_v46  ;;  %7897 = vmatpush1.bf16.msra.mxu1 %v9964_v35 }
0x1486   :  { %7867 = vmatprep.subr.bf16.mxu0 %v9968_v11  ;;  %7899 = vmatprep.subr.bf16.mxu1 %v9972_v62 }
0x1489   :  { %7869 = vmatpush1.bf16.msra.mxu0 %v9976_v32  ;;  %7901 = vmatpush1.bf16.msra.mxu1 %v9980_v63 }
0x148a   :  { %7871 = vmatprep.subr.bf16.mxu0 %v9984_v45  ;;  %7903 = vmatprep.subr.bf16.mxu1 %v9988_v1 }
0x148d   :  { %7873 = vmatpush1.bf16.msra.mxu0 %v9992_v27  ;;  %7905 = vmatpush1.bf16.msra.mxu1 %v9996_v3 }
0x148e   :  { %7907 = vmatprep.subr.bf16.mxu0 %v9879_v13  ;;  %7939 = vmatprep.subr.bf16.mxu1 %v9881_v53 }
0x1543   :  { %v5691_v49 = vpop.f32.mrb[40].mxu0  ;;  %v5762_v50 = vpop.f32.mrb[40].mxu1 }
0x1544   :  { %v8106_v22 = vadd.f32 %v5691_v49, %v10046_v55  ;;  %v5693_v14 = vpop.f32.mrb[41].mxu0  ;;  %v5764_v57 = vpop.f32.mrb[41].mxu1  ;;  %v8122_v39 = vadd.f32 %v5762_v50, %v10053_v43 }
0x1545   :  { %v8107_v42 = vadd.f32 %v5693_v14, %v10049_v28  ;;  %v8123_v26 = vadd.f32 %v5764_v57, %v10058_v21 }
0x1546   :  { %v5771_v24 = vmul.f32 0.5, %v8106_v22 }
0x1547   :  { %v5775_v36 = vmul.f32 0.5, %v8107_v42  ;;  %v5780_v59 = vmul.f32 0.5, %v8123_v26 }
0x1548   :  { %8438 = vtanh.f32 %v5771_v24 }
0x1549   :  { %8440 = vtanh.f32 %v5775_v36 }
0x154a   :  { %8442 = vtanh.f32 %v8122_v39 }
0x154b   :  { %8444 = vtanh.f32 %v5780_v59 }
0x1552   :  { %v8439_v40 = vpop.eup %8438 }
0x1553   :  { %v8441_v2 = vpop.eup %8440  ;;  %v5773_v5 = vmul.f32 0.5, %v8439_v40 }
0x1554   :  { %v5777_v12 = vmul.f32 0.5, %v8441_v2  ;;  %v8443_v31 = vpop.eup %8442 }
0x1555   :  { %v5774_v8 = vadd.f32 0.5, %v5773_v5  ;;  %v8445_v18 = vpop.eup %8444 }
0x1556   :  { %v5778_v60 = vadd.f32 0.5, %v5777_v12  ;;  %v5782_v52 = vmul.f32 0.5, %v8445_v18 }
0x1557   :  { %v5785_v16 = vmul.f32 %v8443_v31, %v5774_v8 }
0x1558   :  { %v5784_v15 = vmul.f32 %v5778_v60, %v10187_v17  ;;  %v5783_v30 = vadd.f32 0.5, %v5782_v52 }
0x155a   :  { %v10229_v25 = vadd.f32 %v5785_v16, %v5784_v15 }
0x155c   :  { %8446 = vtanh.f32 %v10229_v25 }
0x1566   :  { %v8447_v54 = vpop.eup %8446 }
0x1567   :  { %v5788_v4 = vmul.f32 %v8447_v54, %v5783_v30 }
0x1569   :  { %5858 = vmatmul.mubr.f32.vlgmr.msra.gmra.mrb[42].mxu0 %v5788_v4  ;;  %5929 = vmatmul.mubr.f32.vlgmr.msra.gmra.mrb[42].mxu1 %v5788_v4 }
0x156a   :  { %7909 = vmatpush1.bf16.msra.mxu0 %v9883_v41  ;;  %7941 = vmatpush1.bf16.msra.mxu1 %v9886_v7 }
0x156b   :  { %7911 = vmatprep.subr.bf16.mxu0 %v9889_v19  ;;  %7943 = vmatprep.subr.bf16.mxu1 %v9892_v6 }
0x156c   :  { %6025 = vmatprep.mubr.f32.mxu0 %v8652_v0  ;;  %6096 = vmatprep.mubr.f32.mxu1 %v8652_v0 }
0x156e   :  { %7913 = vmatpush1.bf16.msra.mxu0 %v9896_v33  ;;  %7945 = vmatpush1.bf16.msra.mxu1 %v9900_v37 }
0x156f   :  { %7915 = vmatprep.subr.bf16.mxu0 %v9904_v10  ;;  %7947 = vmatprep.subr.bf16.mxu1 %v9908_v9 }
0x1572   :  { %7917 = vmatpush1.bf16.msra.mxu0 %v9912_v47  ;;  %7949 = vmatpush1.bf16.msra.mxu1 %v9916_v51 }
0x1573   :  { %7919 = vmatprep.subr.bf16.mxu0 %v9920_v61  ;;  %7951 = vmatprep.subr.bf16.mxu1 %v9924_v20 }
0x1576   :  { %7921 = vmatpush1.bf16.msra.mxu0 %v9928_v34  ;;  %7953 = vmatpush1.bf16.msra.mxu1 %v9932_v58 }
0x1577   :  { %7923 = vmatprep.subr.bf16.mxu0 %v9936_v44  ;;  %7955 = vmatprep.subr.bf16.mxu1 %v9940_v23 }
0x157a   :  { %7925 = vmatpush1.bf16.msra.mxu0 %v9944_v56  ;;  %7957 = vmatpush1.bf16.msra.mxu1 %v9948_v48 }
0x157b   :  { %7927 = vmatprep.subr.bf16.mxu0 %v9952_v38  ;;  %7959 = vmatprep.subr.bf16.mxu1 %v9956_v29 }
0x157e   :  { %7929 = vmatpush1.bf16.msra.mxu0 %v9960_v46  ;;  %7961 = vmatpush1.bf16.msra.mxu1 %v9964_v35 }
0x157f   :  { %7931 = vmatprep.subr.bf16.mxu0 %v9968_v11  ;;  %7963 = vmatprep.subr.bf16.mxu1 %v9972_v62 }
0x1582   :  { %7933 = vmatpush1.bf16.msra.mxu0 %v9976_v32  ;;  %7965 = vmatpush1.bf16.msra.mxu1 %v9980_v63 }
0x1583   :  { %7935 = vmatprep.subr.bf16.mxu0 %v9984_v45  ;;  %7967 = vmatprep.subr.bf16.mxu1 %v9988_v1 }
0x1586   :  { %7937 = vmatpush1.bf16.msra.mxu0 %v9992_v27  ;;  %7969 = vmatpush1.bf16.msra.mxu1 %v9996_v3 }
0x1587   :  { %7971 = vmatprep.subr.bf16.mxu0 %v9879_v13  ;;  %8003 = vmatprep.subr.bf16.mxu1 %v9881_v53 }
0x163c   :  { %v5859_v17 = vpop.f32.mrb[42].mxu0  ;;  %v5930_v49 = vpop.f32.mrb[42].mxu1 }
0x163d   :  { %v8108_v50 = vadd.f32 %v5859_v17, %v10046_v55  ;;  %v5861_v22 = vpop.f32.mrb[43].mxu0  ;;  %v5932_v14 = vpop.f32.mrb[43].mxu1  ;;  %v8124_v36 = vadd.f32 %v5930_v49, %v10053_v43 }
0x163e   :  { %v8109_v57 = vadd.f32 %v5861_v22, %v10049_v28  ;;  %v8125_v39 = vadd.f32 %v5932_v14, %v10058_v21 }
0x163f   :  { %v5939_v42 = vmul.f32 0.5, %v8108_v50 }
0x1640   :  { %v5943_v24 = vmul.f32 0.5, %v8109_v57  ;;  %v5948_v13 = vmul.f32 0.5, %v8125_v39 }
0x1641   :  { %8448 = vtanh.f32 %v5939_v42 }
0x1642   :  { %8450 = vtanh.f32 %v5943_v24 }
0x1643   :  { %8452 = vtanh.f32 %v8124_v36 }
0x1644   :  { %8454 = vtanh.f32 %v5948_v13 }
0x164b   :  { %v8449_v26 = vpop.eup %8448 }
0x164c   :  { %v8451_v53 = vpop.eup %8450  ;;  %v5941_v59 = vmul.f32 0.5, %v8449_v26 }
0x164d   :  { %v5945_v40 = vmul.f32 0.5, %v8451_v53  ;;  %v8453_v5 = vpop.eup %8452 }
0x164e   :  { %v5942_v2 = vadd.f32 0.5, %v5941_v59  ;;  %v8455_v16 = vpop.eup %8454 }
0x164f   :  { %v5946_v12 = vadd.f32 0.5, %v5945_v40  ;;  %v5950_v15 = vmul.f32 0.5, %v8455_v16 }
0x1650   :  { %v5953_v8 = vmul.f32 %v8453_v5, %v5942_v2 }
0x1651   :  { %v5952_v31 = vmul.f32 %v5946_v12, %v10229_v25  ;;  %v5951_v18 = vadd.f32 0.5, %v5950_v15 }
0x1653   :  { %v10271_v60 = vadd.f32 %v5953_v8, %v5952_v31 }
0x1655   :  { %8456 = vtanh.f32 %v10271_v60 }
0x165f   :  { %v8457_v52 = vpop.eup %8456 }
0x1660   :  { %v5956_v30 = vmul.f32 %v8457_v52, %v5951_v18 }
0x1662   :  { %6026 = vmatmul.mubr.f32.vlgmr.msra.gmra.mrb[44].mxu0 %v5956_v30  ;;  %6097 = vmatmul.mubr.f32.vlgmr.msra.gmra.mrb[44].mxu1 %v5956_v30 }
0x1663   :  { %7973 = vmatpush1.bf16.msra.mxu0 %v9883_v41  ;;  %8005 = vmatpush1.bf16.msra.mxu1 %v9886_v7 }
0x1664   :  { %7975 = vmatprep.subr.bf16.mxu0 %v9889_v19  ;;  %8007 = vmatprep.subr.bf16.mxu1 %v9892_v6 }
0x1665   :  { %6193 = vmatprep.mubr.f32.mxu0 %v8652_v0  ;;  %6264 = vmatprep.mubr.f32.mxu1 %v8652_v0 }
0x1667   :  { %7977 = vmatpush1.bf16.msra.mxu0 %v9896_v33  ;;  %8009 = vmatpush1.bf16.msra.mxu1 %v9900_v37 }
0x1668   :  { %7979 = vmatprep.subr.bf16.mxu0 %v9904_v10  ;;  %8011 = vmatprep.subr.bf16.mxu1 %v9908_v9 }
0x166b   :  { %7981 = vmatpush1.bf16.msra.mxu0 %v9912_v47  ;;  %8013 = vmatpush1.bf16.msra.mxu1 %v9916_v51 }
0x166c   :  { %7983 = vmatprep.subr.bf16.mxu0 %v9920_v61  ;;  %8015 = vmatprep.subr.bf16.mxu1 %v9924_v20 }
0x166f   :  { %7985 = vmatpush1.bf16.msra.mxu0 %v9928_v34  ;;  %8017 = vmatpush1.bf16.msra.mxu1 %v9932_v58 }
0x1670   :  { %7987 = vmatprep.subr.bf16.mxu0 %v9936_v44  ;;  %8019 = vmatprep.subr.bf16.mxu1 %v9940_v23 }
0x1673   :  { %7989 = vmatpush1.bf16.msra.mxu0 %v9944_v56  ;;  %8021 = vmatpush1.bf16.msra.mxu1 %v9948_v48 }
0x1674   :  { %7991 = vmatprep.subr.bf16.mxu0 %v9952_v38  ;;  %8023 = vmatprep.subr.bf16.mxu1 %v9956_v29 }
0x1677   :  { %7993 = vmatpush1.bf16.msra.mxu0 %v9960_v46  ;;  %8025 = vmatpush1.bf16.msra.mxu1 %v9964_v35 }
0x1678   :  { %7995 = vmatprep.subr.bf16.mxu0 %v9968_v11  ;;  %8027 = vmatprep.subr.bf16.mxu1 %v9972_v62 }
0x167b   :  { %7997 = vmatpush1.bf16.msra.mxu0 %v9976_v32  ;;  %8029 = vmatpush1.bf16.msra.mxu1 %v9980_v63 }
0x167c   :  { %7999 = vmatprep.subr.bf16.mxu0 %v9984_v45  ;;  %8031 = vmatprep.subr.bf16.mxu1 %v9988_v1 }
0x167f   :  { %8001 = vmatpush1.bf16.msra.mxu0 %v9992_v27  ;;  %8033 = vmatpush1.bf16.msra.mxu1 %v9996_v3 }
0x1735   :  { %v6027_v0 = vpop.f32.mrb[44].mxu0  ;;  %v6098_v41 = vpop.f32.mrb[44].mxu1 }
0x1736   :  { %v8110_v7 = vadd.f32 %v6027_v0, %v10046_v55  ;;  %v6029_v19 = vpop.f32.mrb[45].mxu0  ;;  %v6100_v6 = vpop.f32.mrb[45].mxu1  ;;  %v8126_v9 = vadd.f32 %v6098_v41, %v10053_v43 }
0x1737   :  { %v8111_v33 = vadd.f32 %v6029_v19, %v10049_v28  ;;  %v8127_v47 = vadd.f32 %v6100_v6, %v10058_v21 }
0x1738   :  { %v6107_v37 = vmul.f32 0.5, %v8110_v7 }
0x1739   :  { %v6111_v10 = vmul.f32 0.5, %v8111_v33  ;;  %v6116_v51 = vmul.f32 0.5, %v8127_v47 }
0x173a   :  { %8458 = vtanh.f32 %v6107_v37 }
0x173b   :  { %8460 = vtanh.f32 %v6111_v10 }
0x173c   :  { %8462 = vtanh.f32 %v8126_v9 }
0x173d   :  { %8464 = vtanh.f32 %v6116_v51 }
0x1744   :  { %v8459_v61 = vpop.eup %8458 }
0x1745   :  { %v8461_v20 = vpop.eup %8460  ;;  %v6109_v34 = vmul.f32 0.5, %v8459_v61 }
0x1746   :  { %v6113_v58 = vmul.f32 0.5, %v8461_v20  ;;  %v8463_v23 = vpop.eup %8462 }
0x1747   :  { %v6110_v44 = vadd.f32 0.5, %v6109_v34  ;;  %v8465_v46 = vpop.eup %8464 }
0x1748   :  { %v6114_v56 = vadd.f32 0.5, %v6113_v58  ;;  %v6118_v35 = vmul.f32 0.5, %v8465_v46 }
0x1749   :  { %v6121_v48 = vmul.f32 %v8463_v23, %v6110_v44 }
0x174a   :  { %v6120_v38 = vmul.f32 %v6114_v56, %v10271_v60  ;;  %v6119_v11 = vadd.f32 0.5, %v6118_v35 }
0x174c   :  { %v6122_v29 = vadd.f32 %v6121_v48, %v6120_v38 }
0x174e   :  { %8466 = vtanh.f32 %v6122_v29 }
0x1758   :  { %v8467_v62 = vpop.eup %8466 }
0x1759   :  { %v6124_v32 = vmul.f32 %v8467_v62, %v6119_v11 }
0x175b   :  { %6194 = vmatmul.mubr.f32.vlgmr.msra.gmra.mrb[46].mxu0 %v6124_v32  ;;  %6265 = vmatmul.mubr.f32.vlgmr.msra.gmra.mrb[46].mxu1 %v6124_v32 }
0x182e   :  { %v6195_v63 = vpop.f32.mrb[46].mxu0  ;;  %v6266_v45 = vpop.f32.mrb[46].mxu1 }
0x182f   :  { %v8112_v1 = vadd.f32 %v6195_v63, %v10046_v55  ;;  %v6197_v27 = vpop.f32.mrb[47].mxu0  ;;  %v6268_v3 = vpop.f32.mrb[47].mxu1  ;;  %v8128_v17 = vadd.f32 %v6266_v45, %v10053_v43 }
0x1830   :  { %v8113_v25 = vadd.f32 %v6197_v27, %v10049_v28  ;;  %v8129_v49 = vadd.f32 %v6268_v3, %v10058_v21 }
0x1831   :  { %v6275_v54 = vmul.f32 0.5, %v8112_v1 }
0x1832   :  { %v6279_v4 = vmul.f32 0.5, %v8113_v25  ;;  %v6284_v50 = vmul.f32 0.5, %v8129_v49 }
0x1833   :  { %8468 = vtanh.f32 %v6275_v54 }
0x1834   :  { %8470 = vtanh.f32 %v6279_v4 }
0x1835   :  { %8472 = vtanh.f32 %v8128_v17 }
0x1836   :  { %8474 = vtanh.f32 %v6284_v50 }
0x183d   :  { %v8469_v22 = vpop.eup %8468 }
0x183e   :  { %v8471_v14 = vpop.eup %8470  ;;  %v6277_v57 = vmul.f32 0.5, %v8469_v22 }
0x183f   :  { %v6281_v42 = vmul.f32 0.5, %v8471_v14  ;;  %v8473_v24 = vpop.eup %8472 }
0x1840   :  { %v6278_v55 = vadd.f32 0.5, %v6277_v57 }
0x1841   :  { %v6282_v36 = vadd.f32 0.5, %v6281_v42 }
0x1842   :  { %v6289_v39 = vmul.f32 %v8473_v24, %v6278_v55 }
0x1843   :  { %v6288_v28 = vmul.f32 %v6282_v36, %v6122_v29 }
0x1845   :  { %v6290_v13 = vadd.f32 %v6289_v39, %v6288_v28 }
0x1847   :  { %8476 = vtanh.f32 %v6290_v13  ;;  %6296 = vst [vmem:[#allocation14 + $0x10] sm:$0xff] %v6290_v13 }
0x1848   :  { %8602 = shalt.err (!%p8599_p6)
}
0x1849   :  { %s8603_s22 = scalar_lea.hbm %s10345_s6, 384 }
0x184a   :  { %p8604_p7 = scmp.ne.s32.totalorder %s10345_s6, %s8603_s22  ;;  %p8607_p8 = scmp.lt.u32.totalorder %s8603_s22, %s10345_s6 }
0x184c   :  { %p8609_p9 = pnand %p8607_p8, %p8604_p7 }
0x184e   :  { %8612 = shalt.err (!%p8609_p9)
}
0x184f   :  { %s8656_s26 = smov 128   ;;  %s8657_s27 = smov 8   ;;  %v8475_v43 = vpop.eup %8474 }
0x1850   :  { %6320 = dma.vmem_to_hbm [thread:$0]  %s6315_s19, 384, %s10345_s6, [#allocation15], %s8656_s26, %s8656_s26, %s8657_s27   ;;  %v6286_v21 = vmul.f32 0.5, %v8475_v43 }
0x1851   :  { %s8658_s30 = smov [#allocation13]   ;;  %v8477_v53 = vpop.eup %8476 }
0x1852   :  { %s6302_s7 = sshll.u32 %s8658_s30, 4  ;;  %v6287_v26 = vadd.f32 0.5, %v6286_v21  ;;  %s6303_s7 = int_to_ptr.vmem [resolvable:$true] %s6302_s7 }
0x1853   :  { %s8613_s1 = scalar_lea.vmem %s6303_s7, 384  ;;  %p8618_p13 = scmp.lt.s32.totalorder %s6303_s7, %s6303_s7 }
0x1854   :  { %v6292_v59 = vmul.f32 %v8477_v53, %v6287_v26  ;;  %p8614_p10 = scmp.ne.s32.totalorder %s6303_s7, %s8613_s1  ;;  %p8619_p0 = scmp.lt.s32.totalorder %s8613_s1, %s8613_s1 }
0x1856   :  { %6294 = vst [vmem:[#allocation13 + $0x10] sm:$0xff] %v6292_v59  ;;  %p8620_p1 = por %p8619_p0, %p8618_p13 }
0x1858   :  { %p8621_p2 = pnand %p8620_p1, %p8614_p10 }
0x185a   :  { %8624 = shalt.err (!%p8621_p2)
}
0x185b   :  { %s8625_s6 = scalar_lea.hbm %s10344_s5, 384 }
0x185c   :  { %p8626_p3 = scmp.ne.s32.totalorder %s10344_s5, %s8625_s6  ;;  %p8629_p11 = scmp.lt.u32.totalorder %s8625_s6, %s10344_s5 }
0x185e   :  { %p8631_p12 = pnand %p8629_p11, %p8626_p3 }
0x1860   :  { %8634 = shalt.err (!%p8631_p12)
}
0x1861   :  { %6308 = dma.vmem_to_hbm [thread:$0]  %s6303_s7, 384, %s10344_s5, [#allocation9], %s8656_s26, %s8656_s26, %s8657_s27  }
0x1862   :  { %8643 = dma.done.wait [#allocation9], 384  }
0x1863   :  { %8644 = vsyncadd [#allocation9], 4294966912 }
0x1864   :  { %8645 = dma.done.wait [#allocation15], 384  }
0x1865   :  { %8646 = vsyncadd [#allocation15], 4294966912 }
0x1866   :  { %6327 = vsyncpa [#allocation8], 1 }
0x1867   :  { %6328 = vsyncpa [#allocation11], 1 }
0x1868   :  { %6329 = vsyncpa [#allocation9], 1 }
0x1869   :  { %6330 = vsyncpa [#allocation15], 1 }
0x186a   :  { %6331 = vsyncmov [#allocation6] }
0x186d   :  { %s6332_s15 = vpop.sfrf %6331 }
0x186e   :  { %p6368_p4 = scmp.ne.s32.totalorder %s6332_s15, 0 }
0x1870   :  { %6336 = shalt.err (%p6368_p4)  }
0x1871   :  { %6338 = vsyncmov [#allocation6 + $0x1] }
0x1874   :  { %s6339_s16 = vpop.sfrf %6338 }
0x1875   :  { %p6369_p5 = scmp.ne.s32.totalorder %s6339_s16, 0 }
0x1877   :  { %6343 = shalt.err (%p6369_p5)  }

</bundles_post_ra>
